<compile_context>
chip_gen: v7x
topology: tpu7x:2x2x1
jax: 0.10.0
libtpu: 0.0.40
codegen_flags: <defaults>
</compile_context>

<pallas_src>
import functools

import jax
import jax.numpy as jnp
from jax.experimental import pallas as pl
from jax.experimental.pallas import tpu as pltpu


@functools.lru_cache(maxsize=None)
def _vmem_limit_bytes():
    """Generation-aware VMEM request (~48 MiB on v7x, 64 MiB on v5e/v6e)."""
    default = 32 * 1024 * 1024
    try:
        cap = int(getattr(pltpu.get_tpu_info(), "vmem_capacity_bytes", 0))
    except Exception:
        return default
    if cap <= 0:
        return default
    return min(64 * 1024 * 1024, (cap * 3) // 4)


# ----------------------------------------------------------------------------
# Fused kernel: the full recurrent chain (1 + t convs) for one batch image.
# ----------------------------------------------------------------------------
def _recurrent_chain_kernel(x_ref, w_ref, scale_ref, shift_ref, o_ref, zbuf_ref, *, t):
    """x1 = conv(x); then t times: x1 = conv(x + x1); conv = 3x3 + BN + ReLU.

    x_ref:     (1, H, W, C)   bf16  input image (no halo; halo lives in zbuf)
    w_ref:     (9, C, C)      bf16  3x3 weights, tap-major rows (k = dy*3 + dx)
    scale_ref: (1, C)         f32   folded BN scale
    shift_ref: (1, C)         f32   folded BN shift (includes conv bias)
    o_ref:     (1, H, W, C)   bf16  output image
    zbuf_ref:  (H+2, W+2, C)  bf16  VMEM scratch: zero-halo conv input buffer
    """
    _, H, W, C = x_ref.shape
    scale = scale_ref[...]                       # (1, C) f32
    shift = shift_ref[...]

    # Zero the scratch once per image so the 1-pixel halo stays zero for every
    # conv in the chain; only the interior is rewritten between convs.
    zbuf_ref[...] = jnp.zeros_like(zbuf_ref)
    zbuf_ref[1:H + 1, 1:W + 1, :] = x_ref[0]

    def conv_bn_relu():
        # 9 shifted bf16 x bf16 -> f32 MXU dots over the halo'd VMEM buffer
        # (in-kernel taps: no im2col buffer, A-side HBM traffic = 1x activation).
        acc = jnp.zeros((H * W, C), jnp.float32)
        for dy in range(3):
            for dx in range(3):
                slab = zbuf_ref[dy:dy + H, dx:dx + W, :].reshape(H * W, C)
                acc = acc + jnp.dot(slab, w_ref[dy * 3 + dx],
                                    preferred_element_type=jnp.float32)
        return jnp.maximum(acc * scale + shift, 0.0)          # (H*W, C) f32

    y = conv_bn_relu()                                         # x1 = conv(x)
    for _ in range(t):                                         # x1 = conv(x + x1)
        res = x_ref[0].astype(jnp.float32) + y.reshape(H, W, C)   # fused residual
        zbuf_ref[1:H + 1, 1:W + 1, :] = res.astype(zbuf_ref.dtype)
        y = conv_bn_relu()

    # For C >= 128 this store is lane-dense; for narrow C it is masked, but the
    # single output write is a small fraction of the fused chain's traffic.
    o_ref[0] = y.reshape(H, W, C).astype(o_ref.dtype)


def _fused_chain_fits_vmem(H, W, C):
    hwc = H * W * C
    est = (
        2 * 2 * (hwc * 2)                 # x in + out blocks, bf16, double-buffered
        + (H + 2) * (W + 2) * C * 2       # zero-halo scratch, bf16
        + 3 * hwc * 4                     # f32 accumulator / y / residual temporaries
        + 2 * 9 * C * C * 2               # weights (double-buffered), bf16
        + (1 << 20)                       # slack for scale/shift & compiler temps
    )
    return est <= int(0.7 * _vmem_limit_bytes())


# ----------------------------------------------------------------------------
# Recurrent_block forward (inference-mode BatchNorm folded into scale/shift)
# ----------------------------------------------------------------------------
def recurrent_block_forward(x_nchw, params, *, t=2):
    w, bias, bn = params["w"], params["b"], params["bn"]
    cout, cin = w.shape[0], w.shape[1]
    assert cin == cout, "Recurrent_block requires ch_in == ch_out"

    Nb, C, H, W = x_nchw.shape

    if not _fused_chain_fits_vmem(H, W, C):
        # TODO(synk): add a row-tiled Pallas path (halo rows DMA'd with
        # pltpu.make_async_copy) for feature maps exceeding VMEM; use XLA convs
        # for those sizes for now.
        return _recurrent_block_xla(x_nchw, params, t=t)

    scale = bn["gamma"] * jax.lax.rsqrt(bn["var"] + 1e-5)
    shift = bn["beta"] + scale * (bias - bn["mean"])
    # (Cout, Cin, 3, 3) -> (3, 3, Cin, Cout) -> (9, Cin, Cout): tap-major rows.
    w9 = jnp.transpose(w, (2, 3, 1, 0)).reshape(9, cin, cout).astype(jnp.bfloat16)

    x = jnp.transpose(x_nchw, (0, 2, 3, 1)).astype(jnp.bfloat16)   # NHWC bf16

    out = pl.pallas_call(
        functools.partial(_recurrent_chain_kernel, t=t),
        out_shape=jax.ShapeDtypeStruct((Nb, H, W, C), jnp.bfloat16),
        grid_spec=pltpu.PrefetchScalarGridSpec(
            num_scalar_prefetch=0,
            grid=(Nb,),   # one image per step; "parallel" -> both v7x TCs for Nb >= 2
            in_specs=[
                pl.BlockSpec((1, H, W, C), lambda b: (b, 0, 0, 0)),   # x
                pl.BlockSpec((9, C, C), lambda b: (0, 0, 0)),         # weights (resident)
                pl.BlockSpec((1, C), lambda b: (0, 0)),               # BN scale
                pl.BlockSpec((1, C), lambda b: (0, 0)),               # BN shift
            ],
            out_specs=pl.BlockSpec((1, H, W, C), lambda b: (b, 0, 0, 0)),
            scratch_shapes=[pltpu.VMEM((H + 2, W + 2, C), jnp.bfloat16)],
        ),
        compiler_params=pltpu.CompilerParams(
            dimension_semantics=("parallel",),
            vmem_limit_bytes=_vmem_limit_bytes(),
        ),
    )(x, w9,
      scale.reshape(1, cout).astype(jnp.float32),
      shift.reshape(1, cout).astype(jnp.float32))

    return jnp.transpose(out, (0, 3, 1, 2)).astype(jnp.float32)     # back to NCHW


# ----------------------------------------------------------------------------
# Pure-JAX path (f32, lax.conv): VMEM-overflow fallback AND numerical reference
# ----------------------------------------------------------------------------
def _recurrent_block_xla(x, params, *, t=2):
    w, bias, bn = params["w"], params["b"], params["bn"]
    scale = bn["gamma"] * jax.lax.rsqrt(bn["var"] + 1e-5)
    shift = bn["beta"] + scale * (bias - bn["mean"])

    def conv(z):
        y = jax.lax.conv_general_dilated(
            z, w, window_strides=(1, 1), padding=((1, 1), (1, 1)),
            dimension_numbers=("NCHW", "OIHW", "NCHW"))
        y = y * scale[None, :, None, None] + shift[None, :, None, None]
        return jnp.maximum(y, 0.0)

    x1 = None
    for i in range(t):               # mirrors the PyTorch loop exactly
        if i == 0:
            x1 = conv(x)
        x1 = conv(x + x1)
    return x1


# ----------------------------------------------------------------------------
# Deterministic parameter init (shapes mirror the PyTorch __init__)
# ----------------------------------------------------------------------------
def init_recurrent_block(key, ch):
    k1, k2 = jax.random.split(key)
    fan_in = ch * 9
    w = jax.random.normal(k1, (ch, ch, 3, 3), jnp.float32) * jnp.sqrt(2.0 / fan_in)
    b = jax.random.normal(k2, (ch,), jnp.float32) * 0.01
    # nn.BatchNorm2d defaults (eval mode): gamma=1, beta=0, mean=0, var=1.
    bn = dict(gamma=jnp.ones((ch,), jnp.float32), beta=jnp.zeros((ch,), jnp.float32),
              mean=jnp.zeros((ch,), jnp.float32), var=jnp.ones((ch,), jnp.float32))
    return dict(w=w, b=b, bn=bn)


if __name__ == "__main__":
    key = jax.random.PRNGKey(0)
    kx, kp = jax.random.split(key)

    batch, ch, hw, t = 2, 64, 16, 2
    x = jax.random.normal(kx, (batch, ch, hw, hw), jnp.float32)
    params = init_recurrent_block(kp, ch)

    fwd = jax.jit(functools.partial(recurrent_block_forward, t=t))
    out = jax.block_until_ready(fwd(x, params))

    assert out.shape == (batch, ch, hw, hw), out.shape
    assert bool(jnp.all(jnp.isfinite(out)))
    assert bool(jnp.all(out >= 0.0))          # ReLU epilogue

    ref = jax.block_until_ready(
        jax.jit(functools.partial(_recurrent_block_xla, t=t))(x, params))
    err = float(jnp.max(jnp.abs(out - ref)))
    ref_scale = float(jnp.max(jnp.abs(ref))) + 1e-6
    assert err <= 0.05 * ref_scale + 0.05, (err, ref_scale)   # bf16 tolerance

    print("KERNEL_OK")
</pallas_src>

<mosaic_0001>
module attributes {stable_mosaic.version = 11 : i64} {
  func.func @_recurrent_chain_kernel(%arg0: i32, %arg1: memref<1x16x16x64xbf16, #tpu.memory_space<vmem>>, %arg2: memref<9x64x64xbf16, #tpu.memory_space<vmem>>, %arg3: memref<1x64xf32, #tpu.memory_space<vmem>>, %arg4: memref<1x64xf32, #tpu.memory_space<vmem>>, %arg5: memref<1x16x16x64xbf16, #tpu.memory_space<vmem>>, %arg6: memref<18x18x64xbf16, #tpu.memory_space<vmem>>) attributes {dimension_semantics = [#tpu.dimension_semantics<parallel>], iteration_bounds = array<i64: 2>, scalar_prefetch = 0 : i64, scratch_operands = 1 : i64, tpu.core_type = #tpu.core_type<tc>, window_params = [{transform_indices = @transform_0, window_bounds = array<i64: 1, 16, 16, 64>}, {pipeline_mode = #tpu.pipeline_mode<synchronous>, transform_indices = @transform_1, window_bounds = array<i64: 9, 64, 64>}, {pipeline_mode = #tpu.pipeline_mode<synchronous>, transform_indices = @transform_2, window_bounds = array<i64: 1, 64>}, {pipeline_mode = #tpu.pipeline_mode<synchronous>, transform_indices = @transform_3, window_bounds = array<i64: 1, 64>}, {transform_indices = @transform_4, window_bounds = array<i64: 1, 16, 16, 64>}]} {
    %c0 = arith.constant 0 : index
    %c0_0 = arith.constant 0 : index
    %0 = vector.load %arg3[%c0, %c0_0] : memref<1x64xf32, #tpu.memory_space<vmem>>, vector<1x64xf32>
    %c0_1 = arith.constant 0 : index
    %c0_2 = arith.constant 0 : index
    %1 = vector.load %arg4[%c0_1, %c0_2] : memref<1x64xf32, #tpu.memory_space<vmem>>, vector<1x64xf32>
    %cst = arith.constant 0.000000e+00 : bf16
    %2 = vector.broadcast %cst : bf16 to vector<18x18x64xbf16>
    %c0_3 = arith.constant 0 : index
    %c0_4 = arith.constant 0 : index
    %c0_5 = arith.constant 0 : index
    %3 = vector.load %arg6[%c0_3, %c0_4, %c0_5] : memref<18x18x64xbf16, #tpu.memory_space<vmem>>, vector<18x18x64xbf16>
    tpu.vector_store %arg6[%c0_3, %c0_4, %c0_5], %2 {strides = array<i32>} : memref<18x18x64xbf16, #tpu.memory_space<vmem>>, vector<18x18x64xbf16>,
    %c0_6 = arith.constant 0 : index
    %c0_7 = arith.constant 0 : index
    %c0_8 = arith.constant 0 : index
    %c0_9 = arith.constant 0 : index
    %4 = vector.load %arg1[%c0_6, %c0_7, %c0_8, %c0_9] : memref<1x16x16x64xbf16, #tpu.memory_space<vmem>>, vector<1x16x16x64xbf16>
    %5 = vector.shape_cast %4 : vector<1x16x16x64xbf16> to vector<16x16x64xbf16>
    %c1 = arith.constant 1 : index
    %c1_10 = arith.constant 1 : index
    %c0_11 = arith.constant 0 : index
    %6 = vector.load %arg6[%c1, %c1_10, %c0_11] : memref<18x18x64xbf16, #tpu.memory_space<vmem>>, vector<16x16x64xbf16>
    tpu.vector_store %arg6[%c1, %c1_10, %c0_11], %5 {strides = array<i32>} : memref<18x18x64xbf16, #tpu.memory_space<vmem>>, vector<16x16x64xbf16>,
    %cst_12 = arith.constant 0.000000e+00 : f32
    %7 = vector.broadcast %cst_12 : f32 to vector<256x64xf32>
    %c0_13 = arith.constant 0 : index
    %c0_14 = arith.constant 0 : index
    %c0_15 = arith.constant 0 : index
    %8 = vector.load %arg6[%c0_13, %c0_14, %c0_15] : memref<18x18x64xbf16, #tpu.memory_space<vmem>>, vector<16x16x64xbf16>
    %9 = vector.shape_cast %8 : vector<16x16x64xbf16> to vector<256x64xbf16>
    %c0_16 = arith.constant 0 : index
    %c0_17 = arith.constant 0 : index
    %c0_18 = arith.constant 0 : index
    %10 = vector.load %arg2[%c0_16, %c0_17, %c0_18] : memref<9x64x64xbf16, #tpu.memory_space<vmem>>, vector<1x64x64xbf16>
    %11 = vector.shape_cast %10 : vector<1x64x64xbf16> to vector<64x64xbf16>
    %cst_19 = arith.constant dense<0.000000e+00> : vector<256x64xf32>
    %12 = tpu.matmul %9, %11, %cst_19 {dimension_numbers = #tpu.dot_dimension_numbers<[1], [0], [0], [1], [0, 0, 1, 1], [], []>} : vector<256x64xbf16>, vector<64x64xbf16>, vector<256x64xf32> -> vector<256x64xf32>
    %13 = arith.addf %7, %12 : vector<256x64xf32>
    %c0_20 = arith.constant 0 : index
    %c1_21 = arith.constant 1 : index
    %c0_22 = arith.constant 0 : index
    %14 = vector.load %arg6[%c0_20, %c1_21, %c0_22] : memref<18x18x64xbf16, #tpu.memory_space<vmem>>, vector<16x16x64xbf16>
    %15 = vector.shape_cast %14 : vector<16x16x64xbf16> to vector<256x64xbf16>
    %c1_23 = arith.constant 1 : index
    %c0_24 = arith.constant 0 : index
    %c0_25 = arith.constant 0 : index
    %16 = vector.load %arg2[%c1_23, %c0_24, %c0_25] : memref<9x64x64xbf16, #tpu.memory_space<vmem>>, vector<1x64x64xbf16>
    %17 = vector.shape_cast %16 : vector<1x64x64xbf16> to vector<64x64xbf16>
    %cst_26 = arith.constant dense<0.000000e+00> : vector<256x64xf32>
    %18 = tpu.matmul %15, %17, %cst_26 {dimension_numbers = #tpu.dot_dimension_numbers<[1], [0], [0], [1], [0, 0, 1, 1], [], []>} : vector<256x64xbf16>, vector<64x64xbf16>, vector<256x64xf32> -> vector<256x64xf32>
    %19 = arith.addf %13, %18 : vector<256x64xf32>
    %c0_27 = arith.constant 0 : index
    %c2 = arith.constant 2 : index
    %c0_28 = arith.constant 0 : index
    %20 = vector.load %arg6[%c0_27, %c2, %c0_28] : memref<18x18x64xbf16, #tpu.memory_space<vmem>>, vector<16x16x64xbf16>
    %21 = vector.shape_cast %20 : vector<16x16x64xbf16> to vector<256x64xbf16>
    %c2_29 = arith.constant 2 : index
    %c0_30 = arith.constant 0 : index
    %c0_31 = arith.constant 0 : index
    %22 = vector.load %arg2[%c2_29, %c0_30, %c0_31] : memref<9x64x64xbf16, #tpu.memory_space<vmem>>, vector<1x64x64xbf16>
    %23 = vector.shape_cast %22 : vector<1x64x64xbf16> to vector<64x64xbf16>
    %cst_32 = arith.constant dense<0.000000e+00> : vector<256x64xf32>
    %24 = tpu.matmul %21, %23, %cst_32 {dimension_numbers = #tpu.dot_dimension_numbers<[1], [0], [0], [1], [0, 0, 1, 1], [], []>} : vector<256x64xbf16>, vector<64x64xbf16>, vector<256x64xf32> -> vector<256x64xf32>
    %25 = arith.addf %19, %24 : vector<256x64xf32>
    %c1_33 = arith.constant 1 : index
    %c0_34 = arith.constant 0 : index
    %c0_35 = arith.constant 0 : index
    %26 = vector.load %arg6[%c1_33, %c0_34, %c0_35] : memref<18x18x64xbf16, #tpu.memory_space<vmem>>, vector<16x16x64xbf16>
    %27 = vector.shape_cast %26 : vector<16x16x64xbf16> to vector<256x64xbf16>
    %c3 = arith.constant 3 : index
    %c0_36 = arith.constant 0 : index
    %c0_37 = arith.constant 0 : index
    %28 = vector.load %arg2[%c3, %c0_36, %c0_37] : memref<9x64x64xbf16, #tpu.memory_space<vmem>>, vector<1x64x64xbf16>
    %29 = vector.shape_cast %28 : vector<1x64x64xbf16> to vector<64x64xbf16>
    %cst_38 = arith.constant dense<0.000000e+00> : vector<256x64xf32>
    %30 = tpu.matmul %27, %29, %cst_38 {dimension_numbers = #tpu.dot_dimension_numbers<[1], [0], [0], [1], [0, 0, 1, 1], [], []>} : vector<256x64xbf16>, vector<64x64xbf16>, vector<256x64xf32> -> vector<256x64xf32>
    %31 = arith.addf %25, %30 : vector<256x64xf32>
    %c1_39 = arith.constant 1 : index
    %c1_40 = arith.constant 1 : index
    %c0_41 = arith.constant 0 : index
    %32 = vector.load %arg6[%c1_39, %c1_40, %c0_41] : memref<18x18x64xbf16, #tpu.memory_space<vmem>>, vector<16x16x64xbf16>
    %33 = vector.shape_cast %32 : vector<16x16x64xbf16> to vector<256x64xbf16>
    %c4 = arith.constant 4 : index
    %c0_42 = arith.constant 0 : index
    %c0_43 = arith.constant 0 : index
    %34 = vector.load %arg2[%c4, %c0_42, %c0_43] : memref<9x64x64xbf16, #tpu.memory_space<vmem>>, vector<1x64x64xbf16>
    %35 = vector.shape_cast %34 : vector<1x64x64xbf16> to vector<64x64xbf16>
    %cst_44 = arith.constant dense<0.000000e+00> : vector<256x64xf32>
    %36 = tpu.matmul %33, %35, %cst_44 {dimension_numbers = #tpu.dot_dimension_numbers<[1], [0], [0], [1], [0, 0, 1, 1], [], []>} : vector<256x64xbf16>, vector<64x64xbf16>, vector<256x64xf32> -> vector<256x64xf32>
    %37 = arith.addf %31, %36 : vector<256x64xf32>
    %c1_45 = arith.constant 1 : index
    %c2_46 = arith.constant 2 : index
    %c0_47 = arith.constant 0 : index
    %38 = vector.load %arg6[%c1_45, %c2_46, %c0_47] : memref<18x18x64xbf16, #tpu.memory_space<vmem>>, vector<16x16x64xbf16>
    %39 = vector.shape_cast %38 : vector<16x16x64xbf16> to vector<256x64xbf16>
    %c5 = arith.constant 5 : index
    %c0_48 = arith.constant 0 : index
    %c0_49 = arith.constant 0 : index
    %40 = vector.load %arg2[%c5, %c0_48, %c0_49] : memref<9x64x64xbf16, #tpu.memory_space<vmem>>, vector<1x64x64xbf16>
    %41 = vector.shape_cast %40 : vector<1x64x64xbf16> to vector<64x64xbf16>
    %cst_50 = arith.constant dense<0.000000e+00> : vector<256x64xf32>
    %42 = tpu.matmul %39, %41, %cst_50 {dimension_numbers = #tpu.dot_dimension_numbers<[1], [0], [0], [1], [0, 0, 1, 1], [], []>} : vector<256x64xbf16>, vector<64x64xbf16>, vector<256x64xf32> -> vector<256x64xf32>
    %43 = arith.addf %37, %42 : vector<256x64xf32>
    %c2_51 = arith.constant 2 : index
    %c0_52 = arith.constant 0 : index
    %c0_53 = arith.constant 0 : index
    %44 = vector.load %arg6[%c2_51, %c0_52, %c0_53] : memref<18x18x64xbf16, #tpu.memory_space<vmem>>, vector<16x16x64xbf16>
    %45 = vector.shape_cast %44 : vector<16x16x64xbf16> to vector<256x64xbf16>
    %c6 = arith.constant 6 : index
    %c0_54 = arith.constant 0 : index
    %c0_55 = arith.constant 0 : index
    %46 = vector.load %arg2[%c6, %c0_54, %c0_55] : memref<9x64x64xbf16, #tpu.memory_space<vmem>>, vector<1x64x64xbf16>
    %47 = vector.shape_cast %46 : vector<1x64x64xbf16> to vector<64x64xbf16>
    %cst_56 = arith.constant dense<0.000000e+00> : vector<256x64xf32>
    %48 = tpu.matmul %45, %47, %cst_56 {dimension_numbers = #tpu.dot_dimension_numbers<[1], [0], [0], [1], [0, 0, 1, 1], [], []>} : vector<256x64xbf16>, vector<64x64xbf16>, vector<256x64xf32> -> vector<256x64xf32>
    %49 = arith.addf %43, %48 : vector<256x64xf32>
    %c2_57 = arith.constant 2 : index
    %c1_58 = arith.constant 1 : index
    %c0_59 = arith.constant 0 : index
    %50 = vector.load %arg6[%c2_57, %c1_58, %c0_59] : memref<18x18x64xbf16, #tpu.memory_space<vmem>>, vector<16x16x64xbf16>
    %51 = vector.shape_cast %50 : vector<16x16x64xbf16> to vector<256x64xbf16>
    %c7 = arith.constant 7 : index
    %c0_60 = arith.constant 0 : index
    %c0_61 = arith.constant 0 : index
    %52 = vector.load %arg2[%c7, %c0_60, %c0_61] : memref<9x64x64xbf16, #tpu.memory_space<vmem>>, vector<1x64x64xbf16>
    %53 = vector.shape_cast %52 : vector<1x64x64xbf16> to vector<64x64xbf16>
    %cst_62 = arith.constant dense<0.000000e+00> : vector<256x64xf32>
    %54 = tpu.matmul %51, %53, %cst_62 {dimension_numbers = #tpu.dot_dimension_numbers<[1], [0], [0], [1], [0, 0, 1, 1], [], []>} : vector<256x64xbf16>, vector<64x64xbf16>, vector<256x64xf32> -> vector<256x64xf32>
    %55 = arith.addf %49, %54 : vector<256x64xf32>
    %c2_63 = arith.constant 2 : index
    %c2_64 = arith.constant 2 : index
    %c0_65 = arith.constant 0 : index
    %56 = vector.load %arg6[%c2_63, %c2_64, %c0_65] : memref<18x18x64xbf16, #tpu.memory_space<vmem>>, vector<16x16x64xbf16>
    %57 = vector.shape_cast %56 : vector<16x16x64xbf16> to vector<256x64xbf16>
    %c8 = arith.constant 8 : index
    %c0_66 = arith.constant 0 : index
    %c0_67 = arith.constant 0 : index
    %58 = vector.load %arg2[%c8, %c0_66, %c0_67] : memref<9x64x64xbf16, #tpu.memory_space<vmem>>, vector<1x64x64xbf16>
    %59 = vector.shape_cast %58 : vector<1x64x64xbf16> to vector<64x64xbf16>
    %cst_68 = arith.constant dense<0.000000e+00> : vector<256x64xf32>
    %60 = tpu.matmul %57, %59, %cst_68 {dimension_numbers = #tpu.dot_dimension_numbers<[1], [0], [0], [1], [0, 0, 1, 1], [], []>} : vector<256x64xbf16>, vector<64x64xbf16>, vector<256x64xf32> -> vector<256x64xf32>
    %61 = arith.addf %55, %60 : vector<256x64xf32>
    %62 = vector.broadcast %0 : vector<1x64xf32> to vector<256x64xf32>
    %63 = arith.mulf %61, %62 : vector<256x64xf32>
    %64 = vector.broadcast %1 : vector<1x64xf32> to vector<256x64xf32>
    %65 = arith.addf %63, %64 : vector<256x64xf32>
    %cst_69 = arith.constant 0.000000e+00 : f32
    %66 = vector.broadcast %cst_69 : f32 to vector<256x64xf32>
    %67 = arith.maximumf %65, %66 : vector<256x64xf32>
    %c0_70 = arith.constant 0 : index
    %c0_71 = arith.constant 0 : index
    %c0_72 = arith.constant 0 : index
    %c0_73 = arith.constant 0 : index
    %68 = vector.load %arg1[%c0_70, %c0_71, %c0_72, %c0_73] : memref<1x16x16x64xbf16, #tpu.memory_space<vmem>>, vector<1x16x16x64xbf16>
    %69 = vector.shape_cast %68 : vector<1x16x16x64xbf16> to vector<16x16x64xbf16>
    %70 = arith.extf %69 : vector<16x16x64xbf16> to vector<16x16x64xf32>
    %71 = vector.shape_cast %67 : vector<256x64xf32> to vector<16x16x64xf32>
    %72 = arith.addf %70, %71 : vector<16x16x64xf32>
    %73 = arith.truncf %72 : vector<16x16x64xf32> to vector<16x16x64xbf16>
    %c1_74 = arith.constant 1 : index
    %c1_75 = arith.constant 1 : index
    %c0_76 = arith.constant 0 : index
    %74 = vector.load %arg6[%c1_74, %c1_75, %c0_76] : memref<18x18x64xbf16, #tpu.memory_space<vmem>>, vector<16x16x64xbf16>
    tpu.vector_store %arg6[%c1_74, %c1_75, %c0_76], %73 {strides = array<i32>} : memref<18x18x64xbf16, #tpu.memory_space<vmem>>, vector<16x16x64xbf16>,
    %cst_77 = arith.constant 0.000000e+00 : f32
    %75 = vector.broadcast %cst_77 : f32 to vector<256x64xf32>
    %c0_78 = arith.constant 0 : index
    %c0_79 = arith.constant 0 : index
    %c0_80 = arith.constant 0 : index
    %76 = vector.load %arg6[%c0_78, %c0_79, %c0_80] : memref<18x18x64xbf16, #tpu.memory_space<vmem>>, vector<16x16x64xbf16>
    %77 = vector.shape_cast %76 : vector<16x16x64xbf16> to vector<256x64xbf16>
    %c0_81 = arith.constant 0 : index
    %c0_82 = arith.constant 0 : index
    %c0_83 = arith.constant 0 : index
    %78 = vector.load %arg2[%c0_81, %c0_82, %c0_83] : memref<9x64x64xbf16, #tpu.memory_space<vmem>>, vector<1x64x64xbf16>
    %79 = vector.shape_cast %78 : vector<1x64x64xbf16> to vector<64x64xbf16>
    %cst_84 = arith.constant dense<0.000000e+00> : vector<256x64xf32>
    %80 = tpu.matmul %77, %79, %cst_84 {dimension_numbers = #tpu.dot_dimension_numbers<[1], [0], [0], [1], [0, 0, 1, 1], [], []>} : vector<256x64xbf16>, vector<64x64xbf16>, vector<256x64xf32> -> vector<256x64xf32>
    %81 = arith.addf %75, %80 : vector<256x64xf32>
    %c0_85 = arith.constant 0 : index
    %c1_86 = arith.constant 1 : index
    %c0_87 = arith.constant 0 : index
    %82 = vector.load %arg6[%c0_85, %c1_86, %c0_87] : memref<18x18x64xbf16, #tpu.memory_space<vmem>>, vector<16x16x64xbf16>
    %83 = vector.shape_cast %82 : vector<16x16x64xbf16> to vector<256x64xbf16>
    %c1_88 = arith.constant 1 : index
    %c0_89 = arith.constant 0 : index
    %c0_90 = arith.constant 0 : index
    %84 = vector.load %arg2[%c1_88, %c0_89, %c0_90] : memref<9x64x64xbf16, #tpu.memory_space<vmem>>, vector<1x64x64xbf16>
    %85 = vector.shape_cast %84 : vector<1x64x64xbf16> to vector<64x64xbf16>
    %cst_91 = arith.constant dense<0.000000e+00> : vector<256x64xf32>
    %86 = tpu.matmul %83, %85, %cst_91 {dimension_numbers = #tpu.dot_dimension_numbers<[1], [0], [0], [1], [0, 0, 1, 1], [], []>} : vector<256x64xbf16>, vector<64x64xbf16>, vector<256x64xf32> -> vector<256x64xf32>
    %87 = arith.addf %81, %86 : vector<256x64xf32>
    %c0_92 = arith.constant 0 : index
    %c2_93 = arith.constant 2 : index
    %c0_94 = arith.constant 0 : index
    %88 = vector.load %arg6[%c0_92, %c2_93, %c0_94] : memref<18x18x64xbf16, #tpu.memory_space<vmem>>, vector<16x16x64xbf16>
    %89 = vector.shape_cast %88 : vector<16x16x64xbf16> to vector<256x64xbf16>
    %c2_95 = arith.constant 2 : index
    %c0_96 = arith.constant 0 : index
    %c0_97 = arith.constant 0 : index
    %90 = vector.load %arg2[%c2_95, %c0_96, %c0_97] : memref<9x64x64xbf16, #tpu.memory_space<vmem>>, vector<1x64x64xbf16>
    %91 = vector.shape_cast %90 : vector<1x64x64xbf16> to vector<64x64xbf16>
    %cst_98 = arith.constant dense<0.000000e+00> : vector<256x64xf32>
    %92 = tpu.matmul %89, %91, %cst_98 {dimension_numbers = #tpu.dot_dimension_numbers<[1], [0], [0], [1], [0, 0, 1, 1], [], []>} : vector<256x64xbf16>, vector<64x64xbf16>, vector<256x64xf32> -> vector<256x64xf32>
    %93 = arith.addf %87, %92 : vector<256x64xf32>
    %c1_99 = arith.constant 1 : index
    %c0_100 = arith.constant 0 : index
    %c0_101 = arith.constant 0 : index
    %94 = vector.load %arg6[%c1_99, %c0_100, %c0_101] : memref<18x18x64xbf16, #tpu.memory_space<vmem>>, vector<16x16x64xbf16>
    %95 = vector.shape_cast %94 : vector<16x16x64xbf16> to vector<256x64xbf16>
    %c3_102 = arith.constant 3 : index
    %c0_103 = arith.constant 0 : index
    %c0_104 = arith.constant 0 : index
    %96 = vector.load %arg2[%c3_102, %c0_103, %c0_104] : memref<9x64x64xbf16, #tpu.memory_space<vmem>>, vector<1x64x64xbf16>
    %97 = vector.shape_cast %96 : vector<1x64x64xbf16> to vector<64x64xbf16>
    %cst_105 = arith.constant dense<0.000000e+00> : vector<256x64xf32>
    %98 = tpu.matmul %95, %97, %cst_105 {dimension_numbers = #tpu.dot_dimension_numbers<[1], [0], [0], [1], [0, 0, 1, 1], [], []>} : vector<256x64xbf16>, vector<64x64xbf16>, vector<256x64xf32> -> vector<256x64xf32>
    %99 = arith.addf %93, %98 : vector<256x64xf32>
    %c1_106 = arith.constant 1 : index
    %c1_107 = arith.constant 1 : index
    %c0_108 = arith.constant 0 : index
    %100 = vector.load %arg6[%c1_106, %c1_107, %c0_108] : memref<18x18x64xbf16, #tpu.memory_space<vmem>>, vector<16x16x64xbf16>
    %101 = vector.shape_cast %100 : vector<16x16x64xbf16> to vector<256x64xbf16>
    %c4_109 = arith.constant 4 : index
    %c0_110 = arith.constant 0 : index
    %c0_111 = arith.constant 0 : index
    %102 = vector.load %arg2[%c4_109, %c0_110, %c0_111] : memref<9x64x64xbf16, #tpu.memory_space<vmem>>, vector<1x64x64xbf16>
    %103 = vector.shape_cast %102 : vector<1x64x64xbf16> to vector<64x64xbf16>
    %cst_112 = arith.constant dense<0.000000e+00> : vector<256x64xf32>
    %104 = tpu.matmul %101, %103, %cst_112 {dimension_numbers = #tpu.dot_dimension_numbers<[1], [0], [0], [1], [0, 0, 1, 1], [], []>} : vector<256x64xbf16>, vector<64x64xbf16>, vector<256x64xf32> -> vector<256x64xf32>
    %105 = arith.addf %99, %104 : vector<256x64xf32>
    %c1_113 = arith.constant 1 : index
    %c2_114 = arith.constant 2 : index
    %c0_115 = arith.constant 0 : index
    %106 = vector.load %arg6[%c1_113, %c2_114, %c0_115] : memref<18x18x64xbf16, #tpu.memory_space<vmem>>, vector<16x16x64xbf16>
    %107 = vector.shape_cast %106 : vector<16x16x64xbf16> to vector<256x64xbf16>
    %c5_116 = arith.constant 5 : index
    %c0_117 = arith.constant 0 : index
    %c0_118 = arith.constant 0 : index
    %108 = vector.load %arg2[%c5_116, %c0_117, %c0_118] : memref<9x64x64xbf16, #tpu.memory_space<vmem>>, vector<1x64x64xbf16>
    %109 = vector.shape_cast %108 : vector<1x64x64xbf16> to vector<64x64xbf16>
    %cst_119 = arith.constant dense<0.000000e+00> : vector<256x64xf32>
    %110 = tpu.matmul %107, %109, %cst_119 {dimension_numbers = #tpu.dot_dimension_numbers<[1], [0], [0], [1], [0, 0, 1, 1], [], []>} : vector<256x64xbf16>, vector<64x64xbf16>, vector<256x64xf32> -> vector<256x64xf32>
    %111 = arith.addf %105, %110 : vector<256x64xf32>
    %c2_120 = arith.constant 2 : index
    %c0_121 = arith.constant 0 : index
    %c0_122 = arith.constant 0 : index
    %112 = vector.load %arg6[%c2_120, %c0_121, %c0_122] : memref<18x18x64xbf16, #tpu.memory_space<vmem>>, vector<16x16x64xbf16>
    %113 = vector.shape_cast %112 : vector<16x16x64xbf16> to vector<256x64xbf16>
    %c6_123 = arith.constant 6 : index
    %c0_124 = arith.constant 0 : index
    %c0_125 = arith.constant 0 : index
    %114 = vector.load %arg2[%c6_123, %c0_124, %c0_125] : memref<9x64x64xbf16, #tpu.memory_space<vmem>>, vector<1x64x64xbf16>
    %115 = vector.shape_cast %114 : vector<1x64x64xbf16> to vector<64x64xbf16>
    %cst_126 = arith.constant dense<0.000000e+00> : vector<256x64xf32>
    %116 = tpu.matmul %113, %115, %cst_126 {dimension_numbers = #tpu.dot_dimension_numbers<[1], [0], [0], [1], [0, 0, 1, 1], [], []>} : vector<256x64xbf16>, vector<64x64xbf16>, vector<256x64xf32> -> vector<256x64xf32>
    %117 = arith.addf %111, %116 : vector<256x64xf32>
    %c2_127 = arith.constant 2 : index
    %c1_128 = arith.constant 1 : index
    %c0_129 = arith.constant 0 : index
    %118 = vector.load %arg6[%c2_127, %c1_128, %c0_129] : memref<18x18x64xbf16, #tpu.memory_space<vmem>>, vector<16x16x64xbf16>
    %119 = vector.shape_cast %118 : vector<16x16x64xbf16> to vector<256x64xbf16>
    %c7_130 = arith.constant 7 : index
    %c0_131 = arith.constant 0 : index
    %c0_132 = arith.constant 0 : index
    %120 = vector.load %arg2[%c7_130, %c0_131, %c0_132] : memref<9x64x64xbf16, #tpu.memory_space<vmem>>, vector<1x64x64xbf16>
    %121 = vector.shape_cast %120 : vector<1x64x64xbf16> to vector<64x64xbf16>
    %cst_133 = arith.constant dense<0.000000e+00> : vector<256x64xf32>
    %122 = tpu.matmul %119, %121, %cst_133 {dimension_numbers = #tpu.dot_dimension_numbers<[1], [0], [0], [1], [0, 0, 1, 1], [], []>} : vector<256x64xbf16>, vector<64x64xbf16>, vector<256x64xf32> -> vector<256x64xf32>
    %123 = arith.addf %117, %122 : vector<256x64xf32>
    %c2_134 = arith.constant 2 : index
    %c2_135 = arith.constant 2 : index
    %c0_136 = arith.constant 0 : index
    %124 = vector.load %arg6[%c2_134, %c2_135, %c0_136] : memref<18x18x64xbf16, #tpu.memory_space<vmem>>, vector<16x16x64xbf16>
    %125 = vector.shape_cast %124 : vector<16x16x64xbf16> to vector<256x64xbf16>
    %c8_137 = arith.constant 8 : index
    %c0_138 = arith.constant 0 : index
    %c0_139 = arith.constant 0 : index
    %126 = vector.load %arg2[%c8_137, %c0_138, %c0_139] : memref<9x64x64xbf16, #tpu.memory_space<vmem>>, vector<1x64x64xbf16>
    %127 = vector.shape_cast %126 : vector<1x64x64xbf16> to vector<64x64xbf16>
    %cst_140 = arith.constant dense<0.000000e+00> : vector<256x64xf32>
    %128 = tpu.matmul %125, %127, %cst_140 {dimension_numbers = #tpu.dot_dimension_numbers<[1], [0], [0], [1], [0, 0, 1, 1], [], []>} : vector<256x64xbf16>, vector<64x64xbf16>, vector<256x64xf32> -> vector<256x64xf32>
    %129 = arith.addf %123, %128 : vector<256x64xf32>
    %130 = vector.broadcast %0 : vector<1x64xf32> to vector<256x64xf32>
    %131 = arith.mulf %129, %130 : vector<256x64xf32>
    %132 = vector.broadcast %1 : vector<1x64xf32> to vector<256x64xf32>
    %133 = arith.addf %131, %132 : vector<256x64xf32>
    %cst_141 = arith.constant 0.000000e+00 : f32
    %134 = vector.broadcast %cst_141 : f32 to vector<256x64xf32>
    %135 = arith.maximumf %133, %134 : vector<256x64xf32>
    %c0_142 = arith.constant 0 : index
    %c0_143 = arith.constant 0 : index
    %c0_144 = arith.constant 0 : index
    %c0_145 = arith.constant 0 : index
    %136 = vector.load %arg1[%c0_142, %c0_143, %c0_144, %c0_145] : memref<1x16x16x64xbf16, #tpu.memory_space<vmem>>, vector<1x16x16x64xbf16>
    %137 = vector.shape_cast %136 : vector<1x16x16x64xbf16> to vector<16x16x64xbf16>
    %138 = arith.extf %137 : vector<16x16x64xbf16> to vector<16x16x64xf32>
    %139 = vector.shape_cast %135 : vector<256x64xf32> to vector<16x16x64xf32>
    %140 = arith.addf %138, %139 : vector<16x16x64xf32>
    %141 = arith.truncf %140 : vector<16x16x64xf32> to vector<16x16x64xbf16>
    %c1_146 = arith.constant 1 : index
    %c1_147 = arith.constant 1 : index
    %c0_148 = arith.constant 0 : index
    %142 = vector.load %arg6[%c1_146, %c1_147, %c0_148] : memref<18x18x64xbf16, #tpu.memory_space<vmem>>, vector<16x16x64xbf16>
    tpu.vector_store %arg6[%c1_146, %c1_147, %c0_148], %141 {strides = array<i32>} : memref<18x18x64xbf16, #tpu.memory_space<vmem>>, vector<16x16x64xbf16>,
    %cst_149 = arith.constant 0.000000e+00 : f32
    %143 = vector.broadcast %cst_149 : f32 to vector<256x64xf32>
    %c0_150 = arith.constant 0 : index
    %c0_151 = arith.constant 0 : index
    %c0_152 = arith.constant 0 : index
    %144 = vector.load %arg6[%c0_150, %c0_151, %c0_152] : memref<18x18x64xbf16, #tpu.memory_space<vmem>>, vector<16x16x64xbf16>
    %145 = vector.shape_cast %144 : vector<16x16x64xbf16> to vector<256x64xbf16>
    %c0_153 = arith.constant 0 : index
    %c0_154 = arith.constant 0 : index
    %c0_155 = arith.constant 0 : index
    %146 = vector.load %arg2[%c0_153, %c0_154, %c0_155] : memref<9x64x64xbf16, #tpu.memory_space<vmem>>, vector<1x64x64xbf16>
    %147 = vector.shape_cast %146 : vector<1x64x64xbf16> to vector<64x64xbf16>
    %cst_156 = arith.constant dense<0.000000e+00> : vector<256x64xf32>
    %148 = tpu.matmul %145, %147, %cst_156 {dimension_numbers = #tpu.dot_dimension_numbers<[1], [0], [0], [1], [0, 0, 1, 1], [], []>} : vector<256x64xbf16>, vector<64x64xbf16>, vector<256x64xf32> -> vector<256x64xf32>
    %149 = arith.addf %143, %148 : vector<256x64xf32>
    %c0_157 = arith.constant 0 : index
    %c1_158 = arith.constant 1 : index
    %c0_159 = arith.constant 0 : index
    %150 = vector.load %arg6[%c0_157, %c1_158, %c0_159] : memref<18x18x64xbf16, #tpu.memory_space<vmem>>, vector<16x16x64xbf16>
    %151 = vector.shape_cast %150 : vector<16x16x64xbf16> to vector<256x64xbf16>
    %c1_160 = arith.constant 1 : index
    %c0_161 = arith.constant 0 : index
    %c0_162 = arith.constant 0 : index
    %152 = vector.load %arg2[%c1_160, %c0_161, %c0_162] : memref<9x64x64xbf16, #tpu.memory_space<vmem>>, vector<1x64x64xbf16>
    %153 = vector.shape_cast %152 : vector<1x64x64xbf16> to vector<64x64xbf16>
    %cst_163 = arith.constant dense<0.000000e+00> : vector<256x64xf32>
    %154 = tpu.matmul %151, %153, %cst_163 {dimension_numbers = #tpu.dot_dimension_numbers<[1], [0], [0], [1], [0, 0, 1, 1], [], []>} : vector<256x64xbf16>, vector<64x64xbf16>, vector<256x64xf32> -> vector<256x64xf32>
    %155 = arith.addf %149, %154 : vector<256x64xf32>
    %c0_164 = arith.constant 0 : index
    %c2_165 = arith.constant 2 : index
    %c0_166 = arith.constant 0 : index
    %156 = vector.load %arg6[%c0_164, %c2_165, %c0_166] : memref<18x18x64xbf16, #tpu.memory_space<vmem>>, vector<16x16x64xbf16>
    %157 = vector.shape_cast %156 : vector<16x16x64xbf16> to vector<256x64xbf16>
    %c2_167 = arith.constant 2 : index
    %c0_168 = arith.constant 0 : index
    %c0_169 = arith.constant 0 : index
    %158 = vector.load %arg2[%c2_167, %c0_168, %c0_169] : memref<9x64x64xbf16, #tpu.memory_space<vmem>>, vector<1x64x64xbf16>
    %159 = vector.shape_cast %158 : vector<1x64x64xbf16> to vector<64x64xbf16>
    %cst_170 = arith.constant dense<0.000000e+00> : vector<256x64xf32>
    %160 = tpu.matmul %157, %159, %cst_170 {dimension_numbers = #tpu.dot_dimension_numbers<[1], [0], [0], [1], [0, 0, 1, 1], [], []>} : vector<256x64xbf16>, vector<64x64xbf16>, vector<256x64xf32> -> vector<256x64xf32>
    %161 = arith.addf %155, %160 : vector<256x64xf32>
    %c1_171 = arith.constant 1 : index
    %c0_172 = arith.constant 0 : index
    %c0_173 = arith.constant 0 : index
    %162 = vector.load %arg6[%c1_171, %c0_172, %c0_173] : memref<18x18x64xbf16, #tpu.memory_space<vmem>>, vector<16x16x64xbf16>
    %163 = vector.shape_cast %162 : vector<16x16x64xbf16> to vector<256x64xbf16>
    %c3_174 = arith.constant 3 : index
    %c0_175 = arith.constant 0 : index
    %c0_176 = arith.constant 0 : index
    %164 = vector.load %arg2[%c3_174, %c0_175, %c0_176] : memref<9x64x64xbf16, #tpu.memory_space<vmem>>, vector<1x64x64xbf16>
    %165 = vector.shape_cast %164 : vector<1x64x64xbf16> to vector<64x64xbf16>
    %cst_177 = arith.constant dense<0.000000e+00> : vector<256x64xf32>
    %166 = tpu.matmul %163, %165, %cst_177 {dimension_numbers = #tpu.dot_dimension_numbers<[1], [0], [0], [1], [0, 0, 1, 1], [], []>} : vector<256x64xbf16>, vector<64x64xbf16>, vector<256x64xf32> -> vector<256x64xf32>
    %167 = arith.addf %161, %166 : vector<256x64xf32>
    %c1_178 = arith.constant 1 : index
    %c1_179 = arith.constant 1 : index
    %c0_180 = arith.constant 0 : index
    %168 = vector.load %arg6[%c1_178, %c1_179, %c0_180] : memref<18x18x64xbf16, #tpu.memory_space<vmem>>, vector<16x16x64xbf16>
    %169 = vector.shape_cast %168 : vector<16x16x64xbf16> to vector<256x64xbf16>
    %c4_181 = arith.constant 4 : index
    %c0_182 = arith.constant 0 : index
    %c0_183 = arith.constant 0 : index
    %170 = vector.load %arg2[%c4_181, %c0_182, %c0_183] : memref<9x64x64xbf16, #tpu.memory_space<vmem>>, vector<1x64x64xbf16>
    %171 = vector.shape_cast %170 : vector<1x64x64xbf16> to vector<64x64xbf16>
    %cst_184 = arith.constant dense<0.000000e+00> : vector<256x64xf32>
    %172 = tpu.matmul %169, %171, %cst_184 {dimension_numbers = #tpu.dot_dimension_numbers<[1], [0], [0], [1], [0, 0, 1, 1], [], []>} : vector<256x64xbf16>, vector<64x64xbf16>, vector<256x64xf32> -> vector<256x64xf32>
    %173 = arith.addf %167, %172 : vector<256x64xf32>
    %c1_185 = arith.constant 1 : index
    %c2_186 = arith.constant 2 : index
    %c0_187 = arith.constant 0 : index
    %174 = vector.load %arg6[%c1_185, %c2_186, %c0_187] : memref<18x18x64xbf16, #tpu.memory_space<vmem>>, vector<16x16x64xbf16>
    %175 = vector.shape_cast %174 : vector<16x16x64xbf16> to vector<256x64xbf16>
    %c5_188 = arith.constant 5 : index
    %c0_189 = arith.constant 0 : index
    %c0_190 = arith.constant 0 : index
    %176 = vector.load %arg2[%c5_188, %c0_189, %c0_190] : memref<9x64x64xbf16, #tpu.memory_space<vmem>>, vector<1x64x64xbf16>
    %177 = vector.shape_cast %176 : vector<1x64x64xbf16> to vector<64x64xbf16>
    %cst_191 = arith.constant dense<0.000000e+00> : vector<256x64xf32>
    %178 = tpu.matmul %175, %177, %cst_191 {dimension_numbers = #tpu.dot_dimension_numbers<[1], [0], [0], [1], [0, 0, 1, 1], [], []>} : vector<256x64xbf16>, vector<64x64xbf16>, vector<256x64xf32> -> vector<256x64xf32>
    %179 = arith.addf %173, %178 : vector<256x64xf32>
    %c2_192 = arith.constant 2 : index
    %c0_193 = arith.constant 0 : index
    %c0_194 = arith.constant 0 : index
    %180 = vector.load %arg6[%c2_192, %c0_193, %c0_194] : memref<18x18x64xbf16, #tpu.memory_space<vmem>>, vector<16x16x64xbf16>
    %181 = vector.shape_cast %180 : vector<16x16x64xbf16> to vector<256x64xbf16>
    %c6_195 = arith.constant 6 : index
    %c0_196 = arith.constant 0 : index
    %c0_197 = arith.constant 0 : index
    %182 = vector.load %arg2[%c6_195, %c0_196, %c0_197] : memref<9x64x64xbf16, #tpu.memory_space<vmem>>, vector<1x64x64xbf16>
    %183 = vector.shape_cast %182 : vector<1x64x64xbf16> to vector<64x64xbf16>
    %cst_198 = arith.constant dense<0.000000e+00> : vector<256x64xf32>
    %184 = tpu.matmul %181, %183, %cst_198 {dimension_numbers = #tpu.dot_dimension_numbers<[1], [0], [0], [1], [0, 0, 1, 1], [], []>} : vector<256x64xbf16>, vector<64x64xbf16>, vector<256x64xf32> -> vector<256x64xf32>
    %185 = arith.addf %179, %184 : vector<256x64xf32>
    %c2_199 = arith.constant 2 : index
    %c1_200 = arith.constant 1 : index
    %c0_201 = arith.constant 0 : index
    %186 = vector.load %arg6[%c2_199, %c1_200, %c0_201] : memref<18x18x64xbf16, #tpu.memory_space<vmem>>, vector<16x16x64xbf16>
    %187 = vector.shape_cast %186 : vector<16x16x64xbf16> to vector<256x64xbf16>
    %c7_202 = arith.constant 7 : index
    %c0_203 = arith.constant 0 : index
    %c0_204 = arith.constant 0 : index
    %188 = vector.load %arg2[%c7_202, %c0_203, %c0_204] : memref<9x64x64xbf16, #tpu.memory_space<vmem>>, vector<1x64x64xbf16>
    %189 = vector.shape_cast %188 : vector<1x64x64xbf16> to vector<64x64xbf16>
    %cst_205 = arith.constant dense<0.000000e+00> : vector<256x64xf32>
    %190 = tpu.matmul %187, %189, %cst_205 {dimension_numbers = #tpu.dot_dimension_numbers<[1], [0], [0], [1], [0, 0, 1, 1], [], []>} : vector<256x64xbf16>, vector<64x64xbf16>, vector<256x64xf32> -> vector<256x64xf32>
    %191 = arith.addf %185, %190 : vector<256x64xf32>
    %c2_206 = arith.constant 2 : index
    %c2_207 = arith.constant 2 : index
    %c0_208 = arith.constant 0 : index
    %192 = vector.load %arg6[%c2_206, %c2_207, %c0_208] : memref<18x18x64xbf16, #tpu.memory_space<vmem>>, vector<16x16x64xbf16>
    %193 = vector.shape_cast %192 : vector<16x16x64xbf16> to vector<256x64xbf16>
    %c8_209 = arith.constant 8 : index
    %c0_210 = arith.constant 0 : index
    %c0_211 = arith.constant 0 : index
    %194 = vector.load %arg2[%c8_209, %c0_210, %c0_211] : memref<9x64x64xbf16, #tpu.memory_space<vmem>>, vector<1x64x64xbf16>
    %195 = vector.shape_cast %194 : vector<1x64x64xbf16> to vector<64x64xbf16>
    %cst_212 = arith.constant dense<0.000000e+00> : vector<256x64xf32>
    %196 = tpu.matmul %193, %195, %cst_212 {dimension_numbers = #tpu.dot_dimension_numbers<[1], [0], [0], [1], [0, 0, 1, 1], [], []>} : vector<256x64xbf16>, vector<64x64xbf16>, vector<256x64xf32> -> vector<256x64xf32>
    %197 = arith.addf %191, %196 : vector<256x64xf32>
    %198 = vector.broadcast %0 : vector<1x64xf32> to vector<256x64xf32>
    %199 = arith.mulf %197, %198 : vector<256x64xf32>
    %200 = vector.broadcast %1 : vector<1x64xf32> to vector<256x64xf32>
    %201 = arith.addf %199, %200 : vector<256x64xf32>
    %cst_213 = arith.constant 0.000000e+00 : f32
    %202 = vector.broadcast %cst_213 : f32 to vector<256x64xf32>
    %203 = arith.maximumf %201, %202 : vector<256x64xf32>
    %204 = vector.shape_cast %203 : vector<256x64xf32> to vector<16x16x64xf32>
    %205 = arith.truncf %204 : vector<16x16x64xf32> to vector<16x16x64xbf16>
    %c0_214 = arith.constant 0 : index
    %c0_215 = arith.constant 0 : index
    %c0_216 = arith.constant 0 : index
    %c0_217 = arith.constant 0 : index
    %206 = vector.load %arg5[%c0_214, %c0_215, %c0_216, %c0_217] : memref<1x16x16x64xbf16, #tpu.memory_space<vmem>>, vector<1x16x16x64xbf16>
    %207 = vector.shape_cast %206 : vector<1x16x16x64xbf16> to vector<16x16x64xbf16>
    %208 = vector.shape_cast %205 : vector<16x16x64xbf16> to vector<1x16x16x64xbf16>
    tpu.vector_store %arg5[%c0_214, %c0_215, %c0_216, %c0_217], %208 {strides = array<i32>} : memref<1x16x16x64xbf16, #tpu.memory_space<vmem>>, vector<1x16x16x64xbf16>,
    return
  }
  func.func @transform_0(%arg0: i32) -> (i32, i32, i32, i32) {
    %c0_i32 = arith.constant 0 : i32
    %c0_i32_0 = arith.constant 0 : i32
    %c0_i32_1 = arith.constant 0 : i32
    %c0_i32_2 = arith.constant 0 : i32
    return %arg0, %c0_i32, %c0_i32_0, %c0_i32_1 : i32, i32, i32, i32
  }
  func.func @transform_1(%arg0: i32) -> (i32, i32, i32) {
    %c0_i32 = arith.constant 0 : i32
    %c0_i32_0 = arith.constant 0 : i32
    %c0_i32_1 = arith.constant 0 : i32
    %c0_i32_2 = arith.constant 0 : i32
    return %c0_i32, %c0_i32_0, %c0_i32_1 : i32, i32, i32
  }
  func.func @transform_2(%arg0: i32) -> (i32, i32) {
    %c0_i32 = arith.constant 0 : i32
    %c0_i32_0 = arith.constant 0 : i32
    %c0_i32_1 = arith.constant 0 : i32
    return %c0_i32, %c0_i32_0 : i32, i32
  }
  func.func @transform_3(%arg0: i32) -> (i32, i32) {
    %c0_i32 = arith.constant 0 : i32
    %c0_i32_0 = arith.constant 0 : i32
    %c0_i32_1 = arith.constant 0 : i32
    return %c0_i32, %c0_i32_0 : i32, i32
  }
  func.func @transform_4(%arg0: i32) -> (i32, i32, i32, i32) {
    %c0_i32 = arith.constant 0 : i32
    %c0_i32_0 = arith.constant 0 : i32
    %c0_i32_1 = arith.constant 0 : i32
    %c0_i32_2 = arith.constant 0 : i32
    return %arg0, %c0_i32, %c0_i32_0, %c0_i32_1 : i32, i32, i32, i32
  }
}

</mosaic_0001>

<bundles_post_ra>
// kernel: recurrent_block_forward.1
= control target key start
LH: loop header
LB: loop body
LE: loop exit
PB: predicated region body
PF: predicated region fallthrough
CT: control target
= control target key end

     0   :  { %s21340_s15 = smov 0   ;;  %s26995_s0 = inlined_call_operand.vmem [shape: bf16[2,16,16,64], index: 0, kind: input, shape index: {}]   ;;  %s26996_s1 = inlined_call_operand.vmem [shape: bf16[9,64,64], index: 1, kind: input, shape index: {}]   ;;  %s26997_s2 = inlined_call_operand.vmem [shape: f32[1,64], index: 2, kind: input, shape index: {}]   ;;  %s26998_s3 = inlined_call_operand.vmem [shape: f32[1,64], index: 3, kind: input, shape index: {}]   ;;  %s26999_s4 = inlined_call_operand.vmem [shape: bf16[2,16,16,64], index: 4, kind: output, shape index: {}]  }
   0x1 LB: > { %s16886_s16 = sadd.s32 4294967295, %s21312_s15   ;;  %p16890_p0 = scmp.ge.s32.totalorder %s21312_s15, 1  ;;  %s21312_s15 = sphi %s21340_s15, %s14_s15  }
   0x2   : > { %p162_p1 = scmp.lt.s32.totalorder %s21312_s15, 3 }
   0x4   : > { %p163_p2 = pnand %p16890_p0, %p162_p1 }
   0x6   : > { %166 = sbr.rel (%p163_p2) target bundleno = 2344 (0x928), region = 36 }
   0xd   : > { %v20964_v0 = vld [vmem:[%s26996_s1 + $0x20] sm:$0xff]   ;;  %vm201_vm0 = vcmask 519168   ;;  %v21357_v2 = vld [vmem:[%s26996_s1 + $0x28] sm:$0xff]   ;;  %v21314_v3 = vmov 0   ;;  %vm204_vm1 = vcmask 516096   ;;  %v20968_v5 = vld [vmem:[%s26996_s1 + $0x30] sm:$0xff]  }
   0xe   : > { %v20965_v1 = vld [vmem:[%s26996_s1 + $0x80] sm:$0xff]   ;;  %19099 = vmatprep.subr.bf16.mxu1 %v20964_v0  ;;  %202 = vst.msk [vmem:[#allocation2] sm:$0xf] %vm201_vm0, %v21314_v3  ;;  %203 = vst.msk [vmem:[#allocation2 + $0x4] sm:$0xf] %vm201_vm0, %v21314_v3  ;;  %v20967_v4 = vld [vmem:[%s26996_s1 + $0x88] sm:$0xff]  }
   0xf   : > { %206 = vst.msk [vmem:[#allocation2 + $0xc] sm:$0xf] %vm201_vm0, %v21314_v3  ;;  %207 = vst.msk [vmem:[#allocation2 + $0x10] sm:$0xf] %vm201_vm0, %v21314_v3  ;;  %19259 = vmatprep.subr.bf16.mxu0 %v20965_v1  ;;  %19100 = vmatpush3.bf16.msra.mxu1 %v20964_v0  ;;  %p188_p3 = scmp.lt.s32.totalorder %s16886_s16, 1  ;;  %v20969_v6 = vld [vmem:[%s26996_s1 + $0x90] sm:$0xff]  }
  0x10   : > { %209 = vst.msk [vmem:[#allocation2 + $0x18] sm:$0xf] %vm201_vm0, %v21314_v3  ;;  %210 = vst.msk [vmem:[#allocation2 + $0x1c] sm:$0xf] %vm201_vm0, %v21314_v3  ;;  %19260 = vmatpush3.bf16.msra.mxu0 %v20965_v1  ;;  %19101 = vmatprep.subr.bf16.mxu1 %v21357_v2  ;;  %v20970_v7 = vld [vmem:[%s26996_s1 + $0x38] sm:$0xff]   ;;  %v21449_v26 = vld [vmem:[%s26996_s1] sm:$0xff]  }
  0x11   : > { %212 = vst.msk [vmem:[#allocation2 + $0x24] sm:$0xf] %vm201_vm0, %v21314_v3  ;;  %213 = vst.msk [vmem:[#allocation2 + $0x28] sm:$0xf] %vm201_vm0, %v21314_v3  ;;  %19261 = vmatprep.subr.bf16.mxu0 %v20967_v4  ;;  %s27365_s16 = smov (!%p188_p3, %s16886_s16), 1  ;;  %v20971_v8 = vld [vmem:[%s26996_s1 + $0x98] sm:$0xff]  }
  0x12   : > { %215 = vst.msk [vmem:[#allocation2 + $0x30] sm:$0xf] %vm201_vm0, %v21314_v3  ;;  %216 = vst.msk [vmem:[#allocation2 + $0x34] sm:$0xf] %vm201_vm0, %v21314_v3  ;;  %vm289_vm2 = vsmask.f32 256 }
  0x13   : > { %218 = vst.msk [vmem:[#allocation2 + $0x3c] sm:$0xf] %vm201_vm0, %v21314_v3  ;;  %219 = vst.msk [vmem:[#allocation2 + $0x40] sm:$0xf] %vm201_vm0, %v21314_v3  ;;  %19102 = vmatpush3.bf16.msra.mxu1 %v21357_v2  ;;  %vm786_vm3 = vsmask.f32 3328 }
  0x14   : > { %221 = vst.msk [vmem:[#allocation2 + $0x48] sm:$0xf] %vm201_vm0, %v21314_v3  ;;  %222 = vst.msk [vmem:[#allocation2 + $0x4c] sm:$0xf] %vm201_vm0, %v21314_v3  ;;  %19262 = vmatpush3.bf16.msra.mxu0 %v20967_v4  ;;  %19103 = vmatprep.subr.bf16.mxu1 %v20968_v5  ;;  %vm787_vm4 = vsmask.f32 7440 }
  0x15   : > { %224 = vst.msk [vmem:[#allocation2 + $0x54] sm:$0xf] %vm201_vm0, %v21314_v3  ;;  %225 = vst.msk [vmem:[#allocation2 + $0x58] sm:$0xf] %vm201_vm0, %v21314_v3  ;;  %19263 = vmatprep.subr.bf16.mxu0 %v20969_v6  ;;  %v730_v9 = vld [vmem:[#allocation2] sm:$0xf] }
  0x16   : > { %227 = vst.msk [vmem:[#allocation2 + $0x60] sm:$0xf] %vm201_vm0, %v21314_v3  ;;  %228 = vst.msk [vmem:[#allocation2 + $0x64] sm:$0xf] %vm201_vm0, %v21314_v3  ;;  %v731_v10 = vld [vmem:[#allocation2 + $0x4] sm:$0xf] }
  0x17   : > { %230 = vst.msk [vmem:[#allocation2 + $0x6c] sm:$0xf] %vm201_vm0, %v21314_v3  ;;  %231 = vst.msk [vmem:[#allocation2 + $0x70] sm:$0xf] %vm201_vm0, %v21314_v3  ;;  %s18303_s7 = sshll.u32 %s27365_s16, 7  ;;  %v790_v12 = vshrl.u32 %v730_v9, 16  ;;  %19104 = vmatpush3.bf16.msra.mxu1 %v20968_v5 }
  0x18   : > { %233 = vst.msk [vmem:[#allocation2 + $0x78] sm:$0xf] %vm201_vm0, %v21314_v3  ;;  %234 = vst.msk [vmem:[#allocation2 + $0x7c] sm:$0xf] %vm201_vm0, %v21314_v3  ;;  %v793_v13 = vshll.u32 %v730_v9, 16  ;;  %v799_v14 = vshll.u32 %v731_v10, 16  ;;  %s21442_s10 = scalar_lea.vmem %s26995_s0, %s18303_s7  ;;  %19264 = vmatpush3.bf16.msra.mxu0 %v20969_v6  ;;  %19105 = vmatprep.subr.bf16.mxu1 %v20970_v7  ;;  %s26869_s23 = scalar_lea.vmem %s26999_s4, %s18303_s7 }
  0x19   : > { %236 = vst.msk [vmem:[#allocation2 + $0x84] sm:$0xf] %vm201_vm0, %v21314_v3  ;;  %237 = vst.msk [vmem:[#allocation2 + $0x88] sm:$0xf] %vm201_vm0, %v21314_v3  ;;  %v803_v15 = vshrl.u32 %v731_v10, 16  ;;  %v792_v19 = vrot.slane %v790_v12, 4  ;;  %19265 = vmatprep.subr.bf16.mxu0 %v20971_v8 }
  0x1a   : > { %239 = vst.msk [vmem:[#allocation2 + $0x90] sm:$0xf] %vm201_vm0, %v21314_v3  ;;  %240 = vst.msk [vmem:[#allocation2 + $0x94] sm:$0xf] %vm201_vm0, %v21314_v3  ;;  %v257_v17 = vld [vmem:[%s21442_s10] sm:$0xf] }
  0x1b   : > { %242 = vst.msk [vmem:[#allocation2 + $0x9c] sm:$0xf] %vm201_vm0, %v21314_v3  ;;  %243 = vst.msk [vmem:[#allocation2 + $0xa0] sm:$0xf] %vm201_vm0, %v21314_v3  ;;  %v258_v18 = vld [vmem:[%s21442_s10 + $0x4] sm:$0xf]  ;;  %19106 = vmatpush3.bf16.msra.mxu1 %v20970_v7 }
  0x1c   : > { %245 = vst.msk [vmem:[#allocation2 + $0xa8] sm:$0xf] %vm201_vm0, %v21314_v3  ;;  %246 = vst.msk [vmem:[#allocation2 + $0xac] sm:$0xf] %vm201_vm0, %v21314_v3  ;;  %v795_v20 = vrot.slane %v793_v13, 5  ;;  %v801_v21 = vrot.slane %v799_v14, 5  ;;  %19266 = vmatpush3.bf16.msra.mxu0 %v20971_v8  ;;  %19139 = vmatprep.subr.bf16.mxu1 %v21449_v26 }
  0x1d   : > { %248 = vst.msk [vmem:[#allocation2 + $0xb4] sm:$0xf] %vm201_vm0, %v21314_v3  ;;  %249 = vst.msk [vmem:[#allocation2 + $0xb8] sm:$0xf] %vm201_vm0, %v21314_v3  ;;  %v805_v22 = vrot.slane %v803_v15, 4  ;;  %v293_v24 = vshrl.u32 %v257_v17, 16 }
  0x1e   : > { %251 = vst.msk [vmem:[#allocation2 + $0xc0] sm:$0xf] %vm201_vm0, %v21314_v3  ;;  %252 = vst.msk [vmem:[#allocation2 + $0xc4] sm:$0xf] %vm201_vm0, %v21314_v3  ;;  %vm290_vm5 = vsmask.f32 4368  ;;  %v796_v28 = vor.u32 %v795_v20, %v792_v19 }
  0x1f   : > { %254 = vst.msk [vmem:[#allocation2 + $0xcc] sm:$0xf] %vm201_vm0, %v21314_v3  ;;  %255 = vst.msk [vmem:[#allocation2 + $0xd0] sm:$0xf] %vm201_vm0, %v21314_v3  ;;  %v296_v25 = vshll.u32 %v257_v17, 16  ;;  %v27099_v27 = vmov 0  ;;  %v806_v29 = vor.u32 %v805_v22, %v801_v21 }
  0x20   : > { %205 = vst.msk [vmem:[#allocation2 + $0x8] sm:$0x1] %vm204_vm1, %v21314_v3  ;;  %208 = vst.msk [vmem:[#allocation2 + $0x14] sm:$0x1] %vm204_vm1, %v21314_v3  ;;  %v301_v30 = vshrl.u32 %v258_v18, 16  ;;  %v304_v31 = vshll.u32 %v258_v18, 16 }
  0x21   : > { %211 = vst.msk [vmem:[#allocation2 + $0x20] sm:$0x1] %vm204_vm1, %v21314_v3  ;;  %214 = vst.msk [vmem:[#allocation2 + $0x2c] sm:$0x1] %vm204_vm1, %v21314_v3  ;;  %v616_v32 = vld [vmem:[#allocation2 + $0xc] sm:$0xf] }
  0x22   : > { %217 = vst.msk [vmem:[#allocation2 + $0x38] sm:$0x1] %vm204_vm1, %v21314_v3  ;;  %220 = vst.msk [vmem:[#allocation2 + $0x44] sm:$0x1] %vm204_vm1, %v21314_v3  ;;  %v295_v34 = vrot.slane %v293_v24, 7  ;;  %v21466_v36 = vld [vmem:[%s26996_s1 + $0xa0] sm:$0xff]  }
  0x23   : > { %223 = vst.msk [vmem:[#allocation2 + $0x50] sm:$0x1] %vm204_vm1, %v21314_v3  ;;  %226 = vst.msk [vmem:[#allocation2 + $0x5c] sm:$0x1] %vm204_vm1, %v21314_v3  ;;  %vm614_vm8 = vsmask.f32 7938  ;;  %19299 = vmatprep.subr.bf16.mxu0 %v21466_v36 }
  0x24   : > { %229 = vst.msk [vmem:[#allocation2 + $0x68] sm:$0x1] %vm204_vm1, %v21314_v3  ;;  %232 = vst.msk [vmem:[#allocation2 + $0x74] sm:$0x1] %vm204_vm1, %v21314_v3  ;;  %v797_v37 = vrot.slane %v796_v28, 4  ;;  %v807_v38 = vrot.slane %v806_v29, 4  ;;  %v298_v42 = vor.u32 %v296_v25, %v295_v34 }
  0x25   : > { %235 = vst.msk [vmem:[#allocation2 + $0x80] sm:$0x1] %vm204_vm1, %v21314_v3  ;;  %238 = vst.msk [vmem:[#allocation2 + $0x8c] sm:$0x1] %vm204_vm1, %v21314_v3  ;;  %v303_v39 = vrot.slane %v301_v30, 7  ;;  %v27104_v40 = vmov 0 }
  0x26   : > { %241 = vst.msk [vmem:[#allocation2 + $0x98] sm:$0x1] %vm204_vm1, %v21314_v3  ;;  %244 = vst.msk [vmem:[#allocation2 + $0xa4] sm:$0x1] %vm204_vm1, %v21314_v3  ;;  %vm1254_vm10 = vcmask 523264   ;;  %v27107_v41 = vmov 0 }
  0x27   : > { %247 = vst.msk [vmem:[#allocation2 + $0xb0] sm:$0x1] %vm204_vm1, %v21314_v3  ;;  %250 = vst.msk [vmem:[#allocation2 + $0xbc] sm:$0x1] %vm204_vm1, %v21314_v3  ;;  %v770_v11 = vld [vmem:[#allocation2 + $0x8] sm:$0x1]  ;;  %v306_v47 = vor.u32 %v304_v31, %v303_v39 }
  0x28   : > { %253 = vst.msk [vmem:[#allocation2 + $0xc8] sm:$0x1] %vm204_vm1, %v21314_v3  ;;  %256 = vst.msk [vmem:[#allocation2 + $0xd4] sm:$0x1] %vm204_vm1, %v21314_v3  ;;  %v809_v16 = vshll.u32 %v770_v11, 16  ;;  %v299_v43 = vrot.slane %v295_v34, 4 }
  0x29   : > { %vm21453_vm6 = vmand %vm204_vm1, %vm289_vm2  ;;  %v622_v35 = vld [vmem:[#allocation2 + $0x14] sm:$0x1]  ;;  %v259_v44 = vld [vmem:[%s21442_s10 + $0x8] sm:$0xf]  ;;  %v308_v48 = vrot.slane %v303_v39, 4  ;;  %vm1825_vm12 = vcmask 1042432  }
  0x2a   : > { %v811_v23 = vrot.slane %v809_v16, 5  ;;  %v27100_v27 = vsel %vm21453_vm6, 4294967295, %v27099_v27  ;;  %vm21459_vm7 = vmor %vm786_vm3, %vm787_vm4  ;;  %v260_v49 = vld [vmem:[%s21442_s10 + $0xc] sm:$0xf]  ;;  %v310_v52 = vshrl.u32 %v259_v44, 16  ;;  %v313_v53 = vshll.u32 %v259_v44, 16 }
  0x2b   : > { %27101 = vst [vmem:[#allocation3_spill] sm:$0xff] %v27100_v27  ;;  %vm21469_vm9 = vmand %vm201_vm0, %vm614_vm8  ;;  %v802_v45 = vsel %vm21459_vm7, %v797_v37, %v801_v21  ;;  %v261_v54 = vld [vmem:[%s21442_s10 + $0x10] sm:$0xf]  ;;  %v623_v56 = vsel %vm21453_vm6, %v308_v48, %v622_v35  ;;  %v318_v57 = vshrl.u32 %v260_v49, 16  ;;  %v321_v58 = vshll.u32 %v260_v49, 16 }
  0x2c   : > { %v27105_v40 = vsel %vm21469_vm9, 4294967295, %v27104_v40  ;;  %vm21476_vm11 = vmor %vm289_vm2, %vm290_vm5  ;;  %v812_v46 = vsel %vm21459_vm7, %v807_v38, %v811_v23  ;;  %v617_v51 = vsel %vm21469_vm9, %v298_v42, %v616_v32  ;;  %v625_v59 = vld [vmem:[#allocation2 + $0x18] sm:$0xf]  ;;  %v262_v60 = vld [vmem:[%s21442_s10 + $0x14] sm:$0xf]  ;;  %v312_v61 = vrot.slane %v310_v52, 7 }
  0x2d   : > { %27106 = vst [vmem:[#allocation4_spill] sm:$0xff] %v27105_v40  ;;  %v27108_v41 = vsel %vm21476_vm11, 4294967295, %v27107_v41  ;;  %v16903_v50 = vcombine.low %v802_v45, %v812_v46  ;;  %v307_v55 = vsel %vm21476_vm11, %v299_v43, %v306_v47  ;;  %618 = vst [vmem:[#allocation2 + $0xc] sm:$0xf] %v617_v51  ;;  %v629_v62 = vld [vmem:[#allocation2 + $0x20] sm:$0x1] }
  0x2e   : > { %27109 = vst [vmem:[#allocation5_spill] sm:$0xff] %v27108_v41  ;;  %619 = vst.msk [vmem:[#allocation2 + $0x10] sm:$0xf] %vm201_vm0, %v307_v55  ;;  %v327_v63 = vshrl.u32 %v261_v54, 16  ;;  %v330_v0 = vshll.u32 %v261_v54, 16  ;;  %v335_v1 = vshrl.u32 %v262_v60, 16  ;;  %v315_v4 = vor.u32 %v313_v53, %v312_v61 }
  0x2f   : > { %19107 = vmatprep.mubr.msk.bf16.mxu1 %vm1254_vm10, %v16903_v50  ;;  %624 = vst [vmem:[#allocation2 + $0x14] sm:$0x1] %v623_v56  ;;  %v320_v2 = vrot.slane %v318_v57, 7  ;;  %v338_v3 = vshll.u32 %v262_v60, 16  ;;  %v316_v5 = vrot.slane %v312_v61, 4  ;;  %vm1826_vm13 = vcmask 1046532  }
  0x30   : > { %v329_v6 = vrot.slane %v327_v63, 7  ;;  %v337_v7 = vrot.slane %v335_v1, 7  ;;  %v263_v8 = vld [vmem:[%s21442_s10 + $0x18] sm:$0xf]  ;;  %v632_v11 = vld [vmem:[#allocation2 + $0x24] sm:$0xf]  ;;  %v626_v14 = vsel %vm21469_vm9, %v315_v4, %v625_v59  ;;  %vm21739_vm14 = vmor %vm1825_vm12, %vm1826_vm13 }
  0x31   : > { %v323_v9 = vor.u32 %v321_v58, %v320_v2  ;;  %v325_v10 = vrot.slane %v320_v2, 4  ;;  %v344_v12 = vshrl.u32 %v263_v8, 16  ;;  %v347_v13 = vshll.u32 %v263_v8, 16  ;;  %v636_v18 = vld [vmem:[#allocation2 + $0x2c] sm:$0x1] }
  0x32   : > { %v332_v15 = vor.u32 %v330_v0, %v329_v6  ;;  %v333_v16 = vrot.slane %v329_v6, 4  ;;  %v340_v17 = vor.u32 %v338_v3, %v337_v7  ;;  %627 = vst [vmem:[#allocation2 + $0x18] sm:$0xf] %v626_v14  ;;  %v342_v21 = vrot.slane %v337_v7, 4  ;;  %v639_v35 = vld [vmem:[#allocation2 + $0x30] sm:$0xf] }
  0x33   : > { %v324_v19 = vsel %vm21476_vm11, %v316_v5, %v323_v9  ;;  %v630_v20 = vsel %vm21453_vm6, %v325_v10, %v629_v62  ;;  %v21504_v22 = vrot.slane %v344_v12, 7  ;;  %v21521_v53 = vld [vmem:[%s21442_s10 + $0x1c] sm:$0xf] }
  0x34   : > { %v732_v23 = vld [vmem:[#allocation2 + $0xc] sm:$0xf]  ;;  %628 = vst.msk [vmem:[#allocation2 + $0x1c] sm:$0xf] %vm201_vm0, %v324_v19  ;;  %631 = vst [vmem:[#allocation2 + $0x20] sm:$0x1] %v630_v20  ;;  %v341_v25 = vsel %vm21476_vm11, %v333_v16, %v340_v17  ;;  %v633_v28 = vsel %vm21469_vm9, %v332_v15, %v632_v11  ;;  %v637_v34 = vsel %vm21453_vm6, %v342_v21, %v636_v18 }
  0x35   : > { %v2648_v24 = vld [vmem:[#allocation2 + $0xc] sm:$0xf]  ;;  %v733_v29 = vld [vmem:[#allocation2 + $0x10] sm:$0xf]  ;;  %v814_v31 = vshrl.u32 %v732_v23, 16  ;;  %v817_v32 = vshll.u32 %v732_v23, 16  ;;  %v349_v43 = vor.u32 %v347_v13, %v21504_v22 }
  0x36   : > { %v771_v30 = vld [vmem:[#allocation2 + $0x14] sm:$0x1]  ;;  %634 = vst [vmem:[#allocation2 + $0x24] sm:$0xf] %v633_v28  ;;  %635 = vst.msk [vmem:[#allocation2 + $0x28] sm:$0xf] %vm201_vm0, %v341_v25 }
  0x37   : > { %v823_v37 = vshll.u32 %v733_v29, 16  ;;  %v827_v38 = vshrl.u32 %v733_v29, 16  ;;  %v833_v39 = vshll.u32 %v771_v30, 16  ;;  %v21514_v42 = vld [vmem:[#allocation2 + $0x10] sm:$0xf]  ;;  %v816_v44 = vrot.slane %v814_v31, 4 }
  0x38   : > { %638 = vst [vmem:[#allocation2 + $0x2c] sm:$0x1] %v637_v34  ;;  %v819_v45 = vrot.slane %v817_v32, 5  ;;  %v21517_v46 = vld [vmem:[#allocation2 + $0x14] sm:$0x1]  ;;  %v2697_v47 = vshrl.u32 %v2648_v24, 16  ;;  %v640_v62 = vsel %vm21469_vm9, %v349_v43, %v639_v35 }
  0x39   : > { %v2700_v48 = vshll.u32 %v2648_v24, 16  ;;  %v825_v49 = vrot.slane %v823_v37, 5  ;;  %v829_v50 = vrot.slane %v827_v38, 4  ;;  %v835_v51 = vrot.slane %v833_v39, 5  ;;  %v2651_v61 = vld [vmem:[#allocation2 + $0x18] sm:$0xf] }
  0x3a   : > { %v2706_v52 = vshll.u32 %v21514_v42, 16  ;;  %v820_v54 = vor.u32 %v819_v45, %v816_v44  ;;  %v2699_v55 = vrot.slane %v2697_v47, 4  ;;  %v2710_v57 = vshrl.u32 %v21514_v42, 16  ;;  %641 = vst [vmem:[#allocation2 + $0x30] sm:$0xf] %v640_v62  ;;  %v20975_v24 = vld [vmem:[%s26996_s1 + $0x8] sm:$0xff]  }
  0x3b   : > { %v2702_v56 = vrot.slane %v2700_v48, 5  ;;  %v830_v58 = vor.u32 %v829_v50, %v825_v49  ;;  %v2716_v60 = vshll.u32 %v21517_v46, 16  ;;  %v21527_v2 = vld [vmem:[#allocation2 + $0x1c] sm:$0xf]  ;;  %v352_v3 = vshrl.u32 %v21521_v53, 16  ;;  %v20978_v48 = vld [vmem:[%s26996_s1 + $0x10] sm:$0xff]  }
  0x3c   : > { %v2708_v59 = vrot.slane %v2706_v52, 5  ;;  %v821_v63 = vrot.slane %v820_v54, 4  ;;  %v2712_v1 = vrot.slane %v2710_v57, 4  ;;  %v2721_v6 = vshrl.u32 %v2651_v61, 16  ;;  %v21532_v11 = vld [vmem:[#allocation2 + $0x20] sm:$0x1] }
  0x3d   : > { %v2703_v0 = vor.u32 %v2702_v56, %v2699_v55  ;;  %v831_v4 = vrot.slane %v830_v58, 4  ;;  %v2718_v5 = vrot.slane %v2716_v60, 5  ;;  %v2724_v7 = vshll.u32 %v2651_v61, 16  ;;  %v734_v13 = vld [vmem:[#allocation2 + $0x18] sm:$0xf] }
  0x3e   : > { %v826_v8 = vsel %vm21459_vm7, %v821_v63, %v825_v49  ;;  %v2713_v10 = vor.u32 %v2712_v1, %v2708_v59  ;;  %v2730_v12 = vshll.u32 %v21527_v2, 16  ;;  %v2723_v15 = vrot.slane %v2721_v6, 4  ;;  %v735_v18 = vld [vmem:[#allocation2 + $0x1c] sm:$0xf]  ;;  %v772_v30 = vld [vmem:[#allocation2 + $0x20] sm:$0x1] }
  0x3f   : > { %v2704_v9 = vrot.slane %v2703_v0, 4  ;;  %v836_v14 = vsel %vm21459_vm7, %v831_v4, %v835_v51  ;;  %v2726_v16 = vrot.slane %v2724_v7, 5  ;;  %v2734_v17 = vshrl.u32 %v21527_v2, 16  ;;  %v736_v38 = vld [vmem:[#allocation2 + $0x24] sm:$0xf] }
  0x40   : > { %v16904_v19 = vcombine.low %v826_v8, %v836_v14  ;;  %v2714_v21 = vrot.slane %v2713_v10, 4  ;;  %v2732_v23 = vrot.slane %v2730_v12, 5  ;;  %v2740_v29 = vshll.u32 %v21532_v11, 16  ;;  %v737_v47 = vld [vmem:[#allocation2 + $0x28] sm:$0xf]  ;;  %v20980_v12 = vld [vmem:[%s26996_s1 + $0x18] sm:$0xff]  }
  0x41   : > { %v2709_v20 = vsel %vm21459_vm7, %v2704_v9, %v2708_v59  ;;  %v2727_v25 = vor.u32 %v2726_v16, %v2723_v15  ;;  %v2736_v28 = vrot.slane %v2734_v17, 4  ;;  %v355_v31 = vshll.u32 %v21521_v53, 16  ;;  %v773_v54 = vld [vmem:[#allocation2 + $0x2c] sm:$0x1]  ;;  %v2654_v55 = vld [vmem:[#allocation2 + $0x24] sm:$0xf] }
  0x42   : > { %19108 = vmatmul.mubr.msk.bf16.vlgmr.msra.gmra.mrb[0].mxu1 %vm1254_vm10, %v16904_v19  ;;  %v2719_v32 = vsel %vm21459_vm7, %v2714_v21, %v2718_v5  ;;  %v838_v34 = vshrl.u32 %v734_v13, 16  ;;  %v841_v35 = vshll.u32 %v734_v13, 16  ;;  %v847_v37 = vshll.u32 %v735_v18, 16  ;;  %v21557_v9 = vld [vmem:[#allocation2 + $0x28] sm:$0xf] }
  0x43   : > { %v17087_v39 = vcombine.low %v2709_v20, %v2719_v32  ;;  %19140 = vmatpush3.bf16.msra.mxu1 %v21449_v26  ;;  %v2728_v43 = vrot.slane %v2727_v25, 4  ;;  %v2737_v44 = vor.u32 %v2736_v28, %v2732_v23  ;;  %v2742_v45 = vrot.slane %v2740_v29, 5  ;;  %v20974_v10 = vld [vmem:[%s26996_s1 + $0xa8] sm:$0xff]  }
  0x44   : > { %v840_v49 = vrot.slane %v838_v34, 4  ;;  %v843_v50 = vrot.slane %v841_v35, 5  ;;  %v849_v51 = vrot.slane %v847_v37, 5  ;;  %v851_v52 = vshrl.u32 %v735_v18, 16  ;;  %19141 = vmatprep.subr.bf16.mxu1 %v20975_v24  ;;  %v21568_v20 = vld [vmem:[#allocation2 + $0x2c] sm:$0x1] }
  0x45   : > { %19267 = vmatprep.mubr.msk.bf16.mxu0 %vm1254_vm10, %v17087_v39  ;;  %v2733_v26 = vsel %vm21459_vm7, %v2728_v43, %v2732_v23  ;;  %v2738_v56 = vrot.slane %v2737_v44, 4  ;;  %v857_v57 = vshll.u32 %v772_v30, 16  ;;  %v862_v58 = vshrl.u32 %v736_v38, 16  ;;  %v2657_v35 = vld [vmem:[#allocation2 + $0x30] sm:$0xf] }
  0x46   : > { %v844_v59 = vor.u32 %v843_v50, %v840_v49  ;;  %v853_v60 = vrot.slane %v851_v52, 4  ;;  %v865_v61 = vshll.u32 %v736_v38, 16  ;;  %v871_v62 = vshll.u32 %v737_v47, 16  ;;  %v20976_v37 = vld [vmem:[%s26996_s1 + $0xb0] sm:$0xff]  }
  0x47   : > { %v2743_v63 = vsel %vm21459_vm7, %v2738_v56, %v2742_v45  ;;  %v859_v0 = vrot.slane %v857_v57, 5  ;;  %v864_v1 = vrot.slane %v862_v58, 4  ;;  %v875_v4 = vshrl.u32 %v737_v47, 16  ;;  %19142 = vmatpush3.bf16.msra.mxu1 %v20975_v24  ;;  %v738_v44 = vld [vmem:[#allocation2 + $0x30] sm:$0xf] }
  0x48   : > { %v17088_v5 = vcombine.low %v2733_v26, %v2743_v63  ;;  %v845_v6 = vrot.slane %v844_v59, 4  ;;  %v854_v7 = vor.u32 %v853_v60, %v849_v51  ;;  %v867_v8 = vrot.slane %v865_v61, 5  ;;  %19143 = vmatprep.subr.bf16.mxu1 %v20978_v48  ;;  %v265_v59 = vld [vmem:[%s21442_s10 + $0x20] sm:$0xf] }
  0x49   : > { %v873_v13 = vrot.slane %v871_v62, 5  ;;  %v877_v14 = vrot.slane %v875_v4, 4  ;;  %v881_v15 = vshll.u32 %v773_v54, 16  ;;  %v2745_v16 = vshrl.u32 %v2654_v55, 16 }
  0x4a   : > { %19268 = vmatmul.mubr.msk.bf16.vlgmr.msra.gmra.mrb[0].mxu0 %vm1254_vm10, %v17088_v5  ;;  %v850_v17 = vsel %vm21459_vm7, %v845_v6, %v849_v51  ;;  %v855_v18 = vrot.slane %v854_v7, 4  ;;  %v868_v19 = vor.u32 %v867_v8, %v864_v1  ;;  %v2748_v21 = vshll.u32 %v2654_v55, 16  ;;  %v20977_v55 = vld [vmem:[%s26996_s1 + $0xb8] sm:$0xff]   ;;  %v266_v5 = vld [vmem:[%s21442_s10 + $0x24] sm:$0xf] }
  0x4b   : > { %19300 = vmatpush3.bf16.msra.mxu0 %v21466_v36  ;;  %v878_v23 = vor.u32 %v877_v14, %v873_v13  ;;  %v883_v24 = vrot.slane %v881_v15, 5  ;;  %v2747_v25 = vrot.slane %v2745_v16, 4  ;;  %v2754_v28 = vshll.u32 %v21557_v9, 16  ;;  %19144 = vmatpush3.bf16.msra.mxu1 %v20978_v48  ;;  %v267_v7 = vld [vmem:[%s21442_s10 + $0x28] sm:$0xf]  ;;  %v21612_v16 = vld [vmem:[%s26996_s1 + $0xc0] sm:$0xff]  }
  0x4c   : > { %v860_v29 = vsel %vm21459_vm7, %v855_v18, %v859_v0  ;;  %v869_v30 = vrot.slane %v868_v19, 4  ;;  %v2750_v32 = vrot.slane %v2748_v21, 5  ;;  %v2758_v34 = vshrl.u32 %v21557_v9, 16  ;;  %19301 = vmatprep.subr.bf16.mxu0 %v20974_v10  ;;  %19145 = vmatprep.subr.bf16.mxu1 %v20980_v12  ;;  %v268_v8 = vld [vmem:[%s21442_s10 + $0x2c] sm:$0xf] }
  0x4d   : > { %v16905_v36 = vcombine.low %v850_v17, %v860_v29  ;;  %v879_v38 = vrot.slane %v878_v23, 4  ;;  %v2756_v39 = vrot.slane %v2754_v28, 5  ;;  %v2764_v43 = vshll.u32 %v21568_v20, 16  ;;  %v646_v14 = vld [vmem:[#allocation2 + $0x3c] sm:$0xf] }
  0x4e   : > { %v874_v45 = vsel %vm21459_vm7, %v869_v30, %v873_v13  ;;  %v2751_v47 = vor.u32 %v2750_v32, %v2747_v25  ;;  %v2760_v48 = vrot.slane %v2758_v34, 4  ;;  %v350_v49 = vrot.slane %v21504_v22, 4  ;;  %v643_v22 = vld [vmem:[#allocation2 + $0x38] sm:$0x1]  ;;  %v21607_v15 = vld [vmem:[%s21442_s10 + $0x30] sm:$0xf] }
  0x4f   : > { %19111 = vmatprep.mubr.msk.bf16.mxu1 %vm1254_vm10, %v16905_v36  ;;  %v884_v50 = vsel %vm21459_vm7, %v879_v38, %v883_v24  ;;  %v2766_v51 = vrot.slane %v2764_v43, 5  ;;  %v354_v52 = vrot.slane %v352_v3, 7  ;;  %v2769_v54 = vshrl.u32 %v2657_v35, 16  ;;  %19302 = vmatpush3.bf16.msra.mxu0 %v20974_v10  ;;  %v650_v25 = vld [vmem:[#allocation2 + $0x44] sm:$0x1] }
  0x50   : > { %v16906_v26 = vcombine.low %v874_v45, %v884_v50  ;;  %v2752_v56 = vrot.slane %v2751_v47, 4  ;;  %v2761_v57 = vor.u32 %v2760_v48, %v2756_v39  ;;  %v2772_v58 = vshll.u32 %v2657_v35, 16  ;;  %19303 = vmatprep.subr.bf16.mxu0 %v20976_v37  ;;  %19146 = vmatpush3.bf16.msra.mxu1 %v20980_v12  ;;  %v653_v50 = vld [vmem:[#allocation2 + $0x48] sm:$0xf] }
  0x51   : > { %v357_v3 = vor.u32 %v355_v31, %v354_v52  ;;  %v359_v60 = vrot.slane %v354_v52, 4  ;;  %v2771_v61 = vrot.slane %v2769_v54, 4  ;;  %v886_v62 = vshrl.u32 %v738_v44, 16 }
  0x52   : > { %19112 = vmatmul.mubr.msk.bf16.gmra.mrb[4].mxu1 %vm1254_vm10, %v16906_v26  ;;  %v2757_v63 = vsel %vm21459_vm7, %v2752_v56, %v2756_v39  ;;  %v2762_v0 = vrot.slane %v2761_v57, 4  ;;  %v2774_v1 = vrot.slane %v2772_v58, 5  ;;  %v889_v4 = vshll.u32 %v738_v44, 16 }
  0x53   : > { %v358_v6 = vsel %vm21476_vm11, %v350_v49, %v357_v3  ;;  %v644_v53 = vsel %vm21453_vm6, %v359_v60, %v643_v22  ;;  %v361_v31 = vshrl.u32 %v265_v59, 16  ;;  %19304 = vmatpush3.bf16.msra.mxu0 %v20976_v37  ;;  %v364_v13 = vshll.u32 %v265_v59, 16 }
  0x54   : > { %v2767_v10 = vsel %vm21459_vm7, %v2762_v0, %v2766_v51  ;;  %642 = vst.msk [vmem:[#allocation2 + $0x34] sm:$0xf] %vm201_vm0, %v358_v6  ;;  %645 = vst [vmem:[#allocation2 + $0x38] sm:$0x1] %v644_v53  ;;  %v2775_v12 = vor.u32 %v2774_v1, %v2771_v61  ;;  %19305 = vmatprep.subr.bf16.mxu0 %v20977_v55  ;;  %v369_v19 = vshrl.u32 %v266_v5, 16  ;;  %v372_v21 = vshll.u32 %v266_v5, 16 }
  0x55   : > { %v17089_v17 = vcombine.low %v2757_v63, %v2767_v10  ;;  %v363_v18 = vrot.slane %v361_v31, 7  ;;  %v888_v23 = vrot.slane %v886_v62, 4  ;;  %v891_v24 = vrot.slane %v889_v4, 5  ;;  %v657_v51 = vld [vmem:[#allocation2 + $0x50] sm:$0x1] }
  0x56   : > { %v378_v28 = vshrl.u32 %v267_v7, 16  ;;  %v381_v29 = vshll.u32 %v267_v7, 16  ;;  %v371_v34 = vrot.slane %v369_v19, 7  ;;  %v386_v35 = vshrl.u32 %v268_v8, 16  ;;  %v21640_v7 = vld [vmem:[%s21442_s10 + $0x34] sm:$0xf] }
  0x57   : > { %19271 = vmatprep.mubr.msk.bf16.mxu0 %vm1254_vm10, %v17089_v17  ;;  %v366_v30 = vor.u32 %v364_v13, %v363_v18  ;;  %v367_v32 = vrot.slane %v363_v18, 4  ;;  %19306 = vmatpush3.bf16.msra.mxu0 %v20977_v55  ;;  %v21615_v37 = vrot.slane %v2775_v12, 4  ;;  %v389_v38 = vshll.u32 %v268_v8, 16  ;;  %v660_v19 = vld [vmem:[#allocation2 + $0x54] sm:$0xf] }
  0x58   : > { %v380_v36 = vrot.slane %v378_v28, 7  ;;  %v395_v39 = vshrl.u32 %v21607_v15, 16  ;;  %19339 = vmatprep.subr.bf16.mxu0 %v21612_v16  ;;  %v374_v43 = vor.u32 %v372_v21, %v371_v34  ;;  %v376_v44 = vrot.slane %v371_v34, 4 }
  0x59   : > { %v647_v45 = vsel %vm21469_vm9, %v366_v30, %v646_v14  ;;  %v388_v47 = vrot.slane %v386_v35, 7  ;;  %v892_v48 = vor.u32 %v891_v24, %v888_v23  ;;  %v398_v54 = vshll.u32 %v21607_v15, 16 }
  0x5a   : > { %648 = vst [vmem:[#allocation2 + $0x3c] sm:$0xf] %v647_v45  ;;  %v384_v49 = vrot.slane %v380_v36, 4  ;;  %v21621_v52 = vrot.slane %v395_v39, 7  ;;  %v375_v57 = vsel %vm21476_vm11, %v367_v32, %v374_v43  ;;  %v651_v22 = vsel %vm21453_vm6, %v376_v44, %v650_v25 }
  0x5b   : > { %v21624_v55 = vld [vmem:[#allocation2 + $0x34] sm:$0xf]  ;;  %v21626_v26 = vld [vmem:[#allocation2 + $0x38] sm:$0x1]  ;;  %v383_v58 = vor.u32 %v381_v29, %v380_v36  ;;  %v391_v59 = vor.u32 %v389_v38, %v388_v47  ;;  %649 = vst.msk [vmem:[#allocation2 + $0x40] sm:$0xf] %vm201_vm0, %v375_v57 }
  0x5c   : > { %v739_v56 = vld [vmem:[#allocation2 + $0x34] sm:$0xf]  ;;  %v2778_v3 = vshll.u32 %v21624_v55, 16  ;;  %v2782_v60 = vshrl.u32 %v21624_v55, 16  ;;  %v2788_v61 = vshll.u32 %v21626_v26, 16  ;;  %v393_v5 = vrot.slane %v388_v47, 4 }
  0x5d   : > { %v774_v62 = vld [vmem:[#allocation2 + $0x38] sm:$0x1]  ;;  %v895_v63 = vshll.u32 %v739_v56, 16  ;;  %652 = vst [vmem:[#allocation2 + $0x44] sm:$0x1] %v651_v22  ;;  %v899_v0 = vshrl.u32 %v739_v56, 16  ;;  %v392_v4 = vsel %vm21476_vm11, %v384_v49, %v391_v59  ;;  %v654_v12 = vsel %vm21469_vm9, %v383_v58, %v653_v50 }
  0x5e   : > { %v905_v1 = vshll.u32 %v774_v62, 16  ;;  %v2780_v6 = vrot.slane %v2778_v3, 5  ;;  %v2784_v53 = vrot.slane %v2782_v60, 4  ;;  %656 = vst.msk [vmem:[#allocation2 + $0x4c] sm:$0xf] %vm201_vm0, %v392_v4  ;;  %v893_v8 = vrot.slane %v892_v48, 4 }
  0x5f   : > { %v897_v31 = vrot.slane %v895_v63, 5  ;;  %v901_v10 = vrot.slane %v899_v0, 4  ;;  %v658_v13 = vsel %vm21453_vm6, %v393_v5, %v657_v51  ;;  %v2790_v15 = vrot.slane %v2788_v61, 5  ;;  %655 = vst [vmem:[#allocation2 + $0x48] sm:$0xf] %v654_v12  ;;  %v20982_v51 = vld [vmem:[%s26996_s1 + $0x40] sm:$0xff]  }
  0x60   : > { %v2785_v14 = vor.u32 %v2784_v53, %v2780_v6  ;;  %v907_v17 = vrot.slane %v905_v1, 5  ;;  %659 = vst [vmem:[#allocation2 + $0x50] sm:$0x1] %v658_v13  ;;  %v400_v18 = vor.u32 %v398_v54, %v21621_v52  ;;  %v2781_v21 = vsel %vm21459_vm7, %v21615_v37, %v2780_v6  ;;  %19179 = vmatprep.subr.bf16.mxu1 %v20982_v51 }
  0x61   : > { %v902_v23 = vor.u32 %v901_v10, %v897_v31  ;;  %v740_v24 = vld [vmem:[#allocation2 + $0x3c] sm:$0xf]  ;;  %v401_v28 = vrot.slane %v21621_v52, 4  ;;  %v403_v29 = vshrl.u32 %v21640_v7, 16  ;;  %v898_v36 = vsel %vm21459_vm7, %v893_v8, %v897_v31 }
  0x62   : > { %v2660_v25 = vld [vmem:[#allocation2 + $0x3c] sm:$0xf]  ;;  %v2786_v30 = vrot.slane %v2785_v14, 4  ;;  %v910_v32 = vshrl.u32 %v740_v24, 16  ;;  %v913_v34 = vshll.u32 %v740_v24, 16  ;;  %v661_v37 = vsel %vm21469_vm9, %v400_v18, %v660_v19 }
  0x63   : > { %v2793_v35 = vshrl.u32 %v2660_v25, 16  ;;  %v903_v38 = vrot.slane %v902_v23, 4  ;;  %v741_v39 = vld [vmem:[#allocation2 + $0x40] sm:$0xf]  ;;  %v2796_v44 = vshll.u32 %v2660_v25, 16 }
  0x64   : > { %v775_v43 = vld [vmem:[#allocation2 + $0x44] sm:$0x1]  ;;  %v2791_v45 = vsel %vm21459_vm7, %v2786_v30, %v2790_v15  ;;  %v912_v47 = vrot.slane %v910_v32, 4  ;;  %v915_v48 = vrot.slane %v913_v34, 5  ;;  %v919_v49 = vshll.u32 %v741_v39, 16 }
  0x65   : > { %v21658_v50 = vld [vmem:[#allocation2 + $0x40] sm:$0xf]  ;;  %662 = vst [vmem:[#allocation2 + $0x54] sm:$0xf] %v661_v37  ;;  %v17090_v54 = vcombine.low %v2781_v21, %v2791_v45  ;;  %v908_v56 = vsel %vm21459_vm7, %v903_v38, %v907_v17  ;;  %v923_v57 = vshrl.u32 %v741_v39, 16  ;;  %v929_v22 = vshll.u32 %v775_v43, 16 }
  0x66   : > { %v21665_v58 = vld [vmem:[#allocation2 + $0x44] sm:$0x1]  ;;  %v16907_v59 = vcombine.low %v898_v36, %v908_v56  ;;  %v916_v3 = vor.u32 %v915_v48, %v912_v47  ;;  %v921_v60 = vrot.slane %v919_v49, 5  ;;  %v2795_v61 = vrot.slane %v2793_v35, 4  ;;  %v2663_v4 = vld [vmem:[#allocation2 + $0x48] sm:$0xf] }
  0x67   : > { %19272 = vmatmul.mubr.msk.bf16.gmra.mrb[4].mxu0 %vm1254_vm10, %v17090_v54  ;;  %v925_v62 = vrot.slane %v923_v57, 4  ;;  %v931_v63 = vrot.slane %v929_v22, 5  ;;  %v2798_v0 = vrot.slane %v2796_v44, 5  ;;  %v2802_v1 = vshll.u32 %v21658_v50, 16  ;;  %v21672_v31 = vld [vmem:[#allocation2 + $0x4c] sm:$0xf] }
  0x68   : > { %19115 = vmatprep.mubr.msk.bf16.mxu1 %vm1254_vm10, %v16907_v59  ;;  %v917_v5 = vrot.slane %v916_v3, 4  ;;  %v2806_v6 = vshrl.u32 %v21658_v50, 16  ;;  %v2812_v53 = vshll.u32 %v21665_v58, 16  ;;  %v2817_v8 = vshrl.u32 %v2663_v4, 16  ;;  %v21674_v14 = vld [vmem:[#allocation2 + $0x50] sm:$0x1] }
  0x69   : > { %v926_v10 = vor.u32 %v925_v62, %v921_v60  ;;  %v2799_v12 = vor.u32 %v2798_v0, %v2795_v61  ;;  %v2804_v13 = vrot.slane %v2802_v1, 5  ;;  %v2820_v15 = vshll.u32 %v2663_v4, 16  ;;  %v742_v17 = vld [vmem:[#allocation2 + $0x48] sm:$0xf]  ;;  %v743_v38 = vld [vmem:[#allocation2 + $0x4c] sm:$0xf] }
  0x6a   : > { %v922_v18 = vsel %vm21459_vm7, %v917_v5, %v921_v60  ;;  %v2808_v19 = vrot.slane %v2806_v6, 4  ;;  %v2814_v21 = vrot.slane %v2812_v53, 5  ;;  %v2819_v23 = vrot.slane %v2817_v8, 4  ;;  %v776_v47 = vld [vmem:[#allocation2 + $0x50] sm:$0x1] }
  0x6b   : > { %v927_v24 = vrot.slane %v926_v10, 4  ;;  %v2800_v25 = vrot.slane %v2799_v12, 4  ;;  %v2822_v30 = vrot.slane %v2820_v15, 5  ;;  %v2826_v32 = vshll.u32 %v21672_v31, 16 }
  0x6c   : > { %v2809_v34 = vor.u32 %v2808_v19, %v2804_v13  ;;  %v2830_v35 = vshrl.u32 %v21672_v31, 16  ;;  %v2836_v36 = vshll.u32 %v21674_v14, 16  ;;  %v934_v39 = vshrl.u32 %v742_v17, 16  ;;  %v2666_v0 = vld [vmem:[#allocation2 + $0x54] sm:$0xf] }
  0x6d   : > { %v932_v43 = vsel %vm21459_vm7, %v927_v24, %v931_v63  ;;  %v2805_v44 = vsel %vm21459_vm7, %v2800_v25, %v2804_v13  ;;  %v2823_v37 = vor.u32 %v2822_v30, %v2819_v23  ;;  %v2828_v45 = vrot.slane %v2826_v32, 5  ;;  %v744_v63 = vld [vmem:[#allocation2 + $0x54] sm:$0xf]  ;;  %v664_v13 = vld [vmem:[#allocation2 + $0x5c] sm:$0x1] }
  0x6e   : > { %v16908_v48 = vcombine.low %v922_v18, %v932_v43  ;;  %v2810_v49 = vrot.slane %v2809_v34, 4  ;;  %v2832_v51 = vrot.slane %v2830_v35, 4  ;;  %v2838_v54 = vrot.slane %v2836_v36, 5  ;;  %v271_v30 = vld [vmem:[%s21442_s10 + $0x38] sm:$0xf] }
  0x6f   : > { %v2824_v56 = vrot.slane %v2823_v37, 4  ;;  %v936_v57 = vrot.slane %v934_v39, 4  ;;  %v937_v22 = vshll.u32 %v742_v17, 16  ;;  %v943_v59 = vshll.u32 %v743_v38, 16 }
  0x70   : > { %19116 = vmatmul.mubr.msk.bf16.gmra.mrb[8].mxu1 %vm1254_vm10, %v16908_v48  ;;  %v2815_v3 = vsel %vm21459_vm7, %v2810_v49, %v2814_v21  ;;  %v2833_v60 = vor.u32 %v2832_v51, %v2828_v45  ;;  %v947_v61 = vshrl.u32 %v743_v38, 16  ;;  %v953_v62 = vshll.u32 %v776_v47, 16  ;;  %v273_v47 = vld [vmem:[%s21442_s10 + $0x40] sm:$0xf] }
  0x71   : > { %v17091_v1 = vcombine.low %v2805_v44, %v2815_v3  ;;  %v2829_v4 = vsel %vm21459_vm7, %v2824_v56, %v2828_v45  ;;  %v939_v5 = vrot.slane %v937_v22, 5  ;;  %v945_v6 = vrot.slane %v943_v59, 5  ;;  %v274_v56 = vld [vmem:[%s21442_s10 + $0x44] sm:$0xf] }
  0x72   : > { %v2834_v53 = vrot.slane %v2833_v60, 4  ;;  %v949_v8 = vrot.slane %v947_v61, 4  ;;  %v955_v10 = vrot.slane %v953_v62, 5  ;;  %v405_v12 = vrot.slane %v403_v29, 7  ;;  %v272_v29 = vld [vmem:[%s21442_s10 + $0x3c] sm:$0xf] }
  0x73   : > { %19275 = vmatprep.mubr.msk.bf16.mxu0 %vm1254_vm10, %v17091_v1  ;;  %v940_v15 = vor.u32 %v939_v5, %v936_v57  ;;  %v406_v17 = vshll.u32 %v21640_v7, 16  ;;  %v958_v18 = vshrl.u32 %v744_v63, 16  ;;  %v961_v19 = vshll.u32 %v744_v63, 16  ;;  %v671_v61 = vld [vmem:[#allocation2 + $0x68] sm:$0x1] }
  0x74   : > { %v2839_v21 = vsel %vm21459_vm7, %v2834_v53, %v2838_v54  ;;  %v950_v23 = vor.u32 %v949_v8, %v945_v6  ;;  %v410_v24 = vrot.slane %v405_v12, 4  ;;  %v2841_v25 = vshrl.u32 %v2666_v0, 16 }
  0x75   : > { %v17092_v32 = vcombine.low %v2829_v4, %v2839_v21  ;;  %v941_v34 = vrot.slane %v940_v15, 4  ;;  %v408_v35 = vor.u32 %v406_v17, %v405_v12  ;;  %v960_v7 = vrot.slane %v958_v18, 4  ;;  %v3402_v17 = vld [vmem:[#allocation2 + $0xc] sm:$0xe] }
  0x76   : > { %v951_v36 = vrot.slane %v950_v23, 4  ;;  %v665_v38 = vsel %vm21453_vm6, %v410_v24, %v664_v13  ;;  %v963_v39 = vrot.slane %v961_v19, 5  ;;  %v2844_v37 = vshll.u32 %v2666_v0, 16 }
  0x77   : > { %19276 = vmatmul.mubr.msk.bf16.gmra.mrb[8].mxu0 %vm1254_vm10, %v17092_v32  ;;  %v946_v43 = vsel %vm21459_vm7, %v941_v34, %v945_v6  ;;  %v409_v44 = vsel %vm21476_vm11, %v401_v28, %v408_v35  ;;  %666 = vst [vmem:[#allocation2 + $0x5c] sm:$0x1] %v665_v38  ;;  %v412_v45 = vshrl.u32 %v271_v30, 16  ;;  %v2843_v49 = vrot.slane %v2841_v25, 4  ;;  %v667_v28 = vld [vmem:[#allocation2 + $0x60] sm:$0xf] }
  0x78   : > { %v956_v48 = vsel %vm21459_vm7, %v951_v36, %v955_v10  ;;  %663 = vst.msk [vmem:[#allocation2 + $0x58] sm:$0xf] %vm201_vm0, %v409_v44  ;;  %v415_v51 = vshll.u32 %v271_v30, 16  ;;  %v420_v54 = vshrl.u32 %v272_v29, 16  ;;  %v2846_v52 = vrot.slane %v2844_v37, 5 }
  0x79   : > { %v16909_v57 = vcombine.low %v946_v43, %v956_v48  ;;  %v414_v22 = vrot.slane %v412_v45, 7  ;;  %v423_v59 = vshll.u32 %v272_v29, 16  ;;  %v964_v3 = vor.u32 %v963_v39, %v960_v7  ;;  %v674_v30 = vld [vmem:[#allocation2 + $0x6c] sm:$0xf]  ;;  %v678_v32 = vld [vmem:[#allocation2 + $0x74] sm:$0x1] }
  0x7a   : > { %v422_v60 = vrot.slane %v420_v54, 7  ;;  %v429_v62 = vshrl.u32 %v273_v47, 16  ;;  %v432_v63 = vshll.u32 %v273_v47, 16  ;;  %v437_v4 = vshrl.u32 %v274_v56, 16  ;;  %v21728_v45 = vld [vmem:[#allocation2 + $0x18] sm:$0xe] }
  0x7b   : > { %19119 = vmatprep.mubr.msk.bf16.mxu1 %vm1254_vm10, %v16909_v57  ;;  %v417_v0 = vor.u32 %v415_v51, %v414_v22  ;;  %v418_v1 = vrot.slane %v414_v22, 4  ;;  %v440_v8 = vshll.u32 %v274_v56, 16  ;;  %v3478_v10 = vrot.slane %v21532_v11, 5 }
  0x7c   : > { %v425_v5 = vor.u32 %v423_v59, %v422_v60  ;;  %v427_v6 = vrot.slane %v422_v60, 4  ;;  %v431_v53 = vrot.slane %v429_v62, 7  ;;  %v2847_v12 = vor.u32 %v2846_v52, %v2843_v49 }
  0x7d   : > { %v668_v13 = vsel %vm21469_vm9, %v417_v0, %v667_v28  ;;  %v439_v15 = vrot.slane %v437_v4, 7  ;;  %v965_v19 = vrot.slane %v964_v3, 4  ;;  %v17123_v51 = vrot.slane %v3402_v17, 9 }
  0x7e   : > { %v777_v18 = vld [vmem:[#allocation2 + $0x5c] sm:$0x1]  ;;  %v426_v23 = vsel %vm21476_vm11, %v418_v1, %v425_v5  ;;  %669 = vst [vmem:[#allocation2 + $0x60] sm:$0xf] %v668_v13  ;;  %v672_v24 = vsel %vm21453_vm6, %v427_v6, %v671_v61  ;;  %v435_v25 = vrot.slane %v431_v53, 4  ;;  %v434_v38 = vor.u32 %v432_v63, %v431_v53 }
  0x7f   : > { %v21716_v21 = vld [vmem:[#allocation2 + $0x5c] sm:$0x1]  ;;  %v745_v34 = vld [vmem:[#allocation2 + $0x58] sm:$0xf]  ;;  %v977_v35 = vshll.u32 %v777_v18, 16  ;;  %v442_v7 = vor.u32 %v440_v8, %v439_v15  ;;  %v2848_v47 = vrot.slane %v2847_v12, 4 }
  0x80   : > { %v21722_v29 = vld [vmem:[#allocation2 + $0x58] sm:$0xf]  ;;  %v2860_v36 = vshll.u32 %v21716_v21, 16  ;;  %670 = vst.msk [vmem:[#allocation2 + $0x64] sm:$0xf] %vm201_vm0, %v426_v23  ;;  %v967_v39 = vshll.u32 %v745_v34, 16  ;;  %v675_v59 = vsel %vm21469_vm9, %v434_v38, %v674_v30 }
  0x81   : > { %673 = vst [vmem:[#allocation2 + $0x68] sm:$0x1] %v672_v24  ;;  %v971_v43 = vshrl.u32 %v745_v34, 16  ;;  %v2850_v44 = vshll.u32 %v21722_v29, 16  ;;  %v2854_v37 = vshrl.u32 %v21722_v29, 16  ;;  %v443_v48 = vsel %vm21476_vm11, %v435_v25, %v442_v7 }
  0x82   : > { %v444_v49 = vrot.slane %v439_v15, 4  ;;  %v969_v54 = vrot.slane %v967_v39, 5  ;;  %677 = vst.msk [vmem:[#allocation2 + $0x70] sm:$0xf] %vm201_vm0, %v443_v48  ;;  %v979_v22 = vrot.slane %v977_v35, 5  ;;  %v3468_v60 = vrot.slane %v21514_v42, 5 }
  0x83   : > { %v973_v56 = vrot.slane %v971_v43, 4  ;;  %v2852_v57 = vrot.slane %v2850_v44, 5  ;;  %v2856_v52 = vrot.slane %v2854_v37, 4  ;;  %v2862_v63 = vrot.slane %v2860_v36, 5  ;;  %676 = vst [vmem:[#allocation2 + $0x6c] sm:$0xf] %v675_v59 }
  0x84   : > { %v679_v28 = vsel %vm21453_vm6, %v444_v49, %v678_v32  ;;  %v3471_v0 = vrot.slane %v21517_v46, 5  ;;  %v970_v1 = vsel %vm21459_vm7, %v965_v19, %v969_v54  ;;  %v21747_v6 = vrot.slane %v3468_v60, 4 }
  0x85   : > { %v974_v61 = vor.u32 %v973_v56, %v969_v54  ;;  %v2857_v62 = vor.u32 %v2856_v52, %v2852_v57  ;;  %680 = vst [vmem:[#allocation2 + $0x74] sm:$0x1] %v679_v28  ;;  %v2669_v4 = vld [vmem:[#allocation2 + $0x60] sm:$0xf]  ;;  %v17124_v53 = vrot.slane %v21728_v45, 9  ;;  %v2853_v42 = vsel %vm21459_vm7, %v2848_v47, %v2852_v57 }
  0x86   : > { %v746_v5 = vld [vmem:[#allocation2 + $0x60] sm:$0xf]  ;;  %v21758_v17 = vsel %vm21739_vm14, %v17123_v51, %v3468_v60  ;;  %v2865_v18 = vshrl.u32 %v2669_v4, 16  ;;  %v2868_v19 = vshll.u32 %v2669_v4, 16 }
  0x87   : > { %v975_v8 = vrot.slane %v974_v61, 4  ;;  %v2858_v12 = vrot.slane %v2857_v62, 4  ;;  %v21752_v13 = vld [vmem:[#allocation2 + $0x64] sm:$0xf]  ;;  %v982_v35 = vshrl.u32 %v746_v5, 16  ;;  %v985_v51 = vshll.u32 %v746_v5, 16 }
  0x88   : > { %v21754_v15 = vld [vmem:[#allocation2 + $0x68] sm:$0x1]  ;;  %v2874_v23 = vshll.u32 %v21752_v13, 16  ;;  %v2878_v24 = vshrl.u32 %v21752_v13, 16  ;;  %v747_v34 = vld [vmem:[#allocation2 + $0x64] sm:$0xf] }
  0x89   : > { %v980_v25 = vsel %vm21459_vm7, %v975_v8, %v979_v22  ;;  %v2863_v30 = vsel %vm21459_vm7, %v2858_v12, %v2862_v63  ;;  %v2884_v32 = vshll.u32 %v21754_v15, 16  ;;  %v2867_v7 = vrot.slane %v2865_v18, 4  ;;  %v778_v43 = vld [vmem:[#allocation2 + $0x68] sm:$0x1]  ;;  %v749_v59 = vld [vmem:[#allocation2 + $0x70] sm:$0xf] }
  0x8a   : > { %v16910_v36 = vcombine.low %v970_v1, %v980_v25  ;;  %v17093_v38 = vcombine.low %v2853_v42, %v2863_v30  ;;  %v2870_v39 = vrot.slane %v2868_v19, 5  ;;  %v2876_v44 = vrot.slane %v2874_v23, 5  ;;  %v748_v57 = vld [vmem:[#allocation2 + $0x6c] sm:$0xf]  ;;  %v275_v25 = vld [vmem:[%s21442_s10 + $0x48] sm:$0xf] }
  0x8b   : > { %v2880_v37 = vrot.slane %v2878_v24, 4  ;;  %v2886_v47 = vrot.slane %v2884_v32, 5  ;;  %v984_v48 = vrot.slane %v982_v35, 4  ;;  %v991_v54 = vshll.u32 %v747_v34, 16 }
  0x8c   : > { %19120 = vmatmul.mubr.msk.bf16.gmra.mrb[12].mxu1 %vm1254_vm10, %v16910_v36  ;;  %19279 = vmatprep.mubr.msk.bf16.mxu0 %vm1254_vm10, %v17093_v38  ;;  %v2871_v49 = vor.u32 %v2870_v39, %v2867_v7  ;;  %v995_v56 = vshrl.u32 %v747_v34, 16  ;;  %v1001_v22 = vshll.u32 %v778_v43, 16  ;;  %v1006_v28 = vshrl.u32 %v748_v57, 16  ;;  %v779_v4 = vld [vmem:[#allocation2 + $0x74] sm:$0x1] }
  0x8d   : > { %v2881_v52 = vor.u32 %v2880_v37, %v2876_v44  ;;  %v1009_v60 = vshll.u32 %v748_v57, 16  ;;  %v987_v62 = vrot.slane %v985_v51, 5  ;;  %v993_v63 = vrot.slane %v991_v54, 5  ;;  %v276_v36 = vld [vmem:[%s21442_s10 + $0x4c] sm:$0xf] }
  0x8e   : > { %v2872_v61 = vrot.slane %v2871_v49, 4  ;;  %v997_v1 = vrot.slane %v995_v56, 4  ;;  %v1003_v42 = vrot.slane %v1001_v22, 5  ;;  %v1008_v12 = vrot.slane %v1006_v28, 4  ;;  %v277_v37 = vld [vmem:[%s21442_s10 + $0x50] sm:$0xf] }
  0x8f   : > { %v2882_v8 = vrot.slane %v2881_v52, 4  ;;  %v1011_v5 = vrot.slane %v1009_v60, 5  ;;  %v988_v19 = vor.u32 %v987_v62, %v984_v48  ;;  %v1015_v24 = vshll.u32 %v749_v59, 16  ;;  %v278_v54 = vld [vmem:[%s21442_s10 + $0x54] sm:$0xf] }
  0x90   : > { %v2877_v18 = vsel %vm21459_vm7, %v2872_v61, %v2876_v44  ;;  %v998_v23 = vor.u32 %v997_v1, %v993_v63  ;;  %v1019_v34 = vshrl.u32 %v749_v59, 16  ;;  %v1025_v35 = vshll.u32 %v779_v4, 16  ;;  %v681_v62 = vld [vmem:[#allocation2 + $0x78] sm:$0xf]  ;;  %v685_v4 = vld [vmem:[#allocation2 + $0x80] sm:$0x1] }
  0x91   : > { %v2887_v30 = vsel %vm21459_vm7, %v2882_v8, %v2886_v47  ;;  %v1012_v32 = vor.u32 %v1011_v5, %v1008_v12  ;;  %v989_v7 = vrot.slane %v988_v19, 4  ;;  %v1017_v43 = vrot.slane %v1015_v24, 5  ;;  %v688_v24 = vld [vmem:[#allocation2 + $0x84] sm:$0xf] }
  0x92   : > { %v17094_v38 = vcombine.low %v2877_v18, %v2887_v30  ;;  %v999_v39 = vrot.slane %v998_v23, 4  ;;  %v1021_v51 = vrot.slane %v1019_v34, 4  ;;  %v1027_v44 = vrot.slane %v1025_v35, 5  ;;  %v20981_v30 = vld [vmem:[%s26996_s1 + $0xc8] sm:$0xff]  }
  0x93   : > { %v1013_v49 = vrot.slane %v1012_v32, 4  ;;  %v3472_v48 = vsel %vm21739_vm14, %v21747_v6, %v3471_v0  ;;  %v994_v47 = vsel %vm21459_vm7, %v989_v7, %v993_v63  ;;  %v3475_v52 = vrot.slane %v21527_v2, 5  ;;  %v692_v35 = vld [vmem:[#allocation2 + $0x8c] sm:$0x1] }
  0x94   : > { %19280 = vmatmul.mubr.msk.bf16.gmra.mrb[12].mxu0 %vm1254_vm10, %v17094_v38  ;;  %v1004_v56 = vsel %vm21459_vm7, %v999_v39, %v1003_v42  ;;  %v17147_v57 = vcombine.low %v21758_v17, %v3472_v48  ;;  %v1022_v59 = vor.u32 %v1021_v51, %v1017_v43  ;;  %v446_v28 = vshrl.u32 %v275_v25, 16  ;;  %v3404_v17 = vld [vmem:[#allocation2 + $0x24] sm:$0xe]  ;;  %v280_v48 = vld [vmem:[%s21442_s10 + $0x5c] sm:$0xf] }
  0x95   : > { %v16911_v22 = vcombine.low %v994_v47, %v1004_v56  ;;  %v1018_v46 = vsel %vm21459_vm7, %v1013_v49, %v1017_v43  ;;  %v3476_v0 = vsel %vm21739_vm14, %v17124_v53, %v3475_v52  ;;  %v3477_v6 = vrot.slane %v3475_v52, 4  ;;  %v279_v43 = vld [vmem:[%s21442_s10 + $0x58] sm:$0xf]  ;;  %v21817_v47 = vld [vmem:[%s21442_s10 + $0x60] sm:$0xf] }
  0x96   : > { %19307 = vmatprep.mubr.msk.bf16.mxu0 %vm1254_vm10, %v17147_v57  ;;  %v449_v60 = vshll.u32 %v275_v25, 16  ;;  %v454_v61 = vshrl.u32 %v276_v36, 16  ;;  %v1023_v2 = vrot.slane %v1022_v59, 4  ;;  %v448_v63 = vrot.slane %v446_v28, 7  ;;  %v3405_v25 = vld [vmem:[#allocation2 + $0x30] sm:$0xe] }
  0x97   : > { %19123 = vmatprep.mubr.msk.bf16.mxu1 %vm1254_vm10, %v16911_v22  ;;  %v457_v1 = vshll.u32 %v276_v36, 16  ;;  %v463_v8 = vshrl.u32 %v277_v37, 16  ;;  %v3479_v45 = vsel %vm21739_vm14, %v3477_v6, %v3478_v10  ;;  %v466_v12 = vshll.u32 %v277_v37, 16 }
  0x98   : > { %v456_v42 = vrot.slane %v454_v61, 7  ;;  %v471_v53 = vshrl.u32 %v278_v54, 16  ;;  %v1028_v5 = vsel %vm21459_vm7, %v1023_v2, %v1027_v44  ;;  %v17148_v18 = vcombine.low %v3476_v0, %v3479_v45 }
  0x99   : > { %v451_v19 = vor.u32 %v449_v60, %v448_v63  ;;  %v452_v23 = vrot.slane %v448_v63, 4  ;;  %v16912_v11 = vcombine.low %v1018_v46, %v1028_v5  ;;  %v465_v34 = vrot.slane %v463_v8, 7 }
  0x9a   : > { %v459_v32 = vor.u32 %v457_v1, %v456_v42  ;;  %v461_v10 = vrot.slane %v456_v42, 4  ;;  %v473_v38 = vrot.slane %v471_v53, 7  ;;  %v474_v7 = vshll.u32 %v278_v54, 16 }
  0x9b   : > { %v682_v36 = vsel %vm21469_vm9, %v451_v19, %v681_v62  ;;  %v17125_v39 = vrot.slane %v3404_v17, 9  ;;  %19124 = vmatmul.mubr.msk.bf16.gmra.mrb[16].mxu1 %vm1254_vm10, %v16912_v11  ;;  %v468_v51 = vor.u32 %v466_v12, %v465_v34  ;;  %v469_v44 = vrot.slane %v465_v34, 4  ;;  %v21840_v62 = vld [vmem:[%s21442_s10 + $0x64] sm:$0xf] }
  0x9c   : > { %19308 = vmatmul.mubr.msk.bf16.vlgmr.msra.gmra.mrb[0].mxu0 %vm1254_vm10, %v17148_v18  ;;  %v460_v37 = vsel %vm21476_vm11, %v452_v23, %v459_v32  ;;  %683 = vst [vmem:[#allocation2 + $0x78] sm:$0xf] %v682_v36  ;;  %v686_v49 = vsel %vm21453_vm6, %v461_v10, %v685_v4  ;;  %v476_v54 = vor.u32 %v474_v7, %v473_v38  ;;  %v478_v56 = vrot.slane %v473_v38, 4  ;;  %v20985_v23 = vld [vmem:[%s26996_s1 + $0xd8] sm:$0xff]  }
  0x9d   : > { %19340 = vmatpush3.bf16.msra.mxu0 %v21612_v16  ;;  %684 = vst.msk [vmem:[#allocation2 + $0x7c] sm:$0xf] %vm201_vm0, %v460_v37  ;;  %687 = vst [vmem:[#allocation2 + $0x80] sm:$0x1] %v686_v49  ;;  %v3482_v57 = vrot.slane %v21557_v9, 5  ;;  %v3485_v52 = vrot.slane %v21568_v20, 5  ;;  %v689_v22 = vsel %vm21469_vm9, %v468_v51, %v688_v24 }
  0x9e   : > { %v17126_v46 = vrot.slane %v3405_v25, 9  ;;  %v3489_v59 = vrot.slane %v21624_v55, 5  ;;  %v3492_v28 = vrot.slane %v21626_v26, 5  ;;  %19341 = vmatprep.subr.bf16.mxu0 %v20981_v30  ;;  %v20983_v16 = vld [vmem:[%s26996_s1 + $0xd0] sm:$0xff]   ;;  %v477_v0 = vsel %vm21476_vm11, %v469_v44, %v476_v54  ;;  %690 = vst [vmem:[#allocation2 + $0x84] sm:$0xf] %v689_v22 }
  0x9f   : > { %v693_v9 = vsel %vm21453_vm6, %v478_v56, %v692_v35  ;;  %v3483_v20 = vsel %vm21739_vm14, %v17125_v39, %v3482_v57  ;;  %v3484_v6 = vrot.slane %v3482_v57, 4  ;;  %691 = vst.msk [vmem:[#allocation2 + $0x88] sm:$0xf] %vm201_vm0, %v477_v0  ;;  %v480_v60 = vshrl.u32 %v279_v43, 16  ;;  %v695_v49 = vld [vmem:[#allocation2 + $0x90] sm:$0xf] }
  0xa0   : > { %694 = vst [vmem:[#allocation2 + $0x8c] sm:$0x1] %v693_v9  ;;  %v3490_v55 = vsel %vm21739_vm14, %v17126_v46, %v3489_v59  ;;  %v3491_v26 = vrot.slane %v3489_v59, 4  ;;  %v483_v61 = vshll.u32 %v279_v43, 16  ;;  %v488_v2 = vshrl.u32 %v280_v48, 16  ;;  %v21869_v44 = vld [vmem:[%s26996_s1 + $0xe0] sm:$0xff]  }
  0xa1   : > { %v3486_v17 = vsel %vm21739_vm14, %v3484_v6, %v3485_v52  ;;  %v491_v63 = vshll.u32 %v280_v48, 16  ;;  %v497_v1 = vshrl.u32 %v21817_v47, 16  ;;  %19342 = vmatpush3.bf16.msra.mxu0 %v20981_v30  ;;  %v482_v45 = vrot.slane %v480_v60, 7  ;;  %v699_v51 = vld [vmem:[#allocation2 + $0x98] sm:$0x1] }
  0xa2   : > { %v17149_v4 = vcombine.low %v3483_v20, %v3486_v17  ;;  %v3493_v8 = vsel %vm21739_vm14, %v3491_v26, %v3492_v28  ;;  %v500_v42 = vshll.u32 %v21817_v47, 16  ;;  %19343 = vmatprep.subr.bf16.mxu0 %v20983_v16  ;;  %v490_v5 = vrot.slane %v488_v2, 7 }
  0xa3   : > { %v21848_v12 = vld [vmem:[#allocation2 + $0x78] sm:$0xf]  ;;  %v17150_v53 = vcombine.low %v3490_v55, %v3493_v8  ;;  %v21850_v18 = vrot.slane %v497_v1, 7  ;;  %v505_v19 = vshrl.u32 %v21840_v62, 16  ;;  %v485_v32 = vor.u32 %v483_v61, %v482_v45  ;;  %v702_v1 = vld [vmem:[#allocation2 + $0x9c] sm:$0xf] }
  0xa4   : > { %v21856_v24 = vld [vmem:[#allocation2 + $0x7c] sm:$0xf]  ;;  %v780_v25 = vld [vmem:[#allocation2 + $0x80] sm:$0x1]  ;;  %v1030_v30 = vshrl.u32 %v21848_v12, 16  ;;  %v1033_v11 = vshll.u32 %v21848_v12, 16  ;;  %19311 = vmatprep.mubr.msk.bf16.mxu0 %vm1254_vm10, %v17149_v4  ;;  %v493_v43 = vor.u32 %v491_v63, %v490_v5 }
  0xa5   : > { %v1039_v10 = vshll.u32 %v21856_v24, 16  ;;  %v1043_v34 = vshrl.u32 %v21856_v24, 16  ;;  %v1049_v35 = vshll.u32 %v780_v25, 16  ;;  %19312 = vmatmul.mubr.msk.bf16.gmra.mrb[4].mxu0 %vm1254_vm10, %v17150_v53  ;;  %v486_v36 = vrot.slane %v482_v45, 4  ;;  %v21864_v39 = vld [vmem:[#allocation2 + $0x84] sm:$0xf] }
  0xa6   : > { %v1032_v38 = vrot.slane %v1030_v30, 4  ;;  %v1035_v7 = vrot.slane %v1033_v11, 5  ;;  %v495_v37 = vrot.slane %v490_v5, 4  ;;  %19344 = vmatpush3.bf16.msra.mxu0 %v20983_v16  ;;  %v21871_v56 = vld [vmem:[#allocation2 + $0x88] sm:$0xf]  ;;  %v1054_v57 = vshrl.u32 %v21864_v39, 16 }
  0xa7   : > { %v1041_v48 = vrot.slane %v1039_v10, 5  ;;  %v1045_v47 = vrot.slane %v1043_v34, 4  ;;  %v1051_v54 = vrot.slane %v1049_v35, 5  ;;  %19345 = vmatprep.subr.bf16.mxu0 %v20985_v23  ;;  %v781_v22 = vld [vmem:[#allocation2 + $0x8c] sm:$0x1]  ;;  %v1057_v46 = vshll.u32 %v21864_v39, 16 }
  0xa8   : > { %v1036_v52 = vor.u32 %v1035_v7, %v1032_v38  ;;  %v1063_v59 = vshll.u32 %v21871_v56, 16  ;;  %v1067_v28 = vshrl.u32 %v21871_v56, 16  ;;  %v1056_v0 = vrot.slane %v1054_v57, 4  ;;  %v3406_v4 = vld [vmem:[#allocation2 + $0x3c] sm:$0xe] }
  0xa9   : > { %v1046_v16 = vor.u32 %v1045_v47, %v1041_v48  ;;  %v1073_v9 = vshll.u32 %v781_v22, 16  ;;  %v494_v20 = vsel %vm21476_vm11, %v486_v36, %v493_v43  ;;  %v1059_v55 = vrot.slane %v1057_v46, 5  ;;  %v3407_v38 = vld [vmem:[#allocation2 + $0x48] sm:$0xe] }
  0xaa   : > { %v1037_v6 = vrot.slane %v1036_v52, 4  ;;  %v1065_v26 = vrot.slane %v1063_v59, 5  ;;  %v1069_v60 = vrot.slane %v1067_v28, 4  ;;  %698 = vst.msk [vmem:[#allocation2 + $0x94] sm:$0xf] %vm201_vm0, %v494_v20  ;;  %19346 = vmatpush3.bf16.msra.mxu0 %v20985_v23  ;;  %v696_v2 = vsel %vm21469_vm9, %v485_v32, %v695_v49 }
  0xab   : > { %v1047_v61 = vrot.slane %v1046_v16, 4  ;;  %v1075_v17 = vrot.slane %v1073_v9, 5  ;;  %v700_v63 = vsel %vm21453_vm6, %v495_v37, %v699_v51  ;;  %19379 = vmatprep.subr.bf16.mxu0 %v21869_v44  ;;  %v1060_v45 = vor.u32 %v1059_v55, %v1056_v0  ;;  %697 = vst [vmem:[#allocation2 + $0x90] sm:$0xf] %v696_v2  ;;  %v706_v23 = vld [vmem:[#allocation2 + $0xa4] sm:$0x1] }
  0xac   : > { %v1042_v8 = vsel %vm21459_vm7, %v1037_v6, %v1041_v48  ;;  %v1070_v53 = vor.u32 %v1069_v60, %v1065_v26  ;;  %701 = vst [vmem:[#allocation2 + $0x98] sm:$0x1] %v700_v63  ;;  %v502_v5 = vor.u32 %v500_v42, %v21850_v18  ;;  %v503_v30 = vrot.slane %v21850_v18, 4  ;;  %v21902_v49 = vld [vmem:[%s21442_s10 + $0x68] sm:$0xf] }
  0xad   : > { %v1052_v25 = vsel %vm21459_vm7, %v1047_v61, %v1051_v54  ;;  %v507_v11 = vrot.slane %v505_v19, 7  ;;  %v508_v32 = vshll.u32 %v21840_v62, 16  ;;  %v1061_v34 = vrot.slane %v1060_v45, 4 }
  0xae   : > { %v16913_v10 = vcombine.low %v1042_v8, %v1052_v25  ;;  %v1071_v35 = vrot.slane %v1070_v53, 4  ;;  %v703_v36 = vsel %vm21469_vm9, %v502_v5, %v702_v1  ;;  %v17127_v42 = vrot.slane %v3406_v4, 9 }
  0xaf   : > { %v510_v7 = vor.u32 %v508_v32, %v507_v11  ;;  %v512_v43 = vrot.slane %v507_v11, 4  ;;  %704 = vst [vmem:[#allocation2 + $0x9c] sm:$0xf] %v703_v36  ;;  %v3496_v37 = vrot.slane %v21658_v50, 5  ;;  %v1066_v18 = vsel %vm21459_vm7, %v1061_v34, %v1065_v26 }
  0xb0   : > { %19127 = vmatprep.mubr.msk.bf16.mxu1 %vm1254_vm10, %v16913_v10  ;;  %v1076_v62 = vsel %vm21459_vm7, %v1071_v35, %v1075_v17  ;;  %v3499_v19 = vrot.slane %v21665_v58, 5  ;;  %v17128_v54 = vrot.slane %v3407_v38, 9  ;;  %v3503_v22 = vrot.slane %v21672_v31, 5 }
  0xb1   : > { %v16914_v51 = vcombine.low %v1066_v18, %v1076_v62  ;;  %v21904_v48 = vld [vmem:[#allocation2 + $0x94] sm:$0xf]  ;;  %v511_v47 = vsel %vm21476_vm11, %v503_v30, %v510_v7  ;;  %v707_v50 = vsel %vm21453_vm6, %v512_v43, %v706_v23  ;;  %v3498_v58 = vrot.slane %v3496_v37, 4  ;;  %v284_v30 = vld [vmem:[%s21442_s10 + $0x6c] sm:$0xf] }
  0xb2   : > { %v1087_v57 = vshll.u32 %v21904_v48, 16  ;;  %v1091_v52 = vshrl.u32 %v21904_v48, 16  ;;  %705 = vst.msk [vmem:[#allocation2 + $0xa0] sm:$0xf] %vm201_vm0, %v511_v47  ;;  %708 = vst [vmem:[#allocation2 + $0xa4] sm:$0x1] %v707_v50  ;;  %v3497_v28 = vsel %vm21739_vm14, %v17127_v42, %v3496_v37  ;;  %v3504_v60 = vsel %vm21739_vm14, %v17128_v54, %v3503_v22 }
  0xb3   : > { %19128 = vmatmul.mubr.msk.bf16.gmra.mrb[20].mxu1 %vm1254_vm10, %v16914_v51  ;;  %v21915_v46 = vld [vmem:[#allocation2 + $0x90] sm:$0xf]  ;;  %v782_v59 = vld [vmem:[#allocation2 + $0x98] sm:$0x1]  ;;  %v3506_v16 = vrot.slane %v21674_v14, 5  ;;  %v514_v0 = vshrl.u32 %v21902_v49, 16  ;;  %v3500_v31 = vsel %vm21739_vm14, %v3498_v58, %v3499_v19 }
  0xb4   : > { %v1078_v9 = vshrl.u32 %v21915_v46, 16  ;;  %v1081_v20 = vshll.u32 %v21915_v46, 16  ;;  %v1089_v6 = vrot.slane %v1087_v57, 5  ;;  %v1093_v55 = vrot.slane %v1091_v52, 4  ;;  %v709_v42 = vld [vmem:[#allocation2 + $0xa8] sm:$0xf] }
  0xb5   : > { %v1097_v26 = vshll.u32 %v782_v59, 16  ;;  %v3505_v61 = vrot.slane %v3503_v22, 4  ;;  %v17151_v1 = vcombine.low %v3497_v28, %v3500_v31  ;;  %v516_v11 = vrot.slane %v514_v0, 7  ;;  %v285_v37 = vld [vmem:[%s21442_s10 + $0x70] sm:$0xf] }
  0xb6   : > { %v1080_v17 = vrot.slane %v1078_v9, 4  ;;  %v1083_v2 = vrot.slane %v1081_v20, 5  ;;  %v1094_v14 = vor.u32 %v1093_v55, %v1089_v6  ;;  %v21927_v63 = vld [vmem:[#allocation2 + $0x9c] sm:$0xf]  ;;  %v517_v19 = vshll.u32 %v21902_v49, 16 }
  0xb7   : > { %v1099_v4 = vrot.slane %v1097_v26, 5  ;;  %v1102_v8 = vshrl.u32 %v21927_v63, 16  ;;  %v1105_v45 = vshll.u32 %v21927_v63, 16  ;;  %v3507_v53 = vsel %vm21739_vm14, %v3505_v61, %v3506_v16  ;;  %19315 = vmatprep.mubr.msk.bf16.mxu0 %vm1254_vm10, %v17151_v1  ;;  %v286_v47 = vld [vmem:[%s21442_s10 + $0x74] sm:$0xf] }
  0xb8   : > { %v1084_v5 = vor.u32 %v1083_v2, %v1080_v17  ;;  %v1095_v23 = vrot.slane %v1094_v14, 4  ;;  %v17152_v25 = vcombine.low %v3504_v60, %v3507_v53  ;;  %v520_v51 = vrot.slane %v516_v11, 4  ;;  %v713_v16 = vld [vmem:[#allocation2 + $0xb0] sm:$0x1]  ;;  %v3408_v26 = vld [vmem:[#allocation2 + $0x54] sm:$0xe] }
  0xb9   : > { %v21935_v32 = vld [vmem:[#allocation2 + $0xa0] sm:$0xf]  ;;  %v783_v10 = vld [vmem:[#allocation2 + $0xa4] sm:$0x1]  ;;  %v1104_v34 = vrot.slane %v1102_v8, 4  ;;  %v1107_v35 = vrot.slane %v1105_v45, 5  ;;  %v519_v28 = vor.u32 %v517_v19, %v516_v11 }
  0xba   : > { %v1085_v36 = vrot.slane %v1084_v5, 4  ;;  %v1100_v38 = vsel %vm21459_vm7, %v1095_v23, %v1099_v4  ;;  %v1111_v7 = vshll.u32 %v21935_v32, 16  ;;  %v1115_v43 = vshrl.u32 %v21935_v32, 16  ;;  %19316 = vmatmul.mubr.msk.bf16.gmra.mrb[8].mxu0 %vm1254_vm10, %v17152_v25  ;;  %v716_v61 = vld [vmem:[#allocation2 + $0xb4] sm:$0xf] }
  0xbb   : > { %v1108_v18 = vor.u32 %v1107_v35, %v1104_v34  ;;  %v1121_v62 = vshll.u32 %v783_v10, 16  ;;  %v522_v52 = vshrl.u32 %v284_v30, 16  ;;  %v525_v20 = vshll.u32 %v284_v30, 16  ;;  %v720_v45 = vld [vmem:[#allocation2 + $0xbc] sm:$0x1] }
  0xbc   : > { %v1090_v50 = vsel %vm21459_vm7, %v1085_v36, %v1089_v6  ;;  %v1113_v54 = vrot.slane %v1111_v7, 5  ;;  %v1117_v57 = vrot.slane %v1115_v43, 4  ;;  %v531_v55 = vshrl.u32 %v285_v37, 16  ;;  %v3409_v10 = vld [vmem:[#allocation2 + $0x60] sm:$0xe] }
  0xbd   : > { %v16915_v58 = vcombine.low %v1090_v50, %v1100_v38  ;;  %v1109_v22 = vrot.slane %v1108_v18, 4  ;;  %v1123_v59 = vrot.slane %v1121_v62, 5  ;;  %v524_v9 = vrot.slane %v522_v52, 7  ;;  %v2673_v7 = vld [vmem:[#allocation2 + $0x70] sm:$0xf] }
  0xbe   : > { %v1118_v0 = vor.u32 %v1117_v57, %v1113_v54  ;;  %v710_v6 = vsel %vm21469_vm9, %v519_v28, %v709_v42  ;;  %v534_v31 = vshll.u32 %v285_v37, 16  ;;  %v539_v60 = vshrl.u32 %v286_v47, 16  ;;  %v2674_v62 = vld [vmem:[#allocation2 + $0x74] sm:$0x1] }
  0xbf   : > { %19131 = vmatprep.mubr.msk.bf16.mxu1 %vm1254_vm10, %v16915_v58  ;;  %v1114_v49 = vsel %vm21459_vm7, %v1109_v22, %v1113_v54  ;;  %v527_v2 = vor.u32 %v525_v20, %v524_v9  ;;  %v529_v14 = vrot.slane %v524_v9, 4  ;;  %711 = vst [vmem:[#allocation2 + $0xa8] sm:$0xf] %v710_v6  ;;  %v533_v1 = vrot.slane %v531_v55, 7  ;;  %v3411_v58 = vld [vmem:[#allocation2 + $0x78] sm:$0xe] }
  0xc0   : > { %v1119_v17 = vrot.slane %v1118_v0, 4  ;;  %v541_v4 = vrot.slane %v539_v60, 7  ;;  %v542_v8 = vshll.u32 %v286_v47, 16  ;;  %v17129_v53 = vrot.slane %v3408_v26, 9  ;;  %v2676_v26 = vld [vmem:[#allocation2 + $0x7c] sm:$0xf] }
  0xc1   : > { %v3510_v5 = vrot.slane %v21722_v29, 5  ;;  %v528_v25 = vsel %vm21476_vm11, %v520_v51, %v527_v2  ;;  %v714_v30 = vsel %vm21453_vm6, %v529_v14, %v713_v16  ;;  %v536_v11 = vor.u32 %v534_v31, %v533_v1  ;;  %v3410_v29 = vld [vmem:[#allocation2 + $0x6c] sm:$0xe] }
  0xc2   : > { %v1124_v23 = vsel %vm21459_vm7, %v1119_v17, %v1123_v59  ;;  %712 = vst.msk [vmem:[#allocation2 + $0xac] sm:$0xf] %vm201_vm0, %v528_v25  ;;  %715 = vst [vmem:[#allocation2 + $0xb0] sm:$0x1] %v714_v30  ;;  %v537_v35 = vrot.slane %v533_v1, 4  ;;  %v544_v36 = vor.u32 %v542_v8, %v541_v4  ;;  %v546_v38 = vrot.slane %v541_v4, 4 }
  0xc3   : > { %v16916_v34 = vcombine.low %v1114_v49, %v1124_v23  ;;  %v717_v43 = vsel %vm21469_vm9, %v536_v11, %v716_v61  ;;  %v3511_v42 = vsel %vm21739_vm14, %v17129_v53, %v3510_v5  ;;  %v3512_v37 = vrot.slane %v3510_v5, 4  ;;  %v2677_v49 = vld [vmem:[#allocation2 + $0x80] sm:$0x1]  ;;  %v21997_v25 = vld [vmem:[#allocation2 + $0x4] sm:$0xf] }
  0xc4   : > { %v3513_v18 = vrot.slane %v21716_v21, 5  ;;  %v545_v19 = vsel %vm21476_vm11, %v537_v35, %v544_v36  ;;  %718 = vst [vmem:[#allocation2 + $0xb4] sm:$0xf] %v717_v43  ;;  %v721_v51 = vsel %vm21453_vm6, %v546_v38, %v720_v45  ;;  %v17130_v47 = vrot.slane %v3409_v10, 9  ;;  %v21995_v23 = vld [vmem:[#allocation2] sm:$0xf] }
  0xc5   : > { %19132 = vmatmul.mubr.msk.bf16.gmra.mrb[24].mxu1 %vm1254_vm10, %v16916_v34  ;;  %v3517_v50 = vrot.slane %v21752_v13, 5  ;;  %719 = vst.msk [vmem:[#allocation2 + $0xb8] sm:$0xf] %vm201_vm0, %v545_v19  ;;  %722 = vst [vmem:[#allocation2 + $0xbc] sm:$0x1] %v721_v51  ;;  %v3520_v21 = vrot.slane %v21754_v15, 5  ;;  %v16939_v30 = vcombine.low %v21995_v23, %v21997_v25 }
  0xc6   : > { %v3514_v54 = vsel %vm21739_vm14, %v3512_v37, %v3513_v18  ;;  %v17131_v57 = vrot.slane %v3410_v29, 9  ;;  %v3524_v52 = vrot.slane %v2673_v7, 5  ;;  %v21975_v22 = vld [vmem:[#allocation2 + $0xa8] sm:$0xf]  ;;  %v3527_v0 = vrot.slane %v2674_v62, 5 }
  0xc7   : > { %v17153_v59 = vcombine.low %v3511_v42, %v3514_v54  ;;  %v3518_v28 = vsel %vm21739_vm14, %v17130_v47, %v3517_v50  ;;  %v3519_v16 = vrot.slane %v3517_v50, 4  ;;  %v1126_v13 = vshrl.u32 %v21975_v22, 16  ;;  %v3412_v34 = vld [vmem:[#allocation2 + $0x84] sm:$0xe]  ;;  %v2679_v43 = vld [vmem:[#allocation2 + $0x88] sm:$0xf] }
  0xc8   : > { %v1129_v9 = vshll.u32 %v21975_v22, 16  ;;  %v3525_v20 = vsel %vm21739_vm14, %v17131_v57, %v3524_v52  ;;  %v3526_v55 = vrot.slane %v3524_v52, 4  ;;  %v17132_v6 = vrot.slane %v3411_v58, 9  ;;  %v2682_v57 = vld [vmem:[#allocation2 + $0x94] sm:$0xf] }
  0xc9   : > { %19319 = vmatprep.mubr.msk.bf16.mxu0 %vm1254_vm10, %v17153_v59  ;;  %v3521_v15 = vsel %vm21739_vm14, %v3519_v16, %v3520_v21  ;;  %v21986_v31 = vld [vmem:[#allocation2 + $0xac] sm:$0xf]  ;;  %v784_v60 = vld [vmem:[#allocation2 + $0xb0] sm:$0x1]  ;;  %v1128_v61 = vrot.slane %v1126_v13, 4  ;;  %v3531_v11 = vrot.slane %v2676_v26, 5 }
  0xca   : > { %v1131_v17 = vrot.slane %v1129_v9, 5  ;;  %v17154_v2 = vcombine.low %v3518_v28, %v3521_v15  ;;  %v3528_v14 = vsel %vm21739_vm14, %v3526_v55, %v3527_v0  ;;  %v1135_v1 = vshll.u32 %v21986_v31, 16  ;;  %v2680_v21 = vld [vmem:[#allocation2 + $0x8c] sm:$0x1]  ;;  %v3413_v16 = vld [vmem:[#allocation2 + $0x90] sm:$0xe] }
  0xcb   : > { %v1139_v4 = vshrl.u32 %v21986_v31, 16  ;;  %v1145_v8 = vshll.u32 %v784_v60, 16  ;;  %v17155_v45 = vcombine.low %v3525_v20, %v3528_v14  ;;  %v21992_v5 = vld [vmem:[#allocation2 + $0xb4] sm:$0xf]  ;;  %v3534_v10 = vrot.slane %v2677_v49, 5 }
  0xcc   : > { %v1132_v53 = vor.u32 %v1131_v17, %v1128_v61  ;;  %19320 = vmatmul.mubr.msk.bf16.gmra.mrb[12].mxu0 %vm1254_vm10, %v17154_v2  ;;  %v1137_v35 = vrot.slane %v1135_v1, 5  ;;  %v22001_v7 = vld [vmem:[#allocation2 + $0xb8] sm:$0xf]  ;;  %v1150_v29 = vshrl.u32 %v21992_v5, 16  ;;  %v785_v37 = vld [vmem:[#allocation2 + $0xbc] sm:$0x1]  ;;  %v3532_v54 = vsel %vm21739_vm14, %v17132_v6, %v3531_v11 }
  0xcd   : > { %v1141_v36 = vrot.slane %v1139_v4, 4  ;;  %v1147_v38 = vrot.slane %v1145_v8, 5  ;;  %19323 = vmatprep.mubr.msk.bf16.mxu0 %vm1254_vm10, %v17155_v45  ;;  %v1153_v18 = vshll.u32 %v21992_v5, 16  ;;  %v1159_v62 = vshll.u32 %v22001_v7, 16  ;;  %v2683_v55 = vld [vmem:[#allocation2 + $0x98] sm:$0x1] }
  0xce   : > { %v1133_v42 = vrot.slane %v1132_v53, 4  ;;  %v1163_v19 = vshrl.u32 %v22001_v7, 16  ;;  %v1152_v47 = vrot.slane %v1150_v29, 4  ;;  %v1169_v50 = vshll.u32 %v785_v37, 16  ;;  %v3414_v14 = vld [vmem:[#allocation2 + $0x9c] sm:$0xe] }
  0xcf   : > { %v1142_v51 = vor.u32 %v1141_v36, %v1137_v35  ;;  %v1155_v58 = vrot.slane %v1153_v18, 5  ;;  %v1161_v59 = vrot.slane %v1159_v62, 5  ;;  %v3533_v9 = vrot.slane %v3531_v11, 4  ;;  %v2685_v53 = vld [vmem:[#allocation2 + $0xa0] sm:$0xf] }
  0xd0   : > { %v1138_v52 = vsel %vm21459_vm7, %v1133_v42, %v1137_v35  ;;  %v1165_v28 = vrot.slane %v1163_v19, 4  ;;  %v1171_v13 = vrot.slane %v1169_v50, 5  ;;  %v17133_v20 = vrot.slane %v3412_v34, 9  ;;  %v2686_v11 = vld [vmem:[#allocation2 + $0xa4] sm:$0x1] }
  0xd1   : > { %v1143_v0 = vrot.slane %v1142_v51, 4  ;;  %v1156_v15 = vor.u32 %v1155_v58, %v1152_v47  ;;  %v3538_v49 = vrot.slane %v2679_v43, 5  ;;  %v3541_v60 = vrot.slane %v2680_v21, 5  ;;  %v2688_v29 = vld [vmem:[#allocation2 + $0xac] sm:$0xf] }
  0xd2   : > { %v1166_v26 = vor.u32 %v1165_v28, %v1161_v59  ;;  %v3535_v61 = vsel %vm21739_vm14, %v3533_v9, %v3534_v10  ;;  %v17134_v17 = vrot.slane %v3413_v16, 9  ;;  %v3545_v2 = vrot.slane %v2682_v57, 5  ;;  %v3415_v18 = vld [vmem:[#allocation2 + $0xa8] sm:$0xe]  ;;  %v287_v62 = vld [vmem:[%s21442_s10 + $0x78] sm:$0xf] }
  0xd3   : > { %v1148_v6 = vsel %vm21459_vm7, %v1143_v0, %v1147_v38  ;;  %v1157_v4 = vrot.slane %v1156_v15, 4  ;;  %v17156_v45 = vcombine.low %v3532_v54, %v3535_v61  ;;  %v3539_v34 = vsel %vm21739_vm14, %v17133_v20, %v3538_v49  ;;  %v2689_v54 = vld [vmem:[#allocation2 + $0xb0] sm:$0x1]  ;;  %v2691_v21 = vld [vmem:[#allocation2 + $0xb8] sm:$0xf] }
  0xd4   : > { %v16917_v1 = vcombine.low %v1138_v52, %v1148_v6  ;;  %v1167_v8 = vrot.slane %v1166_v26, 4  ;;  %v3540_v35 = vrot.slane %v3538_v49, 4  ;;  %v3546_v36 = vsel %vm21739_vm14, %v17134_v17, %v3545_v2  ;;  %v3416_v28 = vld [vmem:[#allocation2 + $0xb4] sm:$0xe]  ;;  %v288_v15 = vld [vmem:[%s21442_s10 + $0x7c] sm:$0xf] }
  0xd5   : > { %v3547_v38 = vrot.slane %v3545_v2, 4  ;;  %v1162_v10 = vsel %vm21459_vm7, %v1157_v4, %v1161_v59  ;;  %19324 = vmatmul.mubr.msk.bf16.gmra.mrb[16].mxu0 %vm1254_vm10, %v17156_v45  ;;  %v3548_v42 = vrot.slane %v2683_v55, 5  ;;  %v17135_v37 = vrot.slane %v3414_v14, 9  ;;  %v2692_v59 = vld [vmem:[#allocation2 + $0xbc] sm:$0x1] }
  0xd6   : > { %19135 = vmatprep.mubr.msk.bf16.mxu1 %vm1254_vm10, %v16917_v1  ;;  %v1172_v43 = vsel %vm21459_vm7, %v1167_v8, %v1171_v13  ;;  %v3542_v51 = vsel %vm21739_vm14, %v3540_v35, %v3541_v60  ;;  %v3552_v47 = vrot.slane %v2685_v53, 5  ;;  %v3555_v50 = vrot.slane %v2686_v11, 5  ;;  %v21189_v23 = vld [vmem:[#allocation2 + $0xc] sm:$0xf]  ;;  %v22042_v1 = vld [vmem:[#allocation2 + $0x10] sm:$0xf] }
  0xd7   : > { %v16918_v19 = vcombine.low %v1162_v10, %v1172_v43  ;;  %v17157_v57 = vcombine.low %v3539_v34, %v3542_v51  ;;  %v3549_v52 = vsel %vm21739_vm14, %v3547_v38, %v3548_v42  ;;  %v3559_v58 = vrot.slane %v2688_v29, 5  ;;  %v21191_v53 = vld [vmem:[#allocation2 + $0x18] sm:$0xf]  ;;  %v22045_v11 = vld [vmem:[#allocation2 + $0x1c] sm:$0xf]  ;;  %v20984_v38 = vld [vmem:[%s26996_s1 + $0x48] sm:$0xff]  }
  0xd8   : > { %v3553_v16 = vsel %vm21739_vm14, %v17135_v37, %v3552_v47  ;;  %v3554_v0 = vrot.slane %v3552_v47, 4  ;;  %v17158_v13 = vcombine.low %v3546_v36, %v3549_v52  ;;  %v17136_v9 = vrot.slane %v3415_v18, 9  ;;  %v723_v36 = vld [vmem:[#allocation2 + $0xc0] sm:$0xf] }
  0xd9   : > { %19136 = vmatmul.mubr.msk.bf16.gmra.mrb[28].mxu1 %vm1254_vm10, %v16918_v19  ;;  %19327 = vmatprep.mubr.msk.bf16.mxu0 %vm1254_vm10, %v17157_v57  ;;  %v3562_v20 = vrot.slane %v2689_v54, 5  ;;  %v3566_v55 = vrot.slane %v2691_v21, 5  ;;  %v3561_v49 = vrot.slane %v3559_v58, 4  ;;  %v548_v60 = vshrl.u32 %v287_v62, 16 }
  0xda   : > { %19147 = vmatprep.mubr.msk.bf16.mxu1 %vm1254_vm10, %v16939_v30  ;;  %v3556_v26 = vsel %vm21739_vm14, %v3554_v0, %v3555_v50  ;;  %v551_v6 = vshll.u32 %v287_v62, 16  ;;  %v17137_v17 = vrot.slane %v3416_v28, 9  ;;  %v3569_v14 = vrot.slane %v2692_v59, 5  ;;  %v727_v62 = vld [vmem:[#allocation2 + $0xc8] sm:$0x1]  ;;  %v21193_v50 = vld [vmem:[%s26996_s1 + $0x40] sm:$0xff]  }
  0xdb   : > { %v17159_v61 = vcombine.low %v3553_v16, %v3556_v26  ;;  %v3568_v2 = vrot.slane %v3566_v55, 4  ;;  %v16940_v30 = vcombine.low %v21189_v23, %v22042_v1  ;;  %v550_v4 = vrot.slane %v548_v60, 7  ;;  %v21194_v59 = vld [vmem:[#allocation2 + $0x24] sm:$0xf]  ;;  %v22076_v28 = vld [vmem:[#allocation2 + $0x28] sm:$0xf] }
  0xdc   : > { %v556_v8 = vshrl.u32 %v288_v15, 16  ;;  %v559_v45 = vshll.u32 %v288_v15, 16  ;;  %v16941_v34 = vcombine.low %v21191_v53, %v22045_v11  ;;  %v3560_v35 = vsel %vm21739_vm14, %v17136_v9, %v3559_v58  ;;  %v20986_v58 = vld [vmem:[%s26996_s1 + $0x50] sm:$0xff]   ;;  %v22092_v60 = vld [vmem:[%s26996_s1 + $0x60] sm:$0xff]   ;;  %v21200_v23 = vld [vmem:[#allocation2 + $0x48] sm:$0xf] }
  0xdd   : > { %19328 = vmatmul.mubr.msk.bf16.gmra.mrb[20].mxu0 %vm1254_vm10, %v17158_v13  ;;  %v3563_v29 = vsel %vm21739_vm14, %v3561_v49, %v3562_v20  ;;  %v553_v10 = vor.u32 %v551_v6, %v550_v4  ;;  %v554_v43 = vrot.slane %v550_v4, 4  ;;  %v3567_v37 = vsel %vm21739_vm14, %v17137_v17, %v3566_v55  ;;  %v21196_v0 = vld [vmem:[#allocation2 + $0x30] sm:$0xf]  ;;  %v22079_v13 = vld [vmem:[#allocation2 + $0x34] sm:$0xf]  ;;  %v20992_v20 = vld [vmem:[%s26996_s1 + $0x58] sm:$0xff]  }
  0xde   : > { %19331 = vmatprep.mubr.msk.bf16.mxu0 %vm1254_vm10, %v17159_v61  ;;  %v558_v42 = vrot.slane %v556_v8, 7  ;;  %v3570_v18 = vsel %vm21739_vm14, %v3568_v2, %v3569_v14  ;;  %v17160_v54 = vcombine.low %v3560_v35, %v3563_v29  ;;  %v16942_v16 = vcombine.low %v21194_v59, %v22076_v28  ;;  %v21198_v17 = vld [vmem:[#allocation2 + $0x3c] sm:$0xf]  ;;  %v22094_v2 = vld [vmem:[#allocation2 + $0x40] sm:$0xf] }
  0xdf   : > { %v724_v47 = vsel %vm21469_vm9, %v553_v10, %v723_v36  ;;  %v17161_v21 = vcombine.low %v3567_v37, %v3570_v18  ;;  %v16943_v9 = vcombine.low %v21196_v0, %v22079_v13  ;;  %v16944_v14 = vcombine.low %v21198_v17, %v22094_v2  ;;  %v21202_v36 = vld [vmem:[#allocation2 + $0x54] sm:$0xf]  ;;  %v21204_v10 = vld [vmem:[#allocation2 + $0x60] sm:$0xf]  ;;  %v20989_v37 = vld [vmem:[#allocation2 + $0x24] sm:$0xff]  }
  0xe0   : > { %v561_v19 = vor.u32 %v559_v45, %v558_v42  ;;  %v563_v51 = vrot.slane %v558_v42, 4  ;;  %725 = vst [vmem:[#allocation2 + $0xc0] sm:$0xf] %v724_v47  ;;  %v20990_v18 = vld [vmem:[#allocation2 + $0x30] sm:$0xff]   ;;  %v1778_v0 = vld [vmem:[#allocation2 + $0xc] sm:$0xe]  ;;  %v16951_v17 = vcombine.low %v21915_v46, %v21904_v48 }
  0xe1   : > { %19148 = vmatmul.mubr.msk.bf16.vlgmr.msra.gmra.mrb[0].mxu1 %vm1254_vm10, %v16940_v30  ;;  %v22097_v30 = vld [vmem:[#allocation2 + $0x4c] sm:$0xf]  ;;  %v21210_v46 = vld [vmem:[#allocation2 + $0x20] sm:$0x1] }
  0xe2   : > { %19180 = vmatpush3.bf16.msra.mxu1 %v21193_v50  ;;  %19151 = vmatprep.mubr.msk.bf16.mxu1 %vm1254_vm10, %v16941_v34  ;;  %v562_v57 = vsel %vm21476_vm11, %v554_v43, %v561_v19  ;;  %v728_v52 = vsel %vm21453_vm6, %v563_v51, %v727_v62  ;;  %v16945_v4 = vcombine.low %v21200_v23, %v22097_v30  ;;  %v20987_v34 = vld [vmem:[#allocation2 + $0x18] sm:$0xff]   ;;  %v22112_v43 = vld [vmem:[#allocation2 + $0x64] sm:$0xf]  ;;  %v20994_v62 = vld [vmem:[%s26996_s1 + $0xe8] sm:$0xff]  }
  0xe3   : > { %19181 = vmatprep.subr.bf16.mxu1 %v20984_v38  ;;  %726 = vst.msk [vmem:[#allocation2 + $0xc4] sm:$0xf] %vm201_vm0, %v562_v57  ;;  %729 = vst [vmem:[#allocation2 + $0xc8] sm:$0x1] %v728_v52  ;;  %v16947_v42 = vcombine.low %v21204_v10, %v22112_v43  ;;  %v21206_v19 = vld [vmem:[#allocation2 + $0x6c] sm:$0xf] }
  0xe4   : > { %v22123_v51 = vld [vmem:[#allocation2 + $0x70] sm:$0xf]  ;;  %v1777_v50 = vld [vmem:[#allocation2] sm:$0xe]  ;;  %v1830_v57 = vrot.slane %v21997_v25, 5  ;;  %v1844_v25 = vrot.slane %v22045_v11, 5 }
  0xe5   : > { %19332 = vmatmul.mubr.msk.bf16.gmra.mrb[24].mxu0 %vm1254_vm10, %v17160_v54  ;;  %v16948_v47 = vcombine.low %v21206_v19, %v22123_v51  ;;  %v21000_v54 = vld [vmem:[%s26996_s1 + $0xf0] sm:$0xff]   ;;  %v20991_v52 = vld [vmem:[#allocation2 + $0x3c] sm:$0xff]   ;;  %v1858_v11 = vrot.slane %v22079_v13, 5  ;;  %v1847_v13 = vrot.slane %v21210_v46, 5  ;;  %v21212_v10 = vld [vmem:[#allocation2 + $0x38] sm:$0x1] }
  0xe6   : > { %19182 = vmatpush3.bf16.msra.mxu1 %v20984_v38  ;;  %19335 = vmatprep.mubr.msk.bf16.mxu0 %vm1254_vm10, %v17161_v21  ;;  %v22109_v38 = vld [vmem:[#allocation2 + $0x58] sm:$0xf]  ;;  %v16949_v21 = vcombine.low %v21848_v12, %v21856_v24  ;;  %v1832_v12 = vrot.slane %v1830_v57, 4  ;;  %v1846_v48 = vrot.slane %v1844_v25, 4 }
  0xe7   : > { %19183 = vmatprep.subr.bf16.mxu1 %v20986_v58  ;;  %v3417_v55 = vld [vmem:[#allocation2 + $0xc0] sm:$0xe]  ;;  %v16946_v29 = vcombine.low %v21202_v36, %v22109_v38  ;;  %v1779_v24 = vld [vmem:[#allocation2 + $0x18] sm:$0xe]  ;;  %v21211_v36 = vld [vmem:[#allocation2 + $0x2c] sm:$0x1] }
  0xe8   : > { %v17138_v15 = vrot.slane %v3417_v55, 9  ;;  %v1780_v55 = vld [vmem:[#allocation2 + $0x24] sm:$0xe] }
  0xe9   : > { %19152 = vmatmul.mubr.msk.bf16.gmra.mrb[4].mxu1 %vm1254_vm10, %v16942_v16  ;;  %v16975_v16 = vrot.slane %v1777_v50, 9 }
  0xea   : > { %19155 = vmatprep.mubr.msk.bf16.mxu1 %vm1254_vm10, %v16943_v9  ;;  %19184 = vmatpush3.bf16.msra.mxu1 %v20986_v58  ;;  %v2694_v26 = vld [vmem:[#allocation2 + $0xc4] sm:$0xf]  ;;  %v2695_v49 = vld [vmem:[#allocation2 + $0xc8] sm:$0x1]  ;;  %v1837_v9 = vrot.slane %v22042_v1, 5 }
  0xeb   : > { %19185 = vmatprep.subr.bf16.mxu1 %v20992_v20  ;;  %v3573_v6 = vrot.slane %v2694_v26, 5  ;;  %v3576_v61 = vrot.slane %v2695_v49, 5  ;;  %v21208_v58 = vld [vmem:[#allocation2 + $0x8] sm:$0x1]  ;;  %v1851_v49 = vrot.slane %v22076_v28, 5  ;;  %v22149_v23 = vsel %vm21739_vm14, %v16975_v16, %v1830_v57 }
  0xec   : > { %v1833_v59 = vrot.slane %v21208_v58, 5  ;;  %v1782_v1 = vld [vmem:[#allocation2 + $0x3c] sm:$0xe]  ;;  %v16977_v28 = vrot.slane %v1779_v24, 9  ;;  %v4287_v58 = vld [vmem:[#allocation2 + $0x18] sm:$0xf] }
  0xed   : > { %v3574_v8 = vsel %vm21739_vm14, %v17138_v15, %v3573_v6  ;;  %v3575_v45 = vrot.slane %v3573_v6, 4  ;;  %v21209_v15 = vld [vmem:[#allocation2 + $0x14] sm:$0x1]  ;;  %v1781_v6 = vld [vmem:[#allocation2 + $0x30] sm:$0xe]  ;;  %v1872_v16 = vrot.slane %v22097_v30, 5 }
  0xee   : > { %19186 = vmatpush3.bf16.msra.mxu1 %v20992_v20  ;;  %v21006_v20 = vld [vmem:[%s26996_s1 + $0xf8] sm:$0xff]   ;;  %v1840_v26 = vrot.slane %v21209_v15, 5  ;;  %v1784_v24 = vld [vmem:[#allocation2 + $0x54] sm:$0xe]  ;;  %v4336_v15 = vshrl.u32 %v4287_v58, 16 }
  0xef   : > { %19219 = vmatprep.subr.bf16.mxu1 %v22092_v60  ;;  %v3577_v53 = vsel %vm21739_vm14, %v3575_v45, %v3576_v61  ;;  %v16950_v61 = vcombine.low %v21864_v39, %v21871_v56  ;;  %v22155_v39 = vld [vmem:[%s26996_s1 + $0x100] sm:$0xff]   ;;  %v22159_v56 = vsel %vm21739_vm14, %v1832_v12, %v1833_v59  ;;  %v16978_v45 = vrot.slane %v1780_v55, 9 }
  0xf0   : > { %v17162_v35 = vcombine.low %v3574_v8, %v3577_v53  ;;  %v1865_v8 = vrot.slane %v22094_v2, 5  ;;  %v20995_v53 = vld [vmem:[#allocation2 + $0x54] sm:$0xff]   ;;  %v16979_v2 = vrot.slane %v1781_v6, 9  ;;  %v16999_v57 = vcombine.low %v22149_v23, %v22159_v56  ;;  %v21218_v23 = vld [vmem:[#allocation2 + $0x7c] sm:$0xf] }
  0xf1   : > { %19156 = vmatmul.mubr.msk.bf16.gmra.mrb[8].mxu1 %vm1254_vm10, %v16944_v14  ;;  %v16976_v14 = vrot.slane %v1778_v0, 9  ;;  %v22187_v59 = vsel %vm21739_vm14, %v1846_v48, %v1847_v13  ;;  %v4288_v0 = vld [vmem:[#allocation2 + $0x1c] sm:$0xf]  ;;  %v4289_v48 = vld [vmem:[#allocation2 + $0x20] sm:$0x1]  ;;  %v1900_v56 = vrot.slane %v21218_v23, 5 }
  0xf2   : > { %19159 = vmatprep.mubr.msk.bf16.mxu1 %vm1254_vm10, %v16945_v4  ;;  %19336 = vmatmul.mubr.msk.bf16.gmra.mrb[28].mxu0 %vm1254_vm10, %v17162_v35  ;;  %v1839_v4 = vrot.slane %v1837_v9, 4  ;;  %v1853_v35 = vrot.slane %v1851_v49, 4  ;;  %v1867_v50 = vrot.slane %v1865_v8, 4  ;;  %v4349_v46 = vshrl.u32 %v4288_v0, 16  ;;  %v4291_v13 = vld [vmem:[#allocation2 + $0x28] sm:$0xf] }
  0xf3   : > { %19347 = vmatprep.mubr.msk.bf16.mxu0 %vm1254_vm10, %v20987_v34  ;;  %v20996_v34 = vld [vmem:[#allocation2 + $0x60] sm:$0xff]   ;;  %v22166_v19 = vsel %vm21739_vm14, %v16976_v14, %v1837_v9 }
  0xf9   : > { %19160 = vmatmul.mubr.msk.bf16.gmra.mrb[12].mxu1 %vm1254_vm10, %v16946_v29  ;;  %v1854_v29 = vrot.slane %v21211_v36, 5 }
  0xfa   : > { %19163 = vmatprep.mubr.msk.bf16.mxu1 %vm1254_vm10, %v16947_v42  ;;  %19348 = vmatmul.mubr.msk.bf16.vlgmr.msra.gmra.mrb[0].mxu0 %vm1254_vm10, %v20989_v37  ;;  %v1861_v42 = vrot.slane %v21212_v10, 5  ;;  %v16952_v37 = vcombine.low %v21927_v63, %v21935_v32  ;;  %v16953_v63 = vcombine.low %v21975_v22, %v21986_v31  ;;  %v16954_v32 = vcombine.low %v21992_v5, %v22001_v7 }
  0xfb   : > { %19380 = vmatpush3.bf16.msra.mxu0 %v21869_v44  ;;  %19351 = vmatprep.mubr.msk.bf16.mxu0 %vm1254_vm10, %v20990_v18  ;;  %v20993_v44 = vld [vmem:[#allocation2 + $0x48] sm:$0xff]   ;;  %v1860_v18 = vrot.slane %v1858_v11, 4  ;;  %v22191_v22 = vsel %vm21739_vm14, %v16978_v45, %v1851_v49  ;;  %v22195_v31 = vsel %vm21739_vm14, %v1853_v35, %v1854_v29  ;;  %v20999_v45 = vld [vmem:[#allocation2 + $0x78] sm:$0xff]   ;;  %v1886_v29 = vrot.slane %v22112_v43, 5 }
  0xfc   : > { %19381 = vmatprep.subr.bf16.mxu0 %v20994_v62  ;;  %v21215_v35 = vld [vmem:[#allocation2 + $0x5c] sm:$0x1]  ;;  %v1893_v10 = vrot.slane %v22123_v51, 5  ;;  %v4351_v51 = vrot.slane %v4349_v46, 4 }
  0xfd   : > { %v22207_v12 = vsel %vm21739_vm14, %v1860_v18, %v1861_v42  ;;  %v1882_v36 = vrot.slane %v21215_v35, 5  ;;  %v4338_v42 = vrot.slane %v4336_v15, 4 }
  0xfe   : > { %v1895_v46 = vrot.slane %v1893_v10, 4 }
  0xff   : > { %19382 = vmatpush3.bf16.msra.mxu0 %v20994_v62  ;;  %v16980_v62 = vrot.slane %v1782_v1, 9 }
 0x100   : > { %19383 = vmatprep.subr.bf16.mxu0 %v21000_v54 }
 0x101   : > { %19164 = vmatmul.mubr.msk.bf16.gmra.mrb[16].mxu1 %vm1254_vm10, %v16948_v47  ;;  %v22170_v47 = vsel %vm21739_vm14, %v1839_v4, %v1840_v26  ;;  %v22212_v30 = vsel %vm21739_vm14, %v16980_v62, %v1865_v8  ;;  %v4339_v26 = vshll.u32 %v4287_v58, 16  ;;  %v21214_v4 = vld [vmem:[#allocation2 + $0x50] sm:$0x1]  ;;  %v1785_v8 = vld [vmem:[#allocation2 + $0x60] sm:$0xe]  ;;  %v4373_v58 = vshrl.u32 %v4291_v13, 16 }
 0x102   : > { %19167 = vmatprep.mubr.msk.bf16.mxu1 %vm1254_vm10, %v16949_v21  ;;  %19352 = vmatmul.mubr.msk.bf16.gmra.mrb[4].mxu0 %vm1254_vm10, %v20991_v52  ;;  %v22182_v52 = vsel %vm21739_vm14, %v16977_v28, %v1844_v25  ;;  %v17000_v9 = vcombine.low %v22166_v19, %v22170_v47  ;;  %v1879_v25 = vrot.slane %v22109_v38, 5  ;;  %v20997_v38 = vld [vmem:[#allocation2 + $0x6c] sm:$0xff]   ;;  %v1875_v28 = vrot.slane %v21214_v4, 5  ;;  %v22457_v19 = vld [vmem:[#allocation2 + $0x7c] sm:$0xf] }
 0x103   : > { %19355 = vmatprep.mubr.msk.bf16.mxu0 %vm1254_vm10, %v20993_v44  ;;  %19384 = vmatpush3.bf16.msra.mxu0 %v21000_v54  ;;  %v21213_v54 = vld [vmem:[#allocation2 + $0x44] sm:$0x1]  ;;  %v1783_v44 = vld [vmem:[#allocation2 + $0x48] sm:$0xe]  ;;  %v17001_v49 = vcombine.low %v22182_v52, %v22187_v59  ;;  %v4341_v18 = vrot.slane %v4339_v26, 5  ;;  %v4355_v26 = vshll.u32 %v4289_v48, 16 }
 0x104   : > { %19385 = vmatprep.subr.bf16.mxu0 %v21006_v20  ;;  %v1868_v21 = vrot.slane %v21213_v54, 5  ;;  %v16981_v1 = vrot.slane %v1783_v44, 9  ;;  %v1786_v62 = vld [vmem:[#allocation2 + $0x6c] sm:$0xe]  ;;  %v4369_v44 = vshll.u32 %v4291_v13, 16  ;;  %27116 = vst [vmem:[#allocation6_spill] sm:$0xff] %v22457_v19 }
 0x105   : > { %v4293_v4 = vld [vmem:[#allocation2 + $0x30] sm:$0xf]  ;;  %v4342_v13 = vor.u32 %v4341_v18, %v4338_v42 }
 0x106   : > { %v22216_v55 = vsel %vm21739_vm14, %v1867_v50, %v1868_v21  ;;  %v22235_v43 = vsel %vm21739_vm14, %v16981_v1, %v1872_v16  ;;  %v1888_v1 = vrot.slane %v1886_v29, 4  ;;  %v22253_v35 = vrot.slane %v4369_v44, 5 }
 0x107   : > { %19386 = vmatpush3.bf16.msra.mxu0 %v21006_v20  ;;  %v22203_v20 = vsel %vm21739_vm14, %v16979_v2, %v1858_v11  ;;  %v1874_v11 = vrot.slane %v1872_v16, 4  ;;  %v1881_v2 = vrot.slane %v1879_v25, 4  ;;  %v4384_v42 = vshrl.u32 %v4293_v4, 16 }
 0x108   : > { %19419 = vmatprep.subr.bf16.mxu0 %v22155_v39  ;;  %v4387_v18 = vshll.u32 %v4293_v4, 16  ;;  %v4343_v7 = vrot.slane %v4342_v13, 4 }
 0x109   : > { %19168 = vmatmul.mubr.msk.bf16.gmra.mrb[20].mxu1 %vm1254_vm10, %v16950_v61  ;;  %v4345_v61 = vshll.u32 %v4288_v0, 16  ;;  %v16983_v0 = vrot.slane %v1785_v8, 9  ;;  %v22248_v16 = vsel %vm21739_vm14, %v1881_v2, %v1882_v36  ;;  %v4375_v36 = vrot.slane %v4373_v58, 4  ;;  %v4296_v2 = vld [vmem:[#allocation2 + $0x3c] sm:$0xf] }
 0x10a   : > { %19171 = vmatprep.mubr.msk.bf16.mxu1 %vm1254_vm10, %v16951_v17  ;;  %19356 = vmatmul.mubr.msk.bf16.gmra.mrb[8].mxu0 %vm1254_vm10, %v20995_v53  ;;  %v4290_v17 = vld [vmem:[#allocation2 + $0x24] sm:$0xf]  ;;  %v4411_v4 = vshll.u32 %v4296_v2, 16 }
 0x10b   : > { %19359 = vmatprep.mubr.msk.bf16.mxu0 %vm1254_vm10, %v20996_v34  ;;  %v16982_v34 = vrot.slane %v1784_v24, 9  ;;  %v22230_v50 = vrot.slane %v4345_v61, 5  ;;  %v4360_v54 = vshrl.u32 %v4290_v17, 16  ;;  %v4363_v21 = vshll.u32 %v4290_v17, 16  ;;  %v21216_v24 = vld [vmem:[#allocation2 + $0x68] sm:$0x1] }
 0x10c   : > { %v1889_v15 = vrot.slane %v21216_v24, 5  ;;  %v16984_v61 = vrot.slane %v1786_v62, 9  ;;  %v21217_v17 = vld [vmem:[#allocation2 + $0x74] sm:$0x1]  ;;  %v22257_v24 = vsel %vm21739_vm14, %v16983_v0, %v1886_v29  ;;  %v4413_v6 = vrot.slane %v4411_v4, 5 }
 0x10d   : > { %v4352_v48 = vor.u32 %v4351_v51, %v22230_v50  ;;  %v21002_v62 = vld [vmem:[#allocation2 + $0x90] sm:$0xff]  }
 0x10e   : > { %v22269_v44 = vsel %vm21739_vm14, %v1888_v1, %v1889_v15  ;;  %v22277_v58 = vsel %vm21739_vm14, %v16984_v61, %v1893_v10  ;;  %v1787_v1 = vld [vmem:[#allocation2 + $0x78] sm:$0xe]  ;;  %v4389_v10 = vrot.slane %v4387_v18, 5  ;;  %v4408_v61 = vshrl.u32 %v4296_v2, 16  ;;  %v1788_v2 = vld [vmem:[#allocation2 + $0x84] sm:$0xe] }
 0x10f   : > { %v4353_v0 = vrot.slane %v4352_v48, 4  ;;  %v21005_v18 = vld [vmem:[#allocation2 + $0xa8] sm:$0xff]  }
 0x110   : > { %v4410_v14 = vrot.slane %v4408_v61, 4 }
 0x111   : > { %19172 = vmatmul.mubr.msk.bf16.gmra.mrb[24].mxu1 %vm1254_vm10, %v16952_v37  ;;  %v22239_v37 = vsel %vm21739_vm14, %v1874_v11, %v1875_v28  ;;  %v4292_v11 = vld [vmem:[#allocation2 + $0x2c] sm:$0x1]  ;;  %v21001_v28 = vld [vmem:[#allocation2 + $0x84] sm:$0xff]  }
 0x112   : > { %19175 = vmatprep.mubr.msk.bf16.mxu1 %vm1254_vm10, %v16953_v63  ;;  %19360 = vmatmul.mubr.msk.bf16.gmra.mrb[12].mxu0 %vm1254_vm10, %v20997_v38  ;;  %v22244_v63 = vsel %vm21739_vm14, %v16982_v34, %v1879_v25  ;;  %v1896_v38 = vrot.slane %v21217_v17, 5  ;;  %v4365_v25 = vrot.slane %v4363_v21, 5  ;;  %v4294_v34 = vld [vmem:[#allocation2 + $0x34] sm:$0xf]  ;;  %v22259_v17 = vrot.slane %v4355_v26, 5 }
 0x113   : > { %19363 = vmatprep.mubr.msk.bf16.mxu0 %vm1254_vm10, %v20999_v45  ;;  %v4362_v45 = vrot.slane %v4360_v54, 4  ;;  %v4297_v54 = vld [vmem:[#allocation2 + $0x40] sm:$0xf]  ;;  %v4393_v51 = vshll.u32 %v4294_v34, 16  ;;  %v4397_v29 = vshrl.u32 %v4294_v34, 16  ;;  %v4376_v26 = vor.u32 %v4375_v36, %v22253_v35 }
 0x114   : > { %v22281_v5 = vsel %vm21739_vm14, %v1895_v46, %v1896_v38  ;;  %v21004_v38 = vld [vmem:[%s26996_s1 + $0x68] sm:$0xff]   ;;  %v4417_v13 = vshll.u32 %v4297_v54, 16  ;;  %v4348_v34 = vsel %vm21459_vm7, %v4343_v7, %v22230_v50  ;;  %v16985_v36 = vrot.slane %v1787_v1, 9 }
 0x115   : > { %v4366_v15 = vor.u32 %v4365_v25, %v4362_v45  ;;  %v22289_v46 = vrot.slane %v4393_v51, 5  ;;  %v4421_v45 = vshrl.u32 %v4297_v54, 16  ;;  %v21003_v25 = vld [vmem:[#allocation2 + $0x9c] sm:$0xff]   ;;  %v4358_v23 = vsel %vm21459_vm7, %v4353_v0, %v22259_v17 }
 0x116   : > { %v1902_v21 = vrot.slane %v1900_v56, 4  ;;  %v4377_v54 = vrot.slane %v4376_v26, 4  ;;  %v22302_v1 = vrot.slane %v4417_v13, 5  ;;  %v22315_v47 = vsel %vm21739_vm14, %v16985_v36, %v1900_v56  ;;  %v4299_v56 = vld [vmem:[#allocation2 + $0x48] sm:$0xf] }
 0x117   : > { %v4367_v51 = vrot.slane %v4366_v15, 4  ;;  %v4423_v17 = vrot.slane %v4421_v45, 4  ;;  %v22321_v52 = vcombine.low %v4348_v34, %v4358_v23  ;;  %v21221_v15 = vld [vmem:[#allocation2 + $0x8c] sm:$0x1]  ;;  %v4414_v61 = vor.u32 %v4413_v6, %v4410_v14  ;;  %v21222_v36 = vld [vmem:[#allocation2 + $0x94] sm:$0xf] }
 0x118   : > { %v1910_v26 = vrot.slane %v21221_v15, 5  ;;  %v21012_v6 = vld [vmem:[%s26996_s1 + $0x78] sm:$0xff]   ;;  %v4432_v14 = vshrl.u32 %v4299_v56, 16  ;;  %v4302_v23 = vld [vmem:[#allocation2 + $0x54] sm:$0xf]  ;;  %v27117_v27 = vcombine.low %v22244_v63, %v22248_v16 }
 0x119   : > { %19176 = vmatmul.mubr.msk.bf16.gmra.mrb[28].mxu1 %vm1254_vm10, %v16954_v32  ;;  %v4379_v32 = vshll.u32 %v4292_v11, 16  ;;  %v4295_v11 = vld [vmem:[#allocation2 + $0x38] sm:$0x1]  ;;  %v4372_v59 = vsel %vm21459_vm7, %v4367_v51, %v22253_v35  ;;  %v21008_v51 = vld [vmem:[#allocation2 + $0xc0] sm:$0xff]  }
 0x11a   : > { %19187 = vmatprep.mubr.msk.bf16.mxu1 %vm1254_vm10, %v16999_v57  ;;  %19364 = vmatmul.mubr.msk.bf16.gmra.mrb[16].mxu0 %vm1254_vm10, %v21001_v28  ;;  %v4386_v57 = vrot.slane %v4384_v42, 4  ;;  %v4399_v28 = vrot.slane %v4397_v29, 4  ;;  %v21220_v29 = vld [vmem:[#allocation2 + $0x88] sm:$0xf]  ;;  %v4403_v53 = vshll.u32 %v4295_v11, 16 }
 0x11b   : > { %19367 = vmatprep.mubr.msk.bf16.mxu0 %vm1254_vm10, %v21002_v62  ;;  %v4381_v48 = vrot.slane %v4379_v32, 5  ;;  %v21219_v62 = vld [vmem:[#allocation2 + $0x80] sm:$0x1]  ;;  %v1907_v8 = vrot.slane %v21220_v29, 5  ;;  %v4298_v32 = vld [vmem:[#allocation2 + $0x44] sm:$0x1] }
 0x11c   : > { %v1903_v42 = vrot.slane %v21219_v62, 5  ;;  %v4390_v50 = vor.u32 %v4389_v10, %v4386_v57  ;;  %v4400_v7 = vor.u32 %v4399_v28, %v22289_v46  ;;  %v4427_v4 = vshll.u32 %v4298_v32, 16  ;;  %v22333_v11 = vld [vmem:[#allocation2 + $0x4c] sm:$0xf]  ;;  %v21007_v28 = vld [vmem:[#allocation2 + $0xb4] sm:$0xff]  }
 0x11d   : > { %v4382_v57 = vsel %vm21459_vm7, %v4377_v54, %v4381_v48  ;;  %v1909_v10 = vrot.slane %v1907_v8, 4  ;;  %v4405_v45 = vrot.slane %v4403_v53, 5  ;;  %v1914_v62 = vrot.slane %v21222_v36, 5  ;;  %v22353_v32 = vld [vmem:[#allocation2 + $0x50] sm:$0x1] }
 0x11e   : > { %v4391_v13 = vrot.slane %v4390_v50, 4  ;;  %v4401_v35 = vrot.slane %v4400_v7, 4  ;;  %v4435_v48 = vshll.u32 %v4299_v56, 16  ;;  %v4415_v54 = vrot.slane %v4414_v61, 4  ;;  %v21223_v15 = vld [vmem:[#allocation2 + $0xa0] sm:$0xf] }
 0x11f   : > { %v22351_v29 = vsel %vm21739_vm14, %v1909_v10, %v1910_v26  ;;  %v4429_v50 = vrot.slane %v4427_v4, 5  ;;  %v1921_v26 = vrot.slane %v21223_v15, 5  ;;  %v22364_v56 = vld [vmem:[#allocation2 + $0x58] sm:$0xf]  ;;  %v4456_v61 = vshrl.u32 %v4302_v23, 16 }
 0x120   : > { %v4437_v10 = vrot.slane %v4435_v48, 5  ;;  %v22380_v36 = vld [vmem:[#allocation2 + $0x5c] sm:$0x1]  ;;  %v22484_v16 = vld [vmem:[#allocation2 + $0x80] sm:$0x1] }
 0x121   : > { %19188 = vmatmul.mubr.msk.bf16.vlgmr.msra.gmra.mrb[0].mxu1 %vm1254_vm10, %v17000_v9  ;;  %v16986_v9 = vrot.slane %v1788_v2, 9  ;;  %v1790_v2 = vld [vmem:[#allocation2 + $0x9c] sm:$0xe]  ;;  %v1923_v48 = vrot.slane %v1921_v26, 4 }
 0x122   : > { %19220 = vmatpush3.bf16.msra.mxu1 %v22092_v60  ;;  %19191 = vmatprep.mubr.msk.bf16.mxu1 %vm1254_vm10, %v17001_v49  ;;  %v21010_v60 = vld [vmem:[%s26996_s1 + $0x70] sm:$0xff]   ;;  %v22328_v49 = vsel %vm21739_vm14, %v1902_v21, %v1903_v42  ;;  %v4424_v21 = vor.u32 %v4423_v17, %v22302_v1  ;;  %v22341_v42 = vcombine.low %v4372_v59, %v4382_v57 }
 0x123   : > { %19368 = vmatmul.mubr.msk.bf16.gmra.mrb[20].mxu0 %vm1254_vm10, %v21003_v25  ;;  %19221 = vmatprep.subr.bf16.mxu1 %v21004_v38  ;;  %v1789_v25 = vld [vmem:[#allocation2 + $0x90] sm:$0xe]  ;;  %v22345_v53 = vsel %vm21739_vm14, %v16986_v9, %v1907_v8  ;;  %v27112_v8 = vcombine.low %v22191_v22, %v22195_v31  ;;  %v4396_v17 = vsel %vm21459_vm7, %v4391_v13, %v22289_v46  ;;  %v1916_v22 = vrot.slane %v1914_v62, 4  ;;  %v21224_v46 = vld [vmem:[#allocation2 + $0x98] sm:$0x1] }
 0x124   : > { %19371 = vmatprep.mubr.msk.bf16.mxu0 %vm1254_vm10, %v21005_v18  ;;  %v4445_v18 = vshrl.u32 %v22333_v11, 16  ;;  %v16987_v7 = vrot.slane %v1789_v25, 9  ;;  %v4406_v9 = vsel %vm21459_vm7, %v4401_v35, %v4405_v45  ;;  %v4425_v59 = vrot.slane %v4424_v21, 4 }
 0x125   : > { %v27113_v57 = vcombine.low %v22203_v20, %v22207_v12  ;;  %v4434_v31 = vrot.slane %v4432_v14, 4  ;;  %v1917_v4 = vrot.slane %v21224_v46, 5  ;;  %v4459_v45 = vshll.u32 %v4302_v23, 16  ;;  %v22388_v23 = vld [vmem:[#allocation2 + $0x64] sm:$0xf] }
 0x126   : > { %19222 = vmatpush3.bf16.msra.mxu1 %v21004_v38  ;;  %v4441_v38 = vshll.u32 %v22333_v11, 16  ;;  %v4447_v35 = vrot.slane %v4445_v18, 4  ;;  %v22374_v21 = vcombine.low %v4396_v17, %v4406_v9  ;;  %v22378_v20 = vsel %vm21739_vm14, %v16987_v7, %v1914_v62  ;;  %v4305_v18 = vld [vmem:[#allocation2 + $0x60] sm:$0xf]  ;;  %v21009_v62 = vld [vmem:[#allocation2 + $0xcc] sm:$0xff]  }
 0x127   : > { %19223 = vmatprep.subr.bf16.mxu1 %v21010_v60  ;;  %v16988_v12 = vrot.slane %v1790_v2, 9  ;;  %v4430_v14 = vsel %vm21459_vm7, %v4425_v59, %v4429_v50  ;;  %v4458_v2 = vrot.slane %v4456_v61, 4  ;;  %v4465_v7 = vshll.u32 %v22364_v56, 16  ;;  %v22392_v17 = vld [vmem:[#allocation2 + $0xa8] sm:$0xe] }
 0x128   : > { %v22371_v13 = vrot.slane %v4441_v38, 5  ;;  %v4451_v38 = vshll.u32 %v22353_v32, 16  ;;  %v4461_v50 = vrot.slane %v4459_v45, 5  ;;  %v4475_v9 = vshll.u32 %v22380_v36, 16  ;;  %v4308_v59 = vld [vmem:[#allocation2 + $0x6c] sm:$0xf] }
 0x129   : > { %19192 = vmatmul.mubr.msk.bf16.gmra.mrb[4].mxu1 %vm1254_vm10, %v27112_v8  ;;  %v4469_v8 = vshrl.u32 %v22364_v56, 16  ;;  %v22408_v15 = vsel %vm21739_vm14, %v16988_v12, %v1921_v26  ;;  %v27114_v61 = vcombine.low %v22212_v30, %v22216_v55  ;;  %v4493_v26 = vshrl.u32 %v22388_v23, 16 }
 0x12a   : > { %19195 = vmatprep.mubr.msk.bf16.mxu1 %vm1254_vm10, %v27113_v57  ;;  %19224 = vmatpush3.bf16.msra.mxu1 %v21010_v60  ;;  %v21225_v60 = vld [vmem:[#allocation2 + $0xa4] sm:$0x1]  ;;  %v4480_v57 = vshrl.u32 %v4305_v18, 16  ;;  %v27115_v45 = vcombine.low %v22235_v43, %v22239_v37  ;;  %v16989_v55 = vrot.slane %v22392_v17, 9  ;;  %v22438_v43 = vld [vmem:[#allocation2 + $0x68] sm:$0x1] }
 0x12b   : > { %19372 = vmatmul.mubr.msk.bf16.gmra.mrb[24].mxu0 %vm1254_vm10, %v21007_v28  ;;  %19225 = vmatprep.subr.bf16.mxu1 %v21012_v6  ;;  %v1924_v25 = vrot.slane %v21225_v60, 5  ;;  %v4420_v28 = vsel %vm21459_vm7, %v4415_v54, %v22302_v1  ;;  %v22396_v1 = vsel %vm21739_vm14, %v1916_v22, %v1917_v4  ;;  %v4448_v54 = vor.u32 %v4447_v35, %v22371_v13 }
 0x12c   : > { %19375 = vmatprep.mubr.msk.bf16.mxu0 %vm1254_vm10, %v21008_v51  ;;  %v4438_v51 = vor.u32 %v4437_v10, %v4434_v31  ;;  %v4483_v22 = vshll.u32 %v4305_v18, 16  ;;  %v4489_v31 = vshll.u32 %v22388_v23, 16  ;;  %v22411_v10 = vld [vmem:[#allocation2 + $0x70] sm:$0xf]  ;;  %v22417_v46 = vcombine.low %v4420_v28, %v4430_v14  ;;  %v22434_v18 = vld [vmem:[#allocation2 + $0xb4] sm:$0xe] }
 0x12d   : > { %v22421_v4 = vsel %vm21739_vm14, %v1923_v48, %v1924_v25  ;;  %v4453_v35 = vrot.slane %v4451_v38, 5  ;;  %v22428_v60 = vrot.slane %v4465_v7, 5  ;;  %v4471_v30 = vrot.slane %v4469_v8, 4  ;;  %v21227_v48 = vld [vmem:[#allocation2 + $0xac] sm:$0xf] }
 0x12e   : > { %19226 = vmatpush3.bf16.msra.mxu1 %v21012_v6  ;;  %v22403_v6 = vld [vmem:[%s26996_s1 + $0x80] sm:$0xff]   ;;  %v4439_v12 = vrot.slane %v4438_v51, 4  ;;  %v4449_v28 = vrot.slane %v4448_v54, 4  ;;  %v4462_v14 = vor.u32 %v4461_v50, %v4458_v2  ;;  %v22432_v25 = vrot.slane %v4475_v9, 5  ;;  %v4311_v50 = vld [vmem:[#allocation2 + $0x78] sm:$0xf] }
 0x12f   : > { %20179 = vmatprep.subr.bf16.mxu1 %v22403_v6  ;;  %v1928_v38 = vrot.slane %v21227_v48, 5  ;;  %v4482_v37 = vrot.slane %v4480_v57, 4  ;;  %v4485_v51 = vrot.slane %v4483_v22, 5  ;;  %v22440_v7 = vrot.slane %v4489_v31, 5  ;;  %v22448_v57 = vld [vmem:[#allocation2 + $0xb8] sm:$0xf] }
 0x130   : > { %v4504_v8 = vshrl.u32 %v4308_v59, 16  ;;  %v4495_v17 = vrot.slane %v4493_v26, 4  ;;  %v4513_v2 = vshll.u32 %v22411_v10, 16  ;;  %v4517_v54 = vshrl.u32 %v22411_v10, 16  ;;  %v22451_v31 = vld [vmem:[#allocation2 + $0x74] sm:$0x1] }
 0x131   : > { %19196 = vmatmul.mubr.msk.bf16.gmra.mrb[8].mxu1 %vm1254_vm10, %v27114_v61  ;;  %v4444_v9 = vsel %vm21459_vm7, %v4439_v12, %v22371_v13  ;;  %v21228_v61 = vld [vmem:[#allocation2 + $0xb0] sm:$0x1]  ;;  %v1930_v26 = vrot.slane %v1928_v38, 4  ;;  %v4499_v34 = vshll.u32 %v22438_v43, 16  ;;  %v4314_v13 = vld [vmem:[#allocation2 + $0x84] sm:$0xf]  ;;  %v4486_v22 = vor.u32 %v4485_v51, %v4482_v37 }
 0x132   : > { %19199 = vmatprep.mubr.msk.bf16.mxu1 %vm1254_vm10, %v27115_v45  ;;  %v1931_v45 = vrot.slane %v21228_v61, 5  ;;  %v22459_v12 = vrot.slane %v4462_v14, 4  ;;  %v4506_v0 = vrot.slane %v4504_v8, 4  ;;  %v22472_v14 = vrot.slane %v4513_v2, 5 }
 0x133   : > { %19376 = vmatmul.mubr.msk.bf16.gmra.mrb[28].mxu0 %vm1254_vm10, %v21009_v62  ;;  %v4507_v62 = vshll.u32 %v4308_v59, 16  ;;  %v4454_v59 = vsel %vm21459_vm7, %v4449_v28, %v4453_v35  ;;  %v21013_v35 = vld [vmem:[%s26996_s1 + $0x108] sm:$0xff]   ;;  %v4496_v28 = vor.u32 %v4495_v17, %v22440_v7  ;;  %v4519_v41 = vrot.slane %v4517_v54, 4  ;;  %v21016_v54 = vld [vmem:[%s26996_s1 + $0x110] sm:$0xff]  }
 0x134   : > { %19387 = vmatprep.mubr.msk.bf16.mxu0 %vm1254_vm10, %v22321_v52  ;;  %v4472_v52 = vor.u32 %v4471_v30, %v22428_v60  ;;  %v22461_v30 = vld [vmem:[#allocation2 + $0xbc] sm:$0x1]  ;;  %v27118_v61 = vcombine.low %v22257_v24, %v22269_v44  ;;  %v27119_v63 = vrot.slane %v22448_v57, 5  ;;  %v4528_v51 = vshrl.u32 %v4311_v50, 16  ;;  %v22486_v17 = vld [vmem:[#allocation2 + $0x88] sm:$0xf] }
 0x135   : > { %v4509_v48 = vrot.slane %v4507_v62, 5  ;;  %v4531_v8 = vshll.u32 %v4311_v50, 16  ;;  %v17239_v62 = vcombine.low %v4444_v9, %v4454_v59  ;;  %v22492_v24 = vsel %vm21739_vm14, %v16989_v55, %v1928_v38 }
 0x136   : > { %v22478_v37 = vrot.slane %v4472_v52, 4  ;;  %v22494_v44 = vrot.slane %v4499_v34, 5  ;;  %v4523_v2 = vshll.u32 %v22451_v31, 16  ;;  %v4541_v50 = vshrl.u32 %v22457_v19, 16 }
 0x137   : > { %v4552_v9 = vshrl.u32 %v4314_v13, 16  ;;  %v4555_v55 = vshll.u32 %v4314_v13, 16  ;;  %v4487_v34 = vrot.slane %v4486_v22, 4  ;;  %v4497_v38 = vrot.slane %v4496_v28, 4  ;;  %v22519_v22 = vld [vmem:[#allocation2 + $0x8c] sm:$0x1] }
 0x138   : > { %v4510_v52 = vor.u32 %v4509_v48, %v4506_v0  ;;  %v4520_v59 = vor.u32 %v4519_v41, %v22472_v14  ;;  %v4533_v40 = vrot.slane %v4531_v8, 5  ;;  %v22516_v13 = vrot.slane %v4523_v2, 5 }
 0x139   : > { %19200 = vmatmul.mubr.msk.bf16.gmra.mrb[12].mxu1 %vm1254_vm10, %v27117_v27  ;;  %v22482_v27 = vrot.slane %v27119_v63, 4  ;;  %v4530_v63 = vrot.slane %v4528_v51, 4  ;;  %v4547_v0 = vshll.u32 %v22484_v16, 16  ;;  %v4561_v41 = vshll.u32 %v22486_v17, 16 }
 0x13a   : > { %19203 = vmatprep.mubr.msk.bf16.mxu1 %vm1254_vm10, %v27118_v61  ;;  %v4317_v61 = vld [vmem:[#allocation2 + $0x90] sm:$0xf]  ;;  %v4565_v48 = vshrl.u32 %v22486_v17, 16  ;;  %v4557_v28 = vrot.slane %v4555_v55, 5  ;;  %v27120_v51 = vcombine.low %v22277_v58, %v22281_v5  ;;  %v4478_v8 = vsel %vm21459_vm7, %v22478_v37, %v22432_v25  ;;  %v22550_v37 = vld [vmem:[#allocation2 + $0x98] sm:$0x1] }
 0x13b   : > { %19388 = vmatmul.mubr.msk.bf16.vlgmr.msra.gmra.mrb[0].mxu0 %vm1254_vm10, %v22341_v42  ;;  %v4537_v42 = vshll.u32 %v22457_v19, 16  ;;  %v22514_v19 = vld [vmem:[#allocation2 + $0x94] sm:$0xf]  ;;  %v4492_v2 = vsel %vm21459_vm7, %v4487_v34, %v22440_v7  ;;  %v4502_v58 = vsel %vm21459_vm7, %v4497_v38, %v22494_v44  ;;  %v4534_v5 = vor.u32 %v4533_v40, %v4530_v63  ;;  %v22565_v63 = vld [vmem:[#allocation2 + $0xa0] sm:$0xf] }
 0x13c   : > { %19420 = vmatpush3.bf16.msra.mxu0 %v22155_v39  ;;  %19391 = vmatprep.mubr.msk.bf16.mxu0 %vm1254_vm10, %v22374_v21  ;;  %v4468_v39 = vsel %vm21459_vm7, %v22459_v12, %v22428_v60  ;;  %v22512_v21 = vsel %vm21739_vm14, %v1930_v26, %v1931_v45  ;;  %v21021_v60 = vld [vmem:[%s26996_s1 + $0x118] sm:$0xff]   ;;  %v4543_v26 = vrot.slane %v4541_v50, 4  ;;  %v4554_v12 = vrot.slane %v4552_v9, 4 }
 0x13d   : > { %19421 = vmatprep.subr.bf16.mxu0 %v21013_v35  ;;  %v22526_v45 = vrot.slane %v4537_v42, 5  ;;  %v4521_v42 = vrot.slane %v4520_v59, 4  ;;  %v27121_v50 = vcombine.low %v22315_v47, %v22328_v49  ;;  %v4576_v9 = vshrl.u32 %v4317_v61, 16 }
 0x13e   : > { %v4579_v55 = vshll.u32 %v4317_v61, 16  ;;  %v22548_v25 = vrot.slane %v4561_v41, 5  ;;  %v4567_v7 = vrot.slane %v4565_v48, 4  ;;  %v4585_v34 = vshll.u32 %v22514_v19, 16 }
 0x13f   : > { %v4589_v47 = vshrl.u32 %v22514_v19, 16  ;;  %v4544_v49 = vor.u32 %v4543_v26, %v22526_v45  ;;  %v4549_v44 = vrot.slane %v4547_v0, 5  ;;  %v4558_v40 = vor.u32 %v4557_v28, %v4554_v12  ;;  %v4323_v26 = vld [vmem:[#allocation2 + $0xa8] sm:$0xf] }
 0x140   : > { %19422 = vmatpush3.bf16.msra.mxu0 %v21013_v35  ;;  %v4511_v35 = vrot.slane %v4510_v52, 4  ;;  %v4571_v38 = vshll.u32 %v22519_v22, 16  ;;  %v4320_v52 = vld [vmem:[#allocation2 + $0x9c] sm:$0xf]  ;;  %v17011_v59 = vcombine.low %v22378_v20, %v22396_v1  ;;  %v17012_v61 = vcombine.low %v22408_v15, %v22421_v4  ;;  %v22570_v1 = vld [vmem:[#allocation2 + $0xac] sm:$0xf] }
 0x141   : > { %19204 = vmatmul.mubr.msk.bf16.gmra.mrb[16].mxu1 %vm1254_vm10, %v27120_v51  ;;  %19423 = vmatprep.subr.bf16.mxu0 %v21016_v54  ;;  %v17240_v0 = vcombine.low %v4468_v39, %v4478_v8  ;;  %v17241_v41 = vcombine.low %v4492_v2, %v4502_v58  ;;  %v4578_v48 = vrot.slane %v4576_v9, 4  ;;  %v4535_v12 = vrot.slane %v4534_v5, 4  ;;  %v22593_v5 = vld [vmem:[#allocation2 + $0xa4] sm:$0x1] }
 0x142   : > { %19207 = vmatprep.mubr.msk.bf16.mxu1 %vm1254_vm10, %v27121_v50  ;;  %v4591_v20 = vrot.slane %v4589_v47, 4  ;;  %v4545_v15 = vrot.slane %v4544_v49, 4  ;;  %v22572_v4 = vrot.slane %v4558_v40, 4  ;;  %v4516_v39 = vsel %vm21459_vm7, %v4511_v35, %v22472_v14 }
 0x143   : > { %19392 = vmatmul.mubr.msk.bf16.gmra.mrb[4].mxu0 %vm1254_vm10, %v22417_v46  ;;  %v17010_v46 = vcombine.low %v22345_v53, %v22351_v29  ;;  %v4568_v53 = vor.u32 %v4567_v7, %v22548_v25  ;;  %v22568_v29 = vrot.slane %v4585_v34, 5  ;;  %v4526_v28 = vsel %vm21459_vm7, %v4521_v42, %v22516_v13 }
 0x144   : > { %19395 = vmatprep.mubr.msk.bf16.mxu0 %vm1254_vm10, %v17239_v62  ;;  %19424 = vmatpush3.bf16.msra.mxu0 %v21016_v54  ;;  %v17013_v62 = vcombine.low %v22492_v24, %v22512_v21  ;;  %v4581_v54 = vrot.slane %v4579_v55, 5  ;;  %v22574_v24 = vrot.slane %v4571_v38, 5  ;;  %v4595_v21 = vshll.u32 %v22550_v37, 16 }
 0x145   : > { %19425 = vmatprep.subr.bf16.mxu0 %v21021_v60  ;;  %v4600_v51 = vshrl.u32 %v4320_v52, 16  ;;  %v4603_v8 = vshll.u32 %v4320_v52, 16  ;;  %v27122_v2 = vrot.slane %v22448_v57, 5  ;;  %v27123_v50 = vrot.slane %v22434_v18, 9  ;;  %v4326_v52 = vld [vmem:[#allocation2 + $0xb4] sm:$0xf] }
 0x146   : > { %v4582_v58 = vor.u32 %v4581_v54, %v4578_v48  ;;  %v4609_v14 = vshll.u32 %v22565_v63, 16  ;;  %v4613_v35 = vshrl.u32 %v22565_v63, 16  ;;  %v4569_v13 = vrot.slane %v4568_v53, 4 }
 0x147   : > { %v4592_v42 = vor.u32 %v4591_v20, %v22568_v29  ;;  %v4624_v9 = vshrl.u32 %v4323_v26, 16  ;;  %v4627_v57 = vshll.u32 %v4323_v26, 16  ;;  %v27124_v18 = vrot.slane %v22461_v30, 5 }
 0x148   : > { %19426 = vmatpush3.bf16.msra.mxu0 %v21021_v60  ;;  %v22591_v60 = vsel %vm21739_vm14, %v27123_v50, %v27122_v2  ;;  %v17242_v7 = vcombine.low %v4516_v39, %v4526_v28  ;;  %v4633_v34 = vshll.u32 %v22570_v1, 16  ;;  %v4637_v47 = vshrl.u32 %v22570_v1, 16  ;;  %v22631_v39 = vld [vmem:[#allocation2 + $0xb0] sm:$0x1]  ;;  %v4329_v28 = vld [vmem:[#allocation2 + $0xc0] sm:$0xf] }
 0x149   : > { %19208 = vmatmul.mubr.msk.bf16.gmra.mrb[20].mxu1 %vm1254_vm10, %v17010_v46  ;;  %v22604_v55 = vsel %vm21739_vm14, %v22482_v27, %v27124_v18  ;;  %v4540_v49 = vsel %vm21459_vm7, %v4535_v12, %v22526_v45  ;;  %v4550_v40 = vsel %vm21459_vm7, %v4545_v15, %v4549_v44  ;;  %v4597_v30 = vrot.slane %v4595_v21, 5  ;;  %v22635_v50 = vld [vmem:[#allocation2 + $0xc4] sm:$0xf] }
 0x14a   : > { %19211 = vmatprep.mubr.msk.bf16.mxu1 %vm1254_vm10, %v17011_v59  ;;  %v4602_v38 = vrot.slane %v4600_v51, 4  ;;  %v4583_v46 = vrot.slane %v4582_v58, 4  ;;  %v4605_v27 = vrot.slane %v4603_v8, 5  ;;  %v22614_v59 = vrot.slane %v4609_v14, 5 }
 0x14b   : > { %19396 = vmatmul.mubr.msk.bf16.gmra.mrb[8].mxu0 %vm1254_vm10, %v17240_v0  ;;  %v4615_v0 = vrot.slane %v4613_v35, 4  ;;  %v4593_v48 = vrot.slane %v4592_v42, 4  ;;  %v4619_v54 = vshll.u32 %v22593_v5, 16  ;;  %v4626_v26 = vrot.slane %v4624_v9, 4  ;;  %v22648_v42 = vld [vmem:[#allocation2 + $0xbc] sm:$0x1] }
 0x14c   : > { %19399 = vmatprep.mubr.msk.bf16.mxu0 %vm1254_vm10, %v17241_v41  ;;  %v22616_v41 = vld [vmem:[#allocation2 + $0xb8] sm:$0xf]  ;;  %v4629_v53 = vrot.slane %v4627_v57, 5  ;;  %v17243_v20 = vcombine.low %v4540_v49, %v4550_v40  ;;  %v22619_v45 = vrot.slane %v4633_v34, 5  ;;  %v4639_v12 = vrot.slane %v4637_v47, 4 }
 0x14d   : > { %v17014_v44 = vcombine.low %v22591_v60, %v22604_v55  ;;  %v4564_v15 = vsel %vm21459_vm7, %v22572_v4, %v22548_v25  ;;  %v4574_v21 = vsel %vm21459_vm7, %v4569_v13, %v22574_v24  ;;  %v4606_v51 = vor.u32 %v4605_v27, %v4602_v38  ;;  %v21014_v60 = vld [vmem:[#allocation2 + $0xc] sm:$0xff]  }
 0x14e   : > { %v4648_v8 = vshrl.u32 %v4326_v52, 16  ;;  %v4651_v2 = vshll.u32 %v4326_v52, 16  ;;  %v4588_v25 = vsel %vm21459_vm7, %v4583_v46, %v22568_v29  ;;  %v4598_v4 = vsel %vm21459_vm7, %v4593_v48, %v4597_v30  ;;  %v4332_v55 = vld [vmem:[#allocation2 + $0xcc] sm:$0xf]  ;;  %v22654_v46 = vld [vmem:[#allocation2 + $0xd0] sm:$0xf] }
 0x14f   : > { %v4657_v24 = vshll.u32 %v22616_v41, 16  ;;  %v4621_v58 = vrot.slane %v4619_v54, 5  ;;  %v4630_v14 = vor.u32 %v4629_v53, %v4626_v26  ;;  %v4640_v35 = vor.u32 %v4639_v12, %v22619_v45  ;;  %v22657_v26 = vld [vmem:[#allocation2 + $0xc8] sm:$0x1] }
 0x150   : > { %v4643_v13 = vshll.u32 %v22631_v39, 16  ;;  %v4672_v9 = vshrl.u32 %v4329_v28, 16  ;;  %v4675_v29 = vshll.u32 %v4329_v28, 16  ;;  %v4681_v57 = vshll.u32 %v22635_v50, 16 }
 0x151   : > { %19212 = vmatmul.mubr.msk.bf16.gmra.mrb[24].mxu1 %vm1254_vm10, %v17012_v61  ;;  %v4616_v61 = vor.u32 %v4615_v0, %v22614_v59  ;;  %v4685_v18 = vshrl.u32 %v22635_v50, 16  ;;  %v4650_v47 = vrot.slane %v4648_v8, 4  ;;  %v4653_v49 = vrot.slane %v4651_v2, 5 }
 0x152   : > { %19215 = vmatprep.mubr.msk.bf16.mxu1 %vm1254_vm10, %v17013_v62  ;;  %v4661_v62 = vshrl.u32 %v22616_v41, 16  ;;  %v17244_v40 = vcombine.low %v4564_v15, %v4574_v21  ;;  %v17245_v30 = vcombine.low %v4588_v25, %v4598_v4  ;;  %v22652_v38 = vrot.slane %v4657_v24, 5 }
 0x153   : > { %19400 = vmatmul.mubr.msk.bf16.gmra.mrb[12].mxu0 %vm1254_vm10, %v17242_v7  ;;  %v4607_v7 = vrot.slane %v4606_v51, 4  ;;  %v4617_v34 = vrot.slane %v4616_v61, 4  ;;  %v4631_v27 = vrot.slane %v4630_v14, 4  ;;  %v4641_v0 = vrot.slane %v4640_v35, 4  ;;  %v21017_v14 = vld [vmem:[#allocation2 + $0x24] sm:$0xff]  }
 0x154   : > { %19403 = vmatprep.mubr.msk.bf16.mxu0 %vm1254_vm10, %v17243_v20  ;;  %v4663_v52 = vrot.slane %v4661_v62, 4  ;;  %v4645_v48 = vrot.slane %v4643_v13, 5  ;;  %v4667_v54 = vshll.u32 %v22648_v42, 16  ;;  %v4674_v53 = vrot.slane %v4672_v9, 4 }
 0x155   : > { %v4677_v20 = vrot.slane %v4675_v29, 5  ;;  %v4683_v12 = vrot.slane %v4681_v57, 5  ;;  %v4687_v28 = vrot.slane %v4685_v18, 4  ;;  %v4696_v15 = vshrl.u32 %v4332_v55, 16  ;;  %v22677_v18 = vld [vmem:[#allocation2 + $0xd4] sm:$0x1] }
 0x156   : > { %v4699_v21 = vshll.u32 %v4332_v55, 16  ;;  %v4612_v51 = vsel %vm21459_vm7, %v4607_v7, %v22614_v59  ;;  %v4622_v61 = vsel %vm21459_vm7, %v4617_v34, %v4621_v58  ;;  %v4654_v8 = vor.u32 %v4653_v49, %v4650_v47  ;;  %v21015_v59 = vld [vmem:[#allocation2 + $0x18] sm:$0xff]  }
 0x157   : > { %v4636_v2 = vsel %vm21459_vm7, %v4631_v27, %v22619_v45  ;;  %v4646_v25 = vsel %vm21459_vm7, %v4641_v0, %v4645_v48  ;;  %v4705_v4 = vshll.u32 %v22654_v46, 16  ;;  %v4709_v24 = vshrl.u32 %v22654_v46, 16 }
 0x158   : > { %v4678_v62 = vor.u32 %v4677_v20, %v4674_v53  ;;  %v4691_v58 = vshll.u32 %v22657_v26, 16  ;;  %v17246_v35 = vcombine.low %v4612_v51, %v4622_v61  ;;  %v17247_v13 = vcombine.low %v4636_v2, %v4646_v25  ;;  %v21018_v53 = vld [vmem:[#allocation2 + $0x30] sm:$0xff]   ;;  %v21019_v20 = vld [vmem:[#allocation2 + $0x3c] sm:$0xff]   ;;  %v5042_v25 = vld [vmem:[#allocation2 + $0x24] sm:$0xe] }
 0x159   : > { %19216 = vmatmul.mubr.msk.bf16.gmra.mrb[28].mxu1 %vm1254_vm10, %v17014_v44  ;;  %v4664_v44 = vor.u32 %v4663_v52, %v22652_v38  ;;  %v4655_v9 = vrot.slane %v4654_v8, 4  ;;  %v4669_v57 = vrot.slane %v4667_v54, 5  ;;  %v4698_v45 = vrot.slane %v4696_v15, 4  ;;  %v5041_v54 = vld [vmem:[#allocation2 + $0x18] sm:$0xe] }
 0x15a   : > { %19227 = vmatprep.mubr.msk.bf16.mxu1 %vm1254_vm10, %v21014_v60  ;;  %v4688_v60 = vor.u32 %v4687_v28, %v4683_v12  ;;  %v4701_v55 = vrot.slane %v4699_v21, 5  ;;  %v22679_v7 = vrot.slane %v4705_v4, 5  ;;  %v4711_v34 = vrot.slane %v4709_v24, 4  ;;  %v21233_v51 = vld [vmem:[#allocation2 + $0x80] sm:$0x1] }
 0x15b   : > { %19404 = vmatmul.mubr.msk.bf16.gmra.mrb[16].mxu0 %vm1254_vm10, %v17244_v40  ;;  %v4665_v29 = vrot.slane %v4664_v44, 4  ;;  %v4679_v47 = vrot.slane %v4678_v62, 4  ;;  %v4693_v40 = vrot.slane %v4691_v58, 5  ;;  %v4660_v52 = vsel %vm21459_vm7, %v4655_v9, %v22652_v38  ;;  %v21232_v38 = vld [vmem:[#allocation2 + $0x1c] sm:$0xf]  ;;  %v21234_v44 = vld [vmem:[%s26996_s1 + $0x90] sm:$0xff]  }
 0x15c   : > { %19407 = vmatprep.mubr.msk.bf16.mxu0 %vm1254_vm10, %v17245_v30  ;;  %v4689_v49 = vrot.slane %v4688_v60, 4  ;;  %v21231_v30 = vld [vmem:[%s26996_s1 + $0x88] sm:$0xff]   ;;  %v4702_v0 = vor.u32 %v4701_v55, %v4698_v45  ;;  %v4715_v48 = vshll.u32 %v22677_v18, 16  ;;  %v5107_v21 = vrot.slane %v21232_v38, 5  ;;  %v21235_v60 = vld [vmem:[#allocation2 + $0x20] sm:$0x1] }
 0x15d   : > { %v4670_v27 = vsel %vm21459_vm7, %v4665_v29, %v4669_v57  ;;  %v4684_v28 = vsel %vm21459_vm7, %v4679_v47, %v4683_v12  ;;  %v2932_v61 = vshll.u32 %v21233_v51, 16  ;;  %v17271_v2 = vrot.slane %v5041_v54, 9  ;;  %v21237_v9 = vld [vmem:[#allocation2 + $0x34] sm:$0xf]  ;;  %v22705_v57 = vld [vmem:[#allocation2 + $0x7c] sm:$0xf] }
 0x15e   : > { %v4694_v15 = vsel %vm21459_vm7, %v4689_v49, %v4693_v40  ;;  %v17248_v8 = vcombine.low %v4660_v52, %v4670_v27  ;;  %v4703_v24 = vrot.slane %v4702_v0, 4  ;;  %v4717_v12 = vrot.slane %v4715_v48, 5  ;;  %v2672_v47 = vld [vmem:[#allocation2 + $0x6c] sm:$0xf]  ;;  %v22722_v0 = vld [vmem:[#allocation2 + $0x3c] sm:$0xe] }
 0x15f   : > { %v17249_v4 = vcombine.low %v4684_v28, %v4694_v15  ;;  %v5109_v62 = vrot.slane %v5107_v21, 4  ;;  %v5110_v58 = vrot.slane %v21235_v60, 5  ;;  %v5121_v29 = vrot.slane %v21237_v9, 5  ;;  %v21020_v49 = vld [vmem:[#allocation2 + $0x48] sm:$0xff]   ;;  %v21241_v38 = vld [vmem:[#allocation2 + $0x38] sm:$0x1] }
 0x160   : > { %v2926_v45 = vshrl.u32 %v22705_v57, 16  ;;  %v22708_v55 = vrot.slane %v2932_v61, 5  ;;  %v4708_v40 = vsel %vm21459_vm7, %v4703_v24, %v22679_v7  ;;  %v5108_v52 = vsel %vm21739_vm14, %v17271_v2, %v5107_v21  ;;  %v22729_v2 = vld [vmem:[#allocation2 + $0x48] sm:$0xe] }
 0x161   : > { %19228 = vmatmul.mubr.msk.bf16.vlgmr.msra.gmra.mrb[0].mxu1 %vm1254_vm10, %v21015_v59  ;;  %v17272_v27 = vrot.slane %v5042_v25, 9  ;;  %v5111_v48 = vsel %vm21739_vm14, %v5109_v62, %v5110_v58  ;;  %v5123_v15 = vrot.slane %v5121_v29, 4  ;;  %v2889_v51 = vshrl.u32 %v2672_v47, 16  ;;  %v22742_v58 = vld [vmem:[#allocation2 + $0x44] sm:$0x1] }
 0x162   : > { %20183 = vmatpush3.bf16.msra.mxu1 %v22403_v6  ;;  %19231 = vmatprep.mubr.msk.bf16.mxu1 %vm1254_vm10, %v21017_v14  ;;  %v4712_v6 = vor.u32 %v4711_v34, %v22679_v7  ;;  %v21236_v14 = vld [vmem:[#allocation2 + $0x28] sm:$0xf]  ;;  %v21239_v34 = vld [vmem:[%s26996_s1 + $0x98] sm:$0xff]   ;;  %v5124_v7 = vrot.slane %v21241_v38, 5  ;;  %v2892_v61 = vshll.u32 %v2672_v47, 16  ;;  %v27007_v25 = vrot.slane %v22333_v11, 5 }
 0x163   : > { %19408 = vmatmul.mubr.msk.bf16.gmra.mrb[20].mxu0 %vm1254_vm10, %v17246_v35  ;;  %20180 = vmatprep.subr.bf16.mxu1 %v21231_v30  ;;  %v5114_v35 = vrot.slane %v21236_v14, 5  ;;  %v17274_v60 = vrot.slane %v22722_v0, 9  ;;  %v5131_v14 = vrot.slane %v22742_v58, 5  ;;  %v17275_v9 = vrot.slane %v22729_v2, 9  ;;  %v22760_v0 = vld [vmem:[#allocation2 + $0x6c] sm:$0xe] }
 0x164   : > { %19411 = vmatprep.mubr.msk.bf16.mxu0 %vm1254_vm10, %v17247_v13  ;;  %v4713_v59 = vrot.slane %v4712_v6, 4  ;;  %v5043_v13 = vld [vmem:[#allocation2 + $0x30] sm:$0xe]  ;;  %v21022_v6 = vld [vmem:[#allocation2 + $0x54] sm:$0xff]   ;;  %v2891_v47 = vrot.slane %v2889_v51, 4 }
 0x165   : > { %v5116_v54 = vrot.slane %v5114_v35, 4  ;;  %v17273_v28 = vrot.slane %v5043_v13, 9  ;;  %v5115_v24 = vsel %vm21739_vm14, %v17272_v27, %v5114_v35  ;;  %v22745_v13 = vld [vmem:[#allocation2 + $0x54] sm:$0xe]  ;;  %v5125_v35 = vsel %vm21739_vm14, %v5123_v15, %v5124_v7  ;;  %v21245_v38 = vld [vmem:[#allocation2 + $0x74] sm:$0x1] }
 0x166   : > { %20184 = vmatpush3.bf16.msra.mxu1 %v21231_v30  ;;  %v4718_v30 = vsel %vm21459_vm7, %v4713_v59, %v4717_v12  ;;  %v2675_v59 = vld [vmem:[#allocation2 + $0x78] sm:$0xf]  ;;  %v5142_v27 = vrot.slane %v22364_v56, 5  ;;  %v2908_v7 = vshll.u32 %v21245_v38, 16  ;;  %v27128_v56 = vrot.slane %v22388_v23, 5 }
 0x167   : > { %20181 = vmatprep.subr.bf16.mxu1 %v21234_v44  ;;  %v22739_v62 = vsel %vm21739_vm14, %v17273_v28, %v5121_v29  ;;  %v2894_v29 = vrot.slane %v2892_v61, 5  ;;  %v2913_v51 = vshrl.u32 %v2675_v59, 16  ;;  %v17276_v61 = vrot.slane %v22745_v13, 9  ;;  %v22768_v58 = vld [vmem:[#allocation2 + $0x78] sm:$0xe] }
 0x168   : > { %v17297_v15 = vcombine.low %v22739_v62, %v5125_v35  ;;  %v2916_v2 = vshll.u32 %v2675_v59, 16  ;;  %v5152_v62 = vrot.slane %v22438_v43, 5  ;;  %v17278_v13 = vrot.slane %v22760_v0, 9 }
 0x169   : > { %19232 = vmatmul.mubr.msk.bf16.gmra.mrb[4].mxu1 %vm1254_vm10, %v21018_v53  ;;  %v21240_v53 = vld [vmem:[#allocation2 + $0x2c] sm:$0x1]  ;;  %v22784_v38 = vrot.slane %v2908_v7, 5 }
 0x16a   : > { %19235 = vmatprep.mubr.msk.bf16.mxu1 %vm1254_vm10, %v21019_v20  ;;  %20185 = vmatpush3.bf16.msra.mxu1 %v21234_v44  ;;  %v5117_v20 = vrot.slane %v21240_v53, 5  ;;  %v22726_v44 = vld [vmem:[#allocation2 + $0x40] sm:$0xf] }
 0x16b   : > { %19412 = vmatmul.mubr.msk.bf16.gmra.mrb[24].mxu0 %vm1254_vm10, %v17248_v8  ;;  %20182 = vmatprep.subr.bf16.mxu1 %v21239_v34  ;;  %v17250_v8 = vcombine.low %v4708_v40, %v4718_v30  ;;  %v27008_v21 = vrot.slane %v22726_v44, 5  ;;  %v5137_v30 = vrot.slane %v27007_v25, 4  ;;  %v5056_v25 = vld [vmem:[#allocation2 + $0xcc] sm:$0xe] }
 0x16c   : > { %19415 = vmatprep.mubr.msk.bf16.mxu0 %vm1254_vm10, %v17249_v4  ;;  %v17295_v4 = vcombine.low %v5108_v52, %v5111_v48  ;;  %v5118_v12 = vsel %vm21739_vm14, %v5116_v54, %v5117_v20  ;;  %v5138_v52 = vrot.slane %v22353_v32, 5  ;;  %v27010_v48 = vrot.slane %v22411_v10, 5  ;;  %v21244_v54 = vld [vmem:[#allocation2 + $0x70] sm:$0xf] }
 0x16d   : > { %v5130_v40 = vrot.slane %v27008_v21, 4  ;;  %v2898_v53 = vshll.u32 %v21244_v54, 16  ;;  %v2902_v20 = vshrl.u32 %v21244_v54, 16  ;;  %v17296_v28 = vcombine.low %v5115_v24, %v5118_v12  ;;  %v21024_v32 = vld [vmem:[#allocation2 + $0x6c] sm:$0xff]  }
 0x16e   : > { %20186 = vmatpush3.bf16.msra.mxu1 %v21239_v34  ;;  %v22751_v34 = vld [vmem:[#allocation2 + $0x60] sm:$0xe]  ;;  %v5144_v21 = vrot.slane %v5142_v27, 4  ;;  %v5145_v24 = vrot.slane %v22380_v36, 5  ;;  %v5158_v59 = vrot.slane %v27010_v48, 4  ;;  %v2928_v48 = vrot.slane %v2926_v45, 4 }
 0x16f   : > { %v17277_v12 = vrot.slane %v22751_v34, 9  ;;  %v22782_v54 = vrot.slane %v2898_v53, 5  ;;  %v2904_v36 = vrot.slane %v2902_v20, 4  ;;  %v2915_v34 = vrot.slane %v2913_v51, 4 }
 0x170   : > { %v27126_v20 = vrot.slane %v22333_v11, 5  ;;  %v17279_v51 = vrot.slane %v22768_v58, 9  ;;  %v5139_v45 = vsel %vm21739_vm14, %v5137_v30, %v5138_v52  ;;  %v5215_v58 = vrot.slane %v22677_v18, 5 }
 0x171   : > { %19236 = vmatmul.mubr.msk.bf16.gmra.mrb[8].mxu1 %vm1254_vm10, %v21020_v49  ;;  %v21023_v49 = vld [vmem:[#allocation2 + $0x60] sm:$0xff]   ;;  %v5146_v18 = vsel %vm21739_vm14, %v5144_v21, %v5145_v24  ;;  %v2905_v52 = vor.u32 %v2904_v36, %v22782_v54 }
 0x172   : > { %19239 = vmatprep.mubr.msk.bf16.mxu1 %vm1254_vm10, %v21022_v6  ;;  %v27009_v6 = vrot.slane %v22388_v23, 5  ;;  %v5136_v7 = vsel %vm21739_vm14, %v17275_v9, %v27126_v20  ;;  %v5050_v21 = vld [vmem:[#allocation2 + $0x84] sm:$0xe] }
 0x173   : > { %19416 = vmatmul.mubr.msk.bf16.gmra.mrb[28].mxu0 %vm1254_vm10, %v17250_v8  ;;  %v2895_v8 = vor.u32 %v2894_v29, %v2891_v47  ;;  %v5159_v47 = vrot.slane %v22451_v31, 5  ;;  %v2678_v29 = vld [vmem:[#allocation2 + $0x84] sm:$0xf]  ;;  %v21025_v31 = vld [vmem:[#allocation2 + $0x78] sm:$0xff]   ;;  %v2906_v23 = vrot.slane %v2905_v52, 4  ;;  %v21029_v52 = vld [vmem:[#allocation2 + $0xa8] sm:$0xff]  }
 0x174   : > { %19427 = vmatprep.mubr.msk.bf16.mxu0 %vm1254_vm10, %v17295_v4  ;;  %v2922_v4 = vshll.u32 %v22705_v57, 16  ;;  %v5151_v35 = vrot.slane %v27009_v6, 4  ;;  %v2918_v6 = vrot.slane %v2916_v2, 5  ;;  %v5132_v57 = vsel %vm21739_vm14, %v5130_v40, %v5131_v14 }
 0x175   : > { %v22787_v43 = vrot.slane %v2895_v8, 4  ;;  %v21026_v8 = vld [vmem:[#allocation2 + $0x84] sm:$0xff]   ;;  %v2937_v11 = vshrl.u32 %v2678_v29, 16  ;;  %v2940_v2 = vshll.u32 %v2678_v29, 16  ;;  %v17299_v40 = vcombine.low %v5136_v7, %v5139_v45  ;;  %v2681_v7 = vld [vmem:[#allocation2 + $0x90] sm:$0xf] }
 0x176   : > { %v22789_v0 = vrot.slane %v2922_v4, 5  ;;  %v21246_v4 = vld [vmem:[#allocation2 + $0x88] sm:$0xf]  ;;  %v5153_v24 = vsel %vm21739_vm14, %v5151_v35, %v5152_v62  ;;  %v22847_v36 = vsel %vm21739_vm14, %v5158_v59, %v5159_v47  ;;  %v17280_v47 = vrot.slane %v5050_v21, 9 }
 0x177   : > { %v2946_v9 = vshll.u32 %v21246_v4, 16  ;;  %v2939_v62 = vrot.slane %v2937_v11, 4  ;;  %v2942_v35 = vrot.slane %v2940_v2, 5  ;;  %v2901_v59 = vsel %vm21459_vm7, %v22787_v43, %v22782_v54 }
 0x178   : > { %v2929_v20 = vor.u32 %v2928_v48, %v22789_v0  ;;  %v2911_v11 = vsel %vm21459_vm7, %v2906_v23, %v22784_v38 }
 0x179   : > { %19240 = vmatmul.mubr.msk.bf16.gmra.mrb[12].mxu1 %vm1254_vm10, %v21023_v49  ;;  %v27125_v49 = vrot.slane %v22726_v44, 5  ;;  %v27127_v44 = vld [vmem:[#allocation6_spill] sm:$0xff]  ;;  %v2943_v38 = vor.u32 %v2942_v35, %v2939_v62  ;;  %v5184_v62 = vrot.slane %v22565_v63, 5 }
 0x17a   : > { %19243 = vmatprep.mubr.msk.bf16.mxu1 %vm1254_vm10, %v21024_v32  ;;  %v17286_v32 = vrot.slane %v5056_v25, 9  ;;  %v2950_v25 = vshrl.u32 %v21246_v4, 16  ;;  %v2930_v45 = vrot.slane %v2929_v20, 4 }
 0x17b   : > { %19428 = vmatmul.mubr.msk.bf16.vlgmr.msra.gmra.mrb[0].mxu0 %vm1254_vm10, %v17296_v28  ;;  %v5129_v53 = vsel %vm21739_vm14, %v17274_v60, %v27125_v49  ;;  %v5163_v28 = vrot.slane %v27127_v44, 5  ;;  %v5212_v60 = vrot.slane %v22654_v46, 5  ;;  %v5143_v46 = vsel %vm21739_vm14, %v17276_v61, %v5142_v27 }
 0x17c   : > { %19431 = vmatprep.mubr.msk.bf16.mxu0 %vm1254_vm10, %v17297_v15  ;;  %v17298_v14 = vcombine.low %v5129_v53, %v5132_v57  ;;  %v2919_v53 = vor.u32 %v2918_v6, %v2915_v34  ;;  %v5150_v27 = vsel %vm21739_vm14, %v17277_v12, %v27128_v56  ;;  %v17300_v61 = vcombine.low %v5143_v46, %v5146_v18  ;;  %v21248_v46 = vld [vmem:[#allocation2 + $0x8c] sm:$0x1] }
 0x17d   : > { %v22813_v15 = vsel %vm21739_vm14, %v17286_v32, %v5212_v60  ;;  %v5214_v49 = vrot.slane %v5212_v60, 4  ;;  %v27129_v6 = vrot.slane %v22411_v10, 5  ;;  %v5165_v34 = vrot.slane %v5163_v28, 4 }
 0x17e   : > { %v5166_v12 = vrot.slane %v22484_v16, 5  ;;  %v5170_v32 = vrot.slane %v22486_v17, 5  ;;  %v2920_v57 = vrot.slane %v2919_v53, 4  ;;  %v17301_v10 = vcombine.low %v5150_v27, %v5153_v24  ;;  %v21030_v53 = vld [vmem:[#allocation2 + $0xb4] sm:$0xff]   ;;  %v5051_v27 = vld [vmem:[#allocation2 + $0x90] sm:$0xe] }
 0x17f   : > { %v22817_v30 = vsel %vm21739_vm14, %v5214_v49, %v5215_v58  ;;  %v22843_v48 = vsel %vm21739_vm14, %v17278_v13, %v27129_v6  ;;  %v2961_v44 = vshrl.u32 %v2681_v7, 16  ;;  %v2964_v60 = vshll.u32 %v2681_v7, 16  ;;  %v21249_v24 = vld [vmem:[#allocation2 + $0xa0] sm:$0xf] }
 0x180   : > { %v17310_v29 = vcombine.low %v22813_v15, %v22817_v30  ;;  %v17302_v13 = vcombine.low %v22843_v48, %v22847_v36  ;;  %v22857_v16 = vrot.slane %v2946_v9, 5  ;;  %v2952_v17 = vrot.slane %v2950_v25, 4  ;;  %v21247_v25 = vld [vmem:[#allocation2 + $0x94] sm:$0xf]  ;;  %v6270_v30 = vld [vmem:[#allocation2] sm:$0xf] }
 0x181   : > { %19244 = vmatmul.mubr.msk.bf16.gmra.mrb[16].mxu1 %vm1254_vm10, %v21025_v31  ;;  %v21027_v31 = vld [vmem:[#allocation2 + $0x90] sm:$0xff]   ;;  %v5164_v2 = vsel %vm21739_vm14, %v17279_v51, %v5163_v28  ;;  %v5172_v4 = vrot.slane %v5170_v32, 4  ;;  %v5173_v58 = vrot.slane %v22519_v22, 5  ;;  %v2925_v54 = vsel %vm21459_vm7, %v2920_v57, %v22789_v0 }
 0x182   : > { %19247 = vmatprep.mubr.msk.bf16.mxu1 %vm1254_vm10, %v21026_v8  ;;  %v21028_v8 = vld [vmem:[#allocation2 + $0x9c] sm:$0xff]   ;;  %v2935_v43 = vsel %vm21459_vm7, %v2930_v45, %v22708_v55  ;;  %v5167_v9 = vsel %vm21739_vm14, %v5165_v34, %v5166_v12  ;;  %v2963_v51 = vrot.slane %v2961_v44, 4  ;;  %v2966_v28 = vrot.slane %v2964_v60, 5  ;;  %v21034_v15 = vld [vmem:[%s26996_s1 + $0x30] sm:$0xff]  }
 0x183   : > { %19432 = vmatmul.mubr.msk.bf16.gmra.mrb[4].mxu0 %vm1254_vm10, %v17298_v14  ;;  %v2970_v22 = vshll.u32 %v21247_v25, 16  ;;  %v2974_v49 = vshrl.u32 %v21247_v25, 16  ;;  %v2684_v14 = vld [vmem:[#allocation2 + $0x9c] sm:$0xf]  ;;  %v22881_v0 = vsel %vm21739_vm14, %v17280_v47, %v5170_v32  ;;  %v2953_v55 = vor.u32 %v2952_v17, %v22857_v16 }
 0x184   : > { %19435 = vmatprep.mubr.msk.bf16.mxu0 %vm1254_vm10, %v17299_v40  ;;  %v22877_v40 = vcombine.low %v2901_v59, %v2911_v11  ;;  %v2956_v18 = vshll.u32 %v21248_v46, 16  ;;  %v22884_v20 = vcombine.low %v2925_v54, %v2935_v43  ;;  %v17303_v7 = vcombine.low %v5164_v2, %v5167_v9  ;;  %v5052_v45 = vld [vmem:[#allocation2 + $0x9c] sm:$0xe]  ;;  %v2687_v54 = vld [vmem:[#allocation2 + $0xa8] sm:$0xf] }
 0x185   : > { %v5177_v56 = vrot.slane %v22514_v19, 5  ;;  %v2985_v21 = vshrl.u32 %v2684_v14, 16  ;;  %v2994_v6 = vshll.u32 %v21249_v24, 16  ;;  %v2998_v48 = vshrl.u32 %v21249_v24, 16  ;;  %v21250_v19 = vld [vmem:[#allocation2 + $0x98] sm:$0x1] }
 0x186   : > { %v2944_v36 = vrot.slane %v2943_v38, 4  ;;  %v2967_v23 = vor.u32 %v2966_v28, %v2963_v51  ;;  %v22891_v34 = vrot.slane %v2970_v22, 5  ;;  %v2976_v12 = vrot.slane %v2974_v49, 4  ;;  %v21251_v38 = vld [vmem:[#allocation2 + $0xa4] sm:$0x1] }
 0x187   : > { %v2958_v57 = vrot.slane %v2956_v18, 5  ;;  %v2980_v35 = vshll.u32 %v21250_v19, 16  ;;  %v5179_v44 = vrot.slane %v5177_v56, 4  ;;  %v5180_v60 = vrot.slane %v22550_v37, 5  ;;  %v21031_v51 = vld [vmem:[#allocation2 + $0xc0] sm:$0xff]  }
 0x188   : > { %v2987_v59 = vrot.slane %v2985_v21, 4  ;;  %v22899_v17 = vrot.slane %v2994_v6, 5  ;;  %v3000_v11 = vrot.slane %v2998_v48, 4  ;;  %v2949_v63 = vsel %vm21459_vm7, %v2944_v36, %v22857_v16  ;;  %v5053_v46 = vld [vmem:[#allocation2 + $0xa8] sm:$0xe] }
 0x189   : > { %19248 = vmatmul.mubr.msk.bf16.gmra.mrb[20].mxu1 %vm1254_vm10, %v21027_v31  ;;  %v22888_v31 = vsel %vm21739_vm14, %v5172_v4, %v5173_v58  ;;  %v22905_v2 = vrot.slane %v2967_v23, 4  ;;  %v2977_v4 = vor.u32 %v2976_v12, %v22891_v34  ;;  %v17282_v58 = vrot.slane %v5052_v45, 9  ;;  %v2690_v21 = vld [vmem:[#allocation2 + $0xb4] sm:$0xf]  ;;  %v21253_v45 = vld [vmem:[#allocation2 + $0xb8] sm:$0xf] }
 0x18a   : > { %19251 = vmatprep.mubr.msk.bf16.mxu1 %vm1254_vm10, %v21028_v8  ;;  %v17304_v32 = vcombine.low %v22881_v0, %v22888_v31  ;;  %v2954_v8 = vrot.slane %v2953_v55, 4  ;;  %v5186_v43 = vrot.slane %v5184_v62, 4  ;;  %v5187_v9 = vrot.slane %v22593_v5, 5 }
 0x18b   : > { %19436 = vmatmul.mubr.msk.bf16.gmra.mrb[8].mxu0 %vm1254_vm10, %v17300_v61  ;;  %v2988_v61 = vshll.u32 %v2684_v14, 16  ;;  %v22912_v28 = vrot.slane %v2980_v35, 5  ;;  %v5181_v25 = vsel %vm21739_vm14, %v5179_v44, %v5180_v60  ;;  %v5191_v22 = vrot.slane %v22570_v1, 5 }
 0x18c   : > { %19439 = vmatprep.mubr.msk.bf16.mxu0 %vm1254_vm10, %v17301_v10  ;;  %v17281_v10 = vrot.slane %v5051_v27, 9  ;;  %v2959_v37 = vsel %vm21459_vm7, %v2954_v8, %v2958_v57  ;;  %v3001_v14 = vor.u32 %v3000_v11, %v22899_v17  ;;  %v3009_v0 = vshrl.u32 %v2687_v54, 16 }
 0x18d   : > { %v2990_v47 = vrot.slane %v2988_v61, 5  ;;  %v3012_v55 = vshll.u32 %v2687_v54, 16  ;;  %v17097_v5 = vcombine.low %v2949_v63, %v2959_v37  ;;  %v2973_v18 = vsel %vm21459_vm7, %v22905_v2, %v22891_v34 }
 0x18e   : > { %v5178_v16 = vsel %vm21739_vm14, %v17281_v10, %v5177_v56  ;;  %v5188_v1 = vsel %vm21739_vm14, %v5186_v43, %v5187_v9  ;;  %v21252_v56 = vld [vmem:[#allocation2 + $0xac] sm:$0xf]  ;;  %v17283_v24 = vrot.slane %v5053_v46, 9  ;;  %v5193_v6 = vrot.slane %v5191_v22, 4 }
 0x18f   : > { %v2991_v49 = vor.u32 %v2990_v47, %v2987_v59  ;;  %v3018_v27 = vshll.u32 %v21252_v56, 16  ;;  %v3022_v61 = vshrl.u32 %v21252_v56, 16  ;;  %v5194_v48 = vrot.slane %v22631_v39, 5  ;;  %v5054_v59 = vld [vmem:[#allocation2 + $0xb4] sm:$0xe] }
 0x190   : > { %v3002_v23 = vrot.slane %v3001_v14, 4  ;;  %v3011_v34 = vrot.slane %v3009_v0, 4  ;;  %v3014_v12 = vrot.slane %v3012_v55, 5  ;;  %v3033_v8 = vshrl.u32 %v2690_v21, 16  ;;  %v21255_v0 = vld [vmem:[#allocation2 + $0xc4] sm:$0xf] }
 0x191   : > { %19252 = vmatmul.mubr.msk.bf16.gmra.mrb[24].mxu1 %vm1254_vm10, %v21029_v52  ;;  %v2978_v52 = vrot.slane %v2977_v4, 4  ;;  %v2992_v36 = vrot.slane %v2991_v49, 4  ;;  %v3036_v57 = vshll.u32 %v2690_v21, 16  ;;  %v3046_v19 = vshrl.u32 %v21253_v45, 16 }
 0x192   : > { %19255 = vmatprep.mubr.msk.bf16.mxu1 %vm1254_vm10, %v21030_v53  ;;  %v5185_v53 = vsel %vm21739_vm14, %v17282_v58, %v5184_v62  ;;  %v3042_v62 = vshll.u32 %v21253_v45, 16  ;;  %v22939_v10 = vrot.slane %v3018_v27, 5  ;;  %v3024_v44 = vrot.slane %v3022_v61, 4  ;;  %v5055_v58 = vld [vmem:[#allocation2 + $0xc0] sm:$0xe] }
 0x193   : > { %19440 = vmatmul.mubr.msk.bf16.gmra.mrb[12].mxu0 %vm1254_vm10, %v17302_v13  ;;  %v3004_v13 = vshll.u32 %v21251_v38, 16  ;;  %v2983_v35 = vsel %vm21459_vm7, %v2978_v52, %v22912_v28  ;;  %v17306_v39 = vcombine.low %v5185_v53, %v5188_v1  ;;  %v5195_v60 = vsel %vm21739_vm14, %v5193_v6, %v5194_v48  ;;  %v2693_v38 = vld [vmem:[#allocation2 + $0xc0] sm:$0xf] }
 0x194   : > { %19443 = vmatprep.mubr.msk.bf16.mxu0 %vm1254_vm10, %v17303_v7  ;;  %v17305_v7 = vcombine.low %v5178_v16, %v5181_v25  ;;  %v5205_v47 = vrot.slane %v22635_v50, 5  ;;  %v2997_v11 = vsel %vm21459_vm7, %v2992_v36, %v22899_v17  ;;  %v3015_v2 = vor.u32 %v3014_v12, %v3011_v34 }
 0x195   : > { %v22928_v31 = vrot.slane %v3004_v13, 5  ;;  %v3035_v54 = vrot.slane %v3033_v8, 4  ;;  %v3038_v37 = vrot.slane %v3036_v57, 5  ;;  %v3044_v43 = vrot.slane %v3042_v62, 5 }
 0x196   : > { %v3048_v9 = vrot.slane %v3046_v19, 4  ;;  %v5201_v28 = vrot.slane %v22648_v42, 5  ;;  %v3025_v17 = vor.u32 %v3024_v44, %v22939_v10  ;;  %v17285_v16 = vrot.slane %v5055_v58, 9 }
 0x197   : > { %v3007_v63 = vsel %vm21459_vm7, %v3002_v23, %v22928_v31  ;;  %v5207_v25 = vrot.slane %v5205_v47, 4  ;;  %v3057_v49 = vshrl.u32 %v2693_v38, 16  ;;  %v3060_v14 = vshll.u32 %v2693_v38, 16 }
 0x198   : > { %v3066_v55 = vshll.u32 %v21255_v0, 16  ;;  %v3070_v46 = vshrl.u32 %v21255_v0, 16  ;;  %v17098_v52 = vcombine.low %v2973_v18, %v2983_v35  ;;  %v3039_v42 = vor.u32 %v3038_v37, %v3035_v54  ;;  %v21257_v35 = vld [vmem:[#allocation2 + $0xc8] sm:$0x1] }
 0x199   : > { %19256 = vmatmul.mubr.msk.bf16.gmra.mrb[28].mxu1 %vm1254_vm10, %v21031_v51  ;;  %v17284_v51 = vrot.slane %v5054_v59, 9  ;;  %v3049_v53 = vor.u32 %v3048_v9, %v3044_v43  ;;  %v3016_v1 = vrot.slane %v3015_v2, 4  ;;  %v17099_v56 = vcombine.low %v2997_v11, %v3007_v63 }
 0x19a   : > { %19283 = vmatprep.mubr.msk.bf16.mxu1 %vm1254_vm10, %v22877_v40  ;;  %v5198_v40 = vrot.slane %v22616_v41, 5  ;;  %v21254_v41 = vld [vmem:[#allocation2 + $0xb0] sm:$0x1]  ;;  %v3026_v27 = vrot.slane %v3025_v17, 4  ;;  %v5206_v18 = vsel %vm21739_vm14, %v17285_v16, %v5205_v47  ;;  %v3059_v61 = vrot.slane %v3057_v49, 4 }
 0x19b   : > { %19444 = vmatmul.mubr.msk.bf16.gmra.mrb[16].mxu0 %vm1254_vm10, %v17304_v32  ;;  %v5192_v32 = vsel %vm21739_vm14, %v17283_v24, %v5191_v22  ;;  %v3028_v4 = vshll.u32 %v21254_v41, 16  ;;  %v5208_v22 = vrot.slane %v22657_v26, 5  ;;  %v3062_v24 = vrot.slane %v3060_v14, 5  ;;  %v21032_v41 = vld [vmem:[%s26996_s1 + $0x20] sm:$0xff]  }
 0x19c   : > { %19447 = vmatprep.mubr.msk.bf16.mxu0 %vm1254_vm10, %v17305_v7  ;;  %v17307_v13 = vcombine.low %v5192_v32, %v5195_v60  ;;  %v5200_v50 = vrot.slane %v5198_v40, 4  ;;  %v21256_v7 = vld [vmem:[#allocation2 + $0xbc] sm:$0x1]  ;;  %v5199_v26 = vsel %vm21739_vm14, %v17284_v51, %v5198_v40  ;;  %v3068_v6 = vrot.slane %v3066_v55, 5  ;;  %19459 = vmatprep.subr.bf16.mxu1 %v21032_v41 }
 0x19d   : > { %v3030_v31 = vrot.slane %v3028_v4, 5  ;;  %v5209_v21 = vsel %vm21739_vm14, %v5207_v25, %v5208_v22  ;;  %v3072_v48 = vrot.slane %v3070_v46, 4  ;;  %v3040_v23 = vrot.slane %v3039_v42, 4  ;;  %v21033_v4 = vld [vmem:[%s26996_s1 + $0x28] sm:$0xff]   ;;  %v21035_v51 = vld [vmem:[%s26996_s1 + $0x38] sm:$0xff]  }
 0x19e   : > { %v3050_v34 = vrot.slane %v3049_v53, 4  ;;  %v17309_v8 = vcombine.low %v5206_v18, %v5209_v21  ;;  %v3021_v57 = vsel %vm21459_vm7, %v3016_v1, %v22939_v10  ;;  %v3063_v62 = vor.u32 %v3062_v24, %v3059_v61  ;;  %v23030_v61 = vld [vmem:[%s21442_s10 + $0x8] sm:$0xff]   ;;  %v23033_v24 = vld [vmem:[%s21442_s10] sm:$0xff]  }
 0x19f   : > { %v3031_v45 = vsel %vm21459_vm7, %v3026_v27, %v3030_v31  ;;  %v3073_v19 = vor.u32 %v3072_v48, %v3068_v6  ;;  %v3045_v40 = vsel %vm21459_vm7, %v3040_v23, %v3044_v43  ;;  %v6327_v58 = vshrl.u32 %v6270_v30, 16  ;;  %v23039_v48 = vld [vmem:[%s21442_s10 + $0x10] sm:$0xff]   ;;  %v23045_v23 = vld [vmem:[%s21442_s10 + $0x20] sm:$0xff]  }
 0x1a0   : > { %v17100_v10 = vcombine.low %v3021_v57, %v3031_v45  ;;  %v3064_v60 = vrot.slane %v3063_v62, 4  ;;  %v6330_v54 = vshll.u32 %v6270_v30, 16  ;;  %v18408_v57 = vunpack.c.h.bf16 %v23030_v61  ;;  %v23054_v62 = vld [vmem:[%s21442_s10 + $0x38] sm:$0xff]  }
 0x1a1   : > { %19284 = vmatmul.mubr.msk.bf16.vlgmr.msra.gmra.mrb[16].mxu1 %vm1254_vm10, %v22884_v20  ;;  %v3052_v20 = vshll.u32 %v21256_v7, 16  ;;  %v3074_v59 = vrot.slane %v3073_v19, 4  ;;  %v6329_v9 = vrot.slane %v6327_v58, 4  ;;  %v18404_v45 = vunpack.c.h.bf16 %v23033_v24  ;;  %v23057_v19 = vld [vmem:[%s21442_s10 + $0x30] sm:$0xff]   ;;  %v21258_v58 = vld [vmem:[#allocation2 + $0xc] sm:$0xf] }
 0x1a2   : > { %19287 = vmatprep.mubr.msk.bf16.mxu1 %vm1254_vm10, %v17097_v5  ;;  %v5202_v5 = vsel %vm21739_vm14, %v5200_v50, %v5201_v28  ;;  %v3069_v11 = vsel %vm21459_vm7, %v3064_v60, %v3068_v6  ;;  %19460 = vmatpush3.bf16.msra.mxu1 %v21032_v41  ;;  %v6332_v38 = vrot.slane %v6330_v54, 5  ;;  %v6310_v50 = vld [vmem:[#allocation2 + $0x8] sm:$0x1]  ;;  %v23036_v6 = vld [vmem:[%s21442_s10 + $0x18] sm:$0xff]   ;;  %v23069_v60 = vld [vmem:[%s21442_s10 + $0x40] sm:$0xff]  }
 0x1a3   : > { %19448 = vmatmul.mubr.msk.bf16.gmra.mrb[20].mxu0 %vm1254_vm10, %v17306_v39  ;;  %v17308_v36 = vcombine.low %v5199_v26, %v5202_v5  ;;  %v3054_v12 = vrot.slane %v3052_v20, 5  ;;  %v3076_v39 = vshll.u32 %v21257_v35, 16  ;;  %19461 = vmatprep.subr.bf16.mxu1 %v21033_v4  ;;  %v6346_v16 = vshll.u32 %v6310_v50, 16 }
 0x1a4   : > { %19451 = vmatprep.mubr.msk.bf16.mxu0 %vm1254_vm10, %v17307_v13  ;;  %v6333_v17 = vor.u32 %v6332_v38, %v6329_v9  ;;  %v23091_v9 = vld [vmem:[%s21442_s10 + $0x50] sm:$0xff]   ;;  %v23096_v38 = vld [vmem:[%s26998_s3] ss:$0 sm:$0xff] }
 0x1a5   : > { %v3055_v44 = vsel %vm21459_vm7, %v3050_v34, %v3054_v12  ;;  %v3078_v47 = vrot.slane %v3076_v39, 5  ;;  %v6348_v49 = vrot.slane %v6346_v16, 5  ;;  %v18407_v12 = vunpack.c.l.bf16 %v23030_v61 }
 0x1a6   : > { %v17101_v32 = vcombine.low %v3045_v40, %v3055_v44  ;;  %19462 = vmatpush3.bf16.msra.mxu1 %v21033_v4  ;;  %v6334_v22 = vrot.slane %v6333_v17, 4  ;;  %v18415_v39 = vunpack.c.l.bf16 %v23036_v6  ;;  %v18411_v40 = vunpack.c.l.bf16 %v23039_v48 }
 0x1a7   : > { %v3079_v63 = vsel %vm21459_vm7, %v3074_v59, %v3078_v47  ;;  %19463 = vmatprep.subr.bf16.mxu1 %v21034_v15  ;;  %v18416_v44 = vunpack.c.h.bf16 %v23036_v6  ;;  %v23076_v47 = vld [vmem:[%s26997_s2] ss:$0 sm:$0xff]  ;;  %v18420_v4 = vunpack.c.h.bf16 %v23045_v23 }
 0x1a8   : > { %v17102_v2 = vcombine.low %v3069_v11, %v3079_v63 }
 0x1a9   : > { %19288 = vmatmul.mubr.msk.bf16.gmra.mrb[20].mxu1 %vm1254_vm10, %v17098_v52  ;;  %v21036_v52 = vld [vmem:[%s26996_s1] sm:$0xff]  }
 0x1aa   : > { %19291 = vmatprep.mubr.msk.bf16.mxu1 %vm1254_vm10, %v17099_v56  ;;  %19464 = vmatpush3.bf16.msra.mxu1 %v21034_v15 }
 0x1ab   : > { %19452 = vmatmul.mubr.msk.bf16.gmra.mrb[24].mxu0 %vm1254_vm10, %v17308_v36  ;;  %19465 = vmatprep.subr.bf16.mxu1 %v21035_v51  ;;  %v23042_v36 = vld [vmem:[%s21442_s10 + $0x28] sm:$0xff]  }
 0x1ac   : > { %19455 = vmatprep.mubr.msk.bf16.mxu0 %vm1254_vm10, %v17309_v8  ;;  %v18403_v8 = vunpack.c.l.bf16 %v23033_v24  ;;  %v18423_v63 = vunpack.c.l.bf16 %v23042_v36  ;;  %v18424_v41 = vunpack.c.h.bf16 %v23042_v36 }
 0x1ae   : > { %19466 = vmatpush3.bf16.msra.mxu1 %v21035_v51 }
 0x1af   : > { %19499 = vmatprep.subr.bf16.mxu1 %v21036_v52 }
 0x1b1   : > { %19292 = vmatmul.mubr.msk.bf16.gmra.mrb[24].mxu1 %vm1254_vm10, %v17100_v10  ;;  %v18412_v10 = vunpack.c.h.bf16 %v23039_v48 }
 0x1b2   : > { %19295 = vmatprep.mubr.msk.bf16.mxu1 %vm1254_vm10, %v17101_v32  ;;  %v23066_v32 = vld [vmem:[%s21442_s10 + $0x48] sm:$0xff]  }
 0x1b3   : > { %19456 = vmatmul.mubr.msk.bf16.gmra.mrb[28].mxu0 %vm1254_vm10, %v17310_v29  ;;  %v6271_v29 = vld [vmem:[#allocation2 + $0x4] sm:$0xf] }
 0x1b4   : > { %v6336_v37 = vshll.u32 %v6271_v29, 16  ;;  %v6340_v43 = vshrl.u32 %v6271_v29, 16 }
 0x1b6   : > { %v6338_v13 = vrot.slane %v6336_v37, 5  ;;  %v6342_v28 = vrot.slane %v6340_v43, 4  ;;  %v23088_v43 = vld [vmem:[%s21442_s10 + $0x58] sm:$0xff]  }
 0x1b8   : > { %v6343_v25 = vor.u32 %v6342_v28, %v6338_v13  ;;  %v6339_v0 = vsel %vm21459_vm7, %v6334_v22, %v6338_v13 }
 0x1b9   : > { %19296 = vmatmul.mubr.msk.bf16.gmra.mrb[28].mxu1 %vm1254_vm10, %v17102_v2  ;;  %v18419_v2 = vunpack.c.l.bf16 %v23045_v23 }
 0x1ba   : > { %v6344_v14 = vrot.slane %v6343_v25, 4 }
 0x1bc   : > { %v6349_v55 = vsel %vm21459_vm7, %v6344_v14, %v6348_v49  ;;  %v23121_v14 = vld [vmem:[%s21442_s10 + $0x70] sm:$0xff]  }
 0x1bd   : > { %v17373_v46 = vcombine.low %v6339_v0, %v6349_v55  ;;  %v23105_v0 = vld [vmem:[%s21442_s10 + $0x68] sm:$0xff]   ;;  %v23108_v55 = vld [vmem:[%s21442_s10 + $0x60] sm:$0xff]  }
 0x1bf   : > { %19467 = vmatprep.mubr.msk.bf16.mxu1 %vm1254_vm10, %v17373_v46 }
 0x234   : > { %v19229_v42 = vpop.f32.mrb[0].mxu1 }
 0x235   : > { %v2489_v53 = vpop.f32.mrb[1].mxu1 }
 0x236   : > { %v19230_v7 = vpop.f32.mrb[2].mxu1 }
 0x237   : > { %v2492_v20 = vpop.f32.mrb[3].mxu1 }
 0x23c   : > { %v23013_v1 = vpop.f32.mrb[4].mxu1 }
 0x23d   : > { %v23015_v31 = vpop.f32.mrb[5].mxu1 }
 0x23e   : > { %v23017_v26 = vpop.f32.mrb[6].mxu1 }
 0x23f   : > { %v23019_v5 = vpop.f32.mrb[7].mxu1 }
 0x244   : > { %v23021_v56 = vpop.f32.mrb[8].mxu1 }
 0x245   : > { %v23023_v27 = vpop.f32.mrb[9].mxu1 }
 0x246   : > { %v23025_v18 = vpop.f32.mrb[10].mxu1 }
 0x247   : > { %v23027_v21 = vpop.f32.mrb[11].mxu1 }
 0x24c   : > { %v23047_v34 = vpop.f32.mrb[12].mxu1 }
 0x24d   : > { %v23059_v35 = vpop.f32.mrb[13].mxu1 }
 0x24e   : > { %v23071_v59 = vpop.f32.mrb[14].mxu1  ;;  %v19429_v11 = vpop.f32.mrb[0].mxu0 }
 0x24f   : > { %v23082_v15 = vpop.f32.mrb[15].mxu1  ;;  %v20187_v30 = vadd.f32 %v19429_v11, %v19229_v42  ;;  %v5380_v29 = vpop.f32.mrb[1].mxu0 }
 0x250   : > { %v20188_v13 = vadd.f32 %v5380_v29, %v2489_v53  ;;  %v19430_v51 = vpop.f32.mrb[2].mxu0 }
 0x251   : > { %v5547_v16 = vmul.f32 %v20187_v30, %v23076_v47  ;;  %v20189_v25 = vadd.f32 %v19430_v51, %v19230_v7  ;;  %v5383_v22 = vpop.f32.mrb[3].mxu0  ;;  %v23118_v51 = vld [vmem:[%s21442_s10 + $0x78] sm:$0xff]  }
 0x252   : > { %v5545_v46 = vmul.f32 %v20188_v13, %v23076_v47  ;;  %v20190_v52 = vadd.f32 %v5383_v22, %v2492_v20 }
 0x253   : > { %v5585_v11 = vadd.f32 %v23096_v38, %v5547_v16  ;;  %v5548_v7 = vmul.f32 %v20189_v25, %v23076_v47 }
 0x254   : > { %v5583_v49 = vadd.f32 %v23096_v38, %v5545_v46  ;;  %v5546_v20 = vmul.f32 %v20190_v52, %v23076_v47 }
 0x255   : > { %v5617_v53 = vmax.f32 %v5585_v11, 0.0  ;;  %v5586_v16 = vadd.f32 %v23096_v38, %v5548_v7 }
 0x256   : > { %v5615_v29 = vmax.f32 %v5583_v49, 0.0  ;;  %v5584_v42 = vadd.f32 %v23096_v38, %v5546_v20  ;;  %v19433_v17 = vpop.f32.mrb[4].mxu0 }
 0x257   : > { %v5713_v52 = vadd.f32 %v18407_v12, %v5617_v53  ;;  %v5618_v13 = vmax.f32 %v5586_v16, 0.0  ;;  %v20191_v11 = vadd.f32 %v19433_v17, %v23013_v1  ;;  %v5396_v22 = vpop.f32.mrb[5].mxu0 }
 0x258   : > { %v5711_v30 = vadd.f32 %v18403_v8, %v5615_v29  ;;  %v5616_v49 = vmax.f32 %v5584_v42, 0.0  ;;  %v20192_v20 = vadd.f32 %v5396_v22, %v23015_v31  ;;  %v19434_v25 = vpop.f32.mrb[6].mxu0 }
 0x259   : > { %v18307_v50 = vpack.c.bf16 %v5713_v52, %v5713_v52  ;;  %v5714_v46 = vadd.f32 %v18408_v57, %v5618_v13  ;;  %v5551_v12 = vmul.f32 %v20191_v11, %v23076_v47  ;;  %v20193_v1 = vadd.f32 %v19434_v25, %v23017_v26  ;;  %v5399_v17 = vpop.f32.mrb[7].mxu0  ;;  %v6165_v25 = vld [vmem:[#allocation2 + $0x18] sm:$0xf] }
 0x25a   : > { %v18305_v53 = vpack.c.bf16 %v5711_v30, %v5711_v30  ;;  %v5712_v16 = vadd.f32 %v18404_v45, %v5616_v49  ;;  %v5549_v8 = vmul.f32 %v20192_v20, %v23076_v47  ;;  %v20194_v31 = vadd.f32 %v5399_v17, %v23019_v5 }
 0x25b   : > { %v5857_v42 = vshrl.u32 %v18307_v50, 16  ;;  %v5860_v29 = vshll.u32 %v18307_v50, 16  ;;  %v18308_v22 = vpack.c.bf16 %v5714_v46, %v5714_v46  ;;  %v5589_v52 = vadd.f32 %v23096_v38, %v5551_v12 }
 0x25c   : > { %v5840_v61 = vshrl.u32 %v18305_v53, 16  ;;  %v5843_v57 = vshll.u32 %v18305_v53, 16  ;;  %v18306_v13 = vpack.c.bf16 %v5712_v16, %v5712_v16  ;;  %v5587_v11 = vadd.f32 %v23096_v38, %v5549_v8  ;;  %v6169_v8 = vld [vmem:[#allocation2 + $0x20] sm:$0x1] }
 0x25d   : > { %v5859_v26 = vrot.slane %v5857_v42, 7  ;;  %v5865_v30 = vshrl.u32 %v18308_v22, 16  ;;  %v5868_v28 = vshll.u32 %v18308_v22, 16  ;;  %v5621_v24 = vmax.f32 %v5589_v52, 0.0 }
 0x25e   : > { %v5842_v45 = vrot.slane %v5840_v61, 7  ;;  %v5848_v49 = vshrl.u32 %v18306_v13, 16  ;;  %v5851_v20 = vshll.u32 %v18306_v13, 16  ;;  %v5619_v7 = vmax.f32 %v5587_v11, 0.0  ;;  %v19437_v5 = vpop.f32.mrb[8].mxu0 }
 0x25f   : > { %v5862_v17 = vor.u32 %v5860_v29, %v5859_v26  ;;  %v5863_v50 = vrot.slane %v5859_v26, 4  ;;  %v5867_v46 = vrot.slane %v5865_v30, 7  ;;  %v5717_v12 = vadd.f32 %v18415_v39, %v5621_v24  ;;  %v5412_v53 = vpop.f32.mrb[9].mxu0  ;;  %v6162_v29 = vld [vmem:[#allocation2 + $0x14] sm:$0x1] }
 0x260   : > { %v5845_v16 = vor.u32 %v5843_v57, %v5842_v45  ;;  %v5846_v37 = vrot.slane %v5842_v45, 4  ;;  %v5850_v42 = vrot.slane %v5848_v49, 7  ;;  %v5715_v22 = vadd.f32 %v18411_v40, %v5619_v7  ;;  %v19438_v52 = vpop.f32.mrb[10].mxu0 }
 0x261   : > { %v6166_v13 = vsel %vm21469_vm9, %v5862_v17, %v6165_v25  ;;  %v5870_v11 = vor.u32 %v5868_v28, %v5867_v46  ;;  %v5872_v54 = vrot.slane %v5867_v46, 4  ;;  %v18311_v26 = vpack.c.bf16 %v5717_v12, %v5717_v12  ;;  %v5415_v30 = vpop.f32.mrb[11].mxu0 }
 0x262   : > { %6167 = vst [vmem:[#allocation2 + $0x18] sm:$0xf] %v6166_v13  ;;  %v6159_v39 = vsel %vm21469_vm9, %v5845_v16, %v21258_v58  ;;  %v5853_v57 = vor.u32 %v5851_v20, %v5850_v42  ;;  %v5855_v24 = vrot.slane %v5850_v42, 4  ;;  %v18309_v45 = vpack.c.bf16 %v5715_v22, %v5715_v22  ;;  %v6179_v42 = vld [vmem:[#allocation2 + $0x30] sm:$0xf] }
 0x263   : > { %6160 = vst [vmem:[#allocation2 + $0xc] sm:$0xf] %v6159_v39  ;;  %v5871_v40 = vsel %vm21476_vm11, %v5863_v50, %v5870_v11  ;;  %v6170_v25 = vsel %vm21453_vm6, %v5872_v54, %v6169_v8  ;;  %v5891_v28 = vshrl.u32 %v18311_v26, 16  ;;  %v5894_v17 = vshll.u32 %v18311_v26, 16 }
 0x264   : > { %6168 = vst.msk [vmem:[#allocation2 + $0x1c] sm:$0xf] %vm201_vm0, %v5871_v40  ;;  %6171 = vst [vmem:[#allocation2 + $0x20] sm:$0x1] %v6170_v25  ;;  %v5854_v46 = vsel %vm21476_vm11, %v5846_v37, %v5853_v57  ;;  %v6163_v58 = vsel %vm21453_vm6, %v5855_v24, %v6162_v29  ;;  %v5874_v20 = vshrl.u32 %v18309_v45, 16  ;;  %v5877_v12 = vshll.u32 %v18309_v45, 16 }
 0x265   : > { %6161 = vst.msk [vmem:[#allocation2 + $0x10] sm:$0xf] %vm201_vm0, %v5854_v46  ;;  %6164 = vst [vmem:[#allocation2 + $0x14] sm:$0x1] %v6163_v58  ;;  %v23169_v50 = vrot.slane %v5891_v28, 7  ;;  %v5552_v54 = vmul.f32 %v20193_v1, %v23076_v47  ;;  %v5550_v16 = vmul.f32 %v20194_v31, %v23076_v47  ;;  %v20195_v8 = vadd.f32 %v19437_v5, %v23021_v56 }
 0x266   : > { %v23174_v22 = vrot.slane %v5874_v20, 7  ;;  %v20196_v37 = vadd.f32 %v5412_v53, %v23023_v27  ;;  %v20197_v13 = vadd.f32 %v19438_v52, %v23025_v18  ;;  %v20198_v11 = vadd.f32 %v5415_v30, %v23027_v21  ;;  %v19441_v29 = vpop.f32.mrb[12].mxu0  ;;  %v6172_v57 = vld [vmem:[#allocation2 + $0x24] sm:$0xf] }
 0x267   : > { %v5896_v26 = vor.u32 %v5894_v17, %v23169_v50  ;;  %v5897_v39 = vrot.slane %v23169_v50, 4  ;;  %v5590_v1 = vadd.f32 %v23096_v38, %v5552_v54  ;;  %v5588_v31 = vadd.f32 %v23096_v38, %v5550_v16  ;;  %v5428_v56 = vpop.f32.mrb[13].mxu0 }
 0x268   : > { %v5879_v5 = vor.u32 %v5877_v12, %v23174_v22  ;;  %v5880_v24 = vrot.slane %v23174_v22, 4  ;;  %v5555_v27 = vmul.f32 %v20195_v8, %v23076_v47  ;;  %v5553_v18 = vmul.f32 %v20196_v37, %v23076_v47  ;;  %v23187_v21 = vpop.f32.mrb[14].mxu0 }
 0x269   : > { %v6180_v53 = vsel %vm21469_vm9, %v5896_v26, %v6179_v42  ;;  %v5622_v52 = vmax.f32 %v5590_v1, 0.0  ;;  %v5620_v30 = vmax.f32 %v5588_v31, 0.0  ;;  %v5556_v45 = vmul.f32 %v20197_v13, %v23076_v47  ;;  %v23192_v40 = vpop.f32.mrb[15].mxu0 }
 0x26a   : > { %6181 = vst [vmem:[#allocation2 + $0x30] sm:$0xf] %v6180_v53  ;;  %v6173_v25 = vsel %vm21469_vm9, %v5879_v5, %v6172_v57  ;;  %v5593_v28 = vadd.f32 %v23096_v38, %v5555_v27  ;;  %v5591_v17 = vadd.f32 %v23096_v38, %v5553_v18  ;;  %v5554_v46 = vmul.f32 %v20198_v11, %v23076_v47 }
 0x26b   : > { %6174 = vst [vmem:[#allocation2 + $0x24] sm:$0xf] %v6173_v25  ;;  %v5718_v58 = vadd.f32 %v18416_v44, %v5622_v52  ;;  %v5716_v20 = vadd.f32 %v18412_v10, %v5620_v30  ;;  %v5594_v12 = vadd.f32 %v23096_v38, %v5556_v45  ;;  %v20199_v54 = vadd.f32 %v19441_v29, %v23047_v34  ;;  %v6183_v52 = vld [vmem:[#allocation2 + $0x38] sm:$0x1] }
 0x26c   : > { %v5625_v16 = vmax.f32 %v5593_v28, 0.0  ;;  %v5623_v8 = vmax.f32 %v5591_v17, 0.0  ;;  %v5592_v42 = vadd.f32 %v23096_v38, %v5554_v46  ;;  %v20200_v37 = vadd.f32 %v5428_v56, %v23059_v35  ;;  %v6176_v17 = vld [vmem:[#allocation2 + $0x2c] sm:$0x1] }
 0x26d   : > { %v18312_v13 = vpack.c.bf16 %v5718_v58, %v5718_v58  ;;  %v18310_v26 = vpack.c.bf16 %v5716_v20, %v5716_v20  ;;  %v5626_v11 = vmax.f32 %v5594_v12, 0.0  ;;  %v5559_v57 = vmul.f32 %v20199_v54, %v23076_v47  ;;  %v6193_v54 = vld [vmem:[#allocation2 + $0x48] sm:$0xf] }
 0x26e   : > { %v5721_v6 = vadd.f32 %v18423_v63, %v5625_v16  ;;  %v5719_v48 = vadd.f32 %v18419_v2, %v5623_v8  ;;  %v5624_v44 = vmax.f32 %v5592_v42, 0.0  ;;  %v5557_v34 = vmul.f32 %v20200_v37, %v23076_v47  ;;  %v23213_v10 = vpop.f32.mrb[16].mxu0  ;;  %v6186_v42 = vld [vmem:[#allocation2 + $0x3c] sm:$0xf] }
 0x26f   : > { %v5899_v29 = vshrl.u32 %v18312_v13, 16  ;;  %v5902_v1 = vshll.u32 %v18312_v13, 16  ;;  %v5882_v31 = vshrl.u32 %v18310_v26, 16  ;;  %v5885_v35 = vshll.u32 %v18310_v26, 16  ;;  %v23215_v56 = vpop.f32.mrb[17].mxu0 }
 0x270   : > { %v18315_v5 = vpack.c.bf16 %v5721_v6, %v5721_v6  ;;  %v18313_v27 = vpack.c.bf16 %v5719_v48, %v5719_v48  ;;  %v5722_v18 = vadd.f32 %v18424_v41, %v5626_v11  ;;  %v5720_v63 = vadd.f32 %v18420_v4, %v5624_v44  ;;  %v23221_v2 = vpop.f32.mrb[18].mxu0 }
 0x271   : > { %v5901_v53 = vrot.slane %v5899_v29, 7  ;;  %v5884_v30 = vrot.slane %v5882_v31, 7  ;;  %v5597_v45 = vadd.f32 %v23096_v38, %v5559_v57  ;;  %v5595_v25 = vadd.f32 %v23096_v38, %v5557_v34  ;;  %v23225_v28 = vpop.f32.mrb[19].mxu0 }
 0x272   : > { %v5925_v46 = vshrl.u32 %v18315_v5, 16  ;;  %v5928_v58 = vshll.u32 %v18315_v5, 16  ;;  %v5908_v20 = vshrl.u32 %v18313_v27, 16  ;;  %v5911_v36 = vshll.u32 %v18313_v27, 16 }
 0x273   : > { %v5904_v41 = vor.u32 %v5902_v1, %v5901_v53  ;;  %v5906_v12 = vrot.slane %v5901_v53, 4  ;;  %v5887_v23 = vor.u32 %v5885_v35, %v5884_v30  ;;  %v5889_v4 = vrot.slane %v5884_v30, 4 }
 0x274   : > { %v5927_v16 = vrot.slane %v5925_v46, 7  ;;  %v5910_v8 = vrot.slane %v5908_v20, 7  ;;  %v18316_v37 = vpack.c.bf16 %v5722_v18, %v5722_v18  ;;  %v18314_v13 = vpack.c.bf16 %v5720_v63, %v5720_v63  ;;  %v19285_v26 = vpop.f32.mrb[16].mxu1 }
 0x275   : > { %v5905_v11 = vsel %vm21476_vm11, %v5897_v39, %v5904_v41  ;;  %v6184_v57 = vsel %vm21453_vm6, %v5906_v12, %v6183_v52  ;;  %v5888_v6 = vsel %vm21476_vm11, %v5880_v24, %v5887_v23  ;;  %v6177_v48 = vsel %vm21453_vm6, %v5889_v4, %v6176_v17  ;;  %v3307_v44 = vpop.f32.mrb[17].mxu1  ;;  %v6197_v12 = vld [vmem:[#allocation2 + $0x50] sm:$0x1]  ;;  %v6190_v23 = vld [vmem:[#allocation2 + $0x44] sm:$0x1] }
 0x276   : > { %6182 = vst.msk [vmem:[#allocation2 + $0x34] sm:$0xf] %vm201_vm0, %v5905_v11  ;;  %6185 = vst [vmem:[#allocation2 + $0x38] sm:$0x1] %v6184_v57  ;;  %v5930_v50 = vor.u32 %v5928_v58, %v5927_v16  ;;  %v5931_v39 = vrot.slane %v5927_v16, 4  ;;  %v5913_v34 = vor.u32 %v5911_v36, %v5910_v8  ;;  %v5914_v29 = vrot.slane %v5910_v8, 4 }
 0x277   : > { %6175 = vst.msk [vmem:[#allocation2 + $0x28] sm:$0xf] %vm201_vm0, %v5888_v6  ;;  %6178 = vst [vmem:[#allocation2 + $0x2c] sm:$0x1] %v6177_v48  ;;  %v19286_v1 = vpop.f32.mrb[18].mxu1  ;;  %v23241_v31 = vpop.f32.mrb[20].mxu0  ;;  %v20201_v20 = vadd.f32 %v23187_v21, %v23071_v59  ;;  %v20202_v36 = vadd.f32 %v23192_v40, %v23082_v15  ;;  %v27133_v4 = vunpack.c.l.bf16 %v23054_v62  ;;  %v20203_v16 = vadd.f32 %v23213_v10, %v19285_v26 }
 0x278   : > { %v5933_v22 = vshrl.u32 %v18316_v37, 16  ;;  %v5936_v35 = vshll.u32 %v18316_v37, 16  ;;  %v5916_v24 = vshrl.u32 %v18314_v13, 16  ;;  %v5919_v5 = vshll.u32 %v18314_v13, 16  ;;  %v3310_v27 = vpop.f32.mrb[19].mxu1  ;;  %v23243_v18 = vpop.f32.mrb[21].mxu0 }
 0x279   : > { %v6194_v63 = vsel %vm21469_vm9, %v5930_v50, %v6193_v54  ;;  %v6187_v53 = vsel %vm21469_vm9, %v5913_v34, %v6186_v42  ;;  %v5629_v52 = vmax.f32 %v5597_v45, 0.0  ;;  %v5627_v30 = vmax.f32 %v5595_v25, 0.0  ;;  %v23249_v17 = vpop.f32.mrb[22].mxu0 }
 0x27a   : > { %6195 = vst [vmem:[#allocation2 + $0x48] sm:$0xf] %v6194_v63  ;;  %6188 = vst [vmem:[#allocation2 + $0x3c] sm:$0xf] %v6187_v53  ;;  %v5935_v46 = vrot.slane %v5933_v22, 7  ;;  %v5918_v58 = vrot.slane %v5916_v24, 7  ;;  %v27134_v25 = vunpack.c.l.bf16 %v23057_v19  ;;  %v20204_v8 = vadd.f32 %v23215_v56, %v3307_v44 }
 0x27b   : > { %v23255_v41 = vpop.f32.mrb[23].mxu0  ;;  %v5725_v45 = vadd.f32 %v27133_v4, %v5629_v52  ;;  %v5560_v40 = vmul.f32 %v20201_v20, %v23076_v47  ;;  %v5558_v11 = vmul.f32 %v20202_v36, %v23076_v47  ;;  %v20205_v20 = vadd.f32 %v23221_v2, %v19286_v1 }
 0x27c   : > { %v5723_v54 = vadd.f32 %v27134_v25, %v5627_v30  ;;  %v5938_v42 = vor.u32 %v5936_v35, %v5935_v46  ;;  %v5940_v37 = vrot.slane %v5935_v46, 4  ;;  %v5921_v59 = vor.u32 %v5919_v5, %v5918_v58  ;;  %v19289_v57 = vpop.f32.mrb[20].mxu1  ;;  %v6207_v46 = vld [vmem:[#allocation2 + $0x60] sm:$0xf] }
 0x27d   : > { %v5923_v21 = vrot.slane %v5918_v58, 4  ;;  %v18319_v13 = vpack.c.bf16 %v5725_v45, %v5725_v45  ;;  %v3323_v26 = vpop.f32.mrb[21].mxu1  ;;  %v5596_v24 = vadd.f32 %v23096_v38, %v5558_v11  ;;  %v5563_v5 = vmul.f32 %v20203_v16, %v23076_v47 }
 0x27e   : > { %v18317_v15 = vpack.c.bf16 %v5723_v54, %v5723_v54  ;;  %v5939_v6 = vsel %vm21476_vm11, %v5931_v39, %v5938_v42  ;;  %v6198_v48 = vsel %vm21453_vm6, %v5940_v37, %v6197_v12  ;;  %v5922_v10 = vsel %vm21476_vm11, %v5914_v29, %v5921_v59  ;;  %v23275_v22 = vpop.f32.mrb[22].mxu1  ;;  %v23277_v35 = vpop.f32.mrb[24].mxu0 }
 0x27f   : > { %v6191_v56 = vsel %vm21453_vm6, %v5923_v21, %v6190_v23  ;;  %6196 = vst.msk [vmem:[#allocation2 + $0x4c] sm:$0xf] %vm201_vm0, %v5939_v6  ;;  %6199 = vst [vmem:[#allocation2 + $0x50] sm:$0x1] %v6198_v48  ;;  %v5959_v44 = vshrl.u32 %v18319_v13, 16  ;;  %v5962_v50 = vshll.u32 %v18319_v13, 16  ;;  %v5598_v29 = vadd.f32 %v23096_v38, %v5560_v40 }
 0x280   : > { %6189 = vst.msk [vmem:[#allocation2 + $0x40] sm:$0xf] %vm201_vm0, %v5922_v10  ;;  %6192 = vst [vmem:[#allocation2 + $0x44] sm:$0x1] %v6191_v56  ;;  %v5942_v34 = vshrl.u32 %v18317_v15, 16  ;;  %v5945_v39 = vshll.u32 %v18317_v15, 16  ;;  %v5561_v63 = vmul.f32 %v20204_v8, %v23076_v47  ;;  %v20206_v36 = vadd.f32 %v23225_v28, %v3310_v27 }
 0x281   : > { %v23283_v53 = vpop.f32.mrb[23].mxu1  ;;  %v23285_v52 = vpop.f32.mrb[25].mxu0  ;;  %v23287_v30 = vrot.slane %v5959_v44, 7  ;;  %v6200_v23 = vld [vmem:[#allocation2 + $0x54] sm:$0xf]  ;;  %v5630_v4 = vmax.f32 %v5598_v29, 0.0  ;;  %v5601_v25 = vadd.f32 %v23096_v38, %v5563_v5  ;;  %v27135_v28 = vunpack.c.h.bf16 %v23054_v62 }
 0x282   : > { %v23289_v58 = vrot.slane %v5942_v34, 7  ;;  %v23293_v12 = vpop.f32.mrb[26].mxu0  ;;  %v5628_v45 = vmax.f32 %v5596_v24, 0.0  ;;  %v5599_v54 = vadd.f32 %v23096_v38, %v5561_v63  ;;  %v27136_v27 = vunpack.c.h.bf16 %v23057_v19 }
 0x283   : > { %v23297_v16 = vpop.f32.mrb[27].mxu0  ;;  %v5964_v8 = vor.u32 %v5962_v50, %v23287_v30  ;;  %v5965_v42 = vrot.slane %v23287_v30, 4  ;;  %v5726_v1 = vadd.f32 %v27135_v28, %v5630_v4  ;;  %v5633_v21 = vmax.f32 %v5601_v25, 0.0  ;;  %v6204_v25 = vld [vmem:[#allocation2 + $0x5c] sm:$0x1] }
 0x284   : > { %v5947_v37 = vor.u32 %v5945_v39, %v23289_v58  ;;  %v5948_v2 = vrot.slane %v23289_v58, 4  ;;  %v5724_v59 = vadd.f32 %v27136_v27, %v5628_v45  ;;  %v5631_v13 = vmax.f32 %v5599_v54, 0.0  ;;  %v23313_v48 = vpop.f32.mrb[24].mxu1  ;;  %v6211_v45 = vld [vmem:[#allocation2 + $0x68] sm:$0x1] }
 0x285   : > { %v6208_v15 = vsel %vm21469_vm9, %v5964_v8, %v6207_v46  ;;  %v5564_v11 = vmul.f32 %v20205_v20, %v23076_v47  ;;  %v5562_v6 = vmul.f32 %v20206_v36, %v23076_v47  ;;  %v18320_v62 = vpack.c.bf16 %v5726_v1, %v5726_v1  ;;  %v23319_v34 = vpop.f32.mrb[25].mxu1 }
 0x286   : > { %v6201_v40 = vsel %vm21469_vm9, %v5947_v37, %v6200_v23  ;;  %6209 = vst [vmem:[#allocation2 + $0x60] sm:$0xf] %v6208_v15  ;;  %v18318_v10 = vpack.c.bf16 %v5724_v59, %v5724_v59  ;;  %v27137_v19 = vunpack.c.l.bf16 %v23066_v32  ;;  %v27138_v44 = vunpack.c.l.bf16 %v23069_v60  ;;  %v23325_v63 = vpop.f32.mrb[26].mxu1  ;;  %v23327_v30 = vpop.f32.mrb[28].mxu0 }
 0x287   : > { %6202 = vst [vmem:[#allocation2 + $0x54] sm:$0xf] %v6201_v40  ;;  %v5602_v39 = vadd.f32 %v23096_v38, %v5564_v11  ;;  %v5600_v29 = vadd.f32 %v23096_v38, %v5562_v6  ;;  %v20207_v24 = vadd.f32 %v23241_v31, %v19289_v57  ;;  %v20208_v5 = vadd.f32 %v23243_v18, %v3323_v26  ;;  %v23329_v23 = vpop.f32.mrb[27].mxu1  ;;  %v23331_v4 = vpop.f32.mrb[29].mxu0 }
 0x288   : > { %v5729_v56 = vadd.f32 %v27137_v19, %v5633_v21  ;;  %v5727_v50 = vadd.f32 %v27138_v44, %v5631_v13  ;;  %v5967_v46 = vshrl.u32 %v18320_v62, 16  ;;  %v5970_v58 = vshll.u32 %v18320_v62, 16  ;;  %v23333_v57 = vpop.f32.mrb[30].mxu0  ;;  %v6221_v19 = vld [vmem:[#allocation2 + $0x78] sm:$0xf] }
 0x289   : > { %v5950_v20 = vshrl.u32 %v18318_v10, 16  ;;  %v5953_v36 = vshll.u32 %v18318_v10, 16  ;;  %v5634_v37 = vmax.f32 %v5602_v39, 0.0  ;;  %v5632_v31 = vmax.f32 %v5600_v29, 0.0  ;;  %v23337_v27 = vpop.f32.mrb[31].mxu0 }
 0x28a   : > { %v18323_v54 = vpack.c.bf16 %v5729_v56, %v5729_v56  ;;  %v18321_v8 = vpack.c.bf16 %v5727_v50, %v5727_v50  ;;  %v5969_v18 = vrot.slane %v5967_v46, 7  ;;  %v5567_v28 = vmul.f32 %v20207_v24, %v23076_v47 }
 0x28b   : > { %v5952_v26 = vrot.slane %v5950_v20, 7  ;;  %v5565_v1 = vmul.f32 %v20208_v5, %v23076_v47  ;;  %v27139_v44 = vunpack.c.h.bf16 %v23066_v32  ;;  %v27140_v39 = vunpack.c.h.bf16 %v23069_v60  ;;  %v6272_v32 = vld [vmem:[#allocation2 + $0xc] sm:$0xf] }
 0x28c   : > { %v5993_v59 = vshrl.u32 %v18323_v54, 16  ;;  %v5996_v21 = vshll.u32 %v18323_v54, 16  ;;  %v5976_v13 = vshrl.u32 %v18321_v8, 16  ;;  %v5979_v15 = vshll.u32 %v18321_v8, 16  ;;  %v23343_v24 = vpop.f32.mrb[28].mxu1 }
 0x28d   : > { %v5972_v40 = vor.u32 %v5970_v58, %v5969_v18  ;;  %v5974_v11 = vrot.slane %v5969_v18, 4  ;;  %v5955_v6 = vor.u32 %v5953_v36, %v5952_v26  ;;  %v5957_v62 = vrot.slane %v5952_v26, 4  ;;  %v6214_v36 = vld [vmem:[#allocation2 + $0x6c] sm:$0xf]  ;;  %v23353_v54 = vpop.f32.mrb[29].mxu1 }
 0x28e   : > { %v5995_v10 = vrot.slane %v5993_v59, 7  ;;  %v5978_v56 = vrot.slane %v5976_v13, 7  ;;  %v5730_v50 = vadd.f32 %v27139_v44, %v5634_v37  ;;  %v5728_v29 = vadd.f32 %v27140_v39, %v5632_v31  ;;  %v23357_v37 = vpop.f32.mrb[30].mxu1 }
 0x28f   : > { %v5973_v5 = vsel %vm21476_vm11, %v5965_v42, %v5972_v40  ;;  %v6212_v46 = vsel %vm21453_vm6, %v5974_v11, %v6211_v45  ;;  %v5956_v58 = vsel %vm21476_vm11, %v5948_v2, %v5955_v6  ;;  %v6205_v20 = vsel %vm21453_vm6, %v5957_v62, %v6204_v25  ;;  %v23361_v26 = vpop.f32.mrb[31].mxu1 }
 0x290   : > { %6210 = vst.msk [vmem:[#allocation2 + $0x64] sm:$0xf] %vm201_vm0, %v5973_v5  ;;  %6213 = vst [vmem:[#allocation2 + $0x68] sm:$0x1] %v6212_v46  ;;  %v5998_v60 = vor.u32 %v5996_v21, %v5995_v10  ;;  %v5999_v42 = vrot.slane %v5995_v10, 4  ;;  %v5981_v8 = vor.u32 %v5979_v15, %v5978_v56  ;;  %v5982_v45 = vrot.slane %v5978_v56, 4 }
 0x291   : > { %6203 = vst.msk [vmem:[#allocation2 + $0x58] sm:$0xf] %vm201_vm0, %v5956_v58  ;;  %6206 = vst [vmem:[#allocation2 + $0x5c] sm:$0x1] %v6205_v20  ;;  %v18324_v2 = vpack.c.bf16 %v5730_v50, %v5730_v50  ;;  %v18322_v31 = vpack.c.bf16 %v5728_v29, %v5728_v29  ;;  %v5605_v25 = vadd.f32 %v23096_v38, %v5567_v28  ;;  %v6273_v15 = vld [vmem:[#allocation2 + $0x10] sm:$0xf]  ;;  %v27142_v58 = vunpack.c.l.bf16 %v23091_v9 }
 0x292   : > { %v5603_v18 = vadd.f32 %v23096_v38, %v5565_v1  ;;  %v6222_v59 = vsel %vm21469_vm9, %v5998_v60, %v6221_v19  ;;  %v6215_v13 = vsel %vm21469_vm9, %v5981_v8, %v6214_v36  ;;  %v20209_v21 = vadd.f32 %v23249_v17, %v23275_v22  ;;  %v6225_v5 = vld [vmem:[#allocation2 + $0x80] sm:$0x1]  ;;  %v6218_v46 = vld [vmem:[#allocation2 + $0x74] sm:$0x1] }
 0x293   : > { %v6351_v40 = vshrl.u32 %v6272_v32, 16  ;;  %6223 = vst [vmem:[#allocation2 + $0x78] sm:$0xf] %v6222_v59  ;;  %6216 = vst [vmem:[#allocation2 + $0x6c] sm:$0xf] %v6215_v13  ;;  %v6001_v11 = vshrl.u32 %v18324_v2, 16  ;;  %v27141_v17 = vunpack.c.l.bf16 %v23088_v43 }
 0x294   : > { %v6004_v6 = vshll.u32 %v18324_v2, 16  ;;  %v5984_v28 = vshrl.u32 %v18322_v31, 16  ;;  %v5987_v62 = vshll.u32 %v18322_v31, 16  ;;  %v5637_v1 = vmax.f32 %v5605_v25, 0.0 }
 0x295   : > { %v5635_v10 = vmax.f32 %v5603_v18, 0.0  ;;  %v5568_v56 = vmul.f32 %v20209_v21, %v23076_v47  ;;  %v6353_v44 = vrot.slane %v6351_v40, 4  ;;  %v6003_v19 = vrot.slane %v6001_v11, 7 }
 0x296   : > { %v5986_v50 = vrot.slane %v5984_v28, 7  ;;  %v6354_v39 = vshll.u32 %v6272_v32, 16  ;;  %v6360_v29 = vshll.u32 %v6273_v15, 16  ;;  %v5733_v22 = vadd.f32 %v27141_v17, %v5637_v1 }
 0x297   : > { %v5731_v20 = vadd.f32 %v27142_v58, %v5635_v10  ;;  %v5606_v36 = vadd.f32 %v23096_v38, %v5568_v56  ;;  %v6364_v60 = vshrl.u32 %v6273_v15, 16  ;;  %v6006_v8 = vor.u32 %v6004_v6, %v6003_v19  ;;  %v6311_v6 = vld [vmem:[#allocation2 + $0x14] sm:$0x1]  ;;  %v6274_v10 = vld [vmem:[#allocation2 + $0x18] sm:$0xf] }
 0x298   : > { %v6008_v2 = vrot.slane %v6003_v19, 4  ;;  %v5989_v31 = vor.u32 %v5987_v62, %v5986_v50  ;;  %v5991_v25 = vrot.slane %v5986_v50, 4  ;;  %v18327_v18 = vpack.c.bf16 %v5733_v22, %v5733_v22  ;;  %v6235_v56 = vld [vmem:[#allocation2 + $0x90] sm:$0xf] }
 0x299   : > { %v18325_v59 = vpack.c.bf16 %v5731_v20, %v5731_v20  ;;  %v5638_v13 = vmax.f32 %v5606_v36, 0.0  ;;  %v6356_v32 = vrot.slane %v6354_v39, 5  ;;  %v6007_v21 = vsel %vm21476_vm11, %v5999_v42, %v6006_v8  ;;  %v6228_v20 = vld [vmem:[#allocation2 + $0x84] sm:$0xf] }
 0x29a   : > { %v6226_v40 = vsel %vm21453_vm6, %v6008_v2, %v6225_v5  ;;  %v5990_v11 = vsel %vm21476_vm11, %v5982_v45, %v5989_v31  ;;  %v6219_v15 = vsel %vm21453_vm6, %v5991_v25, %v6218_v46  ;;  %6224 = vst.msk [vmem:[#allocation2 + $0x7c] sm:$0xf] %vm201_vm0, %v6007_v21  ;;  %v6027_v28 = vshrl.u32 %v18327_v18, 16 }
 0x29b   : > { %6227 = vst [vmem:[#allocation2 + $0x80] sm:$0x1] %v6226_v40  ;;  %6217 = vst.msk [vmem:[#allocation2 + $0x70] sm:$0xf] %vm201_vm0, %v5990_v11  ;;  %v6030_v62 = vshll.u32 %v18327_v18, 16  ;;  %v6010_v1 = vshrl.u32 %v18325_v59, 16  ;;  %v27143_v19 = vunpack.c.h.bf16 %v23088_v43  ;;  %v6357_v45 = vor.u32 %v6356_v32, %v6353_v44 }
 0x29c   : > { %6220 = vst [vmem:[#allocation2 + $0x74] sm:$0x1] %v6219_v15  ;;  %v6013_v42 = vshll.u32 %v18325_v59, 16  ;;  %v6362_v39 = vrot.slane %v6360_v29, 5  ;;  %v6366_v5 = vrot.slane %v6364_v60, 4  ;;  %v6029_v46 = vrot.slane %v6027_v28, 7 }
 0x29d   : > { %v5734_v50 = vadd.f32 %v27143_v19, %v5638_v13  ;;  %v23387_v17 = vrot.slane %v6010_v1, 7  ;;  %v6370_v22 = vshll.u32 %v6311_v6, 16  ;;  %v20210_v58 = vadd.f32 %v23255_v41, %v23283_v53  ;;  %v23393_v29 = vld [vmem:[#allocation2 + $0x1c] sm:$0xf]  ;;  %v6312_v41 = vld [vmem:[#allocation2 + $0x20] sm:$0x1] }
 0x29e   : > { %v6358_v8 = vrot.slane %v6357_v45, 4  ;;  %v6367_v2 = vor.u32 %v6366_v5, %v6362_v39  ;;  %v6375_v31 = vshrl.u32 %v6274_v10, 16  ;;  %v6032_v25 = vor.u32 %v6030_v62, %v6029_v46  ;;  %v6239_v1 = vld [vmem:[#allocation2 + $0x98] sm:$0x1] }
 0x29f   : > { %v18328_v36 = vpack.c.bf16 %v5734_v50, %v5734_v50  ;;  %v6033_v18 = vrot.slane %v6029_v46, 4  ;;  %v6015_v43 = vor.u32 %v6013_v42, %v23387_v17  ;;  %v6016_v44 = vrot.slane %v23387_v17, 4 }
 0x2a0   : > { %v6363_v13 = vsel %vm21459_vm7, %v6358_v8, %v6362_v39  ;;  %v6368_v32 = vrot.slane %v6367_v2, 4  ;;  %v6236_v53 = vsel %vm21469_vm9, %v6032_v25, %v6235_v56  ;;  %v6372_v40 = vrot.slane %v6370_v22, 5  ;;  %v21037_v22 = vld [vmem:[%s26996_s1 + $0x8] sm:$0xff]   ;;  %v23410_v8 = vld [vmem:[#allocation2 + $0x24] sm:$0xf] }
 0x2a1   : > { %v6035_v60 = vshrl.u32 %v18328_v36, 16  ;;  %v6038_v59 = vshll.u32 %v18328_v36, 16  ;;  %v6229_v21 = vsel %vm21469_vm9, %v6015_v43, %v6228_v20  ;;  %v5566_v11 = vmul.f32 %v20210_v58, %v23076_v47  ;;  %6237 = vst [vmem:[#allocation2 + $0x90] sm:$0xf] %v6236_v53 }
 0x2a2   : > { %6230 = vst [vmem:[#allocation2 + $0x84] sm:$0xf] %v6229_v21  ;;  %v6377_v6 = vrot.slane %v6375_v31, 4  ;;  %v6378_v28 = vshll.u32 %v6274_v10, 16  ;;  %v6384_v62 = vshll.u32 %v23393_v29, 16  ;;  %v6373_v42 = vsel %vm21459_vm7, %v6368_v32, %v6372_v40 }
 0x2a3   : > { %v6037_v15 = vrot.slane %v6035_v60, 7  ;;  %v5604_v19 = vadd.f32 %v23096_v38, %v5566_v11  ;;  %v6388_v56 = vshrl.u32 %v23393_v29, 16  ;;  %v6394_v50 = vshll.u32 %v6312_v41, 16  ;;  %v21259_v60 = vld [vmem:[%s26996_s1] sm:$0xff]  }
 0x2a4   : > { %v17374_v5 = vcombine.low %v6363_v13, %v6373_v42  ;;  %v6380_v46 = vrot.slane %v6378_v28, 5  ;;  %v6386_v58 = vrot.slane %v6384_v62, 5  ;;  %v20211_v43 = vadd.f32 %v23277_v35, %v23313_v48 }
 0x2a5   : > { %v6040_v45 = vor.u32 %v6038_v59, %v6037_v15  ;;  %v6042_v39 = vrot.slane %v6037_v15, 4  ;;  %v5636_v10 = vmax.f32 %v5604_v19, 0.0  ;;  %v6390_v20 = vrot.slane %v6388_v56, 4 }
 0x2a6   : > { %v6396_v36 = vrot.slane %v6394_v50, 5  ;;  %19468 = vmatmul.mubr.msk.bf16.vlgmr.msra.gmra.mrb[32].mxu1 %vm1254_vm10, %v17374_v5  ;;  %v6381_v25 = vor.u32 %v6380_v46, %v6377_v6  ;;  %v27144_v59 = vunpack.c.h.bf16 %v23091_v9  ;;  %v20212_v32 = vadd.f32 %v23285_v52, %v23319_v34  ;;  %v21038_v9 = vld [vmem:[%s26996_s1 + $0x10] sm:$0xff]   ;;  %v6313_v6 = vld [vmem:[#allocation2 + $0x2c] sm:$0x1]  ;;  %v21039_v5 = vld [vmem:[%s26996_s1 + $0x18] sm:$0xff]  }
 0x2a7   : > { %v6041_v2 = vsel %vm21476_vm11, %v6033_v18, %v6040_v45  ;;  %v6240_v31 = vsel %vm21453_vm6, %v6042_v39, %v6239_v1  ;;  %19500 = vmatpush3.bf16.msra.mxu1 %v21259_v60  ;;  %v6391_v13 = vor.u32 %v6390_v20, %v6386_v58  ;;  %v20213_v41 = vadd.f32 %v23293_v12, %v23325_v63  ;;  %v23440_v63 = vld [vmem:[#allocation2 + $0x28] sm:$0xf] }
 0x2a8   : > { %6238 = vst.msk [vmem:[#allocation2 + $0x94] sm:$0xf] %vm201_vm0, %v6041_v2  ;;  %6241 = vst [vmem:[#allocation2 + $0x98] sm:$0x1] %v6240_v31  ;;  %v5732_v18 = vadd.f32 %v27144_v59, %v5636_v10  ;;  %v6382_v53 = vrot.slane %v6381_v25, 4  ;;  %v5571_v35 = vmul.f32 %v20211_v43, %v23076_v47  ;;  %v6399_v48 = vshrl.u32 %v23410_v8, 16  ;;  %19501 = vmatprep.subr.bf16.mxu1 %v21037_v22 }
 0x2a9   : > { %v6402_v21 = vshll.u32 %v23410_v8, 16  ;;  %v6392_v11 = vrot.slane %v6391_v13, 4  ;;  %v5569_v15 = vmul.f32 %v20212_v32, %v23076_v47  ;;  %v5572_v52 = vmul.f32 %v20213_v41, %v23076_v47 }
 0x2aa   : > { %v18326_v40 = vpack.c.bf16 %v5732_v18, %v5732_v18  ;;  %v6387_v12 = vsel %vm21459_vm7, %v6382_v53, %v6386_v58  ;;  %v5609_v34 = vadd.f32 %v23096_v38, %v5571_v35  ;;  %v6401_v28 = vrot.slane %v6399_v48, 4 }
 0x2ab   : > { %v6404_v62 = vrot.slane %v6402_v21, 5  ;;  %v6397_v19 = vsel %vm21459_vm7, %v6392_v11, %v6396_v36  ;;  %v5607_v56 = vadd.f32 %v23096_v38, %v5569_v15  ;;  %19502 = vmatpush3.bf16.msra.mxu1 %v21037_v22  ;;  %v5610_v45 = vadd.f32 %v23096_v38, %v5572_v52  ;;  %v6232_v36 = vld [vmem:[#allocation2 + $0x8c] sm:$0x1]  ;;  %v23458_v21 = vld [vmem:[#allocation2 + $0x30] sm:$0xf] }
 0x2ac   : > { %v6018_v1 = vshrl.u32 %v18326_v40, 16  ;;  %v6021_v42 = vshll.u32 %v18326_v40, 16  ;;  %v17375_v50 = vcombine.low %v6387_v12, %v6397_v19  ;;  %v5641_v47 = vmax.f32 %v5609_v34, 0.0  ;;  %19503 = vmatprep.subr.bf16.mxu1 %v21038_v9  ;;  %v23463_v40 = vld [vmem:[%s26996_s1 + $0x40] sm:$0xff]   ;;  %v6242_v19 = vld [vmem:[#allocation2 + $0x9c] sm:$0xf] }
 0x2ad   : > { %v6405_v39 = vor.u32 %v6404_v62, %v6401_v28  ;;  %v5639_v10 = vmax.f32 %v5607_v56, 0.0  ;;  %v6408_v58 = vshll.u32 %v23440_v63, 16  ;;  %v6412_v20 = vshrl.u32 %v23440_v63, 16  ;;  %v6249_v28 = vld [vmem:[#allocation2 + $0xa8] sm:$0xf] }
 0x2ae   : > { %v6020_v46 = vrot.slane %v6018_v1, 7  ;;  %19471 = vmatprep.mubr.msk.bf16.mxu1 %vm1254_vm10, %v17375_v50  ;;  %v27145_v22 = vunpack.c.l.bf16 %v23105_v0  ;;  %v5642_v31 = vmax.f32 %v5610_v45, 0.0  ;;  %v6418_v25 = vshll.u32 %v6313_v6, 16 }
 0x2af   : > { %v6406_v38 = vrot.slane %v6405_v39, 4  ;;  %v27146_v59 = vunpack.c.l.bf16 %v23108_v55  ;;  %v6410_v13 = vrot.slane %v6408_v58, 5  ;;  %19504 = vmatpush3.bf16.msra.mxu1 %v21038_v9  ;;  %v27147_v41 = vunpack.c.h.bf16 %v23105_v0  ;;  %v6253_v39 = vld [vmem:[#allocation2 + $0xb0] sm:$0x1] }
 0x2b0   : > { %v5737_v2 = vadd.f32 %v27145_v22, %v5641_v47  ;;  %v6023_v43 = vor.u32 %v6021_v42, %v6020_v46  ;;  %v6025_v60 = vrot.slane %v6020_v46, 4  ;;  %v6414_v35 = vrot.slane %v6412_v20, 4  ;;  %19505 = vmatprep.subr.bf16.mxu1 %v21039_v5  ;;  %v23483_v46 = vld [vmem:[%s26997_s2] ss:$0 sm:$0xff]  ;;  %v23489_v22 = vld [vmem:[#allocation2 + $0x34] sm:$0xf] }
 0x2b1   : > { %v5735_v18 = vadd.f32 %v27146_v59, %v5639_v10  ;;  %v5738_v53 = vadd.f32 %v27147_v41, %v5642_v31  ;;  %v6420_v48 = vrot.slane %v6418_v25, 5  ;;  %v6411_v15 = vsel %vm21459_vm7, %v6406_v38, %v6410_v13  ;;  %v23496_v25 = vld [vmem:[%s26998_s3] ss:$0 sm:$0xff] }
 0x2b2   : > { %v18331_v32 = vpack.c.bf16 %v5737_v2, %v5737_v2  ;;  %v6024_v11 = vsel %vm21476_vm11, %v6016_v44, %v6023_v43  ;;  %v6233_v9 = vsel %vm21453_vm6, %v6025_v60, %v6232_v36  ;;  %v6415_v6 = vor.u32 %v6414_v35, %v6410_v13  ;;  %v23499_v60 = vld [vmem:[#allocation2 + $0x38] sm:$0x1] }
 0x2b3   : > { %v18329_v0 = vpack.c.bf16 %v5735_v18, %v5735_v18  ;;  %6231 = vst.msk [vmem:[#allocation2 + $0x88] sm:$0xf] %vm201_vm0, %v6024_v11  ;;  %6234 = vst [vmem:[#allocation2 + $0x8c] sm:$0x1] %v6233_v9  ;;  %v18332_v34 = vpack.c.bf16 %v5738_v53, %v5738_v53  ;;  %v20214_v44 = vadd.f32 %v23297_v16, %v23329_v23  ;;  %v6423_v1 = vshrl.u32 %v23458_v21, 16 }
 0x2b4   : > { %v6061_v52 = vshrl.u32 %v18331_v32, 16  ;;  %v6064_v12 = vshll.u32 %v18331_v32, 16  ;;  %19506 = vmatpush3.bf16.msra.mxu1 %v21039_v5  ;;  %v6416_v47 = vrot.slane %v6415_v6, 4  ;;  %v6426_v5 = vshll.u32 %v23458_v21, 16 }
 0x2b5   : > { %v6044_v62 = vshrl.u32 %v18329_v0, 16  ;;  %v6047_v17 = vshll.u32 %v18329_v0, 16  ;;  %v6069_v56 = vshrl.u32 %v18332_v34, 16  ;;  %v6072_v50 = vshll.u32 %v18332_v34, 16  ;;  %19539 = vmatprep.subr.bf16.mxu1 %v23463_v40 }
 0x2b6   : > { %v6063_v42 = vrot.slane %v6061_v52, 7  ;;  %v5570_v16 = vmul.f32 %v23483_v46, %v20214_v44  ;;  %v6425_v23 = vrot.slane %v6423_v1, 4  ;;  %v6421_v36 = vsel %vm21459_vm7, %v6416_v47, %v6420_v48  ;;  %v23513_v52 = vld [vmem:[#allocation2 + $0x3c] sm:$0xf] }
 0x2b7   : > { %v23478_v45 = vrot.slane %v6044_v62, 7  ;;  %v6071_v20 = vrot.slane %v6069_v56, 7  ;;  %v17376_v38 = vcombine.low %v6411_v15, %v6421_v36  ;;  %v6428_v32 = vrot.slane %v6426_v5, 5 }
 0x2b8   : > { %v6066_v10 = vor.u32 %v6064_v12, %v6063_v42  ;;  %v6067_v58 = vrot.slane %v6063_v42, 4  ;;  %v5608_v43 = vadd.f32 %v23496_v25, %v5570_v16  ;;  %v6432_v35 = vshll.u32 %v23489_v22, 16 }
 0x2b9   : > { %v6049_v2 = vor.u32 %v6047_v17, %v23478_v45  ;;  %v6050_v31 = vrot.slane %v23478_v45, 4  ;;  %v6074_v18 = vor.u32 %v6072_v50, %v6071_v20  ;;  %v6076_v13 = vrot.slane %v6071_v20, 4  ;;  %19472 = vmatmul.mubr.msk.bf16.gmra.mrb[36].mxu1 %vm1254_vm10, %v17376_v38 }
 0x2ba   : > { %v6250_v59 = vsel %vm21469_vm9, %v6066_v10, %v6249_v28  ;;  %v5640_v53 = vmax.f32 %v5608_v43, 0.0  ;;  %v6436_v48 = vshrl.u32 %v23489_v22, 16  ;;  %v6429_v0 = vor.u32 %v6428_v32, %v6425_v23  ;;  %v6246_v43 = vld [vmem:[#allocation2 + $0xa4] sm:$0x1] }
 0x2bb   : > { %6251 = vst [vmem:[#allocation2 + $0xa8] sm:$0xf] %v6250_v59  ;;  %v6243_v41 = vsel %vm21469_vm9, %v6049_v2, %v6242_v19  ;;  %v6075_v11 = vsel %vm21476_vm11, %v6067_v58, %v6074_v18  ;;  %v6254_v9 = vsel %vm21453_vm6, %v6076_v13, %v6253_v39  ;;  %v6442_v15 = vshll.u32 %v23499_v60, 16  ;;  %v23539_v32 = vld [vmem:[#allocation2 + $0x44] sm:$0x1] }
 0x2bc   : > { %6244 = vst [vmem:[#allocation2 + $0x9c] sm:$0xf] %v6243_v41  ;;  %6252 = vst.msk [vmem:[#allocation2 + $0xac] sm:$0xf] %vm201_vm0, %v6075_v11  ;;  %v27148_v12 = vunpack.c.h.bf16 %v23108_v55  ;;  %v6434_v6 = vrot.slane %v6432_v35, 5  ;;  %v6438_v28 = vrot.slane %v6436_v48, 4  ;;  %v20215_v62 = vadd.f32 %v23327_v30, %v23343_v24 }
 0x2bd   : > { %6255 = vst [vmem:[#allocation2 + $0xb0] sm:$0x1] %v6254_v9  ;;  %v6430_v17 = vrot.slane %v6429_v0, 4  ;;  %v6444_v44 = vrot.slane %v6442_v15, 5  ;;  %v20216_v1 = vadd.f32 %v23331_v4, %v23353_v54  ;;  %v20217_v42 = vadd.f32 %v23333_v57, %v23357_v37  ;;  %v23530_v24 = vld [vmem:[#allocation2 + $0x40] sm:$0xf] }
 0x2be   : > { %v5736_v34 = vadd.f32 %v27148_v12, %v5640_v53  ;;  %v6439_v56 = vor.u32 %v6438_v28, %v6434_v6  ;;  %v5575_v50 = vmul.f32 %v23483_v46, %v20215_v62  ;;  %v6447_v55 = vshrl.u32 %v23513_v52, 16 }
 0x2bf   : > { %v6435_v47 = vsel %vm21459_vm7, %v6430_v17, %v6434_v6  ;;  %v5573_v39 = vmul.f32 %v23483_v46, %v20216_v1  ;;  %v5576_v30 = vmul.f32 %v23483_v46, %v20217_v42  ;;  %v6450_v4 = vshll.u32 %v23513_v52, 16 }
 0x2c0   : > { %v18330_v19 = vpack.c.bf16 %v5736_v34, %v5736_v34  ;;  %v6440_v57 = vrot.slane %v6439_v56, 4  ;;  %v5613_v37 = vadd.f32 %v23496_v25, %v5575_v50  ;;  %v6449_v10 = vrot.slane %v6447_v55, 4  ;;  %v23559_v50 = vld [vmem:[#allocation2 + $0x48] sm:$0xf] }
 0x2c1   : > { %v5611_v23 = vadd.f32 %v23496_v25, %v5573_v39  ;;  %v5614_v5 = vadd.f32 %v23496_v25, %v5576_v30  ;;  %v6452_v58 = vrot.slane %v6450_v4, 5  ;;  %v6456_v38 = vshll.u32 %v23530_v24, 16  ;;  %v23563_v39 = vld [vmem:[#allocation2 + $0x4c] sm:$0xf] }
 0x2c2   : > { %v6052_v54 = vshrl.u32 %v18330_v19, 16  ;;  %v6055_v16 = vshll.u32 %v18330_v19, 16  ;;  %v6445_v36 = vsel %vm21459_vm7, %v6440_v57, %v6444_v44  ;;  %v5645_v2 = vmax.f32 %v5613_v37, 0.0  ;;  %v6263_v37 = vld [vmem:[#allocation2 + $0xc0] sm:$0xf] }
 0x2c3   : > { %v17377_v59 = vcombine.low %v6435_v47, %v6445_v36  ;;  %v5643_v18 = vmax.f32 %v5611_v23, 0.0  ;;  %v5646_v13 = vmax.f32 %v5614_v5, 0.0  ;;  %v6453_v41 = vor.u32 %v6452_v58, %v6449_v10 }
 0x2c4   : > { %v6054_v20 = vrot.slane %v6052_v54, 7  ;;  %v27149_v48 = vunpack.c.l.bf16 %v23118_v51  ;;  %v6458_v9 = vrot.slane %v6456_v38, 5  ;;  %v27150_v0 = vunpack.c.l.bf16 %v23121_v14 }
 0x2c5   : > { %19475 = vmatprep.mubr.msk.bf16.mxu1 %vm1254_vm10, %v17377_v59  ;;  %v27151_v12 = vunpack.c.h.bf16 %v23118_v51  ;;  %v6454_v6 = vrot.slane %v6453_v41, 4  ;;  %v6460_v28 = vshrl.u32 %v23530_v24, 16  ;;  %v6466_v1 = vshll.u32 %v23539_v32, 16 }
 0x2c6   : > { %v6057_v53 = vor.u32 %v6055_v16, %v6054_v20  ;;  %v6059_v35 = vrot.slane %v6054_v20, 4  ;;  %v5741_v11 = vadd.f32 %v27149_v48, %v5645_v2  ;;  %v5739_v15 = vadd.f32 %v27150_v0, %v5643_v18  ;;  %v6256_v20 = vld [vmem:[#allocation2 + $0xb4] sm:$0xf] }
 0x2c7   : > { %v5742_v34 = vadd.f32 %v27151_v12, %v5646_v13  ;;  %v6459_v19 = vsel %vm21459_vm7, %v6454_v6, %v6458_v9  ;;  %v6462_v56 = vrot.slane %v6460_v28, 4  ;;  %v20218_v47 = vadd.f32 %v23337_v27, %v23361_v26  ;;  %v23572_v13 = vld [vmem:[#allocation2 + $0x50] sm:$0x1]  ;;  %v23582_v12 = vld [vmem:[#allocation2 + $0x58] sm:$0xf] }
 0x2c8   : > { %v6058_v62 = vsel %vm21476_vm11, %v6050_v31, %v6057_v53  ;;  %v6247_v17 = vsel %vm21453_vm6, %v6059_v35, %v6246_v43  ;;  %v18335_v44 = vpack.c.bf16 %v5741_v11, %v5741_v11  ;;  %v18333_v42 = vpack.c.bf16 %v5739_v15, %v5739_v15  ;;  %v6267_v43 = vld [vmem:[#allocation2 + $0xc8] sm:$0x1]  ;;  %v23580_v15 = vld [vmem:[#allocation2 + $0x54] sm:$0xf] }
 0x2c9   : > { %6245 = vst.msk [vmem:[#allocation2 + $0xa0] sm:$0xf] %vm201_vm0, %v6058_v62  ;;  %6248 = vst [vmem:[#allocation2 + $0xa4] sm:$0x1] %v6247_v17  ;;  %v18336_v51 = vpack.c.bf16 %v5742_v34, %v5742_v34  ;;  %v6468_v31 = vrot.slane %v6466_v1, 5  ;;  %v6463_v23 = vor.u32 %v6462_v56, %v6458_v9  ;;  %v5574_v5 = vmul.f32 %v23483_v46, %v20218_v47 }
 0x2ca   : > { %v6095_v45 = vshrl.u32 %v18335_v44, 16  ;;  %v6098_v55 = vshll.u32 %v18335_v44, 16  ;;  %v6078_v30 = vshrl.u32 %v18333_v42, 16  ;;  %v6081_v4 = vshll.u32 %v18333_v42, 16 }
 0x2cb   : > { %v6103_v54 = vshrl.u32 %v18336_v51, 16  ;;  %v6106_v16 = vshll.u32 %v18336_v51, 16  ;;  %v6471_v10 = vshrl.u32 %v23559_v50, 16  ;;  %v6474_v2 = vshll.u32 %v23559_v50, 16 }
 0x2cc   : > { %v6097_v57 = vrot.slane %v6095_v45, 7  ;;  %v23567_v58 = vrot.slane %v6078_v30, 7  ;;  %v6480_v27 = vshll.u32 %v23563_v39, 16  ;;  %v6464_v59 = vrot.slane %v6463_v23, 4  ;;  %v23599_v30 = vld [vmem:[#allocation2 + $0x5c] sm:$0x1] }
 0x2cd   : > { %v6105_v36 = vrot.slane %v6103_v54, 7  ;;  %v5612_v18 = vadd.f32 %v23496_v25, %v5574_v5  ;;  %v6473_v0 = vrot.slane %v6471_v10, 4  ;;  %v27152_v62 = vunpack.c.h.bf16 %v23121_v14 }
 0x2ce   : > { %v6100_v26 = vor.u32 %v6098_v55, %v6097_v57  ;;  %v6101_v38 = vrot.slane %v6097_v57, 4  ;;  %v6083_v46 = vor.u32 %v6081_v4, %v23567_v58  ;;  %v6084_v41 = vrot.slane %v23567_v58, 4  ;;  %v23602_v4 = vld [vmem:[#allocation2 + $0x60] sm:$0xf] }
 0x2cf   : > { %v6108_v53 = vor.u32 %v6106_v16, %v6105_v36  ;;  %v6110_v35 = vrot.slane %v6105_v36, 4  ;;  %v6469_v11 = vsel %vm21459_vm7, %v6464_v59, %v6468_v31  ;;  %v5644_v9 = vmax.f32 %v5612_v18, 0.0  ;;  %v6260_v36 = vld [vmem:[#allocation2 + $0xbc] sm:$0x1] }
 0x2d0   : > { %v6264_v48 = vsel %vm21469_vm9, %v6100_v26, %v6263_v37  ;;  %v6257_v25 = vsel %vm21469_vm9, %v6083_v46, %v6256_v20  ;;  %v17378_v28 = vcombine.low %v6459_v19, %v6469_v11  ;;  %v6476_v44 = vrot.slane %v6474_v2, 5 }
 0x2d1   : > { %6265 = vst [vmem:[#allocation2 + $0xc0] sm:$0xf] %v6264_v48  ;;  %v6109_v34 = vsel %vm21476_vm11, %v6101_v38, %v6108_v53  ;;  %v6268_v6 = vsel %vm21453_vm6, %v6110_v35, %v6267_v43  ;;  %6258 = vst [vmem:[#allocation2 + $0xb4] sm:$0xf] %v6257_v25  ;;  %v5740_v17 = vadd.f32 %v27152_v62, %v5644_v9  ;;  %v6482_v1 = vrot.slane %v6480_v27, 5 }
 0x2d2   : > { %6266 = vst.msk [vmem:[#allocation2 + $0xc4] sm:$0xf] %vm201_vm0, %v6109_v34  ;;  %6269 = vst [vmem:[#allocation2 + $0xc8] sm:$0x1] %v6268_v6  ;;  %v6484_v42 = vshrl.u32 %v23563_v39, 16  ;;  %19476 = vmatmul.mubr.msk.bf16.gmra.mrb[40].mxu1 %vm1254_vm10, %v17378_v28  ;;  %v6490_v51 = vshll.u32 %v23572_v13, 16  ;;  %v6477_v31 = vor.u32 %v6476_v44, %v6473_v0 }
 0x2d3   : > { %v6495_v56 = vshrl.u32 %v23580_v15, 16  ;;  %v6498_v45 = vshll.u32 %v23580_v15, 16  ;;  %v6504_v19 = vshll.u32 %v23582_v12, 16  ;;  %v18334_v55 = vpack.c.bf16 %v5740_v17, %v5740_v17  ;;  %v23605_v38 = vld [vmem:[#allocation2 + $0x64] sm:$0xf] }
 0x2d4   : > { %v6486_v47 = vrot.slane %v6484_v42, 4  ;;  %v6508_v14 = vshrl.u32 %v23582_v12, 16  ;;  %v6492_v54 = vrot.slane %v6490_v51, 5  ;;  %v6478_v10 = vrot.slane %v6477_v31, 4  ;;  %v23611_v9 = vld [vmem:[#allocation2 + $0x68] sm:$0x1] }
 0x2d5   : > { %v6497_v16 = vrot.slane %v6495_v56, 4  ;;  %v6500_v57 = vrot.slane %v6498_v45, 5  ;;  %v6506_v37 = vrot.slane %v6504_v19, 5  ;;  %v6086_v23 = vshrl.u32 %v18334_v55, 16  ;;  %v23615_v62 = vld [vmem:[#allocation2 + $0x6c] sm:$0xf] }
 0x2d6   : > { %v6089_v5 = vshll.u32 %v18334_v55, 16  ;;  %v6487_v20 = vor.u32 %v6486_v47, %v6482_v1  ;;  %v6510_v27 = vrot.slane %v6508_v14, 4  ;;  %v6514_v26 = vshll.u32 %v23599_v30, 16  ;;  %v23627_v55 = vld [vmem:[#allocation2 + $0x70] sm:$0xf] }
 0x2d7   : > { %v6501_v2 = vor.u32 %v6500_v57, %v6497_v16  ;;  %v6519_v43 = vshrl.u32 %v23602_v4, 16  ;;  %v6088_v59 = vrot.slane %v6086_v23, 7  ;;  %v6483_v18 = vsel %vm21459_vm7, %v6478_v10, %v6482_v1  ;;  %v23629_v31 = vld [vmem:[#allocation2 + $0x78] sm:$0xf]  ;;  %v23636_v14 = vld [vmem:[#allocation2 + $0x74] sm:$0x1] }
 0x2d8   : > { %v6488_v46 = vrot.slane %v6487_v20, 4  ;;  %v6522_v53 = vshll.u32 %v23602_v4, 16  ;;  %v6511_v48 = vor.u32 %v6510_v27, %v6506_v37  ;;  %v6516_v11 = vrot.slane %v6514_v26, 5  ;;  %v23644_v27 = vld [vmem:[#allocation2 + $0x80] sm:$0x1] }
 0x2d9   : > { %v6502_v35 = vrot.slane %v6501_v2, 4  ;;  %v6521_v0 = vrot.slane %v6519_v43, 4  ;;  %v6091_v25 = vor.u32 %v6089_v5, %v6088_v59  ;;  %v6093_v34 = vrot.slane %v6088_v59, 4  ;;  %v23640_v5 = vld [vmem:[#allocation2 + $0x7c] sm:$0xf] }
 0x2da   : > { %v6493_v6 = vsel %vm21459_vm7, %v6488_v46, %v6492_v54  ;;  %v6524_v28 = vrot.slane %v6522_v53, 5  ;;  %v6512_v1 = vrot.slane %v6511_v48, 4  ;;  %v6528_v42 = vshll.u32 %v23605_v38, 16 }
 0x2db   : > { %v17379_v17 = vcombine.low %v6483_v18, %v6493_v6  ;;  %v6507_v44 = vsel %vm21459_vm7, %v6502_v35, %v6506_v37  ;;  %v6092_v51 = vsel %vm21476_vm11, %v6084_v41, %v6091_v25  ;;  %v6261_v56 = vsel %vm21453_vm6, %v6093_v34, %v6260_v36 }
 0x2dc   : > { %v6525_v45 = vor.u32 %v6524_v28, %v6521_v0  ;;  %v6532_v19 = vshrl.u32 %v23605_v38, 16  ;;  %6259 = vst.msk [vmem:[#allocation2 + $0xb8] sm:$0xf] %vm201_vm0, %v6092_v51  ;;  %6262 = vst [vmem:[#allocation2 + $0xbc] sm:$0x1] %v6261_v56  ;;  %v6517_v58 = vsel %vm21459_vm7, %v6512_v1, %v6516_v11  ;;  %v6530_v47 = vrot.slane %v6528_v42, 5 }
 0x2dd   : > { %19479 = vmatprep.mubr.msk.bf16.mxu1 %vm1254_vm10, %v17379_v17  ;;  %v6538_v41 = vshll.u32 %v23611_v9, 16  ;;  %v6543_v54 = vshrl.u32 %v23615_v62, 16  ;;  %v17380_v16 = vcombine.low %v6507_v44, %v6517_v58  ;;  %v6546_v23 = vshll.u32 %v23615_v62, 16  ;;  %v23654_v1 = vld [vmem:[#allocation2 + $0x84] sm:$0xf] }
 0x2de   : > { %v6526_v57 = vrot.slane %v6525_v45, 4  ;;  %v6534_v37 = vrot.slane %v6532_v19, 4  ;;  %v6552_v36 = vshll.u32 %v23627_v55, 16  ;;  %v6556_v2 = vshrl.u32 %v23627_v55, 16  ;;  %v23659_v19 = vld [vmem:[#allocation2 + $0x88] sm:$0xf] }
 0x2df   : > { %v6540_v10 = vrot.slane %v6538_v41, 5  ;;  %v6545_v20 = vrot.slane %v6543_v54, 4  ;;  %19480 = vmatmul.mubr.msk.bf16.gmra.mrb[44].mxu1 %vm1254_vm10, %v17380_v16  ;;  %v6548_v59 = vrot.slane %v6546_v23, 5  ;;  %v6562_v18 = vshll.u32 %v23636_v14, 16 }
 0x2e0   : > { %v6531_v26 = vsel %vm21459_vm7, %v6526_v57, %v6530_v47  ;;  %v6535_v43 = vor.u32 %v6534_v37, %v6530_v47  ;;  %v6554_v46 = vrot.slane %v6552_v36, 5  ;;  %v6558_v53 = vrot.slane %v6556_v2, 4  ;;  %v23663_v37 = vld [vmem:[#allocation2 + $0x8c] sm:$0x1] }
 0x2e1   : > { %v6567_v35 = vshrl.u32 %v23629_v31, 16  ;;  %v6570_v48 = vshll.u32 %v23629_v31, 16  ;;  %v6549_v0 = vor.u32 %v6548_v59, %v6545_v20  ;;  %v6564_v25 = vrot.slane %v6562_v18, 5 }
 0x2e2   : > { %v6536_v11 = vrot.slane %v6535_v43, 4  ;;  %v6576_v34 = vshll.u32 %v23640_v5, 16  ;;  %v6559_v6 = vor.u32 %v6558_v53, %v6554_v46  ;;  %v6580_v44 = vshrl.u32 %v23640_v5, 16  ;;  %v23671_v43 = vld [vmem:[#allocation2 + $0x90] sm:$0xf] }
 0x2e3   : > { %v6569_v28 = vrot.slane %v6567_v35, 4  ;;  %v6572_v17 = vrot.slane %v6570_v48, 5  ;;  %v6550_v51 = vrot.slane %v6549_v0, 4  ;;  %v6586_v45 = vshll.u32 %v23644_v27, 16  ;;  %v23674_v35 = vld [vmem:[#allocation2 + $0x94] sm:$0xf] }
 0x2e4   : > { %v6541_v42 = vsel %vm21459_vm7, %v6536_v11, %v6540_v10  ;;  %v6578_v56 = vrot.slane %v6576_v34, 5  ;;  %v6560_v47 = vrot.slane %v6559_v6, 4  ;;  %v6582_v54 = vrot.slane %v6580_v44, 4 }
 0x2e5   : > { %v17381_v58 = vcombine.low %v6531_v26, %v6541_v42  ;;  %v6573_v41 = vor.u32 %v6572_v17, %v6569_v28  ;;  %v6555_v16 = vsel %vm21459_vm7, %v6550_v51, %v6554_v46  ;;  %v6588_v57 = vrot.slane %v6586_v45, 5  ;;  %v23680_v28 = vld [vmem:[#allocation2 + $0x98] sm:$0x1] }
 0x2e6   : > { %v6591_v23 = vshrl.u32 %v23654_v1, 16  ;;  %v6594_v10 = vshll.u32 %v23654_v1, 16  ;;  %v6565_v20 = vsel %vm21459_vm7, %v6560_v47, %v6564_v25  ;;  %v6583_v2 = vor.u32 %v6582_v54, %v6578_v56  ;;  %27153 = vst [vmem:[#allocation6_spill] sm:$0xff] %v23680_v28 }
 0x2e7   : > { %19483 = vmatprep.mubr.msk.bf16.mxu1 %vm1254_vm10, %v17381_v58  ;;  %v6574_v36 = vrot.slane %v6573_v41, 4  ;;  %v6600_v26 = vshll.u32 %v23659_v19, 16  ;;  %v17382_v59 = vcombine.low %v6555_v16, %v6565_v20  ;;  %v6604_v53 = vshrl.u32 %v23659_v19, 16  ;;  %v23688_v58 = vld [vmem:[#allocation2 + $0x9c] sm:$0xf] }
 0x2e8   : > { %v6593_v18 = vrot.slane %v6591_v23, 4  ;;  %v6596_v46 = vrot.slane %v6594_v10, 5  ;;  %v6584_v11 = vrot.slane %v6583_v2, 4  ;;  %v6610_v25 = vshll.u32 %v23663_v37, 16  ;;  %v23690_v23 = vld [vmem:[#allocation2 + $0xa0] sm:$0xf] }
 0x2e9   : > { %v6579_v48 = vsel %vm21459_vm7, %v6574_v36, %v6578_v56  ;;  %v6602_v0 = vrot.slane %v6600_v26, 5  ;;  %19484 = vmatmul.mubr.msk.bf16.gmra.mrb[48].mxu1 %vm1254_vm10, %v17382_v59  ;;  %v6606_v6 = vrot.slane %v6604_v53, 4  ;;  %v6615_v17 = vshrl.u32 %v23671_v43, 16 }
 0x2ea   : > { %v6597_v34 = vor.u32 %v6596_v46, %v6593_v18  ;;  %v6618_v44 = vshll.u32 %v23671_v43, 16  ;;  %v6589_v42 = vsel %vm21459_vm7, %v6584_v11, %v6588_v57  ;;  %v6612_v51 = vrot.slane %v6610_v25, 5  ;;  %v23698_v11 = vld [vmem:[#allocation2 + $0xa4] sm:$0x1] }
 0x2eb   : > { %v6624_v56 = vshll.u32 %v23674_v35, 16  ;;  %v6628_v45 = vshrl.u32 %v23674_v35, 16  ;;  %v17383_v47 = vcombine.low %v6579_v48, %v6589_v42  ;;  %v6607_v54 = vor.u32 %v6606_v6, %v6602_v0  ;;  %27154 = vst [vmem:[#allocation7_spill] sm:$0xff] %v23698_v11  ;;  %v23706_v42 = vld [vmem:[#allocation2 + $0xac] sm:$0xf] }
 0x2ec   : > { %v6598_v41 = vrot.slane %v6597_v34, 4  ;;  %v6617_v16 = vrot.slane %v6615_v17, 4  ;;  %v6620_v10 = vrot.slane %v6618_v44, 5  ;;  %v6634_v2 = vshll.u32 %v23680_v28, 16  ;;  %v23701_v34 = vld [vmem:[#allocation2 + $0xa8] sm:$0xf] }
 0x2ed   : > { %v6626_v20 = vrot.slane %v6624_v56, 5  ;;  %v6630_v36 = vrot.slane %v6628_v45, 4  ;;  %19487 = vmatprep.mubr.msk.bf16.mxu1 %vm1254_vm10, %v17383_v47  ;;  %v6608_v26 = vrot.slane %v6607_v54, 4  ;;  %v6639_v59 = vshrl.u32 %v23688_v58, 16 }
 0x2ee   : > { %v6603_v57 = vsel %vm21459_vm7, %v6598_v41, %v6602_v0  ;;  %v6642_v18 = vshll.u32 %v23688_v58, 16  ;;  %v6621_v46 = vor.u32 %v6620_v10, %v6617_v16  ;;  %v6636_v48 = vrot.slane %v6634_v2, 5 }
 0x2ef   : > { %v6631_v53 = vor.u32 %v6630_v36, %v6626_v20  ;;  %v6648_v25 = vshll.u32 %v23690_v23, 16  ;;  %v6613_v6 = vsel %vm21459_vm7, %v6608_v26, %v6612_v51  ;;  %v6641_v17 = vrot.slane %v6639_v59, 4  ;;  %v23715_v26 = vld [vmem:[#allocation2 + $0xb0] sm:$0x1] }
 0x2f0   : > { %v6644_v44 = vrot.slane %v6642_v18, 5  ;;  %v6652_v0 = vshrl.u32 %v23690_v23, 16  ;;  %v17384_v56 = vcombine.low %v6603_v57, %v6613_v6  ;;  %v6622_v45 = vrot.slane %v6621_v46, 4  ;;  %27155 = vst [vmem:[#allocation8_spill] sm:$0xff] %v23715_v26  ;;  %v23719_v18 = vld [vmem:[#allocation2 + $0xb4] sm:$0xf] }
 0x2f1   : > { %v6632_v47 = vrot.slane %v6631_v53, 4  ;;  %v6650_v41 = vrot.slane %v6648_v25, 5  ;;  %v6658_v10 = vshll.u32 %v23698_v11, 16  ;;  %v6663_v36 = vshrl.u32 %v23701_v34, 16  ;;  %v23721_v6 = vld [vmem:[#allocation2 + $0xb8] sm:$0xf] }
 0x2f2   : > { %v6645_v54 = vor.u32 %v6644_v44, %v6641_v17  ;;  %v6654_v16 = vrot.slane %v6652_v0, 4  ;;  %19488 = vmatmul.mubr.msk.bf16.gmra.mrb[52].mxu1 %vm1254_vm10, %v17384_v56  ;;  %v6627_v51 = vsel %vm21459_vm7, %v6622_v45, %v6626_v20  ;;  %v6666_v57 = vshll.u32 %v23701_v34, 16 }
 0x2f3   : > { %v6637_v2 = vsel %vm21459_vm7, %v6632_v47, %v6636_v48  ;;  %v6672_v59 = vshll.u32 %v23706_v42, 16  ;;  %v6665_v17 = vrot.slane %v6663_v36, 4  ;;  %v6676_v20 = vshrl.u32 %v23706_v42, 16 }
 0x2f4   : > { %v17385_v46 = vcombine.low %v6627_v51, %v6637_v2  ;;  %v6646_v53 = vrot.slane %v6645_v54, 4  ;;  %v6655_v25 = vor.u32 %v6654_v16, %v6650_v41  ;;  %v6668_v44 = vrot.slane %v6666_v57, 5  ;;  %v23727_v51 = vld [vmem:[#allocation2 + $0xbc] sm:$0x1] }
 0x2f5   : > { %v6674_v0 = vrot.slane %v6672_v59, 5  ;;  %v6660_v56 = vrot.slane %v6658_v10, 5  ;;  %v6682_v45 = vshll.u32 %v23715_v26, 16  ;;  %v6687_v47 = vshrl.u32 %v23719_v18, 16 }
 0x2f6   : > { %19491 = vmatprep.mubr.msk.bf16.mxu1 %vm1254_vm10, %v17385_v46  ;;  %v6656_v48 = vrot.slane %v6655_v25, 4  ;;  %v6669_v7 = vor.u32 %v6668_v44, %v6665_v17  ;;  %v6678_v49 = vrot.slane %v6676_v20, 4  ;;  %v6690_v54 = vshll.u32 %v23719_v18, 16 }
 0x2f7   : > { %v6696_v16 = vshll.u32 %v23721_v6, 16  ;;  %v6651_v36 = vsel %vm21459_vm7, %v6646_v53, %v6650_v41  ;;  %v6689_v57 = vrot.slane %v6687_v47, 4  ;;  %v6700_v10 = vshrl.u32 %v23721_v6, 16 }
 0x2f8   : > { %v6661_v2 = vsel %vm21459_vm7, %v6656_v48, %v6660_v56  ;;  %v6670_v46 = vrot.slane %v6669_v7, 4  ;;  %v6679_v25 = vor.u32 %v6678_v49, %v6674_v0  ;;  %v6692_v17 = vrot.slane %v6690_v54, 5 }
 0x2f9   : > { %v17386_v59 = vcombine.low %v6651_v36, %v6661_v2  ;;  %v6698_v44 = vrot.slane %v6696_v16, 5  ;;  %v6702_v20 = vrot.slane %v6700_v10, 4  ;;  %v6706_v61 = vshll.u32 %v23727_v51, 16  ;;  %v21262_v16 = vld [vmem:[#allocation2] sm:$0xf] }
 0x2fa   : > { %v6680_v26 = vrot.slane %v6679_v25, 4  ;;  %v6684_v11 = vrot.slane %v6682_v45, 5  ;;  %v6693_v28 = vor.u32 %v6692_v17, %v6689_v57  ;;  %v6675_v53 = vsel %vm21459_vm7, %v6670_v46, %v6674_v0  ;;  %v21263_v36 = vld [vmem:[#allocation2 + $0x4] sm:$0xf]  ;;  %v21266_v0 = vld [vmem:[#allocation2 + $0x18] sm:$0xf] }
 0x2fb   : > { %19492 = vmatmul.mubr.msk.bf16.gmra.mrb[56].mxu1 %vm1254_vm10, %v17386_v59  ;;  %v6703_v41 = vor.u32 %v6702_v20, %v6698_v44  ;;  %v6708_v47 = vrot.slane %v6706_v61, 5  ;;  %v17409_v2 = vcombine.low %v21262_v16, %v21263_v36  ;;  %v17411_v10 = vcombine.low %v21266_v0, %v23393_v29  ;;  %v21045_v59 = vld [vmem:[%s26996_s1 + $0x50] sm:$0xff]   ;;  %v21050_v29 = vld [vmem:[%s26996_s1 + $0x58] sm:$0xff]  }
 0x2fc   : > { %v6685_v48 = vsel %vm21459_vm7, %v6680_v26, %v6684_v11  ;;  %v6694_v56 = vrot.slane %v6693_v28, 4  ;;  %v21264_v28 = vld [vmem:[#allocation2 + $0xc] sm:$0xf]  ;;  %v23749_v11 = vld [vmem:[#allocation2 + $0x10] sm:$0xf]  ;;  %v17412_v46 = vcombine.low %v23410_v8, %v23440_v63  ;;  %v17413_v25 = vcombine.low %v23458_v21, %v23489_v22 }
 0x2fd   : > { %v17387_v7 = vcombine.low %v6675_v53, %v6685_v48  ;;  %v6704_v49 = vrot.slane %v6703_v41, 4  ;;  %v17410_v61 = vcombine.low %v21264_v28, %v23749_v11  ;;  %v21041_v26 = vld [vmem:[%s26996_s1 + $0x48] sm:$0xff]   ;;  %v17414_v8 = vcombine.low %v23513_v52, %v23530_v24  ;;  %v7312_v41 = vld [vmem:[#allocation2] sm:$0xe]  ;;  %v7314_v28 = vld [vmem:[#allocation2 + $0x18] sm:$0xe] }
 0x2fe   : > { %v6699_v54 = vsel %vm21459_vm7, %v6694_v56, %v6698_v44  ;;  %v17415_v17 = vcombine.low %v23559_v50, %v23563_v39  ;;  %v17416_v21 = vcombine.low %v23580_v15, %v23582_v12  ;;  %v17417_v44 = vcombine.low %v23602_v4, %v23605_v38  ;;  %v21267_v48 = vld [vmem:[#allocation2 + $0x8] sm:$0x1] }
 0x2ff   : > { %19495 = vmatprep.mubr.msk.bf16.mxu1 %vm1254_vm10, %v17387_v7  ;;  %v6709_v45 = vsel %vm21459_vm7, %v6704_v49, %v6708_v47  ;;  %v17418_v52 = vcombine.low %v23615_v62, %v23627_v55  ;;  %v17419_v50 = vcombine.low %v23629_v31, %v23640_v5  ;;  %v17420_v15 = vcombine.low %v23654_v1, %v23659_v19 }
 0x300   : > { %v17388_v57 = vcombine.low %v6699_v54, %v6709_v45  ;;  %v17421_v4 = vcombine.low %v23671_v43, %v23674_v35  ;;  %v7362_v20 = vrot.slane %v21263_v36, 5  ;;  %v17422_v62 = vcombine.low %v23688_v58, %v23690_v23  ;;  %v21268_v58 = vld [vmem:[#allocation2 + $0x1c] sm:$0xf] }
 0x301   : > { %v17445_v31 = vrot.slane %v7312_v41, 9  ;;  %v7365_v56 = vrot.slane %v21267_v48, 5  ;;  %v17423_v7 = vcombine.low %v23701_v34, %v23706_v42  ;;  %v7369_v49 = vrot.slane %v23749_v11, 5  ;;  %v7313_v34 = vld [vmem:[#allocation2 + $0xc] sm:$0xe] }
 0x302   : > { %v7364_v53 = vrot.slane %v7362_v20, 4  ;;  %v7376_v47 = vrot.slane %v21268_v58, 5  ;;  %v17424_v45 = vcombine.low %v23719_v18, %v23721_v6  ;;  %v17446_v0 = vrot.slane %v7313_v34, 9 }
 0x303   : > { %19496 = vmatmul.mubr.msk.bf16.gmra.mrb[60].mxu1 %vm1254_vm10, %v17388_v57  ;;  %v7363_v1 = vsel %vm21739_vm14, %v17445_v31, %v7362_v20  ;;  %v7371_v16 = vrot.slane %v7369_v49, 4  ;;  %v21056_v20 = vld [vmem:[%s26996_s1 + $0x70] sm:$0xff]   ;;  %v7397_v31 = vrot.slane %v23530_v24, 5  ;;  %v7404_v48 = vrot.slane %v23563_v39, 5 }
 0x304   : > { %19507 = vmatprep.mubr.msk.bf16.mxu1 %vm1254_vm10, %v17409_v2  ;;  %v7366_v43 = vsel %vm21739_vm14, %v7364_v53, %v7365_v56  ;;  %v7378_v36 = vrot.slane %v7376_v47, 4  ;;  %v21269_v2 = vld [vmem:[#allocation2 + $0x14] sm:$0x1]  ;;  %v7400_v39 = vrot.slane %v23539_v32, 5 }
 0x305   : > { %v17469_v54 = vcombine.low %v7363_v1, %v7366_v43  ;;  %v7372_v57 = vrot.slane %v21269_v2, 5  ;;  %v21057_v1 = vld [vmem:[%s26996_s1 + $0x78] sm:$0xff]   ;;  %v7399_v43 = vrot.slane %v7397_v31, 4  ;;  %v7406_v58 = vrot.slane %v7404_v48, 4 }
 0x307   : > { %v7373_v11 = vsel %vm21739_vm14, %v7371_v16, %v7372_v57  ;;  %v7401_v34 = vsel %vm21739_vm14, %v7399_v43, %v7400_v39  ;;  %v7418_v57 = vrot.slane %v23605_v38, 5  ;;  %v7414_v38 = vrot.slane %v23599_v30, 5 }
 0x30b   : > { %19508 = vmatmul.mubr.msk.bf16.vlgmr.msra.gmra.mrb[32].mxu1 %vm1254_vm10, %v17410_v61  ;;  %v21270_v61 = vld [vmem:[#allocation2 + $0x20] sm:$0x1] }
 0x30c   : > { %19540 = vmatpush3.bf16.msra.mxu1 %v23463_v40  ;;  %19511 = vmatprep.mubr.msk.bf16.mxu1 %vm1254_vm10, %v17411_v10  ;;  %v21054_v40 = vld [vmem:[%s26996_s1 + $0x60] sm:$0xff]   ;;  %v7383_v10 = vrot.slane %v23440_v63, 5 }
 0x30d   : > { %19541 = vmatprep.subr.bf16.mxu1 %v21041_v26  ;;  %v7315_v63 = vld [vmem:[#allocation2 + $0x24] sm:$0xe] }
 0x30e   : > { %v17448_v41 = vrot.slane %v7315_v63, 9 }
 0x310   : > { %19542 = vmatpush3.bf16.msra.mxu1 %v21041_v26  ;;  %v7379_v26 = vrot.slane %v21270_v61, 5 }
 0x311   : > { %19543 = vmatprep.subr.bf16.mxu1 %v21045_v59 }
 0x312   : > { %v7380_v18 = vsel %vm21739_vm14, %v7378_v36, %v7379_v26  ;;  %v7411_v36 = vrot.slane %v23582_v12, 5  ;;  %v7319_v12 = vld [vmem:[#allocation2 + $0x54] sm:$0xe] }
 0x313   : > { %19512 = vmatmul.mubr.msk.bf16.gmra.mrb[36].mxu1 %vm1254_vm10, %v17412_v46  ;;  %v7390_v46 = vrot.slane %v23489_v22, 5  ;;  %v21271_v22 = vld [vmem:[#allocation2 + $0x2c] sm:$0x1] }
 0x314   : > { %19515 = vmatprep.mubr.msk.bf16.mxu1 %vm1254_vm10, %v17413_v25  ;;  %19544 = vmatpush3.bf16.msra.mxu1 %v21045_v59  ;;  %v17447_v59 = vrot.slane %v7314_v28, 9 }
 0x315   : > { %19545 = vmatprep.subr.bf16.mxu1 %v21050_v29 }
 0x318   : > { %19546 = vmatpush3.bf16.msra.mxu1 %v21050_v29  ;;  %v7370_v29 = vsel %vm21739_vm14, %v17446_v0, %v7369_v49  ;;  %v7317_v49 = vld [vmem:[#allocation2 + $0x3c] sm:$0xe]  ;;  %v7413_v0 = vrot.slane %v7411_v36, 4 }
 0x319   : > { %19579 = vmatprep.subr.bf16.mxu1 %v21054_v40  ;;  %v17470_v25 = vcombine.low %v7370_v29, %v7373_v11  ;;  %v17450_v16 = vrot.slane %v7317_v49, 9  ;;  %v7420_v11 = vrot.slane %v7418_v57, 4  ;;  %v7425_v29 = vrot.slane %v23627_v55, 5 }
 0x31a   : > { %v7428_v55 = vrot.slane %v23636_v14, 5  ;;  %v7453_v49 = vrot.slane %v23690_v23, 5  ;;  %v27157_v23 = vld [vmem:[#allocation7_spill] sm:$0xff] }
 0x31b   : > { %19516 = vmatmul.mubr.msk.bf16.gmra.mrb[40].mxu1 %vm1254_vm10, %v17414_v8  ;;  %v7377_v8 = vsel %vm21739_vm14, %v17447_v59, %v7376_v47  ;;  %v7318_v47 = vld [vmem:[#allocation2 + $0x48] sm:$0xe]  ;;  %v7421_v59 = vrot.slane %v23611_v9, 5  ;;  %v7427_v63 = vrot.slane %v7425_v29, 4 }
 0x31c   : > { %19519 = vmatprep.mubr.msk.bf16.mxu1 %vm1254_vm10, %v17415_v17  ;;  %v21055_v17 = vld [vmem:[%s26996_s1 + $0x68] sm:$0xff]   ;;  %v17451_v2 = vrot.slane %v7318_v47, 9  ;;  %v7460_v47 = vrot.slane %v23706_v42, 5 }
 0x31e   : > { %v7405_v61 = vsel %vm21739_vm14, %v17451_v2, %v7404_v48  ;;  %v7325_v2 = vld [vmem:[#allocation2 + $0x9c] sm:$0xe] }
 0x323   : > { %19520 = vmatmul.mubr.msk.bf16.gmra.mrb[44].mxu1 %vm1254_vm10, %v17416_v21  ;;  %v17471_v21 = vcombine.low %v7377_v8, %v7380_v18  ;;  %v17452_v18 = vrot.slane %v7319_v12, 9  ;;  %v7422_v8 = vsel %vm21739_vm14, %v7420_v11, %v7421_v59 }
 0x324   : > { %19523 = vmatprep.mubr.msk.bf16.mxu1 %vm1254_vm10, %v17417_v44  ;;  %v7385_v44 = vrot.slane %v7383_v10, 4 }
 0x32b   : > { %19524 = vmatmul.mubr.msk.bf16.gmra.mrb[48].mxu1 %vm1254_vm10, %v17418_v52  ;;  %v7392_v52 = vrot.slane %v7390_v46, 4 }
 0x32c   : > { %19527 = vmatprep.mubr.msk.bf16.mxu1 %vm1254_vm10, %v17419_v50  ;;  %v7386_v50 = vrot.slane %v21271_v22, 5 }
 0x333   : > { %19528 = vmatmul.mubr.msk.bf16.gmra.mrb[52].mxu1 %vm1254_vm10, %v17420_v15  ;;  %v7316_v15 = vld [vmem:[#allocation2 + $0x30] sm:$0xe] }
 0x334   : > { %19531 = vmatprep.mubr.msk.bf16.mxu1 %vm1254_vm10, %v17421_v4  ;;  %v7393_v4 = vrot.slane %v23499_v60, 5  ;;  %v17449_v53 = vrot.slane %v7316_v15, 9  ;;  %v7384_v60 = vsel %vm21739_vm14, %v17448_v41, %v7383_v10  ;;  %v7320_v10 = vld [vmem:[#allocation2 + $0x60] sm:$0xe] }
 0x33b   : > { %19532 = vmatmul.mubr.msk.bf16.gmra.mrb[56].mxu1 %vm1254_vm10, %v17422_v62  ;;  %v7387_v62 = vsel %vm21739_vm14, %v7385_v44, %v7386_v50  ;;  %v7322_v50 = vld [vmem:[#allocation2 + $0x78] sm:$0xe] }
 0x33c   : > { %19535 = vmatprep.mubr.msk.bf16.mxu1 %vm1254_vm10, %v17423_v7  ;;  %v17472_v56 = vcombine.low %v7384_v60, %v7387_v62  ;;  %v7391_v7 = vsel %vm21739_vm14, %v17449_v53, %v7390_v46  ;;  %v7415_v46 = vsel %vm21739_vm14, %v7413_v0, %v7414_v38  ;;  %v17455_v41 = vrot.slane %v7322_v50, 9  ;;  %v7323_v60 = vld [vmem:[#allocation2 + $0x84] sm:$0xe]  ;;  %v21065_v50 = vld [vmem:[#allocation2 + $0x48] sm:$0xff]  }
 0x33d   : > { %v7467_v0 = vrot.slane %v23721_v6, 5  ;;  %v7470_v6 = vrot.slane %v23727_v51, 5  ;;  %v21069_v51 = vld [vmem:[%s26996_s1 + $0x90] sm:$0xff]  }
 0x343   : > { %19536 = vmatmul.mubr.msk.bf16.gmra.mrb[60].mxu1 %vm1254_vm10, %v17424_v45  ;;  %v23852_v45 = vld [vmem:[%s26996_s1 + $0x80] sm:$0xff]  }
 0x344   : > { %19547 = vmatprep.mubr.msk.bf16.mxu1 %vm1254_vm10, %v17469_v54  ;;  %v7407_v54 = vrot.slane %v23572_v13, 5  ;;  %v7398_v13 = vsel %vm21739_vm14, %v17450_v16, %v7397_v31  ;;  %v7446_v31 = vrot.slane %v23674_v35, 5 }
 0x345   : > { %v17474_v28 = vcombine.low %v7398_v13, %v7401_v34  ;;  %v7326_v13 = vld [vmem:[#allocation2 + $0xa8] sm:$0xe] }
 0x346   : > { %v7408_v32 = vsel %vm21739_vm14, %v7406_v58, %v7407_v54  ;;  %v17459_v12 = vrot.slane %v7326_v13, 9 }
 0x347   : > { %v17475_v26 = vcombine.low %v7405_v61, %v7408_v32  ;;  %v7462_v32 = vrot.slane %v7460_v47, 4  ;;  %v17458_v61 = vrot.slane %v7325_v2, 9 }
 0x348   : > { %v7461_v59 = vsel %vm21739_vm14, %v17459_v12, %v7460_v47  ;;  %v23979_v12 = vld [vmem:[#allocation2 + $0x20] sm:$0x1] }
 0x349   : > { %v7454_v38 = vsel %vm21739_vm14, %v17458_v61, %v7453_v49 }
 0x34b   : > { %19548 = vmatmul.mubr.msk.bf16.vlgmr.msra.gmra.mrb[32].mxu1 %vm1254_vm10, %v17470_v25  ;;  %v17453_v25 = vrot.slane %v7320_v10, 9 }
 0x34c   : > { %19580 = vmatpush3.bf16.msra.mxu1 %v21054_v40  ;;  %19551 = vmatprep.mubr.msk.bf16.mxu1 %vm1254_vm10, %v17471_v21  ;;  %v7394_v40 = vsel %vm21739_vm14, %v7392_v52, %v7393_v4  ;;  %v7412_v21 = vsel %vm21739_vm14, %v17452_v18, %v7411_v36  ;;  %v7321_v52 = vld [vmem:[#allocation2 + $0x6c] sm:$0xe]  ;;  %v7429_v4 = vsel %vm21739_vm14, %v7427_v63, %v7428_v55  ;;  %v7455_v36 = vrot.slane %v7453_v49, 4  ;;  %v21061_v63 = vld [vmem:[#allocation2 + $0x24] sm:$0xff]   ;;  %v21063_v55 = vld [vmem:[#allocation2 + $0x3c] sm:$0xff]  }
 0x34d   : > { %19581 = vmatprep.subr.bf16.mxu1 %v21055_v17  ;;  %v17473_v24 = vcombine.low %v7391_v7, %v7394_v40  ;;  %v17476_v44 = vcombine.low %v7412_v21, %v7415_v46  ;;  %v7419_v30 = vsel %vm21739_vm14, %v17453_v25, %v7418_v57  ;;  %v17454_v15 = vrot.slane %v7321_v52, 9  ;;  %v7324_v7 = vld [vmem:[#allocation2 + $0x90] sm:$0xe]  ;;  %v21073_v49 = vld [vmem:[#allocation2 + $0x9c] sm:$0xff]  }
 0x34e   : > { %v17477_v9 = vcombine.low %v7419_v30, %v7422_v8  ;;  %v17457_v58 = vrot.slane %v7324_v7, 9  ;;  %v7456_v57 = vrot.slane %v27157_v23, 5  ;;  %v7469_v46 = vrot.slane %v7467_v0, 4  ;;  %v21060_v30 = vld [vmem:[#allocation2 + $0x18] sm:$0xff]   ;;  %v21062_v52 = vld [vmem:[#allocation2 + $0x30] sm:$0xff]  }
 0x34f   : > { %v7426_v53 = vsel %vm21739_vm14, %v17454_v15, %v7425_v29  ;;  %v7327_v29 = vld [vmem:[#allocation2 + $0xb4] sm:$0xe]  ;;  %v21067_v15 = vld [vmem:[#allocation2 + $0x60] sm:$0xff]   ;;  %v23963_v7 = vld [vmem:[#allocation2 + $0x28] sm:$0xf] }
 0x350   : > { %19582 = vmatpush3.bf16.msra.mxu1 %v21055_v17  ;;  %v7432_v17 = vrot.slane %v23640_v5, 5  ;;  %v7435_v5 = vrot.slane %v23644_v27, 5  ;;  %v17478_v40 = vcombine.low %v7426_v53, %v7429_v4  ;;  %v17460_v25 = vrot.slane %v7327_v29, 9  ;;  %v21068_v4 = vld [vmem:[#allocation2 + $0x6c] sm:$0xff]  }
 0x351   : > { %19583 = vmatprep.subr.bf16.mxu1 %v21056_v20  ;;  %v7471_v8 = vsel %vm21739_vm14, %v7469_v46, %v7470_v6  ;;  %v8284_v2 = vshll.u32 %v23963_v7, 16 }
 0x352   : > { %v7434_v22 = vrot.slane %v7432_v17, 4  ;;  %v7433_v14 = vsel %vm21739_vm14, %v17455_v41, %v7432_v17  ;;  %v7468_v17 = vsel %vm21739_vm14, %v17460_v25, %v7467_v0  ;;  %v21071_v41 = vld [vmem:[#allocation2 + $0x84] sm:$0xff]  }
 0x353   : > { %19552 = vmatmul.mubr.msk.bf16.gmra.mrb[36].mxu1 %vm1254_vm10, %v17472_v56  ;;  %v7448_v56 = vrot.slane %v7446_v31, 4  ;;  %v17484_v21 = vcombine.low %v7468_v17, %v7471_v8  ;;  %v21075_v25 = vld [vmem:[#allocation2 + $0xa8] sm:$0xff]  }
 0x354   : > { %19555 = vmatprep.mubr.msk.bf16.mxu1 %vm1254_vm10, %v17473_v24  ;;  %19584 = vmatpush3.bf16.msra.mxu1 %v21056_v20  ;;  %v7439_v20 = vrot.slane %v23659_v19, 5  ;;  %v7436_v62 = vsel %vm21739_vm14, %v7434_v22, %v7435_v5  ;;  %v7442_v19 = vrot.slane %v23663_v37, 5  ;;  %v17456_v24 = vrot.slane %v7323_v60, 9  ;;  %v21074_v22 = vld [vmem:[%s26996_s1 + $0x98] sm:$0xff]   ;;  %v23959_v60 = vld [vmem:[#allocation2 + $0x14] sm:$0x1] }
 0x355   : > { %19585 = vmatprep.subr.bf16.mxu1 %v21057_v1  ;;  %v17479_v27 = vcombine.low %v7433_v14, %v7436_v62  ;;  %v7447_v37 = vsel %vm21739_vm14, %v17457_v58, %v7446_v31  ;;  %v21066_v5 = vld [vmem:[#allocation2 + $0x54] sm:$0xff]   ;;  %v8178_v62 = vld [vmem:[#allocation2 + $0xc] sm:$0xf]  ;;  %v23954_v31 = vld [vmem:[#allocation2 + $0x10] sm:$0xf]  ;;  %v8246_v23 = vshll.u32 %v23959_v60, 16 }
 0x356   : > { %v7441_v48 = vrot.slane %v7439_v20, 4  ;;  %v7440_v54 = vsel %vm21739_vm14, %v17456_v24, %v7439_v20  ;;  %v21070_v20 = vld [vmem:[#allocation2 + $0x78] sm:$0xff]   ;;  %v8227_v53 = vshrl.u32 %v8178_v62, 16  ;;  %v8236_v14 = vshll.u32 %v23954_v31, 16 }
 0x358   : > { %19586 = vmatpush3.bf16.msra.mxu1 %v21057_v1  ;;  %v27156_v1 = vld [vmem:[#allocation6_spill] sm:$0xff]  ;;  %v7443_v43 = vsel %vm21739_vm14, %v7441_v48, %v7442_v19  ;;  %v8181_v48 = vld [vmem:[#allocation2 + $0x18] sm:$0xf]  ;;  %v8184_v19 = vld [vmem:[#allocation2 + $0x24] sm:$0xf]  ;;  %v23967_v58 = vrot.slane %v8236_v14, 5 }
 0x359   : > { %19619 = vmatprep.subr.bf16.mxu1 %v23852_v45  ;;  %v7449_v35 = vrot.slane %v27156_v1, 5  ;;  %v17480_v16 = vcombine.low %v7440_v54, %v7443_v43  ;;  %v21072_v1 = vld [vmem:[#allocation2 + $0x90] sm:$0xff]   ;;  %v8251_v47 = vshrl.u32 %v8181_v48, 16  ;;  %v8254_v54 = vshll.u32 %v8181_v48, 16 }
 0x35a   : > { %v23965_v43 = vld [vmem:[#allocation2 + $0x34] sm:$0xf] }
 0x35b   : > { %19556 = vmatmul.mubr.msk.bf16.gmra.mrb[40].mxu1 %vm1254_vm10, %v17474_v28  ;;  %v7450_v39 = vsel %vm21739_vm14, %v7448_v56, %v7449_v35  ;;  %v27158_v28 = vld [vmem:[#allocation8_spill] sm:$0xff]  ;;  %v23961_v56 = vld [vmem:[#allocation2 + $0x1c] sm:$0xf]  ;;  %v8229_v35 = vrot.slane %v8227_v53, 4  ;;  %v8308_v13 = vshll.u32 %v23965_v43, 16  ;;  %v8256_v0 = vrot.slane %v8254_v54, 5 }
 0x35c   : > { %19559 = vmatprep.mubr.msk.bf16.mxu1 %vm1254_vm10, %v17475_v26  ;;  %v17481_v34 = vcombine.low %v7447_v37, %v7450_v39  ;;  %v7463_v42 = vrot.slane %v27158_v28, 5  ;;  %v7457_v26 = vsel %vm21739_vm14, %v7455_v36, %v7456_v57  ;;  %v8264_v37 = vshrl.u32 %v23961_v56, 16  ;;  %v8187_v57 = vld [vmem:[#allocation2 + $0x30] sm:$0xf]  ;;  %v24008_v54 = vld [vmem:[#allocation2 + $0x44] sm:$0x1] }
 0x35d   : > { %v17482_v10 = vcombine.low %v7454_v38, %v7457_v26  ;;  %v8278_v36 = vshll.u32 %v8184_v19, 16  ;;  %v8312_v28 = vshrl.u32 %v23965_v43, 16  ;;  %v8253_v26 = vrot.slane %v8251_v47, 4 }
 0x35e   : > { %v7464_v11 = vsel %vm21739_vm14, %v7462_v32, %v7463_v42  ;;  %v8288_v32 = vshrl.u32 %v23963_v7, 16  ;;  %v8266_v38 = vrot.slane %v8264_v37, 4  ;;  %v8299_v29 = vshrl.u32 %v8187_v57, 16 }
 0x35f   : > { %v17483_v18 = vcombine.low %v7461_v59, %v7464_v11  ;;  %v8280_v59 = vrot.slane %v8278_v36, 5  ;;  %v8302_v6 = vshll.u32 %v8187_v57, 16  ;;  %v23985_v8 = vrot.slane %v8308_v13, 5 }
 0x360   : > { %v8290_v46 = vrot.slane %v8288_v32, 4  ;;  %v8314_v17 = vrot.slane %v8312_v28, 4 }
 0x362   : > { %v8315_v53 = vor.u32 %v8314_v17, %v23985_v8  ;;  %v24027_v17 = vld [vmem:[#allocation2 + $0x58] sm:$0xf] }
 0x363   : > { %19560 = vmatmul.mubr.msk.bf16.gmra.mrb[44].mxu1 %vm1254_vm10, %v17476_v44  ;;  %v21058_v44 = vld [vmem:[#allocation2 + $0xc] sm:$0xff]  }
 0x364   : > { %19563 = vmatprep.mubr.msk.bf16.mxu1 %vm1254_vm10, %v17477_v9  ;;  %v21064_v9 = vld [vmem:[%s26996_s1 + $0x88] sm:$0xff]   ;;  %v8316_v32 = vrot.slane %v8315_v53, 4 }
 0x36b   : > { %19564 = vmatmul.mubr.msk.bf16.gmra.mrb[48].mxu1 %vm1254_vm10, %v17478_v40  ;;  %v8230_v40 = vshll.u32 %v8178_v62, 16 }
 0x36c   : > { %19567 = vmatprep.mubr.msk.bf16.mxu1 %vm1254_vm10, %v17479_v27  ;;  %v8240_v27 = vshrl.u32 %v23954_v31, 16 }
 0x36d   : > { %v8232_v24 = vrot.slane %v8230_v40, 5 }
 0x36e   : > { %v8242_v39 = vrot.slane %v8240_v27, 4 }
 0x36f   : > { %v8233_v42 = vor.u32 %v8232_v24, %v8229_v35  ;;  %v8193_v35 = vld [vmem:[#allocation2 + $0x48] sm:$0xf] }
 0x370   : > { %v8243_v61 = vor.u32 %v8242_v39, %v23967_v58 }
 0x373   : > { %19568 = vmatmul.mubr.msk.bf16.gmra.mrb[52].mxu1 %vm1254_vm10, %v17480_v16  ;;  %v8260_v16 = vshll.u32 %v23961_v56, 16 }
 0x374   : > { %19571 = vmatprep.mubr.msk.bf16.mxu1 %vm1254_vm10, %v17481_v34  ;;  %v8275_v34 = vshrl.u32 %v8184_v19, 16 }
 0x375   : > { %v23981_v11 = vrot.slane %v8260_v16, 5 }
 0x37b   : > { %19572 = vmatmul.mubr.msk.bf16.gmra.mrb[56].mxu1 %vm1254_vm10, %v17482_v10  ;;  %v8277_v10 = vrot.slane %v8275_v34, 4 }
 0x37c   : > { %19575 = vmatprep.mubr.msk.bf16.mxu1 %vm1254_vm10, %v17483_v18  ;;  %v23983_v18 = vrot.slane %v8284_v2, 5  ;;  %v24010_v2 = vld [vmem:[#allocation2 + $0x4c] sm:$0xf] }
 0x383   : > { %19576 = vmatmul.mubr.msk.bf16.gmra.mrb[60].mxu1 %vm1254_vm10, %v17484_v21  ;;  %v8190_v21 = vld [vmem:[#allocation2 + $0x3c] sm:$0xf] }
 0x384   : > { %19587 = vmatprep.mubr.msk.bf16.mxu1 %vm1254_vm10, %v21058_v44  ;;  %v21076_v44 = vld [vmem:[#allocation2 + $0xb4] sm:$0xff]   ;;  %v8323_v62 = vshrl.u32 %v8190_v21, 16  ;;  %v8326_v40 = vshll.u32 %v8190_v21, 16 }
 0x386   : > { %v8325_v36 = vrot.slane %v8323_v62, 4  ;;  %v8199_v62 = vld [vmem:[#allocation2 + $0x60] sm:$0xf] }
 0x38b   : > { %19588 = vmatmul.mubr.msk.bf16.vlgmr.msra.gmra.mrb[32].mxu1 %vm1254_vm10, %v21060_v30  ;;  %v8234_v30 = vrot.slane %v8233_v42, 4 }
 0x38c   : > { %19620 = vmatpush3.bf16.msra.mxu1 %v23852_v45  ;;  %19591 = vmatprep.mubr.msk.bf16.mxu1 %vm1254_vm10, %v21061_v63  ;;  %v23946_v45 = vld [vmem:[%s26996_s1 + $0xa0] sm:$0xff]   ;;  %v8270_v63 = vshll.u32 %v23979_v12, 16 }
 0x38d   : > { %19621 = vmatprep.subr.bf16.mxu1 %v21064_v9  ;;  %v8239_v48 = vsel %vm21459_vm7, %v8234_v30, %v23967_v58  ;;  %v21077_v58 = vld [vmem:[#allocation2 + $0xc0] sm:$0xff]  }
 0x390   : > { %19622 = vmatpush3.bf16.msra.mxu1 %v21064_v9  ;;  %v8257_v9 = vor.u32 %v8256_v0, %v8253_v26  ;;  %v8350_v26 = vshll.u32 %v8193_v35, 16 }
 0x391   : > { %19623 = vmatprep.subr.bf16.mxu1 %v21069_v51 }
 0x392   : > { %v8258_v19 = vrot.slane %v8257_v9, 4 }
 0x393   : > { %19592 = vmatmul.mubr.msk.bf16.gmra.mrb[36].mxu1 %vm1254_vm10, %v21062_v52  ;;  %v8244_v52 = vrot.slane %v8243_v61, 4  ;;  %v8347_v61 = vshrl.u32 %v8193_v35, 16 }
 0x394   : > { %19595 = vmatprep.mubr.msk.bf16.mxu1 %vm1254_vm10, %v21063_v55  ;;  %19624 = vmatpush3.bf16.msra.mxu1 %v21069_v51  ;;  %v23988_v51 = vld [vmem:[#allocation2 + $0x40] sm:$0xf]  ;;  %v8267_v55 = vor.u32 %v8266_v38, %v23981_v11  ;;  %v8263_v42 = vsel %vm21459_vm7, %v8258_v19, %v23981_v11 }
 0x395   : > { %19625 = vmatprep.subr.bf16.mxu1 %v21074_v22  ;;  %v8332_v14 = vshll.u32 %v23988_v51, 16  ;;  %v8336_v27 = vshrl.u32 %v23988_v51, 16 }
 0x397   : > { %v24012_v57 = vrot.slane %v8332_v14, 5  ;;  %v8338_v13 = vrot.slane %v8336_v27, 4 }
 0x398   : > { %19626 = vmatpush3.bf16.msra.mxu1 %v21074_v22  ;;  %v8248_v22 = vrot.slane %v8246_v23, 5  ;;  %v8328_v23 = vrot.slane %v8326_v40, 5 }
 0x399   : > { %19659 = vmatprep.subr.bf16.mxu1 %v23946_v45  ;;  %v8339_v9 = vor.u32 %v8338_v13, %v24012_v57  ;;  %v24057_v13 = vld [vmem:[#allocation2 + $0x5c] sm:$0x1] }
 0x39a   : > { %v8249_v24 = vsel %vm21459_vm7, %v8244_v52, %v8248_v22  ;;  %v8329_v30 = vor.u32 %v8328_v23, %v8325_v36  ;;  %v8349_v52 = vrot.slane %v8347_v61, 4  ;;  %v8352_v22 = vrot.slane %v8350_v26, 5  ;;  %v24049_v36 = vld [vmem:[#allocation2 + $0x70] sm:$0xf] }
 0x39b   : > { %19596 = vmatmul.mubr.msk.bf16.gmra.mrb[40].mxu1 %vm1254_vm10, %v21065_v50  ;;  %v23992_v50 = vld [vmem:[#allocation2 + $0x2c] sm:$0x1]  ;;  %v17557_v28 = vcombine.low %v8239_v48, %v8249_v24  ;;  %v24043_v48 = vld [vmem:[#allocation2 + $0x64] sm:$0xf]  ;;  %v8340_v35 = vrot.slane %v8339_v9, 4 }
 0x39c   : > { %19599 = vmatprep.mubr.msk.bf16.mxu1 %vm1254_vm10, %v21066_v5  ;;  %v8281_v5 = vor.u32 %v8280_v59, %v8277_v10  ;;  %v8294_v39 = vshll.u32 %v23992_v50, 16  ;;  %v8356_v10 = vshll.u32 %v24010_v2, 16  ;;  %v8360_v59 = vshrl.u32 %v24010_v2, 16  ;;  %v21079_v24 = vld [vmem:[%s26996_s1 + $0xa8] sm:$0xff]  }
 0x39e   : > { %v8282_v16 = vrot.slane %v8281_v5, 4  ;;  %v8296_v0 = vrot.slane %v8294_v39, 5  ;;  %v24036_v5 = vrot.slane %v8356_v10, 5  ;;  %v8202_v39 = vld [vmem:[#allocation2 + $0x6c] sm:$0xf]  ;;  %v8432_v10 = vshrl.u32 %v24049_v36, 16 }
 0x39f   : > { %v8419_v61 = vshrl.u32 %v8202_v39, 16  ;;  %v8422_v26 = vshll.u32 %v8202_v39, 16  ;;  %v24092_v39 = vld [vmem:[#allocation2 + $0x74] sm:$0x1] }
 0x3a0   : > { %v8287_v11 = vsel %vm21459_vm7, %v8282_v16, %v23983_v18 }
 0x3a3   : > { %19600 = vmatmul.mubr.msk.bf16.gmra.mrb[44].mxu1 %vm1254_vm10, %v21067_v15  ;;  %v8291_v15 = vor.u32 %v8290_v46, %v23983_v18  ;;  %v8196_v46 = vld [vmem:[#allocation2 + $0x54] sm:$0xf] }
 0x3a4   : > { %19603 = vmatprep.mubr.msk.bf16.mxu1 %vm1254_vm10, %v21068_v4  ;;  %v23996_v4 = vld [vmem:[#allocation2 + $0x38] sm:$0x1]  ;;  %v8374_v18 = vshll.u32 %v8196_v46, 16 }
 0x3a5   : > { %v8318_v47 = vshll.u32 %v23996_v4, 16  ;;  %v8292_v37 = vrot.slane %v8291_v15, 4  ;;  %v8362_v15 = vrot.slane %v8360_v59, 4  ;;  %v21080_v59 = vld [vmem:[%s26996_s1 + $0xb0] sm:$0xff]  }
 0x3a6   : > { %v8376_v16 = vrot.slane %v8374_v18, 5  ;;  %v8205_v18 = vld [vmem:[#allocation2 + $0x78] sm:$0xf] }
 0x3a7   : > { %v8320_v38 = vrot.slane %v8318_v47, 5  ;;  %v8297_v21 = vsel %vm21459_vm7, %v8292_v37, %v8296_v0  ;;  %v8395_v37 = vshrl.u32 %v8199_v62, 16 }
 0x3a8   : > { %v17559_v40 = vcombine.low %v8287_v11, %v8297_v21 }
 0x3a9   : > { %v8397_v11 = vrot.slane %v8395_v37, 4  ;;  %v8443_v37 = vshrl.u32 %v8205_v18, 16 }
 0x3ab   : > { %19604 = vmatmul.mubr.msk.bf16.gmra.mrb[48].mxu1 %vm1254_vm10, %v21070_v20  ;;  %v8301_v20 = vrot.slane %v8299_v29, 4 }
 0x3ac   : > { %19607 = vmatprep.mubr.msk.bf16.mxu1 %vm1254_vm10, %v21071_v41  ;;  %v8304_v41 = vrot.slane %v8302_v6, 5 }
 0x3ae   : > { %v8305_v34 = vor.u32 %v8304_v41, %v8301_v20  ;;  %v8380_v20 = vshll.u32 %v24027_v17, 16  ;;  %v8384_v41 = vshrl.u32 %v24027_v17, 16 }
 0x3b0   : > { %v8306_v6 = vrot.slane %v8305_v34, 4  ;;  %v8398_v34 = vshll.u32 %v8199_v62, 16  ;;  %v8386_v23 = vrot.slane %v8384_v41, 4 }
 0x3b2   : > { %v8311_v14 = vsel %vm21459_vm7, %v8306_v6, %v23985_v8  ;;  %v8353_v8 = vor.u32 %v8352_v22, %v8349_v52  ;;  %v8400_v6 = vrot.slane %v8398_v34, 5  ;;  %v8421_v22 = vrot.slane %v8419_v61, 4 }
 0x3b3   : > { %19608 = vmatmul.mubr.msk.bf16.gmra.mrb[52].mxu1 %vm1254_vm10, %v21072_v1  ;;  %v8272_v1 = vrot.slane %v8270_v63, 5  ;;  %v24034_v63 = vld [vmem:[#allocation2 + $0x50] sm:$0x1]  ;;  %v8446_v34 = vshll.u32 %v8205_v18, 16 }
 0x3b4   : > { %19611 = vmatprep.mubr.msk.bf16.mxu1 %vm1254_vm10, %v21073_v49  ;;  %v8268_v49 = vrot.slane %v8267_v55, 4  ;;  %v8371_v55 = vshrl.u32 %v8196_v46, 16  ;;  %v8354_v21 = vrot.slane %v8353_v8, 4  ;;  %v8211_v18 = vld [vmem:[#allocation2 + $0x90] sm:$0xf] }
 0x3b6   : > { %v8273_v29 = vsel %vm21459_vm7, %v8268_v49, %v8272_v1  ;;  %v8330_v1 = vrot.slane %v8329_v30, 4  ;;  %v8366_v49 = vshll.u32 %v24034_v63, 16  ;;  %v8373_v47 = vrot.slane %v8371_v55, 4 }
 0x3b7   : > { %v17558_v53 = vcombine.low %v8263_v42, %v8273_v29  ;;  %v8408_v42 = vshrl.u32 %v24043_v48, 16  ;;  %v8390_v30 = vshll.u32 %v24057_v13, 16  ;;  %v8424_v55 = vrot.slane %v8422_v26, 5 }
 0x3b8   : > { %v8335_v0 = vsel %vm21459_vm7, %v8330_v1, %v24012_v57  ;;  %v8368_v46 = vrot.slane %v8366_v49, 5  ;;  %v8377_v29 = vor.u32 %v8376_v16, %v8373_v47  ;;  %v8359_v1 = vsel %vm21459_vm7, %v8354_v21, %v24036_v5  ;;  %v24090_v49 = vld [vmem:[#allocation2 + $0x68] sm:$0x1] }
 0x3b9   : > { %v8410_v52 = vrot.slane %v8408_v42, 4  ;;  %v8392_v47 = vrot.slane %v8390_v30, 5  ;;  %v8425_v8 = vor.u32 %v8424_v55, %v8421_v22  ;;  %v24104_v42 = vld [vmem:[%s26996_s1 + $0xc0] sm:$0xff]  }
 0x3bb   : > { %19612 = vmatmul.mubr.msk.bf16.gmra.mrb[56].mxu1 %vm1254_vm10, %v21075_v25  ;;  %v8342_v25 = vshll.u32 %v24008_v54, 16 }
 0x3bc   : > { %19615 = vmatprep.mubr.msk.bf16.mxu1 %vm1254_vm10, %v21076_v44  ;;  %v8321_v44 = vsel %vm21459_vm7, %v8316_v32, %v8320_v38  ;;  %v24053_v32 = vrot.slane %v8380_v20, 5  ;;  %v8434_v20 = vrot.slane %v8432_v10, 4  ;;  %v8438_v10 = vshll.u32 %v24092_v39, 16 }
 0x3bd   : > { %v8344_v27 = vrot.slane %v8342_v25, 5  ;;  %v17560_v19 = vcombine.low %v8311_v14, %v8321_v44  ;;  %v24071_v25 = vld [vmem:[#allocation2 + $0x7c] sm:$0xf]  ;;  %v8378_v14 = vrot.slane %v8377_v29, 4  ;;  %v24115_v29 = vld [vmem:[#allocation2 + $0x80] sm:$0x1] }
 0x3be   : > { %v8387_v44 = vor.u32 %v8386_v23, %v24053_v32  ;;  %v8452_v41 = vshll.u32 %v24071_v25, 16  ;;  %v8456_v62 = vshrl.u32 %v24071_v25, 16 }
 0x3bf   : > { %v8345_v38 = vsel %vm21459_vm7, %v8340_v35, %v8344_v27  ;;  %v8401_v27 = vor.u32 %v8400_v6, %v8397_v11  ;;  %v8383_v26 = vsel %vm21459_vm7, %v8378_v14, %v24053_v32  ;;  %v8445_v11 = vrot.slane %v8443_v37, 4  ;;  %v24123_v14 = vld [vmem:[#allocation2 + $0x94] sm:$0xf] }
 0x3c0   : > { %v8458_v23 = vrot.slane %v8456_v62, 4  ;;  %v8448_v6 = vrot.slane %v8446_v34, 5 }
 0x3c3   : > { %19616 = vmatmul.mubr.msk.bf16.gmra.mrb[60].mxu1 %vm1254_vm10, %v21077_v58  ;;  %v8363_v58 = vor.u32 %v8362_v15, %v24036_v5 }
 0x3c4   : > { %19627 = vmatprep.mubr.msk.bf16.mxu1 %vm1254_vm10, %v17557_v28  ;;  %v8404_v28 = vshll.u32 %v24043_v48, 16 }
 0x3c5   : > { %v8364_v57 = vrot.slane %v8363_v58, 4  ;;  %v24099_v58 = vrot.slane %v8452_v41, 5  ;;  %v8462_v41 = vshll.u32 %v24115_v29, 16 }
 0x3c6   : > { %v24075_v9 = vrot.slane %v8404_v28, 5  ;;  %v8208_v28 = vld [vmem:[#allocation2 + $0x84] sm:$0xf] }
 0x3c7   : > { %v8369_v35 = vsel %vm21459_vm7, %v8364_v57, %v8368_v46  ;;  %v8467_v21 = vshrl.u32 %v8208_v28, 16  ;;  %v8470_v57 = vshll.u32 %v8208_v28, 16  ;;  %v8504_v28 = vshrl.u32 %v24123_v14, 16 }
 0x3c8   : > { %v8411_v16 = vor.u32 %v8410_v52, %v24075_v9  ;;  %v17562_v61 = vcombine.low %v8359_v1, %v8369_v35  ;;  %v8459_v52 = vor.u32 %v8458_v23, %v24099_v58  ;;  %v8500_v23 = vshll.u32 %v24123_v14, 16 }
 0x3c9   : > { %v8469_v1 = vrot.slane %v8467_v21, 4  ;;  %v8472_v35 = vrot.slane %v8470_v57, 5 }
 0x3ca   : > { %v8412_v32 = vrot.slane %v8411_v16, 4  ;;  %v8460_v34 = vrot.slane %v8459_v52, 4  ;;  %v8506_v52 = vrot.slane %v8504_v28, 4 }
 0x3cb   : > { %19628 = vmatmul.mubr.msk.bf16.vlgmr.msra.gmra.mrb[32].mxu1 %vm1254_vm10, %v17558_v53  ;;  %v21081_v53 = vld [vmem:[%s26996_s1 + $0xb8] sm:$0xff]  }
 0x3cc   : > { %19660 = vmatpush3.bf16.msra.mxu1 %v23946_v45  ;;  %19631 = vmatprep.mubr.msk.bf16.mxu1 %vm1254_vm10, %v17559_v40  ;;  %v8428_v45 = vshll.u32 %v24049_v36, 16  ;;  %v17561_v40 = vcombine.low %v8335_v0, %v8345_v38  ;;  %v8402_v0 = vrot.slane %v8401_v27, 4  ;;  %v8414_v38 = vshll.u32 %v24090_v49, 16 }
 0x3cd   : > { %19661 = vmatprep.subr.bf16.mxu1 %v21079_v24  ;;  %v8449_v27 = vor.u32 %v8448_v6, %v8445_v11 }
 0x3ce   : > { %v24077_v15 = vrot.slane %v8428_v45, 5  ;;  %v8416_v55 = vrot.slane %v8414_v38, 5 }
 0x3d0   : > { %19662 = vmatpush3.bf16.msra.mxu1 %v21079_v24  ;;  %v8388_v24 = vrot.slane %v8387_v44, 4  ;;  %v8435_v5 = vor.u32 %v8434_v20, %v24077_v15  ;;  %v8426_v44 = vrot.slane %v8425_v8, 4  ;;  %v8440_v20 = vrot.slane %v8438_v10, 5  ;;  %v24138_v8 = vld [vmem:[#allocation2 + $0x8c] sm:$0x1] }
 0x3d1   : > { %19663 = vmatprep.subr.bf16.mxu1 %v21080_v59  ;;  %v8486_v6 = vshll.u32 %v24138_v8, 16 }
 0x3d2   : > { %v8393_v45 = vsel %vm21459_vm7, %v8388_v24, %v8392_v47  ;;  %v8436_v30 = vrot.slane %v8435_v5, 4  ;;  %v24129_v24 = vld [vmem:[#allocation2 + $0xa0] sm:$0xf]  ;;  %v8417_v47 = vsel %vm21459_vm7, %v8412_v32, %v8416_v55  ;;  %v8431_v16 = vsel %vm21459_vm7, %v8426_v44, %v24077_v15 }
 0x3d3   : > { %19632 = vmatmul.mubr.msk.bf16.gmra.mrb[36].mxu1 %vm1254_vm10, %v17560_v19  ;;  %v24096_v19 = vld [vmem:[#allocation2 + $0x88] sm:$0xf]  ;;  %v17563_v22 = vcombine.low %v8383_v26, %v8393_v45  ;;  %v8491_v5 = vshrl.u32 %v8211_v18, 16  ;;  %v8464_v26 = vrot.slane %v8462_v41, 5  ;;  %v8524_v38 = vshll.u32 %v24129_v24, 16 }
 0x3d4   : > { %19635 = vmatprep.mubr.msk.bf16.mxu1 %vm1254_vm10, %v17561_v40  ;;  %19664 = vmatpush3.bf16.msra.mxu1 %v21080_v59  ;;  %v8476_v59 = vshll.u32 %v24096_v19, 16  ;;  %v8480_v46 = vshrl.u32 %v24096_v19, 16  ;;  %v8441_v37 = vsel %vm21459_vm7, %v8436_v30, %v8440_v20  ;;  %v8528_v15 = vshrl.u32 %v24129_v24, 16  ;;  %v24153_v20 = vld [vmem:[#allocation2 + $0xac] sm:$0xf] }
 0x3d5   : > { %19665 = vmatprep.subr.bf16.mxu1 %v21081_v53  ;;  %v17565_v10 = vcombine.low %v8431_v16, %v8441_v37  ;;  %v8465_v11 = vsel %vm21459_vm7, %v8460_v34, %v8464_v26  ;;  %v8493_v32 = vrot.slane %v8491_v5, 4  ;;  %v24148_v30 = vrot.slane %v8500_v23, 5  ;;  %v8217_v37 = vld [vmem:[#allocation2 + $0xa8] sm:$0xf] }
 0x3d6   : > { %v24121_v62 = vrot.slane %v8476_v59, 5  ;;  %v8482_v40 = vrot.slane %v8480_v46, 4  ;;  %v8450_v59 = vrot.slane %v8449_v27, 4  ;;  %v8473_v46 = vor.u32 %v8472_v35, %v8469_v1  ;;  %v24161_v27 = vld [vmem:[#allocation2 + $0xb8] sm:$0xf] }
 0x3d7   : > { %v24151_v55 = vrot.slane %v8524_v38, 5  ;;  %v8488_v35 = vrot.slane %v8486_v6, 5  ;;  %v8507_v5 = vor.u32 %v8506_v52, %v24148_v30  ;;  %v8548_v23 = vshll.u32 %v24153_v20, 16 }
 0x3d8   : > { %19666 = vmatpush3.bf16.msra.mxu1 %v21081_v53  ;;  %v8407_v53 = vsel %vm21459_vm7, %v8402_v0, %v24075_v9  ;;  %v8494_v9 = vshll.u32 %v8211_v18, 16  ;;  %v8483_v0 = vor.u32 %v8482_v40, %v24121_v62  ;;  %v8530_v18 = vrot.slane %v8528_v15, 4 }
 0x3d9   : > { %19699 = vmatprep.subr.bf16.mxu1 %v24104_v42  ;;  %v17564_v45 = vcombine.low %v8407_v53, %v8417_v47  ;;  %v8455_v41 = vsel %vm21459_vm7, %v8450_v59, %v24099_v58  ;;  %v8474_v40 = vrot.slane %v8473_v46, 4  ;;  %v24159_v53 = vld [vmem:[#allocation2 + $0x98] sm:$0x1]  ;;  %v8552_v28 = vshrl.u32 %v24153_v20, 16  ;;  %v8220_v58 = vld [vmem:[#allocation2 + $0xb4] sm:$0xf] }
 0x3da   : > { %v8496_v44 = vrot.slane %v8494_v9, 5  ;;  %v17566_v1 = vcombine.low %v8455_v41, %v8465_v11  ;;  %v24164_v9 = vld [vmem:[#allocation2 + $0xa4] sm:$0x1]  ;;  %v8531_v26 = vor.u32 %v8530_v18, %v24151_v55  ;;  %v8576_v38 = vshrl.u32 %v24161_v27, 16 }
 0x3db   : > { %19636 = vmatmul.mubr.msk.bf16.gmra.mrb[40].mxu1 %vm1254_vm10, %v17562_v61  ;;  %v8214_v61 = vld [vmem:[#allocation2 + $0x9c] sm:$0xf]  ;;  %v8479_v15 = vsel %vm21459_vm7, %v8474_v40, %v24121_v62  ;;  %v8542_v59 = vshll.u32 %v8217_v37, 16  ;;  %v8534_v11 = vshll.u32 %v24164_v9, 16  ;;  %v8563_v6 = vshrl.u32 %v8220_v58, 16 }
 0x3dc   : > { %19639 = vmatprep.mubr.msk.bf16.mxu1 %vm1254_vm10, %v17563_v22  ;;  %v8515_v21 = vshrl.u32 %v8214_v61, 16  ;;  %v8518_v57 = vshll.u32 %v8214_v61, 16  ;;  %v8484_v22 = vrot.slane %v8483_v0, 4  ;;  %v8497_v34 = vor.u32 %v8496_v44, %v8493_v32  ;;  %v24179_v62 = vld [vmem:[#allocation2 + $0xc4] sm:$0xf] }
 0x3dd   : > { %v8572_v0 = vshll.u32 %v24161_v27, 16  ;;  %v8508_v32 = vrot.slane %v8507_v5, 4  ;;  %v8550_v44 = vrot.slane %v8548_v23, 5  ;;  %v8554_v52 = vrot.slane %v8552_v28, 4  ;;  %27159 = vst [vmem:[#allocation6_spill] sm:$0xff] %v24179_v62 }
 0x3de   : > { %v8517_v47 = vrot.slane %v8515_v21, 4  ;;  %v8520_v16 = vrot.slane %v8518_v57, 5  ;;  %v8489_v61 = vsel %vm21459_vm7, %v8484_v22, %v8488_v35  ;;  %v8566_v21 = vshll.u32 %v8220_v58, 16  ;;  %v8223_v28 = vld [vmem:[#allocation2 + $0xc0] sm:$0xf] }
 0x3df   : > { %v17567_v57 = vcombine.low %v8479_v15, %v8489_v61  ;;  %v8498_v22 = vrot.slane %v8497_v34, 4  ;;  %v8532_v18 = vrot.slane %v8531_v26, 4  ;;  %v8574_v41 = vrot.slane %v8572_v0, 5  ;;  %v24186_v26 = vld [vmem:[#allocation2 + $0xbc] sm:$0x1] }
 0x3e0   : > { %v8521_v46 = vor.u32 %v8520_v16, %v8517_v47  ;;  %v8578_v35 = vrot.slane %v8576_v38, 4  ;;  %v24182_v47 = vld [vmem:[#allocation2 + $0xb0] sm:$0x1]  ;;  %v8536_v61 = vrot.slane %v8534_v11, 5  ;;  %v8565_v5 = vrot.slane %v8563_v6, 4 }
 0x3e1   : > { %v8568_v23 = vrot.slane %v8566_v21, 5  ;;  %v8555_v34 = vor.u32 %v8554_v52, %v8550_v44  ;;  %v8596_v0 = vshll.u32 %v24179_v62, 16  ;;  %v8600_v38 = vshrl.u32 %v24179_v62, 16 }
 0x3e2   : > { %v8522_v58 = vrot.slane %v8521_v46, 4  ;;  %v8503_v15 = vsel %vm21459_vm7, %v8498_v22, %v24148_v30  ;;  %v8558_v46 = vshll.u32 %v24182_v47, 16  ;;  %v8587_v11 = vshrl.u32 %v8223_v28, 16 }
 0x3e3   : > { %19640 = vmatmul.mubr.msk.bf16.gmra.mrb[44].mxu1 %vm1254_vm10, %v17564_v45  ;;  %v8510_v45 = vshll.u32 %v24159_v53, 16  ;;  %v8590_v6 = vshll.u32 %v8223_v28, 16  ;;  %v8582_v52 = vshll.u32 %v24186_v26, 16  ;;  %v8556_v62 = vrot.slane %v8555_v34, 4 }
 0x3e4   : > { %19643 = vmatprep.mubr.msk.bf16.mxu1 %vm1254_vm10, %v17565_v10  ;;  %v8539_v10 = vshrl.u32 %v8217_v37, 16  ;;  %v8544_v37 = vrot.slane %v8542_v59, 5  ;;  %v8598_v30 = vrot.slane %v8596_v0, 5  ;;  %v8602_v22 = vrot.slane %v8600_v38, 4 }
 0x3e5   : > { %v8512_v40 = vrot.slane %v8510_v45, 5  ;;  %v8537_v45 = vsel %vm21459_vm7, %v8532_v18, %v8536_v61  ;;  %v8592_v61 = vrot.slane %v8590_v6, 5 }
 0x3e6   : > { %v8541_v16 = vrot.slane %v8539_v10, 4  ;;  %v8579_v10 = vor.u32 %v8578_v35, %v8574_v41 }
 0x3e8   : > { %v8545_v59 = vor.u32 %v8544_v37, %v8541_v16  ;;  %v8580_v18 = vrot.slane %v8579_v10, 4  ;;  %v8560_v16 = vrot.slane %v8558_v46, 5  ;;  %v8589_v37 = vrot.slane %v8587_v11, 4 }
 0x3ea   : > { %v8546_v35 = vrot.slane %v8545_v59, 4  ;;  %v8593_v0 = vor.u32 %v8592_v61, %v8589_v37  ;;  %v8933_v61 = vld [vmem:[#allocation2 + $0x24] sm:$0xe] }
 0x3eb   : > { %19644 = vmatmul.mubr.msk.bf16.gmra.mrb[48].mxu1 %vm1254_vm10, %v17566_v1  ;;  %v8513_v1 = vsel %vm21459_vm7, %v8508_v32, %v8512_v40  ;;  %v8569_v32 = vor.u32 %v8568_v23, %v8565_v5  ;;  %v8997_v23 = vrot.slane %v23954_v31, 5  ;;  %v8931_v31 = vld [vmem:[#allocation2 + $0xc] sm:$0xe] }
 0x3ec   : > { %19647 = vmatprep.mubr.msk.bf16.mxu1 %vm1254_vm10, %v17567_v57  ;;  %v17568_v21 = vcombine.low %v8503_v15, %v8513_v1  ;;  %v8527_v57 = vsel %vm21459_vm7, %v8522_v58, %v24151_v55  ;;  %v8584_v1 = vrot.slane %v8582_v52, 5  ;;  %v24202_v15 = vld [vmem:[#allocation2 + $0xc8] sm:$0x1]  ;;  %v8561_v55 = vsel %vm21459_vm7, %v8556_v62, %v8560_v16  ;;  %v8932_v16 = vld [vmem:[#allocation2 + $0x18] sm:$0xe] }
 0x3ed   : > { %v17569_v40 = vcombine.low %v8527_v57, %v8537_v45  ;;  %v8570_v28 = vrot.slane %v8569_v32, 4  ;;  %v8603_v58 = vor.u32 %v8602_v22, %v8598_v30  ;;  %v8551_v34 = vsel %vm21459_vm7, %v8546_v35, %v8550_v44 }
 0x3ee   : > { %v8585_v5 = vsel %vm21459_vm7, %v8580_v18, %v8584_v1  ;;  %v8606_v38 = vshll.u32 %v24202_v15, 16  ;;  %v17570_v45 = vcombine.low %v8551_v34, %v8561_v55  ;;  %v8999_v62 = vrot.slane %v8997_v23, 4 }
 0x3ef   : > { %v8575_v10 = vsel %vm21459_vm7, %v8570_v28, %v8574_v41  ;;  %v8604_v46 = vrot.slane %v8603_v58, 4  ;;  %v8594_v11 = vrot.slane %v8593_v0, 4  ;;  %v9004_v57 = vrot.slane %v23961_v56, 5 }
 0x3f0   : > { %v17571_v59 = vcombine.low %v8575_v10, %v8585_v5  ;;  %v8608_v6 = vrot.slane %v8606_v38, 5  ;;  %v17593_v32 = vrot.slane %v8931_v31, 9  ;;  %v9011_v52 = vrot.slane %v23963_v7, 5  ;;  %v8935_v10 = vld [vmem:[#allocation2 + $0x3c] sm:$0xe] }
 0x3f1   : > { %v9007_v56 = vrot.slane %v23979_v12, 5  ;;  %v9014_v7 = vrot.slane %v23992_v50, 5  ;;  %v17594_v28 = vrot.slane %v8932_v16, 9  ;;  %v9018_v1 = vrot.slane %v23965_v43, 5  ;;  %v21083_v50 = vld [vmem:[%s26996_s1 + $0xc8] sm:$0xff]  }
 0x3f2   : > { %v8609_v44 = vsel %vm21459_vm7, %v8604_v46, %v8608_v6  ;;  %v8998_v18 = vsel %vm21739_vm14, %v17593_v32, %v8997_v23  ;;  %v9013_v37 = vrot.slane %v9011_v52, 4  ;;  %v17595_v55 = vrot.slane %v8933_v61, 9  ;;  %v8934_v43 = vld [vmem:[#allocation2 + $0x30] sm:$0xe] }
 0x3f3   : > { %19648 = vmatmul.mubr.msk.bf16.gmra.mrb[52].mxu1 %vm1254_vm10, %v17568_v21  ;;  %v9000_v21 = vrot.slane %v23959_v60, 5  ;;  %v9006_v60 = vrot.slane %v9004_v57, 4  ;;  %v9025_v5 = vrot.slane %v23988_v51, 5  ;;  %v9005_v23 = vsel %vm21739_vm14, %v17594_v28, %v9004_v57  ;;  %v21084_v46 = vld [vmem:[%s26996_s1 + $0xd0] sm:$0xff]   ;;  %v21085_v57 = vld [vmem:[%s26996_s1 + $0xd8] sm:$0xff]  }
 0x3f4   : > { %19651 = vmatprep.mubr.msk.bf16.mxu1 %vm1254_vm10, %v17569_v40  ;;  %v8599_v40 = vsel %vm21459_vm7, %v8594_v11, %v8598_v30  ;;  %v9015_v58 = vsel %vm21739_vm14, %v9013_v37, %v9014_v7  ;;  %v9012_v12 = vsel %vm21739_vm14, %v17595_v55, %v9011_v52  ;;  %v9020_v38 = vrot.slane %v9018_v1, 4  ;;  %v8939_v55 = vld [vmem:[#allocation2 + $0x6c] sm:$0xe] }
 0x3f5   : > { %v9001_v41 = vsel %vm21739_vm14, %v8999_v62, %v9000_v21  ;;  %v17572_v22 = vcombine.low %v8599_v40, %v8609_v44  ;;  %v9008_v30 = vsel %vm21739_vm14, %v9006_v60, %v9007_v56  ;;  %v17619_v0 = vcombine.low %v9012_v12, %v9015_v58  ;;  %v8937_v40 = vld [vmem:[#allocation2 + $0x54] sm:$0xe] }
 0x3f6   : > { %v17617_v35 = vcombine.low %v8998_v18, %v9001_v41  ;;  %v17618_v34 = vcombine.low %v9005_v23, %v9008_v30  ;;  %v9021_v51 = vrot.slane %v23996_v4, 5  ;;  %v17596_v62 = vrot.slane %v8934_v43, 9  ;;  %v8936_v41 = vld [vmem:[#allocation2 + $0x48] sm:$0xe]  ;;  %v24272_v18 = vld [vmem:[%s26996_s1 + $0xe0] sm:$0xff]  }
 0x3f7   : > { %v9032_v6 = vrot.slane %v24010_v2, 5  ;;  %v17597_v31 = vrot.slane %v8935_v10, 9  ;;  %v9039_v4 = vrot.slane %v24027_v17, 5  ;;  %v9035_v17 = vrot.slane %v24034_v63, 5 }
 0x3f8   : > { %v9022_v11 = vsel %vm21739_vm14, %v9020_v38, %v9021_v51  ;;  %v9046_v16 = vrot.slane %v24043_v48, 5  ;;  %v17599_v37 = vrot.slane %v8937_v40, 9  ;;  %v9053_v56 = vrot.slane %v24049_v36, 5  ;;  %v8938_v48 = vld [vmem:[#allocation2 + $0x60] sm:$0xe] }
 0x3f9   : > { %v9026_v44 = vsel %vm21739_vm14, %v17597_v31, %v9025_v5  ;;  %v9034_v32 = vrot.slane %v9032_v6, 4  ;;  %v9041_v52 = vrot.slane %v9039_v4, 4  ;;  %v9049_v36 = vrot.slane %v24090_v49, 5  ;;  %v8940_v51 = vld [vmem:[#allocation2 + $0x78] sm:$0xe] }
 0x3fa   : > { %v9040_v7 = vsel %vm21739_vm14, %v17599_v37, %v9039_v4  ;;  %v9048_v30 = vrot.slane %v9046_v16, 4  ;;  %v9056_v58 = vrot.slane %v24092_v39, 5  ;;  %v17601_v12 = vrot.slane %v8939_v55, 9  ;;  %v8944_v37 = vld [vmem:[#allocation2 + $0xa8] sm:$0xe] }
 0x3fb   : > { %19652 = vmatmul.mubr.msk.bf16.gmra.mrb[56].mxu1 %vm1254_vm10, %v17570_v45  ;;  %v9027_v45 = vrot.slane %v9025_v5, 4  ;;  %v9036_v60 = vsel %vm21739_vm14, %v9034_v32, %v9035_v17  ;;  %v17600_v5 = vrot.slane %v8938_v48, 9 }
 0x3fc   : > { %19655 = vmatprep.mubr.msk.bf16.mxu1 %vm1254_vm10, %v17571_v59  ;;  %v9028_v59 = vrot.slane %v24008_v54, 5  ;;  %v9019_v54 = vsel %vm21739_vm14, %v17596_v62, %v9018_v1  ;;  %v9055_v1 = vrot.slane %v9053_v56, 4  ;;  %v9050_v23 = vsel %vm21739_vm14, %v9048_v30, %v9049_v36 }
 0x3fd   : > { %v17620_v21 = vcombine.low %v9019_v54, %v9022_v11  ;;  %v9047_v38 = vsel %vm21739_vm14, %v17600_v5, %v9046_v16  ;;  %v9054_v49 = vsel %vm21739_vm14, %v17601_v12, %v9053_v56  ;;  %v9074_v11 = vrot.slane %v24123_v14, 5  ;;  %v8945_v56 = vld [vmem:[#allocation2 + $0xb4] sm:$0xe] }
 0x3fe   : > { %v17624_v43 = vcombine.low %v9047_v38, %v9050_v23  ;;  %v9077_v14 = vrot.slane %v24159_v53, 5  ;;  %v17607_v30 = vrot.slane %v8945_v56, 9  ;;  %v9105_v5 = vrot.slane %v24202_v15, 5  ;;  %v21088_v38 = vld [vmem:[#allocation2 + $0x24] sm:$0xff]   ;;  %v21097_v15 = vld [vmem:[%s26996_s1 + $0xf0] sm:$0xff]  }
 0x403   : > { %19656 = vmatmul.mubr.msk.bf16.gmra.mrb[60].mxu1 %vm1254_vm10, %v17572_v22  ;;  %v9042_v22 = vrot.slane %v24057_v13, 5 }
 0x404   : > { %19667 = vmatprep.mubr.msk.bf16.mxu1 %vm1254_vm10, %v17617_v35  ;;  %v17598_v35 = vrot.slane %v8936_v41, 9 }
 0x405   : > { %v9043_v63 = vsel %vm21739_vm14, %v9041_v52, %v9042_v22  ;;  %v9088_v52 = vrot.slane %v24153_v20, 5  ;;  %v9095_v22 = vrot.slane %v24161_v27, 5  ;;  %v9091_v20 = vrot.slane %v24182_v47, 5 }
 0x406   : > { %v9033_v13 = vsel %vm21739_vm14, %v17598_v35, %v9032_v6  ;;  %v17623_v28 = vcombine.low %v9040_v7, %v9043_v63  ;;  %v9098_v27 = vrot.slane %v24186_v26, 5  ;;  %v27160_v7 = vld [vmem:[#allocation6_spill] sm:$0xff]  ;;  %v8946_v26 = vld [vmem:[#allocation2 + $0xc0] sm:$0xe] }
 0x407   : > { %v17622_v61 = vcombine.low %v9033_v13, %v9036_v60  ;;  %v9090_v16 = vrot.slane %v9088_v52, 4  ;;  %v9097_v63 = vrot.slane %v9095_v22, 4  ;;  %v17606_v13 = vrot.slane %v8944_v37, 9 }
 0x408   : > { %v9096_v47 = vsel %vm21739_vm14, %v17607_v30, %v9095_v22  ;;  %v17608_v23 = vrot.slane %v8946_v26, 9  ;;  %v9819_v22 = vld [vmem:[#allocation2 + $0x30] sm:$0xf] }
 0x409   : > { %v9099_v48 = vsel %vm21739_vm14, %v9097_v63, %v9098_v27  ;;  %v21101_v63 = vld [vmem:[#allocation2 + $0xa8] sm:$0xff]  }
 0x40a   : > { %v17631_v55 = vcombine.low %v9096_v47, %v9099_v48 }
 0x40b   : > { %19668 = vmatmul.mubr.msk.bf16.vlgmr.msra.gmra.mrb[32].mxu1 %vm1254_vm10, %v17618_v34  ;;  %v9060_v34 = vrot.slane %v24071_v25, 5  ;;  %v9063_v25 = vrot.slane %v24115_v29, 5 }
 0x40c   : > { %19700 = vmatpush3.bf16.msra.mxu1 %v24104_v42  ;;  %19671 = vmatprep.mubr.msk.bf16.mxu1 %vm1254_vm10, %v17619_v0  ;;  %v9029_v42 = vsel %vm21739_vm14, %v9027_v45, %v9028_v59  ;;  %v9067_v0 = vrot.slane %v24096_v19, 5  ;;  %v8941_v59 = vld [vmem:[#allocation2 + $0x84] sm:$0xe]  ;;  %v9070_v19 = vrot.slane %v24138_v8, 5 }
 0x40d   : > { %19701 = vmatprep.subr.bf16.mxu1 %v21083_v50  ;;  %v17621_v2 = vcombine.low %v9026_v44, %v9029_v42  ;;  %v9062_v45 = vrot.slane %v9060_v34, 4  ;;  %v17603_v6 = vrot.slane %v8941_v59, 9  ;;  %v9081_v42 = vrot.slane %v24129_v24, 5  ;;  %v8942_v44 = vld [vmem:[#allocation2 + $0x90] sm:$0xe] }
 0x40e   : > { %v9069_v10 = vrot.slane %v9067_v0, 4  ;;  %v9084_v24 = vrot.slane %v24164_v9, 5  ;;  %v17604_v32 = vrot.slane %v8942_v44, 9  ;;  %v21095_v59 = vld [vmem:[#allocation2 + $0x6c] sm:$0xff]  }
 0x40f   : > { %v9064_v62 = vsel %vm21739_vm14, %v9062_v45, %v9063_v25  ;;  %v9068_v29 = vsel %vm21739_vm14, %v17603_v6, %v9067_v0  ;;  %v21086_v0 = vld [vmem:[#allocation2 + $0x18] sm:$0xff]   ;;  %v21094_v25 = vld [vmem:[#allocation2 + $0x60] sm:$0xff]  }
 0x410   : > { %19702 = vmatpush3.bf16.msra.mxu1 %v21083_v50  ;;  %v9057_v50 = vsel %vm21739_vm14, %v9055_v1, %v9056_v58  ;;  %v9071_v31 = vsel %vm21739_vm14, %v9069_v10, %v9070_v19  ;;  %v9075_v35 = vsel %vm21739_vm14, %v17604_v32, %v9074_v11  ;;  %v9089_v1 = vsel %vm21739_vm14, %v17606_v13, %v9088_v52  ;;  %v21102_v45 = vld [vmem:[%s26996_s1 + $0xf8] sm:$0xff]   ;;  %v24381_v32 = vld [vmem:[#allocation2 + $0x20] sm:$0x1] }
 0x411   : > { %19703 = vmatprep.subr.bf16.mxu1 %v21084_v46  ;;  %v17625_v39 = vcombine.low %v9054_v49, %v9057_v50  ;;  %v17627_v8 = vcombine.low %v9068_v29, %v9071_v31  ;;  %v21089_v49 = vld [vmem:[#allocation2 + $0x30] sm:$0xff]   ;;  %v21096_v19 = vld [vmem:[#allocation2 + $0x78] sm:$0xff]   ;;  %v21098_v31 = vld [vmem:[#allocation2 + $0x84] sm:$0xff]  }
 0x412   : > { %v21093_v10 = vld [vmem:[#allocation2 + $0x54] sm:$0xff]   ;;  %v9816_v29 = vld [vmem:[#allocation2 + $0x24] sm:$0xf] }
 0x413   : > { %19672 = vmatmul.mubr.msk.bf16.gmra.mrb[36].mxu1 %vm1254_vm10, %v17620_v21  ;;  %v9076_v21 = vrot.slane %v9074_v11, 4 }
 0x414   : > { %19675 = vmatprep.mubr.msk.bf16.mxu1 %vm1254_vm10, %v17621_v2  ;;  %19704 = vmatpush3.bf16.msra.mxu1 %v21084_v46  ;;  %v17602_v46 = vrot.slane %v8940_v51, 9  ;;  %v8943_v2 = vld [vmem:[#allocation2 + $0x9c] sm:$0xe]  ;;  %v21091_v51 = vld [vmem:[#allocation2 + $0x48] sm:$0xff]  }
 0x415   : > { %19705 = vmatprep.subr.bf16.mxu1 %v21085_v57  ;;  %v9078_v41 = vsel %vm21739_vm14, %v9076_v21, %v9077_v14  ;;  %v17605_v17 = vrot.slane %v8943_v2, 9  ;;  %v9886_v2 = vshrl.u32 %v9816_v29, 16 }
 0x416   : > { %v9061_v4 = vsel %vm21739_vm14, %v17602_v46, %v9060_v34  ;;  %v17628_v60 = vcombine.low %v9075_v35, %v9078_v41  ;;  %v24373_v46 = vld [vmem:[#allocation2 + $0x1c] sm:$0xf] }
 0x417   : > { %v17626_v54 = vcombine.low %v9061_v4, %v9064_v62  ;;  %v9082_v53 = vsel %vm21739_vm14, %v17605_v17, %v9081_v42  ;;  %v9813_v62 = vld [vmem:[#allocation2 + $0x18] sm:$0xf]  ;;  %v9871_v11 = vshll.u32 %v24373_v46, 16  ;;  %v9875_v6 = vshrl.u32 %v24373_v46, 16  ;;  %v24385_v17 = vld [vmem:[#allocation2 + $0x34] sm:$0xf] }
 0x418   : > { %19706 = vmatpush3.bf16.msra.mxu1 %v21085_v57  ;;  %v9083_v57 = vrot.slane %v9081_v42, 4  ;;  %v9862_v42 = vshrl.u32 %v9813_v62, 16  ;;  %v9865_v4 = vshll.u32 %v9813_v62, 16  ;;  %v21100_v35 = vld [vmem:[#allocation2 + $0x9c] sm:$0xff]   ;;  %v9919_v27 = vshll.u32 %v24385_v17, 16 }
 0x419   : > { %19739 = vmatprep.subr.bf16.mxu1 %v24272_v18  ;;  %v9873_v21 = vrot.slane %v9871_v11, 5  ;;  %v9877_v44 = vrot.slane %v9875_v6, 4  ;;  %v9923_v13 = vshrl.u32 %v24385_v17, 16  ;;  %v24417_v11 = vld [vmem:[#allocation2 + $0x58] sm:$0xf] }
 0x41a   : > { %v9085_v40 = vsel %vm21739_vm14, %v9083_v57, %v9084_v24  ;;  %v9864_v57 = vrot.slane %v9862_v42, 4  ;;  %v9867_v14 = vrot.slane %v9865_v4, 5  ;;  %v9889_v24 = vshll.u32 %v9816_v29, 16  ;;  %v24424_v29 = vld [vmem:[#allocation2 + $0xd4] sm:$0x1] }
 0x41b   : > { %19676 = vmatmul.mubr.msk.bf16.gmra.mrb[40].mxu1 %vm1254_vm10, %v17622_v61  ;;  %v17629_v9 = vcombine.low %v9082_v53, %v9085_v40  ;;  %v9092_v61 = vsel %vm21739_vm14, %v9090_v16, %v9091_v20  ;;  %v9878_v40 = vor.u32 %v9877_v44, %v9873_v21  ;;  %v9881_v53 = vshll.u32 %v24381_v32, 16 }
 0x41c   : > { %19679 = vmatprep.mubr.msk.bf16.mxu1 %vm1254_vm10, %v17623_v28  ;;  %v9102_v28 = vrot.slane %v27160_v7, 5  ;;  %v17630_v36 = vcombine.low %v9089_v1, %v9092_v61  ;;  %v9888_v16 = vrot.slane %v9886_v2, 4  ;;  %v9891_v37 = vrot.slane %v9889_v24, 5 }
 0x41d   : > { %v9910_v61 = vshrl.u32 %v9819_v22, 16  ;;  %v9913_v7 = vshll.u32 %v9819_v22, 16  ;;  %v9883_v47 = vrot.slane %v9881_v53, 5  ;;  %v9925_v26 = vrot.slane %v9923_v13, 4 }
 0x41e   : > { %v9104_v58 = vrot.slane %v9102_v28, 4  ;;  %v9103_v12 = vsel %vm21739_vm14, %v17608_v23, %v9102_v28  ;;  %v9879_v28 = vrot.slane %v9878_v40, 4  ;;  %v9892_v48 = vor.u32 %v9891_v37, %v9888_v16  ;;  %v21105_v37 = vld [vmem:[#allocation2 + $0xcc] sm:$0xff]  }
 0x41f   : > { %v9912_v23 = vrot.slane %v9910_v61, 4  ;;  %v10740_v2 = vrot.slane %v24424_v29, 5  ;;  %v9995_v40 = vshrl.u32 %v24417_v11, 16 }
 0x420   : > { %v9106_v34 = vsel %vm21739_vm14, %v9104_v58, %v9105_v5  ;;  %v24398_v58 = vrot.slane %v9919_v27, 5  ;;  %v24400_v5 = vld [vmem:[#allocation2 + $0x38] sm:$0x1] }
 0x421   : > { %v17632_v50 = vcombine.low %v9103_v12, %v9106_v34  ;;  %v9915_v34 = vrot.slane %v9913_v7, 5  ;;  %v24402_v12 = vld [vmem:[#allocation2 + $0x40] sm:$0xf] }
 0x422   : > { %v9943_v62 = vshll.u32 %v24402_v12, 16  ;;  %v9947_v42 = vshrl.u32 %v24402_v12, 16 }
 0x423   : > { %19680 = vmatmul.mubr.msk.bf16.gmra.mrb[44].mxu1 %vm1254_vm10, %v17624_v43  ;;  %v21092_v43 = vld [vmem:[%s26996_s1 + $0xe8] sm:$0xff]  }
 0x424   : > { %19683 = vmatprep.mubr.msk.bf16.mxu1 %vm1254_vm10, %v17625_v39  ;;  %v21090_v39 = vld [vmem:[#allocation2 + $0x3c] sm:$0xff]  }
 0x42b   : > { %19684 = vmatmul.mubr.msk.bf16.gmra.mrb[48].mxu1 %vm1254_vm10, %v17626_v54  ;;  %v21099_v54 = vld [vmem:[#allocation2 + $0x90] sm:$0xff]  }
 0x42c   : > { %19687 = vmatprep.mubr.msk.bf16.mxu1 %vm1254_vm10, %v17627_v8  ;;  %v24378_v8 = vld [vmem:[#allocation2 + $0x28] sm:$0xf] }
 0x42d   : > { %v9895_v41 = vshll.u32 %v24378_v8, 16  ;;  %v9899_v52 = vshrl.u32 %v24378_v8, 16 }
 0x42f   : > { %v24390_v20 = vrot.slane %v9895_v41, 5  ;;  %v9901_v56 = vrot.slane %v9899_v52, 4  ;;  %v9828_v41 = vld [vmem:[#allocation2 + $0x54] sm:$0xf]  ;;  %v9991_v52 = vshll.u32 %v24417_v11, 16 }
 0x433   : > { %19688 = vmatmul.mubr.msk.bf16.gmra.mrb[52].mxu1 %vm1254_vm10, %v17628_v60  ;;  %v9868_v60 = vor.u32 %v9867_v14, %v9864_v57  ;;  %v10581_v57 = vld [vmem:[#allocation2 + $0xcc] sm:$0xe] }
 0x434   : > { %19691 = vmatprep.mubr.msk.bf16.mxu1 %vm1254_vm10, %v17629_v9  ;;  %v24388_v9 = vld [vmem:[#allocation2 + $0x2c] sm:$0x1]  ;;  %v17756_v22 = vrot.slane %v10581_v57, 9 }
 0x435   : > { %v9869_v30 = vrot.slane %v9868_v60, 4  ;;  %v9905_v1 = vshll.u32 %v24388_v9, 16  ;;  %v24432_v60 = vrot.slane %v9943_v62, 5 }
 0x43b   : > { %19692 = vmatmul.mubr.msk.bf16.gmra.mrb[56].mxu1 %vm1254_vm10, %v17630_v36  ;;  %v9822_v36 = vld [vmem:[#allocation2 + $0x3c] sm:$0xf] }
 0x43c   : > { %19695 = vmatprep.mubr.msk.bf16.mxu1 %vm1254_vm10, %v17631_v55  ;;  %v9902_v55 = vor.u32 %v9901_v56, %v24390_v20  ;;  %v9949_v56 = vrot.slane %v9947_v42, 4 }
 0x443   : > { %19696 = vmatmul.mubr.msk.bf16.gmra.mrb[60].mxu1 %vm1254_vm10, %v17632_v50  ;;  %v9884_v50 = vsel %vm21459_vm7, %v9879_v28, %v9883_v47  ;;  %v9982_v28 = vshrl.u32 %v9828_v41, 16  ;;  %v9997_v47 = vrot.slane %v9995_v40, 4 }
 0x444   : > { %19707 = vmatprep.mubr.msk.bf16.mxu1 %vm1254_vm10, %v21086_v0  ;;  %v9934_v0 = vshrl.u32 %v9822_v36, 16 }
 0x445   : > { %v9984_v62 = vrot.slane %v9982_v28, 4 }
 0x44b   : > { %19708 = vmatmul.mubr.msk.bf16.vlgmr.msra.gmra.mrb[32].mxu1 %vm1254_vm10, %v21088_v38  ;;  %v24406_v38 = vld [vmem:[#allocation2 + $0x4c] sm:$0xf] }
 0x44c   : > { %19740 = vmatpush3.bf16.msra.mxu1 %v24272_v18  ;;  %19711 = vmatprep.mubr.msk.bf16.mxu1 %vm1254_vm10, %v21089_v49  ;;  %v24366_v18 = vld [vmem:[%s26996_s1 + $0x100] sm:$0xff]   ;;  %v9874_v49 = vsel %vm21459_vm7, %v9869_v30, %v9873_v21  ;;  %v9967_v4 = vshll.u32 %v24406_v38, 16  ;;  %v9936_v21 = vrot.slane %v9934_v0, 4  ;;  %v9971_v44 = vshrl.u32 %v24406_v38, 16  ;;  %v24458_v0 = vld [vmem:[#allocation2 + $0x50] sm:$0x1] }
 0x44d   : > { %19741 = vmatprep.subr.bf16.mxu1 %v21092_v43  ;;  %v17705_v6 = vcombine.low %v9874_v49, %v9884_v50  ;;  %v9985_v30 = vshll.u32 %v9828_v41, 16 }
 0x44e   : > { %v24436_v13 = vrot.slane %v9967_v4, 5  ;;  %v9973_v7 = vrot.slane %v9971_v44, 4 }
 0x450   : > { %19742 = vmatpush3.bf16.msra.mxu1 %v21092_v43  ;;  %v21103_v43 = vld [vmem:[#allocation2 + $0xb4] sm:$0xff]  }
 0x451   : > { %19743 = vmatprep.subr.bf16.mxu1 %v21097_v15 }
 0x453   : > { %19712 = vmatmul.mubr.msk.bf16.gmra.mrb[36].mxu1 %vm1254_vm10, %v21090_v39  ;;  %v24412_v39 = vrot.slane %v9905_v1, 5 }
 0x454   : > { %19715 = vmatprep.mubr.msk.bf16.mxu1 %vm1254_vm10, %v21091_v51  ;;  %19744 = vmatpush3.bf16.msra.mxu1 %v21097_v15  ;;  %v24410_v15 = vrot.slane %v9892_v48, 4  ;;  %v9825_v51 = vld [vmem:[#allocation2 + $0x48] sm:$0xf] }
 0x455   : > { %19745 = vmatprep.subr.bf16.mxu1 %v21102_v45  ;;  %v9958_v53 = vshrl.u32 %v9825_v51, 16  ;;  %v9961_v27 = vshll.u32 %v9825_v51, 16  ;;  %v9950_v51 = vor.u32 %v9949_v56, %v24432_v60  ;;  %v24484_v56 = vld [vmem:[#allocation2 + $0x70] sm:$0xf] }
 0x458   : > { %19746 = vmatpush3.bf16.msra.mxu1 %v21102_v45  ;;  %v9937_v45 = vshll.u32 %v9822_v36, 16  ;;  %v24446_v36 = vrot.slane %v9991_v52, 5 }
 0x459   : > { %19779 = vmatprep.subr.bf16.mxu1 %v24366_v18 }
 0x45a   : > { %v9939_v24 = vrot.slane %v9937_v45, 5  ;;  %v9998_v4 = vor.u32 %v9997_v47, %v24446_v36  ;;  %v24489_v47 = vld [vmem:[#allocation2 + $0x68] sm:$0x1] }
 0x45b   : > { %19716 = vmatmul.mubr.msk.bf16.gmra.mrb[40].mxu1 %vm1254_vm10, %v21093_v10  ;;  %v21104_v10 = vld [vmem:[#allocation2 + $0xc0] sm:$0xff]  }
 0x45c   : > { %19719 = vmatprep.mubr.msk.bf16.mxu1 %vm1254_vm10, %v21094_v25  ;;  %v9903_v25 = vrot.slane %v9902_v55, 4  ;;  %v9940_v45 = vor.u32 %v9939_v24, %v9936_v21  ;;  %v9834_v24 = vld [vmem:[#allocation2 + $0x6c] sm:$0xf] }
 0x45e   : > { %v9941_v52 = vrot.slane %v9940_v45, 4  ;;  %v10043_v45 = vshrl.u32 %v24484_v56, 16 }
 0x463   : > { %19720 = vmatmul.mubr.msk.bf16.gmra.mrb[44].mxu1 %vm1254_vm10, %v21095_v59  ;;  %v9926_v59 = vor.u32 %v9925_v26, %v24398_v58  ;;  %v9898_v26 = vsel %vm21459_vm7, %v24410_v15, %v24390_v20  ;;  %v24464_v20 = vld [vmem:[#allocation2 + $0x64] sm:$0xf] }
 0x464   : > { %19723 = vmatprep.mubr.msk.bf16.mxu1 %vm1254_vm10, %v21096_v19  ;;  %v9929_v19 = vshll.u32 %v24400_v5, 16  ;;  %v21110_v15 = vld [vmem:[%s26996_s1 + $0x20] sm:$0xff]  }
 0x465   : > { %19819 = vmatprep.subr.bf16.mxu0 %v21110_v15 }
 0x466   : > { %v9931_v1 = vrot.slane %v9929_v19, 5  ;;  %v24474_v19 = vld [vmem:[#allocation2 + $0x5c] sm:$0x1]  ;;  %19820 = vmatpush3.bf16.msra.mxu0 %v21110_v15 }
 0x46b   : > { %19724 = vmatmul.mubr.msk.bf16.gmra.mrb[48].mxu1 %vm1254_vm10, %v21098_v31  ;;  %v9916_v31 = vor.u32 %v9915_v34, %v9912_v23  ;;  %v9908_v23 = vsel %vm21459_vm7, %v9903_v25, %v24412_v39  ;;  %v21111_v39 = vld [vmem:[%s26996_s1 + $0x28] sm:$0xff]   ;;  %v9963_v25 = vrot.slane %v9961_v27, 5  ;;  %v9999_v27 = vrot.slane %v9998_v4, 4 }
 0x46c   : > { %19727 = vmatprep.mubr.msk.bf16.mxu1 %vm1254_vm10, %v21099_v54  ;;  %v24422_v54 = vld [vmem:[#allocation2 + $0xd0] sm:$0xf]  ;;  %v17706_v42 = vcombine.low %v9898_v26, %v9908_v23  ;;  %19821 = vmatprep.subr.bf16.mxu0 %v21111_v39 }
 0x46d   : > { %v10737_v14 = vrot.slane %v24422_v54, 5  ;;  %v9917_v34 = vrot.slane %v9916_v31, 4  ;;  %v9987_v31 = vrot.slane %v9985_v30, 5  ;;  %v10030_v30 = vshrl.u32 %v9834_v24, 16  ;;  %19822 = vmatpush3.bf16.msra.mxu0 %v21111_v39 }
 0x46f   : > { %v10739_v16 = vrot.slane %v10737_v14, 4  ;;  %v24440_v61 = vsel %vm21739_vm14, %v17756_v22, %v10737_v14  ;;  %v9922_v57 = vsel %vm21459_vm7, %v9917_v34, %v24398_v58  ;;  %v9977_v14 = vshll.u32 %v24458_v0, 16  ;;  %v21107_v58 = vld [vmem:[%s26996_s1 + $0x108] sm:$0xff]  }
 0x470   : > { %27161 = vst [vmem:[#allocation7_spill] sm:$0xff] %v24440_v61  ;;  %v10001_v22 = vshll.u32 %v24474_v19, 16  ;;  %v10033_v34 = vshll.u32 %v9834_v24, 16 }
 0x471   : > { %v24444_v48 = vsel %vm21739_vm14, %v10739_v16, %v10740_v2  ;;  %v10019_v2 = vshrl.u32 %v24464_v20, 16 }
 0x472   : > { %27162 = vst [vmem:[#allocation8_spill] sm:$0xff] %v24444_v48 }
 0x473   : > { %19728 = vmatmul.mubr.msk.bf16.gmra.mrb[52].mxu1 %vm1254_vm10, %v21100_v35  ;;  %v9927_v35 = vrot.slane %v9926_v59, 4  ;;  %v9974_v59 = vor.u32 %v9973_v7, %v24436_v13  ;;  %v10021_v23 = vrot.slane %v10019_v2, 4  ;;  %v10045_v2 = vrot.slane %v10043_v45, 4  ;;  %v24539_v45 = vld [vmem:[#allocation2 + $0x80] sm:$0x1] }
 0x474   : > { %19731 = vmatprep.mubr.msk.bf16.mxu1 %vm1254_vm10, %v21101_v63  ;;  %v24434_v63 = vld [vmem:[#allocation2 + $0x44] sm:$0x1] }
 0x475   : > { %v9953_v50 = vshll.u32 %v24434_v63, 16  ;;  %v9932_v49 = vsel %vm21459_vm7, %v9927_v35, %v9931_v1  ;;  %v9951_v35 = vrot.slane %v9950_v51, 4  ;;  %v9975_v16 = vrot.slane %v9974_v59, 4  ;;  %v9837_v51 = vld [vmem:[#allocation2 + $0x78] sm:$0xf] }
 0x476   : > { %v17707_v41 = vcombine.low %v9922_v57, %v9932_v49  ;;  %v9979_v1 = vrot.slane %v9977_v14, 5  ;;  %v10039_v49 = vshll.u32 %v24484_v56, 16  ;;  %v24505_v59 = vld [vmem:[#allocation2 + $0x7c] sm:$0xf]  ;;  %v10057_v57 = vshll.u32 %v9837_v51, 16 }
 0x477   : > { %v9955_v40 = vrot.slane %v9953_v50, 5  ;;  %v9946_v50 = vsel %vm21459_vm7, %v9941_v52, %v24432_v60  ;;  %v24514_v14 = vld [vmem:[#allocation2 + $0x74] sm:$0x1]  ;;  %v10063_v24 = vshll.u32 %v24505_v59, 16 }
 0x478   : > { %v9980_v39 = vsel %vm21459_vm7, %v9975_v16, %v9979_v1 }
 0x47b   : > { %19732 = vmatmul.mubr.msk.bf16.gmra.mrb[56].mxu1 %vm1254_vm10, %v21103_v43  ;;  %v9831_v43 = vld [vmem:[#allocation2 + $0x60] sm:$0xf] }
 0x47c   : > { %19735 = vmatprep.mubr.msk.bf16.mxu1 %vm1254_vm10, %v21104_v10  ;;  %v9960_v10 = vrot.slane %v9958_v53, 4  ;;  %v10006_v21 = vshrl.u32 %v9831_v43, 16  ;;  %v10009_v44 = vshll.u32 %v9831_v43, 16  ;;  %v10003_v43 = vrot.slane %v10001_v22, 5 }
 0x47e   : > { %v9964_v53 = vor.u32 %v9963_v25, %v9960_v10  ;;  %v10008_v7 = vrot.slane %v10006_v21, 4  ;;  %v10011_v28 = vrot.slane %v10009_v44, 5  ;;  %v9956_v10 = vsel %vm21459_vm7, %v9951_v35, %v9955_v40  ;;  %v9840_v35 = vld [vmem:[#allocation2 + $0x84] sm:$0xf] }
 0x47f   : > { %v10004_v60 = vsel %vm21459_vm7, %v9999_v27, %v10003_v43  ;;  %v10035_v21 = vrot.slane %v10033_v34, 5  ;;  %v10054_v44 = vshrl.u32 %v9837_v51, 16  ;;  %v17708_v52 = vcombine.low %v9946_v50, %v9956_v10 }
 0x480   : > { %v9965_v15 = vrot.slane %v9964_v53, 4  ;;  %v9843_v53 = vld [vmem:[#allocation2 + $0x90] sm:$0xf]  ;;  %v10059_v34 = vrot.slane %v10057_v57, 5  ;;  %v24536_v43 = vrot.slane %v10063_v24, 5  ;;  %v10078_v51 = vshrl.u32 %v9840_v35, 16 }
 0x481   : > { %v10081_v10 = vshll.u32 %v9840_v35, 16  ;;  %v10073_v24 = vshll.u32 %v24539_v45, 16 }
 0x482   : > { %v9970_v40 = vsel %vm21459_vm7, %v9965_v15, %v24436_v13  ;;  %v10049_v13 = vshll.u32 %v24514_v14, 16 }
 0x483   : > { %19736 = vmatmul.mubr.msk.bf16.gmra.mrb[60].mxu1 %vm1254_vm10, %v21105_v37  ;;  %v9988_v37 = vor.u32 %v9987_v31, %v9984_v62  ;;  %v10012_v62 = vor.u32 %v10011_v28, %v10008_v7  ;;  %v10025_v31 = vshll.u32 %v24489_v47, 16  ;;  %v17709_v16 = vcombine.low %v9970_v40, %v9980_v39  ;;  %v24526_v28 = vld [vmem:[#allocation2 + $0x88] sm:$0xf] }
 0x484   : > { %19747 = vmatprep.mubr.msk.bf16.mxu1 %vm1254_vm10, %v17705_v6  ;;  %v10015_v6 = vshll.u32 %v24464_v20, 16  ;;  %v10087_v15 = vshll.u32 %v24526_v28, 16  ;;  %v10091_v39 = vshrl.u32 %v24526_v28, 16 }
 0x485   : > { %v9989_v25 = vrot.slane %v9988_v37, 4  ;;  %v10013_v27 = vrot.slane %v10012_v62, 4  ;;  %v10027_v7 = vrot.slane %v10025_v31, 5 }
 0x486   : > { %v24491_v26 = vrot.slane %v10015_v6, 5  ;;  %v24516_v6 = vrot.slane %v10039_v49, 5  ;;  %v24552_v40 = vrot.slane %v10087_v15, 5 }
 0x487   : > { %v9994_v22 = vsel %vm21459_vm7, %v9989_v25, %v24446_v36  ;;  %v24532_v36 = vld [vmem:[#allocation2 + $0x94] sm:$0xf]  ;;  %v10102_v25 = vshrl.u32 %v9843_v53, 16 }
 0x488   : > { %v10022_v4 = vor.u32 %v10021_v23, %v24491_v26  ;;  %v17710_v37 = vcombine.low %v9994_v22, %v10004_v60  ;;  %v10056_v23 = vrot.slane %v10054_v44, 4  ;;  %v10046_v50 = vor.u32 %v10045_v2, %v24516_v6 }
 0x489   : > { %v10105_v60 = vshll.u32 %v9843_v53, 16  ;;  %v10111_v62 = vshll.u32 %v24532_v36, 16  ;;  %v10115_v31 = vshrl.u32 %v24532_v36, 16  ;;  %v10093_v22 = vrot.slane %v10091_v39, 4 }
 0x48a   : > { %v10060_v44 = vor.u32 %v10059_v34, %v10056_v23  ;;  %v10047_v2 = vrot.slane %v10046_v50, 4  ;;  %v10104_v35 = vrot.slane %v10102_v25, 4  ;;  %v10075_v39 = vrot.slane %v10073_v24, 5 }
 0x48b   : > { %19748 = vmatmul.mubr.msk.bf16.vlgmr.msra.gmra.mrb[32].mxu1 %vm1254_vm10, %v17706_v42  ;;  %v21108_v42 = vld [vmem:[%s26996_s1 + $0x110] sm:$0xff]   ;;  %v10107_v53 = vrot.slane %v10105_v60, 5 }
 0x48c   : > { %19780 = vmatpush3.bf16.msra.mxu1 %v24366_v18  ;;  %19751 = vmatprep.mubr.msk.bf16.mxu1 %vm1254_vm10, %v17707_v41  ;;  %v10032_v18 = vrot.slane %v10030_v30, 4  ;;  %v10067_v41 = vshrl.u32 %v24505_v59, 16  ;;  %v21109_v30 = vld [vmem:[%s26996_s1 + $0x118] sm:$0xff]  }
 0x48d   : > { %19781 = vmatprep.subr.bf16.mxu1 %v21107_v58  ;;  %v10108_v25 = vor.u32 %v10107_v53, %v10104_v35  ;;  %v24584_v53 = vld [vmem:[#allocation2 + $0xa4] sm:$0x1] }
 0x48e   : > { %v10036_v1 = vor.u32 %v10035_v21, %v10032_v18  ;;  %v10069_v49 = vrot.slane %v10067_v41, 4  ;;  %v10018_v18 = vsel %vm21459_vm7, %v10013_v27, %v24491_v26  ;;  %v10051_v21 = vrot.slane %v10049_v13, 5  ;;  %v9846_v27 = vld [vmem:[#allocation2 + $0x9c] sm:$0xf]  ;;  %27164 = vst [vmem:[#allocation9_spill] sm:$0xff] %v24584_v53 }
 0x48f   : > { %v10080_v41 = vrot.slane %v10078_v51, 4  ;;  %v24554_v26 = vrot.slane %v10111_v62, 5  ;;  %v10061_v13 = vrot.slane %v10060_v44, 4  ;;  %v24568_v51 = vld [vmem:[#allocation2 + $0x98] sm:$0x1]  ;;  %v10129_v15 = vshll.u32 %v9846_v27, 16 }
 0x490   : > { %19782 = vmatpush3.bf16.msra.mxu1 %v21107_v58  ;;  %v10023_v58 = vrot.slane %v10022_v4, 4  ;;  %v10037_v4 = vrot.slane %v10036_v1, 4  ;;  %v10052_v34 = vsel %vm21459_vm7, %v10047_v2, %v10051_v21  ;;  %v9849_v21 = vld [vmem:[#allocation2 + $0xa8] sm:$0xf]  ;;  %v10109_v35 = vrot.slane %v10108_v25, 4 }
 0x491   : > { %19783 = vmatprep.subr.bf16.mxu1 %v21108_v42  ;;  %v10145_v25 = vshll.u32 %v24584_v53, 16 }
 0x492   : > { %v10028_v57 = vsel %vm21459_vm7, %v10023_v58, %v10027_v7  ;;  %v24556_v7 = vld [vmem:[#allocation2 + $0x8c] sm:$0x1]  ;;  %v10042_v23 = vsel %vm21459_vm7, %v10037_v4, %v24516_v6  ;;  %v24564_v58 = vld [vmem:[#allocation2 + $0xa0] sm:$0xf] }
 0x493   : > { %19752 = vmatmul.mubr.msk.bf16.gmra.mrb[36].mxu1 %vm1254_vm10, %v17708_v52  ;;  %v10083_v52 = vrot.slane %v10081_v10, 5  ;;  %v17711_v1 = vcombine.low %v10018_v18, %v10028_v57  ;;  %v10126_v10 = vshrl.u32 %v9846_v27, 16  ;;  %v10097_v6 = vshll.u32 %v24556_v7, 16 }
 0x494   : > { %19755 = vmatprep.mubr.msk.bf16.mxu1 %vm1254_vm10, %v17709_v16  ;;  %19784 = vmatpush3.bf16.msra.mxu1 %v21108_v42  ;;  %v10070_v42 = vor.u32 %v10069_v49, %v24536_v43  ;;  %v10117_v16 = vrot.slane %v10115_v31, 4  ;;  %v10094_v49 = vor.u32 %v10093_v22, %v24552_v40  ;;  %v17712_v62 = vcombine.low %v10042_v23, %v10052_v34 }
 0x495   : > { %19785 = vmatprep.subr.bf16.mxu1 %v21109_v30  ;;  %v10084_v50 = vor.u32 %v10083_v52, %v10080_v41  ;;  %v10066_v31 = vsel %vm21459_vm7, %v10061_v13, %v24536_v43  ;;  %v10135_v18 = vshll.u32 %v24564_v58, 16  ;;  %v10139_v4 = vshrl.u32 %v24564_v58, 16 }
 0x496   : > { %v10118_v60 = vor.u32 %v10117_v16, %v24554_v26  ;;  %v10121_v57 = vshll.u32 %v24568_v51, 16  ;;  %v10095_v41 = vrot.slane %v10094_v49, 4  ;;  %v10128_v52 = vrot.slane %v10126_v10, 4  ;;  %v24591_v49 = vld [vmem:[#allocation2 + $0xb8] sm:$0xf] }
 0x497   : > { %v10085_v24 = vrot.slane %v10084_v50, 4  ;;  %v10131_v22 = vrot.slane %v10129_v15, 5  ;;  %v10150_v16 = vshrl.u32 %v9849_v21, 16  ;;  %v10153_v27 = vshll.u32 %v9849_v21, 16  ;;  %27165 = vst [vmem:[#allocation10_spill] sm:$0xff] %v24591_v49 }
 0x498   : > { %19786 = vmatpush3.bf16.msra.mxu1 %v21109_v30  ;;  %v10071_v30 = vrot.slane %v10070_v42, 4  ;;  %v10119_v43 = vrot.slane %v10118_v60, 4  ;;  %v10099_v13 = vrot.slane %v10097_v6, 5  ;;  %v24586_v23 = vrot.slane %v10135_v18, 5  ;;  %v24600_v60 = vld [vmem:[#allocation2 + $0xc4] sm:$0xf] }
 0x499   : > { %v10141_v34 = vrot.slane %v10139_v4, 4  ;;  %v10090_v10 = vsel %vm21459_vm7, %v10085_v24, %v24552_v40  ;;  %v10132_v6 = vor.u32 %v10131_v22, %v10128_v52  ;;  %27166 = vst [vmem:[#allocation11_spill] sm:$0xff] %v24600_v60  ;;  %v24607_v18 = vld [vmem:[#allocation2 + $0xb0] sm:$0x1]  ;;  %v10152_v4 = vrot.slane %v10150_v16, 4 }
 0x49a   : > { %v10076_v44 = vsel %vm21459_vm7, %v10071_v30, %v10075_v39  ;;  %v9852_v30 = vld [vmem:[#allocation2 + $0xb4] sm:$0xf]  ;;  %v10123_v39 = vrot.slane %v10121_v57, 5  ;;  %v10100_v15 = vsel %vm21459_vm7, %v10095_v41, %v10099_v13  ;;  %v10155_v21 = vrot.slane %v10153_v27, 5 }
 0x49b   : > { %19756 = vmatmul.mubr.msk.bf16.gmra.mrb[40].mxu1 %vm1254_vm10, %v17710_v37  ;;  %v24570_v37 = vld [vmem:[#allocation2 + $0xac] sm:$0xf]  ;;  %v10142_v40 = vor.u32 %v10141_v34, %v24586_v23  ;;  %v10183_v57 = vshll.u32 %v24591_v49, 16  ;;  %v10177_v41 = vshll.u32 %v9852_v30, 16  ;;  %v10211_v52 = vshrl.u32 %v24600_v60, 16 }
 0x49c   : > { %19759 = vmatprep.mubr.msk.bf16.mxu1 %vm1254_vm10, %v17711_v1  ;;  %27163 = vst [vmem:[#allocation6_spill] sm:$0xff] %v24570_v37  ;;  %v10159_v2 = vshll.u32 %v24570_v37, 16  ;;  %v10163_v42 = vshrl.u32 %v24570_v37, 16  ;;  %v17713_v1 = vcombine.low %v10066_v31, %v10076_v44  ;;  %v10124_v31 = vsel %vm21459_vm7, %v10119_v43, %v10123_v39  ;;  %v9858_v39 = vld [vmem:[#allocation2 + $0xcc] sm:$0xf] }
 0x49d   : > { %v10174_v44 = vshrl.u32 %v9852_v30, 16  ;;  %v17714_v22 = vcombine.low %v10090_v10, %v10100_v15  ;;  %v10133_v43 = vrot.slane %v10132_v6, 4  ;;  %v10147_v16 = vrot.slane %v10145_v25, 5  ;;  %v24618_v10 = vld [vmem:[#allocation2 + $0xbc] sm:$0x1] }
 0x49e   : > { %v24589_v55 = vrot.slane %v10159_v2, 5  ;;  %v10165_v50 = vrot.slane %v10163_v42, 4  ;;  %v10187_v2 = vshrl.u32 %v24591_v49, 16  ;;  %v9855_v42 = vld [vmem:[#allocation2 + $0xc0] sm:$0xf]  ;;  %v10156_v27 = vor.u32 %v10155_v21, %v10152_v4 }
 0x49f   : > { %v10198_v13 = vshrl.u32 %v9855_v42, 16  ;;  %v10201_v34 = vshll.u32 %v9855_v42, 16  ;;  %v10143_v48 = vrot.slane %v10142_v40, 4  ;;  %v10176_v61 = vrot.slane %v10174_v44, 4  ;;  %v24627_v42 = vld [vmem:[#allocation2 + $0xc8] sm:$0x1] }
 0x4a0   : > { %v10166_v24 = vor.u32 %v10165_v50, %v24589_v55  ;;  %v10185_v49 = vrot.slane %v10183_v57, 5  ;;  %v10189_v53 = vrot.slane %v10187_v2, 4  ;;  %v10179_v50 = vrot.slane %v10177_v41, 5 }
 0x4a1   : > { %v10222_v15 = vshrl.u32 %v9858_v39, 16  ;;  %v10225_v6 = vshll.u32 %v9858_v39, 16  ;;  %v10231_v25 = vshll.u32 %v24422_v54, 16  ;;  %v10200_v21 = vrot.slane %v10198_v13, 4 }
 0x4a2   : > { %v10167_v30 = vrot.slane %v10166_v24, 4  ;;  %v10203_v40 = vrot.slane %v10201_v34, 5  ;;  %v10138_v44 = vsel %vm21459_vm7, %v10133_v43, %v24586_v23  ;;  %v10148_v57 = vsel %vm21459_vm7, %v10143_v48, %v10147_v16 }
 0x4a3   : > { %19760 = vmatmul.mubr.msk.bf16.gmra.mrb[44].mxu1 %vm1254_vm10, %v17712_v62  ;;  %v10114_v62 = vsel %vm21459_vm7, %v10109_v35, %v24554_v26  ;;  %v10207_v26 = vshll.u32 %v24600_v60, 16  ;;  %v10213_v60 = vrot.slane %v10211_v52, 4  ;;  %v10190_v2 = vor.u32 %v10189_v53, %v10185_v49 }
 0x4a4   : > { %19763 = vmatprep.mubr.msk.bf16.mxu1 %vm1254_vm10, %v17713_v1  ;;  %v17715_v35 = vcombine.low %v10114_v62, %v10124_v31  ;;  %v10169_v1 = vshll.u32 %v24607_v18, 16  ;;  %v10235_v62 = vshrl.u32 %v24422_v54, 16  ;;  %v10157_v31 = vrot.slane %v10156_v27, 4 }
 0x4a5   : > { %v10209_v37 = vrot.slane %v10207_v26, 5  ;;  %v10180_v41 = vor.u32 %v10179_v50, %v10176_v61  ;;  %v10193_v54 = vshll.u32 %v24618_v10, 16  ;;  %v10224_v52 = vrot.slane %v10222_v15, 4 }
 0x4a6   : > { %v10171_v4 = vrot.slane %v10169_v1, 5  ;;  %v10237_v27 = vrot.slane %v10235_v62, 4  ;;  %v17716_v1 = vcombine.low %v10138_v44, %v10148_v57  ;;  %v10162_v23 = vsel %vm21459_vm7, %v10157_v31, %v24589_v55 }
 0x4a7   : > { %v10214_v26 = vor.u32 %v10213_v60, %v10209_v37  ;;  %v10204_v48 = vor.u32 %v10203_v40, %v10200_v21  ;;  %v10217_v53 = vshll.u32 %v24627_v42, 16  ;;  %v10191_v16 = vrot.slane %v10190_v2, 4 }
 0x4a8   : > { %v10172_v24 = vsel %vm21459_vm7, %v10167_v30, %v10171_v4  ;;  %v10195_v61 = vrot.slane %v10193_v54, 5  ;;  %v10181_v60 = vrot.slane %v10180_v41, 4  ;;  %v10241_v30 = vshll.u32 %v24424_v29, 16 }
 0x4a9   : > { %v17717_v43 = vcombine.low %v10162_v23, %v10172_v24  ;;  %v10215_v13 = vrot.slane %v10214_v26, 4  ;;  %v10205_v50 = vrot.slane %v10204_v48, 4  ;;  %v10219_v15 = vrot.slane %v10217_v53, 5 }
 0x4aa   : > { %v10196_v55 = vsel %vm21459_vm7, %v10191_v16, %v10195_v61  ;;  %v10186_v62 = vsel %vm21459_vm7, %v10181_v60, %v10185_v49  ;;  %v10243_v21 = vrot.slane %v10241_v30, 5  ;;  %v10566_v49 = vld [vmem:[#allocation2 + $0x18] sm:$0xe]  ;;  %v10635_v24 = vrot.slane %v24381_v32, 5  ;;  %v10568_v32 = vld [vmem:[#allocation2 + $0x30] sm:$0xe] }
 0x4ab   : > { %19764 = vmatmul.mubr.msk.bf16.gmra.mrb[48].mxu1 %vm1254_vm10, %v17714_v22  ;;  %v10227_v22 = vrot.slane %v10225_v6, 5  ;;  %v10220_v6 = vsel %vm21459_vm7, %v10215_v13, %v10219_v15  ;;  %v17718_v40 = vcombine.low %v10186_v62, %v10196_v55  ;;  %v10210_v29 = vsel %vm21459_vm7, %v10205_v50, %v10209_v37  ;;  %v10569_v30 = vld [vmem:[#allocation2 + $0x3c] sm:$0xe]  ;;  %v10570_v15 = vld [vmem:[#allocation2 + $0x48] sm:$0xe] }
 0x4ac   : > { %19767 = vmatprep.mubr.msk.bf16.mxu1 %vm1254_vm10, %v17715_v35  ;;  %v10233_v35 = vrot.slane %v10231_v25, 5  ;;  %v10632_v25 = vrot.slane %v24373_v46, 5  ;;  %v17719_v44 = vcombine.low %v10210_v29, %v10220_v6  ;;  %v10639_v41 = vrot.slane %v24378_v8, 5 }
 0x4ad   : > { %v10228_v34 = vor.u32 %v10227_v22, %v10224_v52  ;;  %v17741_v26 = vrot.slane %v10566_v49, 9  ;;  %v10646_v52 = vrot.slane %v24385_v17, 5  ;;  %v10642_v8 = vrot.slane %v24388_v9, 5 }
 0x4ae   : > { %v10238_v39 = vor.u32 %v10237_v27, %v10233_v35  ;;  %v10634_v57 = vrot.slane %v10632_v25, 4  ;;  %v10649_v48 = vrot.slane %v24400_v5, 5  ;;  %v17743_v16 = vrot.slane %v10568_v32, 9 }
 0x4af   : > { %v10229_v31 = vrot.slane %v10228_v34, 4  ;;  %v10633_v22 = vsel %vm21739_vm14, %v17741_v26, %v10632_v25  ;;  %v10648_v23 = vrot.slane %v10646_v52, 4  ;;  %v10660_v13 = vrot.slane %v24406_v38, 5 }
 0x4b0   : > { %v10239_v4 = vrot.slane %v10238_v39, 4  ;;  %v10636_v37 = vsel %vm21739_vm14, %v10634_v57, %v10635_v24  ;;  %v10647_v9 = vsel %vm21739_vm14, %v17743_v16, %v10646_v52  ;;  %v10663_v38 = vrot.slane %v24458_v0, 5 }
 0x4b1   : > { %v10234_v2 = vsel %vm21459_vm7, %v10229_v31, %v10233_v35  ;;  %v17765_v27 = vcombine.low %v10633_v22, %v10636_v37  ;;  %v10641_v35 = vrot.slane %v10639_v41, 4  ;;  %v10650_v61 = vsel %vm21739_vm14, %v10648_v23, %v10649_v48 }
 0x4b2   : > { %v10244_v46 = vsel %vm21459_vm7, %v10239_v4, %v10243_v21  ;;  %v17767_v5 = vcombine.low %v10647_v9, %v10650_v61  ;;  %v10662_v50 = vrot.slane %v10660_v13, 4  ;;  %v17744_v55 = vrot.slane %v10569_v30, 9 }
 0x4b3   : > { %19768 = vmatmul.mubr.msk.bf16.gmra.mrb[52].mxu1 %vm1254_vm10, %v17716_v1  ;;  %v17720_v54 = vcombine.low %v10234_v2, %v10244_v46  ;;  %v10567_v1 = vld [vmem:[#allocation2 + $0x24] sm:$0xe]  ;;  %v10643_v17 = vsel %vm21739_vm14, %v10641_v35, %v10642_v8  ;;  %v10667_v25 = vrot.slane %v24417_v11, 5  ;;  %v17745_v62 = vrot.slane %v10570_v15, 9  ;;  %v10572_v2 = vld [vmem:[#allocation2 + $0x60] sm:$0xe] }
 0x4b4   : > { %19771 = vmatprep.mubr.msk.bf16.mxu1 %vm1254_vm10, %v17717_v43  ;;  %v17742_v53 = vrot.slane %v10567_v1, 9  ;;  %v10653_v43 = vrot.slane %v24402_v12, 5  ;;  %v10656_v12 = vrot.slane %v24434_v63, 5  ;;  %v10664_v31 = vsel %vm21739_vm14, %v10662_v50, %v10663_v38  ;;  %v10574_v1 = vld [vmem:[#allocation2 + $0x78] sm:$0xe] }
 0x4b5   : > { %v10674_v4 = vrot.slane %v24464_v20, 5  ;;  %v10661_v63 = vsel %vm21739_vm14, %v17745_v62, %v10660_v13  ;;  %v10669_v29 = vrot.slane %v10667_v25, 4  ;;  %v10670_v11 = vrot.slane %v24474_v19, 5  ;;  %v10575_v13 = vld [vmem:[#allocation2 + $0x84] sm:$0xe] }
 0x4b6   : > { %v10640_v60 = vsel %vm21739_vm14, %v17742_v53, %v10639_v41  ;;  %v10655_v39 = vrot.slane %v10653_v43, 4  ;;  %v10654_v21 = vsel %vm21739_vm14, %v17744_v55, %v10653_v43  ;;  %v17769_v0 = vcombine.low %v10661_v63, %v10664_v31 }
 0x4b7   : > { %v17766_v34 = vcombine.low %v10640_v60, %v10643_v17  ;;  %v10676_v57 = vrot.slane %v10674_v4, 4  ;;  %v10677_v20 = vrot.slane %v24489_v47, 5  ;;  %v10671_v49 = vsel %vm21739_vm14, %v10669_v29, %v10670_v11  ;;  %v27170_v11 = vld [vmem:[#allocation11_spill] sm:$0xff] }
 0x4b8   : > { %v10657_v6 = vsel %vm21739_vm14, %v10655_v39, %v10656_v12  ;;  %v10681_v24 = vrot.slane %v24484_v56, 5  ;;  %v17747_v41 = vrot.slane %v10572_v2, 9  ;;  %v10688_v26 = vrot.slane %v24505_v59, 5  ;;  %v27167_v12 = vld [vmem:[#allocation6_spill] sm:$0xff] }
 0x4b9   : > { %v10684_v56 = vrot.slane %v24514_v14, 5  ;;  %v10691_v59 = vrot.slane %v24539_v45, 5  ;;  %v10695_v32 = vrot.slane %v24526_v28, 5  ;;  %v17749_v48 = vrot.slane %v10574_v1, 9 }
 0x4ba   : > { %v10675_v19 = vsel %vm21739_vm14, %v17747_v41, %v10674_v4  ;;  %v10683_v22 = vrot.slane %v10681_v24, 4  ;;  %v10690_v35 = vrot.slane %v10688_v26, 4  ;;  %v10702_v17 = vrot.slane %v24532_v36, 5  ;;  %v10578_v4 = vld [vmem:[#allocation2 + $0xa8] sm:$0xe] }
 0x4bb   : > { %19772 = vmatmul.mubr.msk.bf16.gmra.mrb[56].mxu1 %vm1254_vm10, %v17718_v40  ;;  %v17768_v40 = vcombine.low %v10654_v21, %v10657_v6  ;;  %v10689_v14 = vsel %vm21739_vm14, %v17749_v48, %v10688_v26  ;;  %v10697_v61 = vrot.slane %v10695_v32, 4  ;;  %v10698_v28 = vrot.slane %v24556_v7, 5  ;;  %v10579_v41 = vld [vmem:[#allocation2 + $0xb4] sm:$0xe]  ;;  %v11782_v48 = vld [vmem:[#allocation2] sm:$0xf] }
 0x4bc   : > { %19775 = vmatprep.mubr.msk.bf16.mxu1 %vm1254_vm10, %v17719_v44  ;;  %v10571_v44 = vld [vmem:[#allocation2 + $0x54] sm:$0xe]  ;;  %v10685_v8 = vsel %vm21739_vm14, %v10683_v22, %v10684_v56  ;;  %v10692_v53 = vsel %vm21739_vm14, %v10690_v35, %v10691_v59  ;;  %v10704_v60 = vrot.slane %v10702_v17, 4  ;;  %v10705_v36 = vrot.slane %v24568_v51, 5 }
 0x4bd   : > { %v17746_v46 = vrot.slane %v10571_v44, 9  ;;  %v17773_v45 = vcombine.low %v10689_v14, %v10692_v53  ;;  %v17750_v9 = vrot.slane %v10575_v13, 9  ;;  %v10709_v39 = vrot.slane %v24564_v58, 5  ;;  %v27168_v58 = vld [vmem:[#allocation9_spill] sm:$0xff]  ;;  %v11783_v53 = vld [vmem:[#allocation2 + $0x4] sm:$0xf] }
 0x4be   : > { %v10706_v50 = vsel %vm21739_vm14, %v10704_v60, %v10705_v36  ;;  %v10716_v15 = vrot.slane %v27167_v12, 5  ;;  %v10712_v31 = vrot.slane %v27168_v58, 5  ;;  %v10719_v21 = vrot.slane %v24607_v18, 5 }
 0x4bf   : > { %v10668_v37 = vsel %vm21739_vm14, %v17746_v46, %v10667_v25  ;;  %v10696_v38 = vsel %vm21739_vm14, %v17750_v9, %v10695_v32  ;;  %v10711_v6 = vrot.slane %v10709_v39, 4  ;;  %v10577_v25 = vld [vmem:[#allocation2 + $0x9c] sm:$0xe]  ;;  %v17753_v44 = vrot.slane %v10578_v4, 9 }
 0x4c0   : > { %v17770_v52 = vcombine.low %v10668_v37, %v10671_v49  ;;  %v10718_v62 = vrot.slane %v10716_v15, 4  ;;  %v10730_v2 = vrot.slane %v27170_v11, 5  ;;  %v10726_v26 = vrot.slane %v24618_v10, 5  ;;  %v10580_v37 = vld [vmem:[#allocation2 + $0xc0] sm:$0xe]  ;;  %v27171_v10 = vld [vmem:[#allocation7_spill] sm:$0xff] }
 0x4c1   : > { %v10713_v63 = vsel %vm21739_vm14, %v10711_v6, %v10712_v31  ;;  %v10717_v49 = vsel %vm21739_vm14, %v17753_v44, %v10716_v15  ;;  %v17755_v22 = vrot.slane %v10580_v37, 9  ;;  %v21113_v32 = vld [vmem:[%s26996_s1 + $0x38] sm:$0xff]   ;;  %v11848_v14 = vshll.u32 %v11783_v53, 16  ;;  %v24790_v6 = vld [vmem:[%s21442_s10 + $0x10] sm:$0xff]   ;;  %v24813_v11 = vld [vmem:[%s21442_s10 + $0x48] sm:$0xff]  }
 0x4c3   : > { %19776 = vmatmul.mubr.msk.bf16.gmra.mrb[60].mxu1 %vm1254_vm10, %v17720_v54  ;;  %v10678_v54 = vsel %vm21739_vm14, %v10676_v57, %v10677_v20  ;;  %v10720_v57 = vsel %vm21739_vm14, %v10718_v62, %v10719_v21  ;;  %v10731_v1 = vsel %vm21739_vm14, %v17755_v22, %v10730_v2  ;;  %v24796_v62 = vld [vmem:[%s21442_s10 + $0x20] sm:$0xff]   ;;  %v24835_v22 = vld [vmem:[%s21442_s10 + $0x50] sm:$0xff]  }
 0x4c4   : > { %19787 = vmatprep.mubr.msk.bf16.mxu1 %vm1254_vm10, %v17765_v27  ;;  %v17771_v47 = vcombine.low %v10675_v19, %v10678_v54  ;;  %v10573_v27 = vld [vmem:[#allocation2 + $0x6c] sm:$0xe]  ;;  %v17777_v18 = vcombine.low %v10717_v49, %v10720_v57  ;;  %v10732_v54 = vrot.slane %v10730_v2, 4  ;;  %v17754_v19 = vrot.slane %v10579_v41, 9  ;;  %v24816_v2 = vld [vmem:[%s21442_s10 + $0x40] sm:$0xff]  }
 0x4c5   : > { %v17748_v23 = vrot.slane %v10573_v27, 9  ;;  %v18476_v57 = vunpack.c.h.bf16 %v24790_v6  ;;  %v18483_v49 = vunpack.c.l.bf16 %v24796_v62  ;;  %v24825_v41 = vld [vmem:[%s26997_s2] ss:$0 sm:$0xff] }
 0x4c7   : > { %v10682_v43 = vsel %vm21739_vm14, %v17748_v23, %v10681_v24 }
 0x4c8   : > { %v17772_v16 = vcombine.low %v10682_v43, %v10685_v8  ;;  %v21112_v8 = vld [vmem:[%s26996_s1 + $0x30] sm:$0xff]   ;;  %v11839_v43 = vshrl.u32 %v11782_v48, 16 }
 0x4c9   : > { %19823 = vmatprep.subr.bf16.mxu0 %v21112_v8 }
 0x4ca   : > { %19824 = vmatpush3.bf16.msra.mxu0 %v21112_v8  ;;  %v11841_v60 = vrot.slane %v11839_v43, 4 }
 0x4cb   : > { %19788 = vmatmul.mubr.msk.bf16.vlgmr.msra.gmra.mrb[32].mxu1 %vm1254_vm10, %v17766_v34  ;;  %v10576_v34 = vld [vmem:[#allocation2 + $0x90] sm:$0xe]  ;;  %19825 = vmatprep.subr.bf16.mxu0 %v21113_v32 }
 0x4cc   : > { %19791 = vmatprep.mubr.msk.bf16.mxu1 %vm1254_vm10, %v17767_v5  ;;  %v10699_v5 = vsel %vm21739_vm14, %v10697_v61, %v10698_v28  ;;  %v17751_v30 = vrot.slane %v10576_v34, 9  ;;  %v24772_v61 = vld [vmem:[%s26996_s1] sm:$0xff]   ;;  %v11850_v34 = vrot.slane %v11848_v14, 5 }
 0x4cd   : > { %v17774_v55 = vcombine.low %v10696_v38, %v10699_v5 }
 0x4ce   : > { %v10703_v7 = vsel %vm21739_vm14, %v17751_v30, %v10702_v17  ;;  %19826 = vmatpush3.bf16.msra.mxu0 %v21113_v32  ;;  %v11822_v17 = vld [vmem:[#allocation2 + $0x8] sm:$0x1]  ;;  %v18504_v32 = vunpack.c.h.bf16 %v24813_v11 }
 0x4cf   : > { %v17775_v51 = vcombine.low %v10703_v7, %v10706_v50  ;;  %v11858_v13 = vshll.u32 %v11822_v17, 16  ;;  %19859 = vmatprep.subr.bf16.mxu0 %v24772_v61  ;;  %v24784_v7 = vld [vmem:[%s21442_s10] sm:$0xff]  }
 0x4d0   : > { %v18467_v31 = vunpack.c.l.bf16 %v24784_v7  ;;  %v18468_v21 = vunpack.c.h.bf16 %v24784_v7  ;;  %v24854_v17 = vld [vmem:[%s21442_s10 + $0x60] sm:$0xff]  }
 0x4d3   : > { %19792 = vmatmul.mubr.msk.bf16.gmra.mrb[36].mxu1 %vm1254_vm10, %v17768_v40  ;;  %v17752_v40 = vrot.slane %v10577_v25, 9  ;;  %v24793_v25 = vld [vmem:[%s21442_s10 + $0x28] sm:$0xff]  }
 0x4d4   : > { %19795 = vmatprep.mubr.msk.bf16.mxu1 %vm1254_vm10, %v17769_v0  ;;  %v27169_v0 = vld [vmem:[#allocation10_spill] sm:$0xff] }
 0x4d5   : > { %v10723_v29 = vrot.slane %v27169_v0, 5  ;;  %v10710_v20 = vsel %vm21739_vm14, %v17752_v40, %v10709_v39  ;;  %v11860_v39 = vrot.slane %v11858_v13, 5  ;;  %v24803_v40 = vld [vmem:[%s21442_s10 + $0x38] sm:$0xff]  }
 0x4d6   : > { %v17776_v46 = vcombine.low %v10710_v20, %v10713_v63  ;;  %v24806_v63 = vld [vmem:[%s21442_s10 + $0x30] sm:$0xff]   ;;  %v18495_v37 = vunpack.c.l.bf16 %v24803_v40 }
 0x4d7   : > { %v10725_v24 = vrot.slane %v10723_v29, 4  ;;  %v10724_v35 = vsel %vm21739_vm14, %v17754_v19, %v10723_v29  ;;  %v18475_v29 = vunpack.c.l.bf16 %v24790_v6  ;;  %v18496_v19 = vunpack.c.h.bf16 %v24803_v40 }
 0x4db   : > { %19796 = vmatmul.mubr.msk.bf16.gmra.mrb[40].mxu1 %vm1254_vm10, %v17770_v52  ;;  %v10733_v52 = vrot.slane %v24627_v42, 5  ;;  %v27172_v42 = vld [vmem:[#allocation8_spill] sm:$0xff] }
 0x4dc   : > { %19799 = vmatprep.mubr.msk.bf16.mxu1 %vm1254_vm10, %v17771_v47  ;;  %v10727_v47 = vsel %vm21739_vm14, %v10725_v24, %v10726_v26  ;;  %v27173_v23 = vcombine.low %v27171_v10, %v27172_v42  ;;  %v18484_v24 = vunpack.c.h.bf16 %v24796_v62  ;;  %v24844_v10 = vld [vmem:[%s26998_s3] ss:$0 sm:$0xff] }
 0x4dd   : > { %v10734_v27 = vsel %vm21739_vm14, %v10732_v54, %v10733_v52  ;;  %v17778_v56 = vcombine.low %v10724_v35, %v10727_v47  ;;  %v18491_v52 = vunpack.c.l.bf16 %v24806_v63  ;;  %v24832_v47 = vld [vmem:[%s21442_s10 + $0x58] sm:$0xff]  }
 0x4de   : > { %v17779_v59 = vcombine.low %v10731_v1, %v10734_v27  ;;  %v18503_v1 = vunpack.c.l.bf16 %v24813_v11  ;;  %v18511_v14 = vunpack.c.l.bf16 %v24832_v47 }
 0x4e3   : > { %19800 = vmatmul.mubr.msk.bf16.gmra.mrb[44].mxu1 %vm1254_vm10, %v17772_v16  ;;  %v11842_v16 = vshll.u32 %v11782_v48, 16  ;;  %v18500_v48 = vunpack.c.h.bf16 %v24816_v2 }
 0x4e4   : > { %19803 = vmatprep.mubr.msk.bf16.mxu1 %vm1254_vm10, %v17773_v45  ;;  %v11852_v45 = vshrl.u32 %v11783_v53, 16  ;;  %v24851_v53 = vld [vmem:[%s21442_s10 + $0x68] sm:$0xff]  }
 0x4e5   : > { %v11844_v28 = vrot.slane %v11842_v16, 5 }
 0x4e6   : > { %v11854_v36 = vrot.slane %v11852_v45, 4 }
 0x4e7   : > { %v11845_v9 = vor.u32 %v11844_v28, %v11841_v60 }
 0x4e8   : > { %v11855_v5 = vor.u32 %v11854_v36, %v11850_v34  ;;  %v24864_v36 = vld [vmem:[%s21442_s10 + $0x78] sm:$0xff]  }
 0x4e9   : > { %v11846_v30 = vrot.slane %v11845_v9, 4  ;;  %v24867_v9 = vld [vmem:[%s21442_s10 + $0x70] sm:$0xff]  }
 0x4ea   : > { %v11856_v50 = vrot.slane %v11855_v5, 4 }
 0x4eb   : > { %19804 = vmatmul.mubr.msk.bf16.gmra.mrb[48].mxu1 %vm1254_vm10, %v17774_v55  ;;  %v11851_v12 = vsel %vm21459_vm7, %v11846_v30, %v11850_v34  ;;  %v24781_v55 = vld [vmem:[%s21442_s10 + $0x8] sm:$0xff]  }
 0x4ec   : > { %19807 = vmatprep.mubr.msk.bf16.mxu1 %vm1254_vm10, %v17775_v51  ;;  %v11861_v15 = vsel %vm21459_vm7, %v11856_v50, %v11860_v39  ;;  %v24787_v51 = vld [vmem:[%s21442_s10 + $0x18] sm:$0xff]   ;;  %v18471_v58 = vunpack.c.l.bf16 %v24781_v55  ;;  %v18472_v4 = vunpack.c.h.bf16 %v24781_v55 }
 0x4ed   : > { %v17841_v38 = vcombine.low %v11851_v12, %v11861_v15  ;;  %v18479_v0 = vunpack.c.l.bf16 %v24787_v51  ;;  %v18480_v44 = vunpack.c.h.bf16 %v24787_v51 }
 0x4ef   : > { %19827 = vmatprep.mubr.msk.bf16.mxu0 %vm1254_vm10, %v17841_v38 }
 0x4f3   : > { %19808 = vmatmul.mubr.msk.bf16.gmra.mrb[52].mxu1 %vm1254_vm10, %v17776_v46  ;;  %v18487_v46 = vunpack.c.l.bf16 %v24793_v25 }
 0x4f4   : > { %19811 = vmatprep.mubr.msk.bf16.mxu1 %vm1254_vm10, %v17777_v18  ;;  %v18488_v18 = vunpack.c.h.bf16 %v24793_v25 }
 0x4fb   : > { %19812 = vmatmul.mubr.msk.bf16.gmra.mrb[56].mxu1 %vm1254_vm10, %v17778_v56  ;;  %v18492_v56 = vunpack.c.h.bf16 %v24806_v63 }
 0x4fc   : > { %19815 = vmatprep.mubr.msk.bf16.mxu1 %vm1254_vm10, %v17779_v59  ;;  %v18499_v59 = vunpack.c.l.bf16 %v24816_v2 }
 0x503   : > { %19816 = vmatmul.mubr.msk.bf16.gmra.mrb[60].mxu1 %vm1254_vm10, %v27173_v23 }
 0x59e   : > { %v19789_v20 = vpop.f32.mrb[32].mxu1 }
 0x59f   : > { %v11065_v54 = vmul.f32 %v24825_v41, %v19789_v20  ;;  %v10904_v26 = vpop.f32.mrb[33].mxu1 }
 0x5a0   : > { %v11063_v27 = vmul.f32 %v24825_v41, %v10904_v26  ;;  %v19790_v35 = vpop.f32.mrb[34].mxu1 }
 0x5a1   : > { %v11097_v42 = vadd.f32 %v24844_v10, %v11065_v54  ;;  %v11066_v23 = vmul.f32 %v24825_v41, %v19790_v35  ;;  %v10907_v8 = vpop.f32.mrb[35].mxu1 }
 0x5a2   : > { %v11095_v43 = vadd.f32 %v24844_v10, %v11063_v27  ;;  %v11064_v16 = vmul.f32 %v24825_v41, %v10907_v8 }
 0x5a3   : > { %v11129_v13 = vmax.f32 %v11097_v42, 0.0  ;;  %v11098_v60 = vadd.f32 %v24844_v10, %v11066_v23 }
 0x5a4   : > { %v11127_v5 = vmax.f32 %v11095_v43, 0.0  ;;  %v11096_v39 = vadd.f32 %v24844_v10, %v11064_v16 }
 0x5a5   : > { %v11225_v12 = vadd.f32 %v18471_v58, %v11129_v13  ;;  %v11130_v15 = vmax.f32 %v11098_v60, 0.0 }
 0x5a6   : > { %v11223_v20 = vadd.f32 %v18467_v31, %v11127_v5  ;;  %v11128_v54 = vmax.f32 %v11096_v39, 0.0  ;;  %v19793_v26 = vpop.f32.mrb[36].mxu1 }
 0x5a7   : > { %v18339_v42 = vpack.c.bf16 %v11225_v12, %v11225_v12  ;;  %v11226_v23 = vadd.f32 %v18472_v4, %v11130_v15  ;;  %v11069_v8 = vmul.f32 %v24825_v41, %v19793_v26  ;;  %v10920_v43 = vpop.f32.mrb[37].mxu1 }
 0x5a8   : > { %v18337_v58 = vpack.c.bf16 %v11223_v20, %v11223_v20  ;;  %v11224_v13 = vadd.f32 %v18468_v21, %v11128_v54  ;;  %v11067_v60 = vmul.f32 %v24825_v41, %v10920_v43  ;;  %v19794_v31 = vpop.f32.mrb[38].mxu1 }
 0x5a9   : > { %v11369_v39 = vshrl.u32 %v18339_v42, 16  ;;  %v11372_v27 = vshll.u32 %v18339_v42, 16  ;;  %v18340_v55 = vpack.c.bf16 %v11226_v23, %v11226_v23  ;;  %v11101_v12 = vadd.f32 %v24844_v10, %v11069_v8  ;;  %v10923_v4 = vpop.f32.mrb[39].mxu1  ;;  %v11677_v8 = vld [vmem:[#allocation2 + $0x18] sm:$0xf] }
 0x5aa   : > { %v11352_v15 = vshrl.u32 %v18337_v58, 16  ;;  %v11355_v26 = vshll.u32 %v18337_v58, 16  ;;  %v18338_v35 = vpack.c.bf16 %v11224_v13, %v11224_v13  ;;  %v11099_v16 = vadd.f32 %v24844_v10, %v11067_v60 }
 0x5ab   : > { %v11371_v20 = vrot.slane %v11369_v39, 7  ;;  %v11377_v38 = vshrl.u32 %v18340_v55, 16  ;;  %v11380_v7 = vshll.u32 %v18340_v55, 16  ;;  %v11133_v21 = vmax.f32 %v11101_v12, 0.0 }
 0x5ac   : > { %v11354_v54 = vrot.slane %v11352_v15, 7  ;;  %v11360_v43 = vshrl.u32 %v18338_v35, 16  ;;  %v11363_v50 = vshll.u32 %v18338_v35, 16  ;;  %v11131_v30 = vmax.f32 %v11099_v16, 0.0 }
 0x5ad   : > { %v11374_v5 = vor.u32 %v11372_v27, %v11371_v20  ;;  %v11375_v34 = vrot.slane %v11371_v20, 4  ;;  %v11379_v42 = vrot.slane %v11377_v38, 7  ;;  %v11229_v23 = vadd.f32 %v18479_v0, %v11133_v21  ;;  %v21274_v38 = vld [vmem:[#allocation2 + $0xc] sm:$0xf]  ;;  %v11681_v20 = vld [vmem:[#allocation2 + $0x20] sm:$0x1] }
 0x5ae   : > { %v11357_v28 = vor.u32 %v11355_v26, %v11354_v54  ;;  %v11358_v58 = vrot.slane %v11354_v54, 4  ;;  %v11362_v13 = vrot.slane %v11360_v43, 7  ;;  %v11227_v60 = vadd.f32 %v18475_v29, %v11131_v30  ;;  %v19797_v39 = vpop.f32.mrb[40].mxu1 }
 0x5af   : > { %v11678_v12 = vsel %vm21469_vm9, %v11374_v5, %v11677_v8  ;;  %v11382_v15 = vor.u32 %v11380_v7, %v11379_v42  ;;  %v11384_v35 = vrot.slane %v11379_v42, 4  ;;  %v18343_v16 = vpack.c.bf16 %v11229_v23, %v11229_v23  ;;  %v10936_v27 = vpop.f32.mrb[41].mxu1  ;;  %v11674_v7 = vld [vmem:[#allocation2 + $0x14] sm:$0x1] }
 0x5b0   : > { %11679 = vst [vmem:[#allocation2 + $0x18] sm:$0xf] %v11678_v12  ;;  %v11671_v0 = vsel %vm21469_vm9, %v11357_v28, %v21274_v38  ;;  %v11365_v26 = vor.u32 %v11363_v50, %v11362_v13  ;;  %v11367_v21 = vrot.slane %v11362_v13, 4  ;;  %v18341_v54 = vpack.c.bf16 %v11227_v60, %v11227_v60  ;;  %v19798_v43 = vpop.f32.mrb[42].mxu1 }
 0x5b1   : > { %11672 = vst [vmem:[#allocation2 + $0xc] sm:$0xf] %v11671_v0  ;;  %v11383_v30 = vsel %vm21476_vm11, %v11375_v34, %v11382_v15  ;;  %v11682_v5 = vsel %vm21453_vm6, %v11384_v35, %v11681_v20  ;;  %v11403_v42 = vshrl.u32 %v18343_v16, 16  ;;  %v11406_v23 = vshll.u32 %v18343_v16, 16  ;;  %v10939_v8 = vpop.f32.mrb[43].mxu1 }
 0x5b2   : > { %11683 = vst [vmem:[#allocation2 + $0x20] sm:$0x1] %v11682_v5  ;;  %11680 = vst.msk [vmem:[#allocation2 + $0x1c] sm:$0xf] %vm201_vm0, %v11383_v30  ;;  %v11366_v28 = vsel %vm21476_vm11, %v11358_v58, %v11365_v26  ;;  %v11675_v50 = vsel %vm21453_vm6, %v11367_v21, %v11674_v7  ;;  %v11386_v13 = vshrl.u32 %v18341_v54, 16  ;;  %v11389_v60 = vshll.u32 %v18341_v54, 16 }
 0x5b3   : > { %11673 = vst.msk [vmem:[#allocation2 + $0x10] sm:$0xf] %vm201_vm0, %v11366_v28  ;;  %11676 = vst [vmem:[#allocation2 + $0x14] sm:$0x1] %v11675_v50  ;;  %v24902_v34 = vrot.slane %v11403_v42, 7  ;;  %v11070_v12 = vmul.f32 %v24825_v41, %v19794_v31  ;;  %v11068_v15 = vmul.f32 %v24825_v41, %v10923_v4  ;;  %v11073_v35 = vmul.f32 %v24825_v41, %v19797_v39 }
 0x5b4   : > { %v24907_v16 = vrot.slane %v11386_v13, 7  ;;  %v11071_v58 = vmul.f32 %v24825_v41, %v10936_v27  ;;  %v11074_v38 = vmul.f32 %v24825_v41, %v19798_v43  ;;  %v11072_v0 = vmul.f32 %v24825_v41, %v10939_v8  ;;  %v11691_v54 = vld [vmem:[#allocation2 + $0x30] sm:$0xf]  ;;  %v11684_v7 = vld [vmem:[#allocation2 + $0x24] sm:$0xf] }
 0x5b5   : > { %v11408_v20 = vor.u32 %v11406_v23, %v24902_v34  ;;  %v11409_v26 = vrot.slane %v24902_v34, 4  ;;  %v11102_v21 = vadd.f32 %v24844_v10, %v11070_v12  ;;  %v11100_v31 = vadd.f32 %v24844_v10, %v11068_v15 }
 0x5b6   : > { %v11391_v4 = vor.u32 %v11389_v60, %v24907_v16  ;;  %v11392_v39 = vrot.slane %v24907_v16, 4  ;;  %v11105_v30 = vadd.f32 %v24844_v10, %v11073_v35  ;;  %v11103_v27 = vadd.f32 %v24844_v10, %v11071_v58  ;;  %v19801_v43 = vpop.f32.mrb[44].mxu1 }
 0x5b7   : > { %v11692_v5 = vsel %vm21469_vm9, %v11408_v20, %v11691_v54  ;;  %v11134_v42 = vmax.f32 %v11102_v21, 0.0  ;;  %v11132_v23 = vmax.f32 %v11100_v31, 0.0  ;;  %v11106_v8 = vadd.f32 %v24844_v10, %v11074_v38  ;;  %v10952_v28 = vpop.f32.mrb[45].mxu1 }
 0x5b8   : > { %11693 = vst [vmem:[#allocation2 + $0x30] sm:$0xf] %v11692_v5  ;;  %v11685_v50 = vsel %vm21469_vm9, %v11391_v4, %v11684_v7  ;;  %v11137_v13 = vmax.f32 %v11105_v30, 0.0  ;;  %v11135_v60 = vmax.f32 %v11103_v27, 0.0  ;;  %v11104_v12 = vadd.f32 %v24844_v10, %v11072_v0  ;;  %v24926_v15 = vpop.f32.mrb[46].mxu1 }
 0x5b9   : > { %11686 = vst [vmem:[#allocation2 + $0x24] sm:$0xf] %v11685_v50  ;;  %v11230_v35 = vadd.f32 %v18480_v44, %v11134_v42  ;;  %v11228_v58 = vadd.f32 %v18476_v57, %v11132_v23  ;;  %v11138_v20 = vmax.f32 %v11106_v8, 0.0  ;;  %v11077_v38 = vmul.f32 %v24825_v41, %v19801_v43  ;;  %v24933_v21 = vpop.f32.mrb[47].mxu1 }
 0x5ba   : > { %v11233_v31 = vadd.f32 %v18487_v46, %v11137_v13  ;;  %v11231_v0 = vadd.f32 %v18483_v49, %v11135_v60  ;;  %v11136_v54 = vmax.f32 %v11104_v12, 0.0  ;;  %v11075_v4 = vmul.f32 %v24825_v41, %v10952_v28 }
 0x5bb   : > { %v18344_v30 = vpack.c.bf16 %v11230_v35, %v11230_v35  ;;  %v18342_v51 = vpack.c.bf16 %v11228_v58, %v11228_v58  ;;  %v11234_v6 = vadd.f32 %v18488_v18, %v11138_v20  ;;  %v11109_v44 = vadd.f32 %v24844_v10, %v11077_v38  ;;  %v11695_v58 = vld [vmem:[#allocation2 + $0x38] sm:$0x1]  ;;  %v11688_v20 = vld [vmem:[#allocation2 + $0x2c] sm:$0x1] }
 0x5bc   : > { %v18347_v57 = vpack.c.bf16 %v11233_v31, %v11233_v31  ;;  %v18345_v27 = vpack.c.bf16 %v11231_v0, %v11231_v0  ;;  %v11232_v43 = vadd.f32 %v18484_v24, %v11136_v54  ;;  %v11107_v46 = vadd.f32 %v24844_v10, %v11075_v4 }
 0x5bd   : > { %v11411_v5 = vshrl.u32 %v18344_v30, 16  ;;  %v11414_v7 = vshll.u32 %v18344_v30, 16  ;;  %v11394_v49 = vshrl.u32 %v18342_v51, 16  ;;  %v11397_v42 = vshll.u32 %v18342_v51, 16 }
 0x5be   : > { %v11437_v23 = vshrl.u32 %v18347_v57, 16  ;;  %v11440_v8 = vshll.u32 %v18347_v57, 16  ;;  %v11420_v28 = vshrl.u32 %v18345_v27, 16  ;;  %v11423_v50 = vshll.u32 %v18345_v27, 16  ;;  %v19805_v13 = vpop.f32.mrb[48].mxu1 }
 0x5bf   : > { %v11413_v25 = vrot.slane %v11411_v5, 7  ;;  %v11396_v18 = vrot.slane %v11394_v49, 7  ;;  %v18348_v60 = vpack.c.bf16 %v11234_v6, %v11234_v6  ;;  %v18346_v12 = vpack.c.bf16 %v11232_v43, %v11232_v43  ;;  %v10968_v35 = vpop.f32.mrb[49].mxu1  ;;  %v11705_v57 = vld [vmem:[#allocation2 + $0x48] sm:$0xf] }
 0x5c0   : > { %v11439_v62 = vrot.slane %v11437_v23, 7  ;;  %v24946_v24 = vrot.slane %v11420_v28, 7  ;;  %v11141_v38 = vmax.f32 %v11109_v44, 0.0  ;;  %v11139_v31 = vmax.f32 %v11107_v46, 0.0  ;;  %v24948_v0 = vpop.f32.mrb[50].mxu1 }
 0x5c1   : > { %v11416_v54 = vor.u32 %v11414_v7, %v11413_v25  ;;  %v11418_v4 = vrot.slane %v11413_v25, 4  ;;  %v11399_v30 = vor.u32 %v11397_v42, %v11396_v18  ;;  %v11401_v51 = vrot.slane %v11396_v18, 4  ;;  %v24950_v27 = vpop.f32.mrb[51].mxu1  ;;  %v11698_v23 = vld [vmem:[#allocation2 + $0x3c] sm:$0xf] }
 0x5c2   : > { %v11442_v5 = vor.u32 %v11440_v8, %v11439_v62  ;;  %v11443_v6 = vrot.slane %v11439_v62, 4  ;;  %v11425_v43 = vor.u32 %v11423_v50, %v24946_v24  ;;  %v11426_v49 = vrot.slane %v24946_v24, 4 }
 0x5c3   : > { %v11417_v44 = vsel %vm21476_vm11, %v11409_v26, %v11416_v54  ;;  %v11696_v46 = vsel %vm21453_vm6, %v11418_v4, %v11695_v58  ;;  %v11400_v7 = vsel %vm21476_vm11, %v11392_v39, %v11399_v30  ;;  %v11689_v42 = vsel %vm21453_vm6, %v11401_v51, %v11688_v20 }
 0x5c4   : > { %11697 = vst [vmem:[#allocation2 + $0x38] sm:$0x1] %v11696_v46  ;;  %11694 = vst.msk [vmem:[#allocation2 + $0x34] sm:$0xf] %vm201_vm0, %v11417_v44  ;;  %v11706_v34 = vsel %vm21469_vm9, %v11442_v5, %v11705_v57  ;;  %v11699_v26 = vsel %vm21469_vm9, %v11425_v43, %v11698_v23  ;;  %v11445_v16 = vshrl.u32 %v18348_v60, 16  ;;  %v11448_v8 = vshll.u32 %v18348_v60, 16 }
 0x5c5   : > { %11690 = vst [vmem:[#allocation2 + $0x2c] sm:$0x1] %v11689_v42  ;;  %11687 = vst.msk [vmem:[#allocation2 + $0x28] sm:$0xf] %vm201_vm0, %v11400_v7  ;;  %v11428_v39 = vshrl.u32 %v18346_v12, 16  ;;  %v11431_v28 = vshll.u32 %v18346_v12, 16  ;;  %v11237_v50 = vadd.f32 %v18495_v37, %v11141_v38  ;;  %v11235_v25 = vadd.f32 %v18491_v52, %v11139_v31 }
 0x5c6   : > { %11707 = vst [vmem:[#allocation2 + $0x48] sm:$0xf] %v11706_v34  ;;  %11700 = vst [vmem:[#allocation2 + $0x3c] sm:$0xf] %v11699_v26  ;;  %v11447_v18 = vrot.slane %v11445_v16, 7  ;;  %v11078_v58 = vmul.f32 %v24825_v41, %v24926_v15  ;;  %v11076_v20 = vmul.f32 %v24825_v41, %v24933_v21  ;;  %v11081_v62 = vmul.f32 %v24825_v41, %v19805_v13  ;;  %v24981_v60 = vpop.f32.mrb[52].mxu1 }
 0x5c7   : > { %v11430_v24 = vrot.slane %v11428_v39, 7  ;;  %v18351_v54 = vpack.c.bf16 %v11237_v50, %v11237_v50  ;;  %v18349_v12 = vpack.c.bf16 %v11235_v25, %v11235_v25  ;;  %v11079_v4 = vmul.f32 %v24825_v41, %v10968_v35  ;;  %v24984_v37 = vpop.f32.mrb[53].mxu1  ;;  %v11709_v21 = vld [vmem:[#allocation2 + $0x50] sm:$0x1]  ;;  %v11702_v46 = vld [vmem:[#allocation2 + $0x44] sm:$0x1] }
 0x5c8   : > { %v11450_v38 = vor.u32 %v11448_v8, %v11447_v18  ;;  %v11452_v52 = vrot.slane %v11447_v18, 4  ;;  %v11110_v31 = vadd.f32 %v24844_v10, %v11078_v58  ;;  %v11108_v15 = vadd.f32 %v24844_v10, %v11076_v20  ;;  %v24988_v30 = vpop.f32.mrb[54].mxu1  ;;  %v11719_v18 = vld [vmem:[#allocation2 + $0x60] sm:$0xf]  ;;  %v11712_v58 = vld [vmem:[#allocation2 + $0x54] sm:$0xf] }
 0x5c9   : > { %v11433_v51 = vor.u32 %v11431_v28, %v11430_v24  ;;  %v11435_v13 = vrot.slane %v11430_v24, 4  ;;  %v11471_v57 = vshrl.u32 %v18351_v54, 16  ;;  %v11474_v5 = vshll.u32 %v18351_v54, 16  ;;  %v24990_v43 = vpop.f32.mrb[55].mxu1 }
 0x5ca   : > { %v11451_v35 = vsel %vm21476_vm11, %v11443_v6, %v11450_v38  ;;  %v11710_v44 = vsel %vm21453_vm6, %v11452_v52, %v11709_v21  ;;  %v11454_v7 = vshrl.u32 %v18349_v12, 16  ;;  %v11457_v42 = vshll.u32 %v18349_v12, 16 }
 0x5cb   : > { %11711 = vst [vmem:[#allocation2 + $0x50] sm:$0x1] %v11710_v44  ;;  %11708 = vst.msk [vmem:[#allocation2 + $0x4c] sm:$0xf] %vm201_vm0, %v11451_v35  ;;  %v11434_v23 = vsel %vm21476_vm11, %v11426_v49, %v11433_v51  ;;  %v11703_v34 = vsel %vm21453_vm6, %v11435_v13, %v11702_v46  ;;  %v11473_v26 = vrot.slane %v11471_v57, 7  ;;  %v11142_v16 = vmax.f32 %v11110_v31, 0.0 }
 0x5cc   : > { %11704 = vst [vmem:[#allocation2 + $0x44] sm:$0x1] %v11703_v34  ;;  %11701 = vst.msk [vmem:[#allocation2 + $0x40] sm:$0xf] %vm201_vm0, %v11434_v23  ;;  %v25002_v6 = vrot.slane %v11454_v7, 7  ;;  %v11140_v8 = vmax.f32 %v11108_v15, 0.0  ;;  %v11113_v39 = vadd.f32 %v24844_v10, %v11081_v62  ;;  %v11111_v28 = vadd.f32 %v24844_v10, %v11079_v4 }
 0x5cd   : > { %v11476_v50 = vor.u32 %v11474_v5, %v11473_v26  ;;  %v11477_v25 = vrot.slane %v11473_v26, 4  ;;  %v11238_v49 = vadd.f32 %v18496_v19, %v11142_v16  ;;  %v11082_v20 = vmul.f32 %v24825_v41, %v24948_v0  ;;  %v11723_v26 = vld [vmem:[#allocation2 + $0x68] sm:$0x1] }
 0x5ce   : > { %v11459_v24 = vor.u32 %v11457_v42, %v25002_v6  ;;  %v11460_v54 = vrot.slane %v25002_v6, 4  ;;  %v11236_v12 = vadd.f32 %v18492_v56, %v11140_v8  ;;  %v11145_v62 = vmax.f32 %v11113_v39, 0.0  ;;  %v25014_v38 = vpop.f32.mrb[56].mxu1 }
 0x5cf   : > { %v11720_v4 = vsel %vm21469_vm9, %v11476_v50, %v11719_v18  ;;  %v18352_v52 = vpack.c.bf16 %v11238_v49, %v11238_v49  ;;  %v11143_v31 = vmax.f32 %v11111_v28, 0.0  ;;  %v11114_v40 = vadd.f32 %v24844_v10, %v11082_v20  ;;  %v25019_v19 = vpop.f32.mrb[57].mxu1  ;;  %v11716_v50 = vld [vmem:[#allocation2 + $0x5c] sm:$0x1] }
 0x5d0   : > { %11721 = vst [vmem:[#allocation2 + $0x60] sm:$0xf] %v11720_v4  ;;  %v11713_v0 = vsel %vm21469_vm9, %v11459_v24, %v11712_v58  ;;  %v18350_v15 = vpack.c.bf16 %v11236_v12, %v11236_v12  ;;  %v11241_v63 = vadd.f32 %v18503_v1, %v11145_v62  ;;  %v11080_v56 = vmul.f32 %v24825_v41, %v24950_v27  ;;  %v25027_v21 = vpop.f32.mrb[58].mxu1 }
 0x5d1   : > { %11714 = vst [vmem:[#allocation2 + $0x54] sm:$0xf] %v11713_v0  ;;  %v11479_v51 = vshrl.u32 %v18352_v52, 16  ;;  %v11482_v13 = vshll.u32 %v18352_v52, 16  ;;  %v11239_v57 = vadd.f32 %v18499_v59, %v11143_v31  ;;  %v11146_v5 = vmax.f32 %v11114_v40, 0.0  ;;  %v25031_v35 = vpop.f32.mrb[59].mxu1 }
 0x5d2   : > { %v11462_v44 = vshrl.u32 %v18350_v15, 16  ;;  %v11465_v46 = vshll.u32 %v18350_v15, 16  ;;  %v18355_v7 = vpack.c.bf16 %v11241_v63, %v11241_v63  ;;  %v11112_v42 = vadd.f32 %v24844_v10, %v11080_v56  ;;  %v11784_v31 = vld [vmem:[#allocation2 + $0xc] sm:$0xf] }
 0x5d3   : > { %v11481_v1 = vrot.slane %v11479_v51, 7  ;;  %v18353_v23 = vpack.c.bf16 %v11239_v57, %v11239_v57  ;;  %v11242_v27 = vadd.f32 %v18504_v32, %v11146_v5  ;;  %v11085_v34 = vmul.f32 %v24825_v41, %v24981_v60  ;;  %v11733_v60 = vld [vmem:[#allocation2 + $0x78] sm:$0xf]  ;;  %v11726_v56 = vld [vmem:[#allocation2 + $0x6c] sm:$0xf] }
 0x5d4   : > { %v11464_v16 = vrot.slane %v11462_v44, 7  ;;  %v11505_v6 = vshrl.u32 %v18355_v7, 16  ;;  %v11508_v59 = vshll.u32 %v18355_v7, 16  ;;  %v11144_v8 = vmax.f32 %v11112_v42, 0.0  ;;  %v11785_v51 = vld [vmem:[#allocation2 + $0x10] sm:$0xf] }
 0x5d5   : > { %v11484_v39 = vor.u32 %v11482_v13, %v11481_v1  ;;  %v11486_v28 = vrot.slane %v11481_v1, 4  ;;  %v11488_v18 = vshrl.u32 %v18353_v23, 16  ;;  %v11491_v58 = vshll.u32 %v18353_v23, 16  ;;  %v11823_v44 = vld [vmem:[#allocation2 + $0x14] sm:$0x1] }
 0x5d6   : > { %v11467_v49 = vor.u32 %v11465_v46, %v11464_v16  ;;  %v11469_v20 = vrot.slane %v11464_v16, 4  ;;  %v11507_v24 = vrot.slane %v11505_v6, 7  ;;  %v18356_v12 = vpack.c.bf16 %v11242_v27, %v11242_v27  ;;  %v25038_v62 = vpop.f32.mrb[60].mxu1 }
 0x5d7   : > { %v11485_v11 = vsel %vm21476_vm11, %v11477_v25, %v11484_v39  ;;  %v11724_v32 = vsel %vm21453_vm6, %v11486_v28, %v11723_v26  ;;  %v25044_v4 = vrot.slane %v11488_v18, 7  ;;  %v11240_v52 = vadd.f32 %v18500_v48, %v11144_v8  ;;  %v25048_v40 = vpop.f32.mrb[61].mxu1  ;;  %v11737_v18 = vld [vmem:[#allocation2 + $0x80] sm:$0x1] }
 0x5d8   : > { %11725 = vst [vmem:[#allocation2 + $0x68] sm:$0x1] %v11724_v32  ;;  %11722 = vst.msk [vmem:[#allocation2 + $0x64] sm:$0xf] %vm201_vm0, %v11485_v11  ;;  %v11468_v0 = vsel %vm21476_vm11, %v11460_v54, %v11467_v49  ;;  %v11717_v25 = vsel %vm21453_vm6, %v11469_v20, %v11716_v50  ;;  %v11510_v15 = vor.u32 %v11508_v59, %v11507_v24  ;;  %v11511_v63 = vrot.slane %v11507_v24, 4  ;;  %v25055_v13 = vpop.f32.mrb[62].mxu1 }
 0x5d9   : > { %11718 = vst [vmem:[#allocation2 + $0x5c] sm:$0x1] %v11717_v25  ;;  %11715 = vst.msk [vmem:[#allocation2 + $0x58] sm:$0xf] %vm201_vm0, %v11468_v0  ;;  %v11493_v2 = vor.u32 %v11491_v58, %v25044_v4  ;;  %v11494_v48 = vrot.slane %v25044_v4, 4  ;;  %v11513_v57 = vshrl.u32 %v18356_v12, 16  ;;  %v18354_v7 = vpack.c.bf16 %v11240_v52, %v11240_v52 }
 0x5da   : > { %v11516_v5 = vshll.u32 %v18356_v12, 16  ;;  %v25060_v54 = vpop.f32.mrb[63].mxu1  ;;  %v11734_v46 = vsel %vm21469_vm9, %v11510_v15, %v11733_v60  ;;  %v11117_v42 = vadd.f32 %v24844_v10, %v11085_v34  ;;  %v11863_v1 = vshrl.u32 %v11784_v31, 16  ;;  %v11786_v11 = vld [vmem:[#allocation2 + $0x18] sm:$0xf] }
 0x5db   : > { %11735 = vst [vmem:[#allocation2 + $0x78] sm:$0xf] %v11734_v46  ;;  %v11727_v23 = vsel %vm21469_vm9, %v11493_v2, %v11726_v56  ;;  %v11515_v27 = vrot.slane %v11513_v57, 7  ;;  %v11866_v26 = vshll.u32 %v11784_v31, 16  ;;  %v11872_v16 = vshll.u32 %v11785_v51, 16 }
 0x5dc   : > { %11728 = vst [vmem:[#allocation2 + $0x6c] sm:$0xf] %v11727_v23  ;;  %v11496_v6 = vshrl.u32 %v18354_v7, 16  ;;  %v11499_v59 = vshll.u32 %v18354_v7, 16  ;;  %v11149_v8 = vmax.f32 %v11117_v42, 0.0  ;;  %v11865_v39 = vrot.slane %v11863_v1, 4 }
 0x5dd   : > { %v11518_v28 = vor.u32 %v11516_v5, %v11515_v27  ;;  %v11520_v50 = vrot.slane %v11515_v27, 4  ;;  %v11868_v58 = vrot.slane %v11866_v26, 5  ;;  %v11874_v49 = vrot.slane %v11872_v16, 5  ;;  %v11730_v25 = vld [vmem:[#allocation2 + $0x74] sm:$0x1] }
 0x5de   : > { %v11498_v20 = vrot.slane %v11496_v6, 7  ;;  %v11245_v34 = vadd.f32 %v18511_v14, %v11149_v8  ;;  %v11876_v24 = vshrl.u32 %v11785_v51, 16  ;;  %v11882_v12 = vshll.u32 %v11823_v44, 16  ;;  %v11787_v56 = vld [vmem:[#allocation2 + $0x1c] sm:$0xf] }
 0x5df   : > { %v11519_v32 = vsel %vm21476_vm11, %v11511_v63, %v11518_v28  ;;  %v11738_v60 = vsel %vm21453_vm6, %v11520_v50, %v11737_v18  ;;  %v11869_v4 = vor.u32 %v11868_v58, %v11865_v39  ;;  %v11083_v52 = vmul.f32 %v24825_v41, %v24984_v37  ;;  %v11824_v7 = vld [vmem:[#allocation2 + $0x20] sm:$0x1] }
 0x5e0   : > { %11739 = vst [vmem:[#allocation2 + $0x80] sm:$0x1] %v11738_v60  ;;  %11736 = vst.msk [vmem:[#allocation2 + $0x7c] sm:$0xf] %vm201_vm0, %v11519_v32  ;;  %v11501_v31 = vor.u32 %v11499_v59, %v11498_v20  ;;  %v11503_v0 = vrot.slane %v11498_v20, 4  ;;  %v18359_v14 = vpack.c.bf16 %v11245_v34, %v11245_v34  ;;  %v11878_v15 = vrot.slane %v11876_v24, 4 }
 0x5e1   : > { %v11870_v51 = vrot.slane %v11869_v4, 4  ;;  %v11884_v2 = vrot.slane %v11882_v12, 5  ;;  %v11115_v63 = vadd.f32 %v24844_v10, %v11083_v52  ;;  %v11887_v57 = vshrl.u32 %v11786_v11, 16  ;;  %v11747_v34 = vld [vmem:[#allocation2 + $0x90] sm:$0xf] }
 0x5e2   : > { %v11502_v5 = vsel %vm21476_vm11, %v11494_v48, %v11501_v31  ;;  %v11731_v37 = vsel %vm21453_vm6, %v11503_v0, %v11730_v25  ;;  %v11539_v44 = vshrl.u32 %v18359_v14, 16  ;;  %v11542_v46 = vshll.u32 %v18359_v14, 16  ;;  %v25094_v60 = vld [vmem:[#allocation2 + $0x24] sm:$0xf]  ;;  %v21115_v0 = vld [vmem:[%s26996_s1 + $0x8] sm:$0xff]  }
 0x5e3   : > { %11732 = vst [vmem:[#allocation2 + $0x74] sm:$0x1] %v11731_v37  ;;  %11729 = vst.msk [vmem:[#allocation2 + $0x70] sm:$0xf] %vm201_vm0, %v11502_v5  ;;  %v11875_v42 = vsel %vm21459_vm7, %v11870_v51, %v11874_v49  ;;  %v11879_v1 = vor.u32 %v11878_v15, %v11874_v49  ;;  %v11147_v23 = vmax.f32 %v11115_v63, 0.0  ;;  %v11889_v27 = vrot.slane %v11887_v57, 4 }
 0x5e4   : > { %v25084_v26 = vrot.slane %v11539_v44, 7  ;;  %v11890_v16 = vshll.u32 %v11786_v11, 16  ;;  %v11896_v6 = vshll.u32 %v11787_v56, 16  ;;  %v11900_v48 = vshrl.u32 %v11787_v56, 16  ;;  %v15343_v3 = vld [vmem:[#allocation2 + $0x60] sm:$0xf] }
 0x5e5   : > { %v11880_v59 = vrot.slane %v11879_v1, 4  ;;  %v27177_v8 = vunpack.c.l.bf16 %v24835_v22  ;;  %v11906_v28 = vshll.u32 %v11824_v7, 16  ;;  %v11086_v50 = vmul.f32 %v24825_v41, %v24988_v30 }
 0x5e6   : > { %v11544_v18 = vor.u32 %v11542_v46, %v25084_v26  ;;  %v11545_v58 = vrot.slane %v25084_v26, 4  ;;  %v11892_v49 = vrot.slane %v11890_v16, 5  ;;  %v11898_v20 = vrot.slane %v11896_v6, 5  ;;  %v25112_v46 = vld [vmem:[#allocation2 + $0x28] sm:$0xf] }
 0x5e7   : > { %v11243_v39 = vadd.f32 %v27177_v8, %v11147_v23  ;;  %v11885_v24 = vsel %vm21459_vm7, %v11880_v59, %v11884_v2  ;;  %v11902_v11 = vrot.slane %v11900_v48, 4  ;;  %v11908_v32 = vrot.slane %v11906_v28, 5  ;;  %v11740_v59 = vld [vmem:[#allocation2 + $0x84] sm:$0xf]  ;;  %v11825_v28 = vld [vmem:[#allocation2 + $0x2c] sm:$0x1] }
 0x5e8   : > { %v11748_v4 = vsel %vm21469_vm9, %v11544_v18, %v11747_v34  ;;  %v17842_v52 = vcombine.low %v11875_v42, %v11885_v24  ;;  %v11893_v30 = vor.u32 %v11892_v49, %v11889_v27  ;;  %v11118_v31 = vadd.f32 %v24844_v10, %v11086_v50 }
 0x5e9   : > { %v18357_v12 = vpack.c.bf16 %v11243_v39, %v11243_v39  ;;  %11749 = vst [vmem:[#allocation2 + $0x90] sm:$0xf] %v11748_v4  ;;  %v11903_v15 = vor.u32 %v11902_v11, %v11898_v20  ;;  %v11084_v56 = vmul.f32 %v24825_v41, %v24990_v43  ;;  %v11089_v63 = vmul.f32 %v24825_v41, %v25014_v38 }
 0x5ea   : > { %19828 = vmatmul.mubr.msk.bf16.vlgmr.msra.gmra.mrb[32].mxu0 %vm1254_vm10, %v17842_v52  ;;  %v11894_v51 = vrot.slane %v11893_v30, 4  ;;  %v11150_v2 = vmax.f32 %v11118_v31, 0.0  ;;  %v11911_v57 = vshrl.u32 %v25094_v60, 16  ;;  %v11914_v43 = vshll.u32 %v25094_v60, 16 }
 0x5eb   : > { %v11522_v25 = vshrl.u32 %v18357_v12, 16  ;;  %v11525_v14 = vshll.u32 %v18357_v12, 16  ;;  %19860 = vmatpush3.bf16.msra.mxu0 %v24772_v61  ;;  %v11904_v37 = vrot.slane %v11903_v15, 4  ;;  %v11116_v44 = vadd.f32 %v24844_v10, %v11084_v56  ;;  %v21116_v61 = vld [vmem:[%s26996_s1 + $0x10] sm:$0xff]  }
 0x5ec   : > { %v11899_v7 = vsel %vm21459_vm7, %v11894_v51, %v11898_v20  ;;  %v27178_v42 = vunpack.c.h.bf16 %v24832_v47  ;;  %v11121_v38 = vadd.f32 %v24844_v10, %v11089_v63  ;;  %v11913_v23 = vrot.slane %v11911_v57, 4  ;;  %19861 = vmatprep.subr.bf16.mxu0 %v21115_v0 }
 0x5ed   : > { %v25109_v5 = vrot.slane %v11522_v25, 7  ;;  %v11909_v6 = vsel %vm21459_vm7, %v11904_v37, %v11908_v32  ;;  %v11148_v48 = vmax.f32 %v11116_v44, 0.0  ;;  %v11916_v50 = vrot.slane %v11914_v43, 5  ;;  %v25141_v44 = vld [vmem:[#allocation2 + $0x30] sm:$0xf] }
 0x5ee   : > { %v11246_v1 = vadd.f32 %v27178_v42, %v11150_v2  ;;  %v17843_v8 = vcombine.low %v11899_v7, %v11909_v6  ;;  %v11153_v39 = vmax.f32 %v11121_v38, 0.0  ;;  %v27179_v49 = vunpack.c.h.bf16 %v24835_v22  ;;  %v21117_v22 = vld [vmem:[%s26996_s1 + $0x18] sm:$0xff]   ;;  %v25146_v38 = vld [vmem:[%s26996_s1 + $0x40] sm:$0xff]  }
 0x5ef   : > { %v11527_v27 = vor.u32 %v11525_v14, %v25109_v5  ;;  %v11528_v16 = vrot.slane %v25109_v5, 4  ;;  %v11920_v34 = vshll.u32 %v25112_v46, 16  ;;  %v11924_v24 = vshrl.u32 %v25112_v46, 16  ;;  %19862 = vmatpush3.bf16.msra.mxu0 %v21115_v0 }
 0x5f0   : > { %v18360_v47 = vpack.c.bf16 %v11246_v1, %v11246_v1  ;;  %v11244_v20 = vadd.f32 %v27179_v49, %v11148_v48  ;;  %19831 = vmatprep.mubr.msk.bf16.mxu0 %vm1254_vm10, %v17843_v8  ;;  %v27180_v32 = vunpack.c.l.bf16 %v24851_v53  ;;  %v11917_v52 = vor.u32 %v11916_v50, %v11913_v23  ;;  %19863 = vmatprep.subr.bf16.mxu0 %v21116_v61  ;;  %v11751_v23 = vld [vmem:[#allocation2 + $0x98] sm:$0x1]  ;;  %v25159_v8 = vld [vmem:[#allocation2 + $0x34] sm:$0xf] }
 0x5f1   : > { %v11741_v18 = vsel %vm21469_vm9, %v11527_v27, %v11740_v59  ;;  %v11922_v31 = vrot.slane %v11920_v34, 5  ;;  %v11926_v25 = vrot.slane %v11924_v24, 4  ;;  %v11930_v14 = vshll.u32 %v11825_v28, 16  ;;  %v11826_v50 = vld [vmem:[#allocation2 + $0x38] sm:$0x1] }
 0x5f2   : > { %11742 = vst [vmem:[#allocation2 + $0x84] sm:$0xf] %v11741_v18  ;;  %v11547_v12 = vshrl.u32 %v18360_v47, 16  ;;  %v11550_v11 = vshll.u32 %v18360_v47, 16  ;;  %v11249_v4 = vadd.f32 %v27180_v32, %v11153_v39  ;;  %v18358_v30 = vpack.c.bf16 %v11244_v20, %v11244_v20 }
 0x5f3   : > { %v11918_v56 = vrot.slane %v11917_v52, 4  ;;  %v11087_v51 = vmul.f32 %v24825_v41, %v25019_v19  ;;  %v11927_v57 = vor.u32 %v11926_v25, %v11922_v31  ;;  %v11932_v37 = vrot.slane %v11930_v14, 5  ;;  %19864 = vmatpush3.bf16.msra.mxu0 %v21116_v61  ;;  %v25186_v14 = vld [vmem:[%s26997_s2] ss:$0 sm:$0xff] }
 0x5f4   : > { %v11549_v15 = vrot.slane %v11547_v12, 7  ;;  %v18363_v0 = vpack.c.bf16 %v11249_v4, %v11249_v4  ;;  %v11530_v2 = vshrl.u32 %v18358_v30, 16  ;;  %v11533_v63 = vshll.u32 %v18358_v30, 16  ;;  %19865 = vmatprep.subr.bf16.mxu0 %v21117_v22 }
 0x5f5   : > { %v11923_v41 = vsel %vm21459_vm7, %v11918_v56, %v11922_v31  ;;  %v11928_v19 = vrot.slane %v11927_v57, 4  ;;  %v11119_v6 = vadd.f32 %v24844_v10, %v11087_v51  ;;  %v11935_v47 = vshrl.u32 %v25141_v44, 16  ;;  %v25192_v56 = vld [vmem:[#allocation2 + $0x3c] sm:$0xf] }
 0x5f6   : > { %v11552_v43 = vor.u32 %v11550_v11, %v11549_v15  ;;  %v11554_v7 = vrot.slane %v11549_v15, 4  ;;  %v11573_v42 = vshrl.u32 %v18363_v0, 16  ;;  %v11576_v1 = vshll.u32 %v18363_v0, 16  ;;  %v11761_v11 = vld [vmem:[#allocation2 + $0xa8] sm:$0xf] }
 0x5f7   : > { %v11532_v27 = vrot.slane %v11530_v2, 7  ;;  %v11933_v10 = vsel %vm21459_vm7, %v11928_v19, %v11932_v37  ;;  %v11151_v26 = vmax.f32 %v11119_v6, 0.0  ;;  %19866 = vmatpush3.bf16.msra.mxu0 %v21117_v22  ;;  %v11937_v34 = vrot.slane %v11935_v47, 4 }
 0x5f8   : > { %v11553_v61 = vsel %vm21476_vm11, %v11545_v58, %v11552_v43  ;;  %v11752_v48 = vsel %vm21453_vm6, %v11554_v7, %v11751_v23  ;;  %v25157_v59 = vrot.slane %v11573_v42, 7  ;;  %v11744_v58 = vld [vmem:[#allocation2 + $0x8c] sm:$0x1]  ;;  %v17844_v20 = vcombine.low %v11923_v41, %v11933_v10  ;;  %19899 = vmatprep.subr.bf16.mxu0 %v25146_v38  ;;  %v25199_v42 = vld [vmem:[%s26998_s3] ss:$0 sm:$0xff] }
 0x5f9   : > { %11753 = vst [vmem:[#allocation2 + $0x98] sm:$0x1] %v11752_v48  ;;  %11750 = vst.msk [vmem:[#allocation2 + $0x94] sm:$0xf] %vm201_vm0, %v11553_v61  ;;  %v11535_v39 = vor.u32 %v11533_v63, %v11532_v27  ;;  %v11537_v28 = vrot.slane %v11532_v27, 4  ;;  %v27181_v32 = vunpack.c.l.bf16 %v24854_v17  ;;  %v11938_v52 = vshll.u32 %v25141_v44, 16 }
 0x5fa   : > { %v11578_v18 = vor.u32 %v11576_v1, %v25157_v59  ;;  %v11579_v49 = vrot.slane %v25157_v59, 4  ;;  %19832 = vmatmul.mubr.msk.bf16.gmra.mrb[36].mxu0 %vm1254_vm10, %v17844_v20  ;;  %v11944_v5 = vshll.u32 %v25159_v8, 16  ;;  %v11954_v30 = vshll.u32 %v11826_v50, 16  ;;  %v25204_v27 = vld [vmem:[#allocation2 + $0x40] sm:$0xf] }
 0x5fb   : > { %v11536_v24 = vsel %vm21476_vm11, %v11528_v16, %v11535_v39  ;;  %v11745_v12 = vsel %vm21453_vm6, %v11537_v28, %v11744_v58  ;;  %v11247_v4 = vadd.f32 %v27181_v32, %v11151_v26  ;;  %v11948_v16 = vshrl.u32 %v25159_v8, 16  ;;  %v11754_v50 = vld [vmem:[#allocation2 + $0x9c] sm:$0xf] }
 0x5fc   : > { %11746 = vst [vmem:[#allocation2 + $0x8c] sm:$0x1] %v11745_v12  ;;  %11743 = vst.msk [vmem:[#allocation2 + $0x88] sm:$0xf] %vm201_vm0, %v11536_v24  ;;  %v11762_v22 = vsel %vm21469_vm9, %v11578_v18, %v11761_v11  ;;  %v11940_v25 = vrot.slane %v11938_v52, 5  ;;  %v11090_v15 = vmul.f32 %v25186_v14, %v25027_v21  ;;  %v11088_v0 = vmul.f32 %v25186_v14, %v25031_v35 }
 0x5fd   : > { %11763 = vst [vmem:[#allocation2 + $0xa8] sm:$0xf] %v11762_v22  ;;  %v18361_v31 = vpack.c.bf16 %v11247_v4, %v11247_v4  ;;  %v11946_v51 = vrot.slane %v11944_v5, 5  ;;  %v11950_v2 = vrot.slane %v11948_v16, 4  ;;  %v11956_v63 = vrot.slane %v11954_v30, 5 }
 0x5fe   : > { %v11093_v57 = vmul.f32 %v25186_v14, %v25038_v62  ;;  %v11941_v7 = vor.u32 %v11940_v25, %v11937_v34  ;;  %v11122_v21 = vadd.f32 %v25199_v42, %v11090_v15  ;;  %v11120_v35 = vadd.f32 %v25199_v42, %v11088_v0  ;;  %v25222_v4 = vld [vmem:[#allocation2 + $0x44] sm:$0x1] }
 0x5ff   : > { %v11556_v37 = vshrl.u32 %v18361_v31, 16  ;;  %v11559_v43 = vshll.u32 %v18361_v31, 16  ;;  %v11951_v1 = vor.u32 %v11950_v2, %v11946_v51  ;;  %v11959_v41 = vshrl.u32 %v25192_v56, 16 }
 0x600   : > { %v11125_v23 = vadd.f32 %v25199_v42, %v11093_v57  ;;  %v11942_v19 = vrot.slane %v11941_v7, 4  ;;  %v11154_v6 = vmax.f32 %v11122_v21, 0.0  ;;  %v11962_v61 = vshll.u32 %v25192_v56, 16 }
 0x601   : > { %v25207_v62 = vrot.slane %v11556_v37, 7  ;;  %v11952_v48 = vrot.slane %v11951_v1, 4  ;;  %v11152_v47 = vmax.f32 %v11120_v35, 0.0  ;;  %v11961_v28 = vrot.slane %v11959_v41, 4 }
 0x602   : > { %v11157_v39 = vmax.f32 %v11125_v23, 0.0  ;;  %v11947_v58 = vsel %vm21459_vm7, %v11942_v19, %v11946_v51  ;;  %v27182_v18 = vunpack.c.h.bf16 %v24851_v53  ;;  %v27183_v24 = vunpack.c.h.bf16 %v24854_v17 }
 0x603   : > { %v11561_v10 = vor.u32 %v11559_v43, %v25207_v62  ;;  %v11562_v26 = vrot.slane %v25207_v62, 4  ;;  %v11957_v34 = vsel %vm21459_vm7, %v11952_v48, %v11956_v63  ;;  %v27184_v11 = vunpack.c.l.bf16 %v24864_v36  ;;  %v25230_v63 = vld [vmem:[#allocation2 + $0x48] sm:$0xf] }
 0x604   : > { %v11250_v20 = vadd.f32 %v27182_v18, %v11154_v6  ;;  %v11248_v12 = vadd.f32 %v27183_v24, %v11152_v47  ;;  %v11964_v52 = vrot.slane %v11962_v61, 5  ;;  %v17845_v5 = vcombine.low %v11947_v58, %v11957_v34  ;;  %v11765_v47 = vld [vmem:[#allocation2 + $0xb0] sm:$0x1]  ;;  %v11775_v34 = vld [vmem:[#allocation2 + $0xc0] sm:$0xf] }
 0x605   : > { %v11253_v32 = vadd.f32 %v27184_v11, %v11157_v39  ;;  %v11755_v22 = vsel %vm21469_vm9, %v11561_v10, %v11754_v50  ;;  %v11968_v53 = vshll.u32 %v25204_v27, 16  ;;  %v11972_v17 = vshrl.u32 %v25204_v27, 16  ;;  %v11758_v39 = vld [vmem:[#allocation2 + $0xa4] sm:$0x1]  ;;  %v25241_v24 = vld [vmem:[#allocation2 + $0x4c] sm:$0xf] }
 0x606   : > { %v18364_v16 = vpack.c.bf16 %v11250_v20, %v11250_v20  ;;  %11756 = vst [vmem:[#allocation2 + $0x9c] sm:$0xf] %v11755_v22  ;;  %v18362_v30 = vpack.c.bf16 %v11248_v12, %v11248_v12  ;;  %v11965_v25 = vor.u32 %v11964_v52, %v11961_v28  ;;  %19835 = vmatprep.mubr.msk.bf16.mxu0 %vm1254_vm10, %v17845_v5  ;;  %v11978_v2 = vshll.u32 %v25222_v4, 16  ;;  %v25250_v52 = vld [vmem:[#allocation2 + $0x50] sm:$0x1] }
 0x607   : > { %v18367_v31 = vpack.c.bf16 %v11253_v32, %v11253_v32  ;;  %v11970_v51 = vrot.slane %v11968_v53, 5  ;;  %v11974_v35 = vrot.slane %v11972_v17, 4  ;;  %v11091_v19 = vmul.f32 %v25186_v14, %v25048_v40 }
 0x608   : > { %v11581_v15 = vshrl.u32 %v18364_v16, 16  ;;  %v11584_v0 = vshll.u32 %v18364_v16, 16  ;;  %v11564_v57 = vshrl.u32 %v18362_v30, 16  ;;  %v11567_v37 = vshll.u32 %v18362_v30, 16 }
 0x609   : > { %v11607_v43 = vshrl.u32 %v18367_v31, 16  ;;  %v11610_v7 = vshll.u32 %v18367_v31, 16  ;;  %v11966_v1 = vrot.slane %v11965_v25, 4  ;;  %v11980_v23 = vrot.slane %v11978_v2, 5 }
 0x60a   : > { %v11583_v21 = vrot.slane %v11581_v15, 7  ;;  %v11566_v41 = vrot.slane %v11564_v57, 7  ;;  %v11983_v6 = vshrl.u32 %v25230_v63, 16  ;;  %v11975_v10 = vor.u32 %v11974_v35, %v11970_v51 }
 0x60b   : > { %v25232_v62 = vrot.slane %v11607_v43, 7  ;;  %v11971_v28 = vsel %vm21459_vm7, %v11966_v1, %v11970_v51  ;;  %v11123_v32 = vadd.f32 %v25199_v42, %v11091_v19  ;;  %v11986_v30 = vshll.u32 %v25230_v63, 16 }
 0x60c   : > { %v11586_v61 = vor.u32 %v11584_v0, %v11583_v21  ;;  %v11588_v48 = vrot.slane %v11583_v21, 4  ;;  %v11569_v50 = vor.u32 %v11567_v37, %v11566_v41  ;;  %v11571_v58 = vrot.slane %v11566_v41, 4 }
 0x60d   : > { %v11612_v18 = vor.u32 %v11610_v7, %v25232_v62  ;;  %v11613_v20 = vrot.slane %v25232_v62, 4  ;;  %v11976_v11 = vrot.slane %v11975_v10, 4  ;;  %v11985_v5 = vrot.slane %v11983_v6, 4  ;;  %v25274_v7 = vld [vmem:[#allocation2 + $0x58] sm:$0xf] }
 0x60e   : > { %v11587_v40 = vsel %vm21476_vm11, %v11579_v49, %v11586_v61  ;;  %v11766_v12 = vsel %vm21453_vm6, %v11588_v48, %v11765_v47  ;;  %v11570_v22 = vsel %vm21476_vm11, %v11562_v26, %v11569_v50  ;;  %v11759_v59 = vsel %vm21453_vm6, %v11571_v58, %v11758_v39  ;;  %v25264_v26 = vld [vmem:[#allocation2 + $0x54] sm:$0xf]  ;;  %v25282_v50 = vld [vmem:[#allocation2 + $0x5c] sm:$0x1] }
 0x60f   : > { %11767 = vst [vmem:[#allocation2 + $0xb0] sm:$0x1] %v11766_v12  ;;  %11764 = vst.msk [vmem:[#allocation2 + $0xac] sm:$0xf] %vm201_vm0, %v11587_v40  ;;  %v11776_v49 = vsel %vm21469_vm9, %v11612_v18, %v11775_v34  ;;  %v11981_v16 = vsel %vm21459_vm7, %v11976_v11, %v11980_v23  ;;  %v11155_v53 = vmax.f32 %v11123_v32, 0.0  ;;  %v11992_v31 = vshll.u32 %v25241_v24, 16 }
 0x610   : > { %11760 = vst [vmem:[#allocation2 + $0xa4] sm:$0x1] %v11759_v59  ;;  %11757 = vst.msk [vmem:[#allocation2 + $0xa0] sm:$0xf] %vm201_vm0, %v11570_v22  ;;  %v17846_v25 = vcombine.low %v11971_v28, %v11981_v16  ;;  %v11996_v17 = vshrl.u32 %v25241_v24, 16  ;;  %v12002_v15 = vshll.u32 %v25250_v52, 16  ;;  %v11094_v0 = vmul.f32 %v25186_v14, %v25055_v13 }
 0x611   : > { %11777 = vst [vmem:[#allocation2 + $0xc0] sm:$0xf] %v11776_v49  ;;  %v27185_v51 = vunpack.c.l.bf16 %v24867_v9  ;;  %v11988_v57 = vrot.slane %v11986_v30, 5  ;;  %v11994_v37 = vrot.slane %v11992_v31, 5  ;;  %v11092_v43 = vmul.f32 %v25186_v14, %v25060_v54  ;;  %v11768_v49 = vld [vmem:[#allocation2 + $0xb4] sm:$0xf] }
 0x612   : > { %19836 = vmatmul.mubr.msk.bf16.gmra.mrb[40].mxu0 %vm1254_vm10, %v17846_v25  ;;  %v11998_v21 = vrot.slane %v11996_v17, 4  ;;  %v12004_v1 = vrot.slane %v12002_v15, 5  ;;  %v11126_v35 = vadd.f32 %v25199_v42, %v11094_v0  ;;  %v12007_v23 = vshrl.u32 %v25264_v26, 16  ;;  %v25294_v30 = vld [vmem:[#allocation2 + $0x60] sm:$0xf] }
 0x613   : > { %v11251_v2 = vadd.f32 %v27185_v51, %v11155_v53  ;;  %v11989_v13 = vor.u32 %v11988_v57, %v11985_v5  ;;  %v11124_v19 = vadd.f32 %v25199_v42, %v11092_v43  ;;  %v12010_v6 = vshll.u32 %v25264_v26, 16  ;;  %v25296_v31 = vld [vmem:[#allocation2 + $0x64] sm:$0xf] }
 0x614   : > { %v11999_v61 = vor.u32 %v11998_v21, %v11994_v37  ;;  %v11158_v48 = vmax.f32 %v11126_v35, 0.0  ;;  %v12009_v47 = vrot.slane %v12007_v23, 4  ;;  %v12016_v54 = vshll.u32 %v25274_v7, 16 }
 0x615   : > { %v18365_v41 = vpack.c.bf16 %v11251_v2, %v11251_v2  ;;  %v11990_v28 = vrot.slane %v11989_v13, 4  ;;  %v11156_v10 = vmax.f32 %v11124_v19, 0.0  ;;  %v27186_v18 = vunpack.c.h.bf16 %v24864_v36  ;;  %v11779_v19 = vld [vmem:[#allocation2 + $0xc8] sm:$0x1] }
 0x616   : > { %v12000_v58 = vrot.slane %v11999_v61, 4  ;;  %v12012_v40 = vrot.slane %v12010_v6, 5  ;;  %v12018_v12 = vrot.slane %v12016_v54, 5  ;;  %v27187_v32 = vunpack.c.h.bf16 %v24867_v9 }
 0x617   : > { %v11590_v14 = vshrl.u32 %v18365_v41, 16  ;;  %v11593_v39 = vshll.u32 %v18365_v41, 16  ;;  %v11254_v34 = vadd.f32 %v27186_v18, %v11158_v48  ;;  %v11995_v11 = vsel %vm21459_vm7, %v11990_v28, %v11994_v37  ;;  %v25307_v28 = vld [vmem:[#allocation2 + $0x68] sm:$0x1] }
 0x618   : > { %v11252_v22 = vadd.f32 %v27187_v32, %v11156_v10  ;;  %v12020_v59 = vshrl.u32 %v25274_v7, 16  ;;  %v12005_v5 = vsel %vm21459_vm7, %v12000_v58, %v12004_v1  ;;  %v12013_v53 = vor.u32 %v12012_v40, %v12009_v47 }
 0x619   : > { %v11592_v42 = vrot.slane %v11590_v14, 7  ;;  %v18368_v16 = vpack.c.bf16 %v11254_v34, %v11254_v34  ;;  %v12026_v36 = vshll.u32 %v25282_v50, 16  ;;  %v17847_v15 = vcombine.low %v11995_v11, %v12005_v5  ;;  %v11772_v14 = vld [vmem:[#allocation2 + $0xbc] sm:$0x1] }
 0x61a   : > { %v18366_v0 = vpack.c.bf16 %v11252_v22, %v11252_v22  ;;  %v12014_v2 = vrot.slane %v12013_v53, 4  ;;  %v12022_v57 = vrot.slane %v12020_v59, 4  ;;  %v12031_v13 = vshrl.u32 %v25294_v30, 16  ;;  %v25319_v59 = vld [vmem:[#allocation2 + $0x70] sm:$0xf] }
 0x61b   : > { %v11595_v25 = vor.u32 %v11593_v39, %v11592_v42  ;;  %v11596_v17 = vrot.slane %v11592_v42, 4  ;;  %v11615_v9 = vshrl.u32 %v18368_v16, 16  ;;  %v11618_v51 = vshll.u32 %v18368_v16, 16  ;;  %19839 = vmatprep.mubr.msk.bf16.mxu0 %vm1254_vm10, %v17847_v15  ;;  %v25328_v53 = vld [vmem:[#allocation2 + $0x78] sm:$0xf] }
 0x61c   : > { %v11598_v43 = vshrl.u32 %v18366_v0, 16  ;;  %v11601_v21 = vshll.u32 %v18366_v0, 16  ;;  %v12028_v1 = vrot.slane %v12026_v36, 5  ;;  %v12019_v23 = vsel %vm21459_vm7, %v12014_v2, %v12018_v12  ;;  %v25340_v2 = vld [vmem:[#allocation2 + $0x80] sm:$0x1] }
 0x61d   : > { %v11769_v37 = vsel %vm21469_vm9, %v11595_v25, %v11768_v49  ;;  %v11617_v35 = vrot.slane %v11615_v9, 7  ;;  %v12023_v41 = vor.u32 %v12022_v57, %v12018_v12  ;;  %v12034_v61 = vshll.u32 %v25294_v30, 16  ;;  %v25309_v12 = vld [vmem:[#allocation2 + $0x6c] sm:$0xf]  ;;  %v25321_v49 = vld [vmem:[#allocation2 + $0x74] sm:$0x1] }
 0x61e   : > { %11770 = vst [vmem:[#allocation2 + $0xb4] sm:$0xf] %v11769_v37  ;;  %v11600_v6 = vrot.slane %v11598_v43, 7  ;;  %v12040_v55 = vshll.u32 %v25296_v31, 16  ;;  %v12044_v48 = vshrl.u32 %v25296_v31, 16  ;;  %v12033_v10 = vrot.slane %v12031_v13, 4 }
 0x61f   : > { %v11620_v47 = vor.u32 %v11618_v51, %v11617_v35  ;;  %v11622_v54 = vrot.slane %v11617_v35, 4  ;;  %v12024_v39 = vrot.slane %v12023_v41, 4  ;;  %v12036_v34 = vrot.slane %v12034_v61, 5  ;;  %v25334_v9 = vld [vmem:[#allocation2 + $0x7c] sm:$0xf] }
 0x620   : > { %v11603_v58 = vor.u32 %v11601_v21, %v11600_v6  ;;  %v11605_v18 = vrot.slane %v11600_v6, 4  ;;  %v12042_v40 = vrot.slane %v12040_v55, 5  ;;  %v12046_v22 = vrot.slane %v12044_v48, 4  ;;  %v25348_v55 = vld [vmem:[#allocation2 + $0x84] sm:$0xf] }
 0x621   : > { %v11621_v42 = vsel %vm21476_vm11, %v11613_v20, %v11620_v47  ;;  %v11780_v11 = vsel %vm21453_vm6, %v11622_v54, %v11779_v19  ;;  %v12029_v32 = vsel %vm21459_vm7, %v12024_v39, %v12028_v1  ;;  %v12037_v16 = vor.u32 %v12036_v34, %v12033_v10  ;;  %v25353_v34 = vld [vmem:[#allocation2 + $0x88] sm:$0xf] }
 0x622   : > { %11781 = vst [vmem:[#allocation2 + $0xc8] sm:$0x1] %v11780_v11  ;;  %11778 = vst.msk [vmem:[#allocation2 + $0xc4] sm:$0xf] %vm201_vm0, %v11621_v42  ;;  %v11604_v62 = vsel %vm21476_vm11, %v11596_v17, %v11603_v58  ;;  %v11773_v20 = vsel %vm21453_vm6, %v11605_v18, %v11772_v14  ;;  %v17848_v5 = vcombine.low %v12019_v23, %v12029_v32  ;;  %v12050_v25 = vshll.u32 %v25307_v28, 16 }
 0x623   : > { %11774 = vst [vmem:[#allocation2 + $0xbc] sm:$0x1] %v11773_v20  ;;  %11771 = vst.msk [vmem:[#allocation2 + $0xb8] sm:$0xf] %vm201_vm0, %v11604_v62  ;;  %v12047_v36 = vor.u32 %v12046_v22, %v12042_v40  ;;  %v12055_v15 = vshrl.u32 %v25309_v12, 16  ;;  %v12058_v0 = vshll.u32 %v25309_v12, 16 }
 0x624   : > { %19840 = vmatmul.mubr.msk.bf16.gmra.mrb[44].mxu0 %vm1254_vm10, %v17848_v5  ;;  %v12038_v45 = vrot.slane %v12037_v16, 4  ;;  %v12064_v29 = vshll.u32 %v25319_v59, 16  ;;  %v12068_v17 = vshrl.u32 %v25319_v59, 16  ;;  %v12074_v51 = vshll.u32 %v25321_v49, 16  ;;  %v25357_v22 = vld [vmem:[#allocation2 + $0x90] sm:$0xf] }
 0x625   : > { %v12048_v57 = vrot.slane %v12047_v36, 4  ;;  %v12052_v37 = vrot.slane %v12050_v25, 5  ;;  %v12057_v43 = vrot.slane %v12055_v15, 4  ;;  %v12060_v21 = vrot.slane %v12058_v0, 5  ;;  %v25361_v16 = vld [vmem:[#allocation2 + $0x8c] sm:$0x1] }
 0x626   : > { %v12043_v1 = vsel %vm21459_vm7, %v12038_v45, %v12042_v40  ;;  %v12066_v35 = vrot.slane %v12064_v29, 5  ;;  %v12070_v23 = vrot.slane %v12068_v17, 4  ;;  %v12076_v41 = vrot.slane %v12074_v51, 5  ;;  %v25364_v25 = vld [vmem:[#allocation2 + $0x94] sm:$0xf] }
 0x627   : > { %v12053_v13 = vsel %vm21459_vm7, %v12048_v57, %v12052_v37  ;;  %v12061_v19 = vor.u32 %v12060_v21, %v12057_v43  ;;  %v12079_v6 = vshrl.u32 %v25328_v53, 16  ;;  %v12082_v61 = vshll.u32 %v25328_v53, 16 }
 0x628   : > { %v17849_v48 = vcombine.low %v12043_v1, %v12053_v13  ;;  %v12071_v47 = vor.u32 %v12070_v23, %v12066_v35  ;;  %v12088_v54 = vshll.u32 %v25334_v9, 16  ;;  %v12092_v14 = vshrl.u32 %v25334_v9, 16 }
 0x629   : > { %v12062_v39 = vrot.slane %v12061_v19, 4  ;;  %v12081_v10 = vrot.slane %v12079_v6, 4  ;;  %v12084_v58 = vrot.slane %v12082_v61, 5  ;;  %v12098_v18 = vshll.u32 %v25340_v2, 16  ;;  %v25375_v19 = vld [vmem:[#allocation2 + $0x98] sm:$0x1] }
 0x62a   : > { %19843 = vmatprep.mubr.msk.bf16.mxu0 %vm1254_vm10, %v17849_v48  ;;  %v12072_v40 = vrot.slane %v12071_v47, 4  ;;  %v12090_v42 = vrot.slane %v12088_v54, 5  ;;  %v12094_v11 = vrot.slane %v12092_v14, 4  ;;  %v12103_v32 = vshrl.u32 %v25348_v55, 16  ;;  %v25378_v61 = vld [vmem:[#allocation2 + $0x9c] sm:$0xf] }
 0x62b   : > { %v12067_v62 = vsel %vm21459_vm7, %v12062_v39, %v12066_v35  ;;  %v12085_v20 = vor.u32 %v12084_v58, %v12081_v10  ;;  %v12100_v5 = vrot.slane %v12098_v18, 5  ;;  %v12106_v36 = vshll.u32 %v25348_v55, 16 }
 0x62c   : > { %v12077_v15 = vsel %vm21459_vm7, %v12072_v40, %v12076_v41  ;;  %v12095_v0 = vor.u32 %v12094_v11, %v12090_v42  ;;  %v12105_v45 = vrot.slane %v12103_v32, 4  ;;  %v12112_v29 = vshll.u32 %v25353_v34, 16  ;;  %v25383_v40 = vld [vmem:[#allocation2 + $0xa0] sm:$0xf] }
 0x62d   : > { %v17850_v17 = vcombine.low %v12067_v62, %v12077_v15  ;;  %v12086_v51 = vrot.slane %v12085_v20, 4  ;;  %v12108_v57 = vrot.slane %v12106_v36, 5  ;;  %v12116_v37 = vshrl.u32 %v25353_v34, 16  ;;  %v25391_v15 = vld [vmem:[#allocation2 + $0xa4] sm:$0x1] }
 0x62e   : > { %v12096_v43 = vrot.slane %v12095_v0, 4  ;;  %v12114_v21 = vrot.slane %v12112_v29, 5  ;;  %v12122_v1 = vshll.u32 %v25361_v16, 16  ;;  %v12127_v35 = vshrl.u32 %v25357_v22, 16 }
 0x62f   : > { %19844 = vmatmul.mubr.msk.bf16.gmra.mrb[48].mxu0 %vm1254_vm10, %v17850_v17  ;;  %v12091_v23 = vsel %vm21459_vm7, %v12086_v51, %v12090_v42  ;;  %v12109_v41 = vor.u32 %v12108_v57, %v12105_v45  ;;  %v12118_v13 = vrot.slane %v12116_v37, 4  ;;  %v12130_v6 = vshll.u32 %v25357_v22, 16  ;;  %v25395_v57 = vld [vmem:[#allocation2 + $0xa8] sm:$0xf] }
 0x630   : > { %v12101_v48 = vsel %vm21459_vm7, %v12096_v43, %v12100_v5  ;;  %v12124_v47 = vrot.slane %v12122_v1, 5  ;;  %v12129_v54 = vrot.slane %v12127_v35, 4  ;;  %v12136_v14 = vshll.u32 %v25364_v25, 16  ;;  %v25400_v35 = vld [vmem:[#allocation2 + $0xac] sm:$0xf] }
 0x631   : > { %v17851_v39 = vcombine.low %v12091_v23, %v12101_v48  ;;  %v12110_v10 = vrot.slane %v12109_v41, 4  ;;  %v12119_v58 = vor.u32 %v12118_v13, %v12114_v21  ;;  %v12132_v18 = vrot.slane %v12130_v6, 5 }
 0x632   : > { %v12138_v42 = vrot.slane %v12136_v14, 5  ;;  %v12140_v11 = vshrl.u32 %v25364_v25, 16  ;;  %v12146_v32 = vshll.u32 %v25375_v19, 16  ;;  %v12151_v62 = vshrl.u32 %v25378_v61, 16 }
 0x633   : > { %19847 = vmatprep.mubr.msk.bf16.mxu0 %vm1254_vm10, %v17851_v39  ;;  %v12115_v20 = vsel %vm21459_vm7, %v12110_v10, %v12114_v21  ;;  %v12120_v5 = vrot.slane %v12119_v58, 4  ;;  %v12133_v36 = vor.u32 %v12132_v18, %v12129_v54  ;;  %v12154_v0 = vshll.u32 %v25378_v61, 16  ;;  %v25405_v39 = vld [vmem:[#allocation2 + $0xb0] sm:$0x1] }
 0x634   : > { %v12142_v45 = vrot.slane %v12140_v11, 4  ;;  %v12148_v29 = vrot.slane %v12146_v32, 5  ;;  %v12153_v17 = vrot.slane %v12151_v62, 4  ;;  %v12160_v51 = vshll.u32 %v25383_v40, 16 }
 0x635   : > { %v12125_v37 = vsel %vm21459_vm7, %v12120_v5, %v12124_v47  ;;  %v12134_v43 = vrot.slane %v12133_v36, 4  ;;  %v12156_v1 = vrot.slane %v12154_v0, 5  ;;  %v12164_v21 = vshrl.u32 %v25383_v40, 16 }
 0x636   : > { %v17852_v23 = vcombine.low %v12115_v20, %v12125_v37  ;;  %v12143_v41 = vor.u32 %v12142_v45, %v12138_v42  ;;  %v12162_v13 = vrot.slane %v12160_v51, 5  ;;  %v12170_v6 = vshll.u32 %v25391_v15, 16  ;;  %v25417_v51 = vld [vmem:[#allocation2 + $0xb8] sm:$0xf] }
 0x637   : > { %v12139_v48 = vsel %vm21459_vm7, %v12134_v43, %v12138_v42  ;;  %v12157_v54 = vor.u32 %v12156_v1, %v12153_v17  ;;  %v12166_v14 = vrot.slane %v12164_v21, 4  ;;  %v12175_v47 = vshrl.u32 %v25395_v57, 16  ;;  %v25412_v42 = vld [vmem:[#allocation2 + $0xb4] sm:$0xf] }
 0x638   : > { %19848 = vmatmul.mubr.msk.bf16.gmra.mrb[52].mxu0 %vm1254_vm10, %v17852_v23  ;;  %v12144_v10 = vrot.slane %v12143_v41, 4  ;;  %v12172_v58 = vrot.slane %v12170_v6, 5  ;;  %v12178_v18 = vshll.u32 %v25395_v57, 16  ;;  %v12184_v11 = vshll.u32 %v25400_v35, 16  ;;  %v25421_v6 = vld [vmem:[#allocation2 + $0xbc] sm:$0x1] }
 0x639   : > { %v12158_v32 = vrot.slane %v12157_v54, 4  ;;  %v12167_v62 = vor.u32 %v12166_v14, %v12162_v13  ;;  %v12177_v20 = vrot.slane %v12175_v47, 4  ;;  %v12188_v5 = vshrl.u32 %v25400_v35, 16 }
 0x63a   : > { %v12149_v36 = vsel %vm21459_vm7, %v12144_v10, %v12148_v29  ;;  %v12180_v0 = vrot.slane %v12178_v18, 5  ;;  %v12186_v45 = vrot.slane %v12184_v11, 5  ;;  %v12194_v17 = vshll.u32 %v25405_v39, 16 }
 0x63b   : > { %v17853_v37 = vcombine.low %v12139_v48, %v12149_v36  ;;  %v12163_v43 = vsel %vm21459_vm7, %v12158_v32, %v12162_v13  ;;  %v12168_v1 = vrot.slane %v12167_v62, 4  ;;  %v12190_v21 = vrot.slane %v12188_v5, 4 }
 0x63c   : > { %v12181_v23 = vor.u32 %v12180_v0, %v12177_v20  ;;  %v12196_v41 = vrot.slane %v12194_v17, 5  ;;  %v12199_v54 = vshrl.u32 %v25412_v42, 16  ;;  %v12202_v29 = vshll.u32 %v25412_v42, 16 }
 0x63d   : > { %19851 = vmatprep.mubr.msk.bf16.mxu0 %vm1254_vm10, %v17853_v37  ;;  %v12173_v14 = vsel %vm21459_vm7, %v12168_v1, %v12172_v58  ;;  %v12191_v47 = vor.u32 %v12190_v21, %v12186_v45  ;;  %v12208_v48 = vshll.u32 %v25417_v51, 16  ;;  %v12212_v13 = vshrl.u32 %v25417_v51, 16  ;;  %v21277_v21 = vld [vmem:[#allocation2] sm:$0xf] }
 0x63e   : > { %v17854_v10 = vcombine.low %v12163_v43, %v12173_v14  ;;  %v12182_v18 = vrot.slane %v12181_v23, 4  ;;  %v12201_v11 = vrot.slane %v12199_v54, 4  ;;  %v12204_v32 = vrot.slane %v12202_v29, 5  ;;  %v25436_v23 = vld [vmem:[#allocation2 + $0x4] sm:$0xf] }
 0x63f   : > { %v12192_v62 = vrot.slane %v12191_v47, 4  ;;  %v12210_v20 = vrot.slane %v12208_v48, 5  ;;  %v12214_v5 = vrot.slane %v12212_v13, 4  ;;  %v12218_v36 = vshll.u32 %v25421_v6, 16 }
 0x640   : > { %19852 = vmatmul.mubr.msk.bf16.gmra.mrb[56].mxu0 %vm1254_vm10, %v17854_v10  ;;  %v12205_v0 = vor.u32 %v12204_v32, %v12201_v11  ;;  %v12187_v58 = vsel %vm21459_vm7, %v12182_v18, %v12186_v45  ;;  %v17877_v54 = vcombine.low %v21277_v21, %v25436_v23  ;;  %v17883_v47 = vcombine.low %v25230_v63, %v25241_v24  ;;  %v25472_v21 = vld [vmem:[#allocation2 + $0x1c] sm:$0xf]  ;;  %v12835_v11 = vld [vmem:[#allocation2 + $0x84] sm:$0xe]  ;;  %v12836_v10 = vld [vmem:[#allocation2 + $0x90] sm:$0xe] }
 0x641   : > { %v12197_v17 = vsel %vm21459_vm7, %v12192_v62, %v12196_v41  ;;  %v12215_v37 = vor.u32 %v12214_v5, %v12210_v20  ;;  %v12220_v14 = vrot.slane %v12218_v36, 5  ;;  %v17884_v48 = vcombine.low %v25264_v26, %v25274_v7 }
 0x642   : > { %v17855_v1 = vcombine.low %v12187_v58, %v12197_v17  ;;  %v12206_v43 = vrot.slane %v12205_v0, 4  ;;  %v17885_v41 = vcombine.low %v25294_v30, %v25296_v31  ;;  %v17886_v13 = vcombine.low %v25309_v12, %v25319_v59  ;;  %v21279_v0 = vld [vmem:[#allocation2 + $0xc] sm:$0xf]  ;;  %v25466_v58 = vld [vmem:[#allocation2 + $0x10] sm:$0xf] }
 0x643   : > { %v12216_v29 = vrot.slane %v12215_v37, 4  ;;  %v17878_v17 = vcombine.low %v21279_v0, %v25466_v58  ;;  %v21119_v37 = vld [vmem:[%s26996_s1 + $0x48] sm:$0xff]   ;;  %v12919_v0 = vrot.slane %v25250_v52, 5  ;;  %v17880_v36 = vcombine.low %v25094_v60, %v25112_v46 }
 0x644   : > { %19855 = vmatprep.mubr.msk.bf16.mxu0 %vm1254_vm10, %v17855_v1  ;;  %v12211_v45 = vsel %vm21459_vm7, %v12206_v43, %v12210_v20  ;;  %v12830_v1 = vld [vmem:[#allocation2 + $0x48] sm:$0xe]  ;;  %v21281_v43 = vld [vmem:[#allocation2 + $0x18] sm:$0xf]  ;;  %v12930_v46 = vrot.slane %v25296_v31, 5  ;;  %v12926_v62 = vrot.slane %v25282_v50, 5  ;;  %v27189_v26 = vcombine.low %v25348_v55, %v25353_v34 }
 0x645   : > { %v12221_v18 = vsel %vm21459_vm7, %v12216_v29, %v12220_v14  ;;  %v17879_v29 = vcombine.low %v21281_v43, %v25472_v21  ;;  %v12916_v14 = vrot.slane %v25241_v24, 5  ;;  %v17881_v43 = vcombine.low %v25141_v44, %v25159_v8  ;;  %v12833_v44 = vld [vmem:[#allocation2 + $0x6c] sm:$0xe]  ;;  %v12824_v31 = vld [vmem:[#allocation2] sm:$0xe] }
 0x646   : > { %v17856_v20 = vcombine.low %v12211_v45, %v12221_v18  ;;  %v12831_v45 = vld [vmem:[#allocation2 + $0x54] sm:$0xe]  ;;  %v17919_v18 = vrot.slane %v12830_v1, 9  ;;  %v17922_v50 = vrot.slane %v12833_v44, 9  ;;  %v12982_v63 = vrot.slane %v25421_v6, 5 }
 0x647   : > { %v17920_v5 = vrot.slane %v12831_v45, 9  ;;  %v27188_v6 = vcombine.low %v25328_v53, %v25334_v9  ;;  %v12874_v30 = vrot.slane %v25436_v23, 5  ;;  %v17913_v12 = vrot.slane %v12824_v31, 9  ;;  %v12827_v31 = vld [vmem:[#allocation2 + $0x24] sm:$0xe] }
 0x648   : > { %19856 = vmatmul.mubr.msk.bf16.gmra.mrb[60].mxu0 %vm1254_vm10, %v17856_v20  ;;  %v12918_v20 = vrot.slane %v12916_v14, 4  ;;  %v25490_v1 = vsel %vm21739_vm14, %v17919_v18, %v12916_v14  ;;  %v12834_v14 = vld [vmem:[#allocation2 + $0x78] sm:$0xe]  ;;  %v27191_v53 = vcombine.low %v25378_v61, %v25383_v40  ;;  %v27193_v61 = vcombine.low %v25412_v42, %v25417_v51 }
 0x649   : > { %19867 = vmatprep.mubr.msk.bf16.mxu0 %vm1254_vm10, %v17877_v54  ;;  %v12832_v54 = vld [vmem:[#allocation2 + $0x60] sm:$0xe]  ;;  %v17923_v32 = vrot.slane %v12834_v14, 9  ;;  %v12951_v14 = vrot.slane %v25353_v34, 5  ;;  %v12875_v55 = vsel %vm21739_vm14, %v17913_v12, %v12874_v30 }
 0x64a   : > { %v25494_v52 = vsel %vm21739_vm14, %v12918_v20, %v12919_v0  ;;  %v17921_v60 = vrot.slane %v12832_v54, 9  ;;  %v12932_v54 = vrot.slane %v12930_v46, 4  ;;  %v12933_v20 = vrot.slane %v25307_v28, 5 }
 0x64b   : > { %v12937_v0 = vrot.slane %v25319_v59, 5  ;;  %v12876_v59 = vrot.slane %v12874_v30, 4 }
 0x64c   : > { %v25506_v18 = vsel %vm21739_vm14, %v17921_v60, %v12930_v46  ;;  %v12944_v60 = vrot.slane %v25334_v9, 5  ;;  %v25523_v28 = vsel %vm21739_vm14, %v12932_v54, %v12933_v20  ;;  %v12958_v20 = vrot.slane %v25364_v25, 5 }
 0x64d   : > { %v12939_v8 = vrot.slane %v12937_v0, 4  ;;  %v25534_v54 = vsel %vm21739_vm14, %v17922_v50, %v12937_v0  ;;  %v12953_v50 = vrot.slane %v12951_v14, 4  ;;  %v12961_v46 = vrot.slane %v25375_v19, 5 }
 0x64e   : > { %v12946_v44 = vrot.slane %v12944_v60, 4  ;;  %v27192_v9 = vcombine.low %v25395_v57, %v25400_v35 }
 0x650   : > { %19868 = vmatmul.mubr.msk.bf16.vlgmr.msra.gmra.mrb[32].mxu0 %vm1254_vm10, %v17878_v17  ;;  %v21122_v17 = vld [vmem:[%s26996_s1 + $0x50] sm:$0xff]  }
 0x651   : > { %19900 = vmatpush3.bf16.msra.mxu0 %v25146_v38  ;;  %19871 = vmatprep.mubr.msk.bf16.mxu0 %vm1254_vm10, %v17879_v29  ;;  %v12923_v38 = vrot.slane %v25274_v7, 5  ;;  %v27190_v7 = vcombine.low %v25357_v22, %v25364_v25  ;;  %v12881_v22 = vrot.slane %v25466_v58, 5  ;;  %v12888_v25 = vrot.slane %v25472_v21, 5  ;;  %v21286_v21 = vld [vmem:[#allocation2 + $0x28] sm:$0xf] }
 0x652   : > { %19901 = vmatprep.subr.bf16.mxu0 %v21119_v37 }
 0x653   : > { %v25501_v29 = vsel %vm21739_vm14, %v17920_v5, %v12923_v38  ;;  %v12925_v45 = vrot.slane %v12923_v38, 4  ;;  %v21127_v5 = vld [vmem:[%s26996_s1 + $0x58] sm:$0xff]   ;;  %v12890_v57 = vrot.slane %v12888_v25, 4 }
 0x655   : > { %19902 = vmatpush3.bf16.msra.mxu0 %v21119_v37  ;;  %v25515_v38 = vsel %vm21739_vm14, %v12925_v45, %v12926_v62  ;;  %v12940_v37 = vrot.slane %v25321_v49, 5  ;;  %v17882_v62 = vcombine.low %v25192_v56, %v25204_v27  ;;  %v12947_v45 = vrot.slane %v25340_v2, 5  ;;  %v25548_v2 = vld [vmem:[%s26996_s1 + $0x60] sm:$0xff]  }
 0x656   : > { %19903 = vmatprep.subr.bf16.mxu0 %v21122_v17  ;;  %v25542_v56 = vsel %vm21739_vm14, %v17923_v32, %v12944_v60  ;;  %v12837_v32 = vld [vmem:[#allocation2 + $0x9c] sm:$0xe]  ;;  %v17925_v60 = vrot.slane %v12836_v10, 9  ;;  %v12972_v10 = vrot.slane %v25400_v35, 5  ;;  %v21284_v35 = vld [vmem:[#allocation2 + $0x14] sm:$0x1] }
 0x658   : > { %19872 = vmatmul.mubr.msk.bf16.gmra.mrb[36].mxu0 %vm1254_vm10, %v17880_v36  ;;  %v25538_v36 = vsel %vm21739_vm14, %v12939_v8, %v12940_v37  ;;  %v17924_v8 = vrot.slane %v12835_v11, 9  ;;  %v12954_v37 = vrot.slane %v25361_v16, 5  ;;  %v12838_v11 = vld [vmem:[#allocation2 + $0xa8] sm:$0xe]  ;;  %v25572_v0 = vsel %vm21739_vm14, %v17925_v60, %v12958_v20  ;;  %v12839_v60 = vld [vmem:[#allocation2 + $0xb4] sm:$0xe] }
 0x659   : > { %19875 = vmatprep.mubr.msk.bf16.mxu0 %vm1254_vm10, %v17881_v43  ;;  %19904 = vmatpush3.bf16.msra.mxu0 %v21122_v17  ;;  %v25554_v17 = vsel %vm21739_vm14, %v12946_v44, %v12947_v45  ;;  %v12960_v43 = vrot.slane %v12958_v20, 4  ;;  %v12965_v44 = vrot.slane %v25383_v40, 5  ;;  %v17926_v16 = vrot.slane %v12837_v32, 9  ;;  %v12825_v40 = vld [vmem:[#allocation2 + $0xc] sm:$0xe] }
 0x65a   : > { %19905 = vmatprep.subr.bf16.mxu0 %v21127_v5  ;;  %v25562_v49 = vsel %vm21739_vm14, %v17924_v8, %v12951_v14  ;;  %v25568_v45 = vsel %vm21739_vm14, %v12953_v50, %v12954_v37  ;;  %v12968_v8 = vrot.slane %v25391_v15, 5  ;;  %v17927_v20 = vrot.slane %v12838_v11, 9  ;;  %v14455_v50 = vld [vmem:[#allocation2 + $0x9c] sm:$0xe] }
 0x65b   : > { %v25580_v14 = vsel %vm21739_vm14, %v12960_v43, %v12961_v46  ;;  %v12974_v37 = vrot.slane %v12972_v10, 4  ;;  %v12975_v32 = vrot.slane %v25405_v39, 5  ;;  %v25589_v19 = vsel %vm21739_vm14, %v17926_v16, %v12965_v44 }
 0x65c   : > { %v12979_v15 = vrot.slane %v25417_v51, 5  ;;  %v17928_v11 = vrot.slane %v12839_v60, 9  ;;  %v12895_v60 = vrot.slane %v21286_v21, 5  ;;  %v21287_v51 = vld [vmem:[#allocation2 + $0x34] sm:$0xf] }
 0x65d   : > { %19906 = vmatpush3.bf16.msra.mxu0 %v21127_v5  ;;  %v12967_v5 = vrot.slane %v12965_v44, 4  ;;  %v25608_v43 = vsel %vm21739_vm14, %v12974_v37, %v12975_v32  ;;  %v17914_v32 = vrot.slane %v12825_v40, 9  ;;  %v14454_v44 = vld [vmem:[#allocation2 + $0x90] sm:$0xe] }
 0x65e   : > { %19939 = vmatprep.subr.bf16.mxu0 %v25548_v2  ;;  %v12981_v16 = vrot.slane %v12979_v15, 4  ;;  %v25615_v24 = vsel %vm21739_vm14, %v17928_v11, %v12979_v15  ;;  %v12902_v11 = vrot.slane %v21287_v51, 5  ;;  %v12897_v30 = vrot.slane %v12895_v60, 4 }
 0x65f   : > { %v25593_v46 = vsel %vm21739_vm14, %v12967_v5, %v12968_v8  ;;  %v12884_v5 = vrot.slane %v21284_v35, 5  ;;  %v12826_v8 = vld [vmem:[#allocation2 + $0x18] sm:$0xe]  ;;  %v27195_v51 = vcombine.low %v25501_v29, %v25515_v38 }
 0x660   : > { %19876 = vmatmul.mubr.msk.bf16.gmra.mrb[40].mxu0 %vm1254_vm10, %v17882_v62  ;;  %v25604_v62 = vsel %vm21739_vm14, %v17927_v20, %v12972_v10  ;;  %v21285_v20 = vld [vmem:[#allocation2 + $0x20] sm:$0x1]  ;;  %v17915_v15 = vrot.slane %v12826_v8, 9  ;;  %v12904_v12 = vrot.slane %v12902_v11, 4  ;;  %v12912_v8 = vrot.slane %v25222_v4, 5 }
 0x661   : > { %19879 = vmatprep.mubr.msk.bf16.mxu0 %vm1254_vm10, %v17883_v47  ;;  %v25619_v47 = vsel %vm21739_vm14, %v12981_v16, %v12982_v63  ;;  %v12891_v37 = vrot.slane %v21285_v20, 5  ;;  %v12882_v16 = vsel %vm21739_vm14, %v17914_v32, %v12881_v22  ;;  %v25702_v20 = vld [vmem:[%s26996_s1 + $0x80] sm:$0xff]   ;;  %v27194_v4 = vcombine.low %v25490_v1, %v25494_v52  ;;  %v25729_v52 = vld [vmem:[#allocation2 + $0x38] sm:$0x1] }
 0x662   : > { %v27196_v1 = vcombine.low %v25506_v18, %v25523_v28  ;;  %v25741_v28 = vld [vmem:[#allocation2 + $0x58] sm:$0xf] }
 0x663   : > { %v12892_v42 = vsel %vm21739_vm14, %v12890_v57, %v12891_v37  ;;  %v21134_v57 = vld [vmem:[%s26996_s1 + $0x78] sm:$0xff]  }
 0x668   : > { %19880 = vmatmul.mubr.msk.bf16.gmra.mrb[44].mxu0 %vm1254_vm10, %v17884_v48  ;;  %v21283_v48 = vld [vmem:[#allocation2 + $0x8] sm:$0x1] }
 0x669   : > { %19883 = vmatprep.mubr.msk.bf16.mxu0 %vm1254_vm10, %v17885_v41  ;;  %v12877_v41 = vrot.slane %v21283_v48, 5 }
 0x66b   : > { %v12878_v34 = vsel %vm21739_vm14, %v12876_v59, %v12877_v41  ;;  %v21288_v59 = vld [vmem:[#allocation2 + $0x2c] sm:$0x1]  ;;  %v12828_v41 = vld [vmem:[#allocation2 + $0x30] sm:$0xe] }
 0x66c   : > { %v17937_v23 = vcombine.low %v12875_v55, %v12878_v34  ;;  %v12898_v48 = vrot.slane %v21288_v59, 5  ;;  %v21133_v55 = vld [vmem:[%s26996_s1 + $0x70] sm:$0xff]   ;;  %v17916_v34 = vrot.slane %v12827_v31, 9  ;;  %v25736_v31 = vld [vmem:[#allocation2 + $0x44] sm:$0x1] }
 0x670   : > { %19884 = vmatmul.mubr.msk.bf16.gmra.mrb[48].mxu0 %vm1254_vm10, %v17886_v13  ;;  %v12883_v13 = vrot.slane %v12881_v22, 4  ;;  %v12899_v22 = vsel %vm21739_vm14, %v12897_v30, %v12898_v48 }
 0x671   : > { %19887 = vmatprep.mubr.msk.bf16.mxu0 %vm1254_vm10, %v27188_v6  ;;  %v12889_v6 = vsel %vm21739_vm14, %v17915_v15, %v12888_v25  ;;  %v12909_v25 = vrot.slane %v25204_v27, 5  ;;  %v12829_v27 = vld [vmem:[#allocation2 + $0x3c] sm:$0xe]  ;;  %v25716_v15 = vld [vmem:[#allocation2 + $0x2c] sm:$0x1] }
 0x672   : > { %v12885_v58 = vsel %vm21739_vm14, %v12883_v13, %v12884_v5  ;;  %v12896_v13 = vsel %vm21739_vm14, %v17916_v34, %v12895_v60  ;;  %v17918_v37 = vrot.slane %v12829_v27, 9  ;;  %v25714_v60 = vld [vmem:[#allocation2 + $0x28] sm:$0xf]  ;;  %v14526_v30 = vrot.slane %v25716_v15, 5  ;;  %v25767_v27 = vld [vmem:[#allocation2 + $0x64] sm:$0xf] }
 0x673   : > { %v17938_v63 = vcombine.low %v12882_v16, %v12885_v58  ;;  %v12911_v5 = vrot.slane %v12909_v25, 4  ;;  %v14523_v16 = vrot.slane %v25714_v60, 5 }
 0x674   : > { %v12910_v58 = vsel %vm21739_vm14, %v17918_v37, %v12909_v25 }
 0x675   : > { %v12913_v32 = vsel %vm21739_vm14, %v12911_v5, %v12912_v8  ;;  %v14525_v38 = vrot.slane %v14523_v16, 4 }
 0x676   : > { %v17942_v21 = vcombine.low %v12910_v58, %v12913_v32  ;;  %v14551_v58 = vrot.slane %v25741_v28, 5 }
 0x678   : > { %19888 = vmatmul.mubr.msk.bf16.gmra.mrb[52].mxu0 %vm1254_vm10, %v27189_v26  ;;  %v21132_v26 = vld [vmem:[%s26996_s1 + $0x68] sm:$0xff]  }
 0x679   : > { %19891 = vmatprep.mubr.msk.bf16.mxu0 %vm1254_vm10, %v27190_v7  ;;  %v17939_v7 = vcombine.low %v12889_v6, %v12892_v42  ;;  %v14445_v42 = vld [vmem:[#allocation2 + $0x24] sm:$0xe]  ;;  %v25731_v6 = vld [vmem:[#allocation2 + $0x40] sm:$0xf] }
 0x67a   : > { %v18063_v29 = vrot.slane %v14445_v42, 9  ;;  %v25847_v42 = vld [vmem:[#allocation2 + $0xa0] sm:$0xf] }
 0x67c   : > { %v25745_v48 = vsel %vm21739_vm14, %v18063_v29, %v14523_v16 }
 0x67d   : > { %27197 = vst [vmem:[#allocation6_spill] sm:$0xff] %v25745_v48  ;;  %v21154_v48 = vld [vmem:[#allocation2 + $0xc0] sm:$0xff]  }
 0x680   : > { %19892 = vmatmul.mubr.msk.bf16.gmra.mrb[56].mxu0 %vm1254_vm10, %v27191_v53  ;;  %v21289_v53 = vld [vmem:[#allocation2 + $0x38] sm:$0x1] }
 0x681   : > { %19895 = vmatprep.mubr.msk.bf16.mxu0 %vm1254_vm10, %v27192_v9  ;;  %v12905_v9 = vrot.slane %v21289_v53, 5 }
 0x688   : > { %19896 = vmatmul.mubr.msk.bf16.gmra.mrb[60].mxu0 %vm1254_vm10, %v27193_v61  ;;  %v17940_v61 = vcombine.low %v12896_v13, %v12899_v22  ;;  %v14450_v13 = vld [vmem:[#allocation2 + $0x60] sm:$0xe] }
 0x689   : > { %19907 = vmatprep.mubr.msk.bf16.mxu0 %vm1254_vm10, %v17937_v23  ;;  %v17917_v23 = vrot.slane %v12828_v41, 9  ;;  %v25749_v41 = vsel %vm21739_vm14, %v14525_v38, %v14526_v30  ;;  %v14553_v38 = vrot.slane %v14551_v58, 4 }
 0x68a   : > { %27198 = vst [vmem:[#allocation9_spill] sm:$0xff] %v25749_v41 }
 0x68b   : > { %v12903_v40 = vsel %vm21739_vm14, %v17917_v23, %v12902_v11  ;;  %v25722_v11 = vld [vmem:[#allocation2 + $0x34] sm:$0xf]  ;;  %v14533_v23 = vrot.slane %v25729_v52, 5 }
 0x68c   : > { %v14530_v18 = vrot.slane %v25722_v11, 5 }
 0x68e   : > { %v14532_v25 = vrot.slane %v14530_v18, 4 }
 0x690   : > { %19908 = vmatmul.mubr.msk.bf16.vlgmr.msra.gmra.mrb[32].mxu0 %vm1254_vm10, %v17938_v63  ;;  %v14446_v63 = vld [vmem:[#allocation2 + $0x30] sm:$0xe]  ;;  %v25771_v8 = vsel %vm21739_vm14, %v14532_v25, %v14533_v23  ;;  %v25813_v25 = vld [vmem:[#allocation2 + $0x80] sm:$0x1]  ;;  %v25815_v23 = vld [vmem:[#allocation2 + $0x88] sm:$0xf] }
 0x691   : > { %19940 = vmatpush3.bf16.msra.mxu0 %v25548_v2  ;;  %19911 = vmatprep.mubr.msk.bf16.mxu0 %vm1254_vm10, %v17939_v7  ;;  %v12906_v2 = vsel %vm21739_vm14, %v12904_v12, %v12905_v9  ;;  %v25733_v7 = vld [vmem:[#allocation2 + $0x4c] sm:$0xf]  ;;  %v25738_v12 = vld [vmem:[#allocation2 + $0x50] sm:$0x1]  ;;  %v18064_v59 = vrot.slane %v14446_v63, 9  ;;  %v14537_v9 = vrot.slane %v25731_v6, 5 }
 0x692   : > { %19941 = vmatprep.subr.bf16.mxu0 %v21132_v26  ;;  %v17941_v35 = vcombine.low %v12903_v40, %v12906_v2  ;;  %v14449_v2 = vld [vmem:[#allocation2 + $0x54] sm:$0xe]  ;;  %v14544_v5 = vrot.slane %v25733_v7, 5  ;;  %27201 = vst [vmem:[#allocation7_spill] sm:$0xff] %v25771_v8  ;;  %v14547_v32 = vrot.slane %v25738_v12, 5  ;;  %v21148_v8 = vld [vmem:[#allocation2 + $0x84] sm:$0xff]  }
 0x693   : > { %v25756_v22 = vsel %vm21739_vm14, %v18064_v59, %v14530_v18  ;;  %v18067_v63 = vrot.slane %v14449_v2, 9  ;;  %v14452_v59 = vld [vmem:[#allocation2 + $0x78] sm:$0xe]  ;;  %v25800_v18 = vld [vmem:[#allocation2 + $0x74] sm:$0x1]  ;;  %v14575_v2 = vrot.slane %v25813_v25, 5 }
 0x694   : > { %27199 = vst [vmem:[#allocation10_spill] sm:$0xff] %v25756_v22  ;;  %v14546_v16 = vrot.slane %v14544_v5, 4 }
 0x695   : > { %19942 = vmatpush3.bf16.msra.mxu0 %v21132_v26  ;;  %v14447_v26 = vld [vmem:[#allocation2 + $0x3c] sm:$0xe] }
 0x696   : > { %19943 = vmatprep.subr.bf16.mxu0 %v21133_v55  ;;  %v18065_v53 = vrot.slane %v14447_v26, 9  ;;  %v27204_v26 = vcombine.low %v25542_v56, %v25554_v17  ;;  %v25806_v56 = vsel %vm21739_vm14, %v14546_v16, %v14547_v32  ;;  %v25810_v17 = vsel %vm21739_vm14, %v18067_v63, %v14551_v58  ;;  %v14453_v16 = vld [vmem:[#allocation2 + $0x84] sm:$0xe]  ;;  %v25833_v63 = vld [vmem:[#allocation2 + $0x8c] sm:$0x1] }
 0x697   : > { %27206 = vst [vmem:[#allocation5_spill] sm:$0xff] %v25806_v56  ;;  %27207 = vst [vmem:[#allocation3_spill] sm:$0xff] %v25810_v17  ;;  %v18071_v10 = vrot.slane %v14453_v16, 9  ;;  %v25868_v16 = vld [vmem:[#allocation2 + $0xa4] sm:$0x1]  ;;  %v13806_v17 = vshll.u32 %v25716_v15, 16 }
 0x698   : > { %19912 = vmatmul.mubr.msk.bf16.gmra.mrb[36].mxu0 %vm1254_vm10, %v17940_v61  ;;  %v25759_v61 = vld [vmem:[#allocation2 + $0x5c] sm:$0x1]  ;;  %v25763_v40 = vsel %vm21739_vm14, %v18065_v53, %v14537_v9 }
 0x699   : > { %19915 = vmatprep.mubr.msk.bf16.mxu0 %vm1254_vm10, %v17941_v35  ;;  %19944 = vmatpush3.bf16.msra.mxu0 %v21133_v55  ;;  %v14448_v55 = vld [vmem:[#allocation2 + $0x48] sm:$0xe]  ;;  %27200 = vst [vmem:[#allocation11_spill] sm:$0xff] %v25763_v40  ;;  %v14540_v35 = vrot.slane %v25736_v31, 5  ;;  %v14554_v30 = vrot.slane %v25759_v61, 5 }
 0x69a   : > { %19945 = vmatprep.subr.bf16.mxu0 %v21134_v57  ;;  %v18066_v37 = vrot.slane %v14448_v55, 9  ;;  %v25802_v53 = vld [vmem:[#allocation2 + $0x7c] sm:$0xf]  ;;  %v14558_v55 = vrot.slane %v25767_v27, 5 }
 0x69c   : > { %v25797_v29 = vsel %vm21739_vm14, %v18066_v37, %v14544_v5  ;;  %v25824_v37 = vld [vmem:[#allocation2 + $0x94] sm:$0xf]  ;;  %v14560_v58 = vrot.slane %v14558_v55, 4 }
 0x69d   : > { %19946 = vmatpush3.bf16.msra.mxu0 %v21134_v57  ;;  %v14539_v57 = vrot.slane %v14537_v9, 4  ;;  %27205 = vst [vmem:[#allocation4_spill] sm:$0xff] %v25797_v29  ;;  %v18068_v9 = vrot.slane %v14450_v13, 9  ;;  %v13725_v13 = vld [vmem:[#allocation2 + $0x98] sm:$0x1] }
 0x69e   : > { %19979 = vmatprep.subr.bf16.mxu0 %v25702_v20 }
 0x69f   : > { %v25830_v32 = vsel %vm21739_vm14, %v18068_v9, %v14558_v55  ;;  %v18070_v55 = vrot.slane %v14452_v59, 9  ;;  %v25859_v59 = vld [vmem:[#allocation2 + $0xac] sm:$0xf] }
 0x6a0   : > { %19916 = vmatmul.mubr.msk.bf16.gmra.mrb[40].mxu0 %vm1254_vm10, %v17942_v21  ;;  %v27202_v21 = vcombine.low %v25534_v54, %v25538_v36  ;;  %v25791_v54 = vld [vmem:[#allocation2 + $0x68] sm:$0x1]  ;;  %27209 = vst [vmem:[#allocation13_spill] sm:$0xff] %v25830_v32  ;;  %v14579_v36 = vrot.slane %v25815_v23, 5 }
 0x6a1   : > { %19919 = vmatprep.mubr.msk.bf16.mxu0 %vm1254_vm10, %v27194_v4  ;;  %v25779_v4 = vld [vmem:[#allocation2 + $0x70] sm:$0xf] }
 0x6a2   : > { %v14565_v5 = vrot.slane %v25779_v4, 5  ;;  %v14581_v39 = vrot.slane %v14579_v36, 4 }
 0x6a8   : > { %19920 = vmatmul.mubr.msk.bf16.gmra.mrb[44].mxu0 %vm1254_vm10, %v27195_v51  ;;  %v25785_v51 = vsel %vm21739_vm14, %v14539_v57, %v14540_v35  ;;  %v25821_v57 = vsel %vm21739_vm14, %v14553_v38, %v14554_v30  ;;  %v14568_v38 = vrot.slane %v25800_v18, 5  ;;  %v14572_v30 = vrot.slane %v25802_v53, 5 }
 0x6a9   : > { %19923 = vmatprep.mubr.msk.bf16.mxu0 %vm1254_vm10, %v27196_v1  ;;  %27203 = vst [vmem:[#allocation8_spill] sm:$0xff] %v25785_v51  ;;  %v14451_v1 = vld [vmem:[#allocation2 + $0x6c] sm:$0xe]  ;;  %27208 = vst [vmem:[#allocation12_spill] sm:$0xff] %v25821_v57 }
 0x6aa   : > { %v18069_v35 = vrot.slane %v14451_v1, 9  ;;  %v14574_v34 = vrot.slane %v14572_v30, 4 }
 0x6ac   : > { %v25837_v1 = vsel %vm21739_vm14, %v18069_v35, %v14565_v5  ;;  %v14582_v35 = vrot.slane %v25833_v63, 5 }
 0x6ad   : > { %27210 = vst [vmem:[#allocation14_spill] sm:$0xff] %v25837_v1  ;;  %v18073_v1 = vrot.slane %v14455_v50, 9 }
 0x6b0   : > { %19924 = vmatmul.mubr.msk.bf16.gmra.mrb[48].mxu0 %vm1254_vm10, %v27202_v21  ;;  %v14561_v21 = vrot.slane %v25791_v54, 5 }
 0x6b1   : > { %19927 = vmatprep.mubr.msk.bf16.mxu0 %vm1254_vm10, %v27204_v26  ;;  %v14567_v26 = vrot.slane %v14565_v5, 4 }
 0x6b2   : > { %v25843_v9 = vsel %vm21739_vm14, %v14560_v58, %v14561_v21  ;;  %v27213_v58 = vcombine.low %v25562_v49, %v25568_v45  ;;  %v25872_v49 = vsel %vm21739_vm14, %v18070_v55, %v14572_v30  ;;  %v25876_v45 = vsel %vm21739_vm14, %v14574_v34, %v14575_v2  ;;  %v14456_v34 = vld [vmem:[#allocation2 + $0xa8] sm:$0xe]  ;;  %v13734_v2 = vld [vmem:[#allocation2 + $0xbc] sm:$0x1] }
 0x6b3   : > { %27211 = vst [vmem:[#allocation15_spill] sm:$0xff] %v25843_v9  ;;  %v25853_v5 = vsel %vm21739_vm14, %v14567_v26, %v14568_v38  ;;  %v27214_v26 = vcombine.low %v25572_v0, %v25580_v14  ;;  %v13731_v38 = vld [vmem:[#allocation2 + $0xb0] sm:$0x1]  ;;  %27215 = vst [vmem:[#allocation17_spill] sm:$0xff] %v25872_v49  ;;  %v14586_v21 = vrot.slane %v25824_v37, 5  ;;  %v18072_v30 = vrot.slane %v14454_v44, 9 }
 0x6b4   : > { %27212 = vst [vmem:[#allocation16_spill] sm:$0xff] %v25853_v5  ;;  %27216 = vst [vmem:[#allocation18_spill] sm:$0xff] %v25876_v45  ;;  %v25883_v0 = vld [vmem:[#allocation2 + $0xb8] sm:$0xf]  ;;  %v14593_v55 = vrot.slane %v25847_v42, 5  ;;  %v14589_v5 = vrot.slane %v13725_v13, 5 }
 0x6b5   : > { %v25896_v9 = vsel %vm21739_vm14, %v18072_v30, %v14586_v21  ;;  %v14596_v45 = vrot.slane %v25868_v16, 5  ;;  %v14457_v44 = vld [vmem:[#allocation2 + $0xb4] sm:$0xe]  ;;  %v18074_v50 = vrot.slane %v14456_v34, 9  ;;  %v13737_v30 = vld [vmem:[#allocation2 + $0xc8] sm:$0x1]  ;;  %v27223_v34 = vcombine.low %v25589_v19, %v25593_v46 }
 0x6b6   : > { %27219 = vst [vmem:[#allocation21_spill] sm:$0xff] %v25896_v9  ;;  %v14595_v14 = vrot.slane %v14593_v55, 4  ;;  %v25908_v13 = vsel %vm21739_vm14, %v18073_v1, %v14593_v55  ;;  %v14603_v32 = vrot.slane %v13731_v38, 5  ;;  %v14610_v1 = vrot.slane %v13734_v2, 5  ;;  %v14458_v55 = vld [vmem:[#allocation2 + $0xc0] sm:$0xe] }
 0x6b7   : > { %27221 = vst [vmem:[#allocation23_spill] sm:$0xff] %v25908_v13 }
 0x6b8   : > { %19928 = vmatmul.mubr.msk.bf16.gmra.mrb[52].mxu0 %vm1254_vm10, %v27213_v58  ;;  %v25880_v58 = vsel %vm21739_vm14, %v18071_v10, %v14579_v36  ;;  %v14588_v36 = vrot.slane %v14586_v21, 4  ;;  %v14607_v21 = vrot.slane %v25883_v0, 5 }
 0x6b9   : > { %19931 = vmatprep.mubr.msk.bf16.mxu0 %vm1254_vm10, %v27214_v26  ;;  %27217 = vst [vmem:[#allocation19_spill] sm:$0xff] %v25880_v58  ;;  %v25889_v26 = vsel %vm21739_vm14, %v14581_v39, %v14582_v35  ;;  %v14600_v39 = vrot.slane %v25859_v59, 5  ;;  %v25900_v35 = vld [vmem:[#allocation2 + $0xc4] sm:$0xf] }
 0x6ba   : > { %27218 = vst [vmem:[#allocation20_spill] sm:$0xff] %v25889_v26  ;;  %v25904_v49 = vsel %vm21739_vm14, %v14588_v36, %v14589_v5  ;;  %v25915_v26 = vsel %vm21739_vm14, %v14595_v14, %v14596_v45  ;;  %v18075_v36 = vrot.slane %v14457_v44, 9  ;;  %v14609_v57 = vrot.slane %v14607_v21, 4  ;;  %v25988_v5 = vld [vmem:[#allocation2 + $0x14] sm:$0x1] }
 0x6bb   : > { %27220 = vst [vmem:[#allocation22_spill] sm:$0xff] %v25904_v49  ;;  %27222 = vst [vmem:[#allocation24_spill] sm:$0xff] %v25915_v26  ;;  %v14602_v58 = vrot.slane %v14600_v39, 4  ;;  %v25925_v10 = vsel %vm21739_vm14, %v18074_v50, %v14600_v39  ;;  %v14614_v38 = vrot.slane %v25900_v35, 5  ;;  %v27226_v14 = vcombine.low %v25604_v62, %v25608_v43 }
 0x6bc   : > { %27224 = vst [vmem:[#allocation25_spill] sm:$0xff] %v25925_v10  ;;  %v25940_v46 = vsel %vm21739_vm14, %v18075_v36, %v14607_v21  ;;  %v25944_v2 = vsel %vm21739_vm14, %v14609_v57, %v14610_v1  ;;  %v14617_v44 = vrot.slane %v13737_v30, 5  ;;  %v21135_v21 = vld [vmem:[#allocation2 + $0xc] sm:$0xff]   ;;  %v27231_v57 = vcombine.low %v25615_v24, %v25619_v47  ;;  %v21137_v30 = vld [vmem:[#allocation2 + $0x18] sm:$0xff]   ;;  %v21138_v1 = vld [vmem:[#allocation2 + $0x24] sm:$0xff]  }
 0x6bd   : > { %v25929_v45 = vsel %vm21739_vm14, %v14602_v58, %v14603_v32  ;;  %27227 = vst [vmem:[#allocation27_spill] sm:$0xff] %v25940_v46  ;;  %27228 = vst [vmem:[#allocation28_spill] sm:$0xff] %v25944_v2  ;;  %v18076_v58 = vrot.slane %v14458_v55, 9  ;;  %v14616_v39 = vrot.slane %v14614_v38, 4  ;;  %v21141_v36 = vld [vmem:[%s26996_s1 + $0x88] sm:$0xff]   ;;  %v21146_v24 = vld [vmem:[%s26996_s1 + $0x90] sm:$0xff]  }
 0x6be   : > { %27225 = vst [vmem:[#allocation26_spill] sm:$0xff] %v25929_v45  ;;  %v25969_v55 = vld [vmem:[#allocation2 + $0x10] sm:$0xf]  ;;  %v13690_v47 = vld [vmem:[#allocation2 + $0xc] sm:$0xf]  ;;  %v21143_v2 = vld [vmem:[#allocation2 + $0x54] sm:$0xff]  }
 0x6bf   : > { %v25950_v62 = vsel %vm21739_vm14, %v18076_v58, %v14614_v38  ;;  %v25954_v43 = vsel %vm21739_vm14, %v14616_v39, %v14617_v44  ;;  %v13752_v38 = vshrl.u32 %v25969_v55, 16  ;;  %v13742_v58 = vshll.u32 %v13690_v47, 16  ;;  %v21139_v39 = vld [vmem:[#allocation2 + $0x30] sm:$0xff]   ;;  %v21140_v44 = vld [vmem:[#allocation2 + $0x3c] sm:$0xff]  }
 0x6c0   : > { %19932 = vmatmul.mubr.msk.bf16.gmra.mrb[56].mxu0 %vm1254_vm10, %v27223_v34  ;;  %27229 = vst [vmem:[#allocation29_spill] sm:$0xff] %v25950_v62  ;;  %27230 = vst [vmem:[#allocation30_spill] sm:$0xff] %v25954_v43  ;;  %v13748_v34 = vshll.u32 %v25969_v55, 16 }
 0x6c1   : > { %19935 = vmatprep.mubr.msk.bf16.mxu0 %vm1254_vm10, %v27226_v14  ;;  %v13739_v14 = vshrl.u32 %v13690_v47, 16  ;;  %v13744_v50 = vrot.slane %v13742_v58, 5  ;;  %v25986_v47 = vld [vmem:[%s26996_s1 + $0xa0] sm:$0xff]   ;;  %v13758_v58 = vshll.u32 %v25988_v5, 16 }
 0x6c8   : > { %19936 = vmatmul.mubr.msk.bf16.gmra.mrb[60].mxu0 %vm1254_vm10, %v27231_v57  ;;  %v13750_v57 = vrot.slane %v13748_v34, 5 }
 0x6c9   : > { %19947 = vmatprep.mubr.msk.bf16.mxu0 %vm1254_vm10, %v21135_v21  ;;  %v13693_v21 = vld [vmem:[#allocation2 + $0x18] sm:$0xf] }
 0x6ca   : > { %v13763_v32 = vshrl.u32 %v13693_v21, 16  ;;  %v13766_v19 = vshll.u32 %v13693_v21, 16  ;;  %v13696_v21 = vld [vmem:[#allocation2 + $0x24] sm:$0xf] }
 0x6cb   : > { %v13787_v26 = vshrl.u32 %v13696_v21, 16  ;;  %v13790_v13 = vshll.u32 %v13696_v21, 16 }
 0x6cc   : > { %v13765_v43 = vrot.slane %v13763_v32, 4  ;;  %v13768_v62 = vrot.slane %v13766_v19, 5 }
 0x6cd   : > { %v13789_v49 = vrot.slane %v13787_v26, 4 }
 0x6ce   : > { %v13769_v10 = vor.u32 %v13768_v62, %v13765_v43  ;;  %v13824_v62 = vshrl.u32 %v25722_v11, 16  ;;  %v13702_v43 = vld [vmem:[#allocation2 + $0x3c] sm:$0xf] }
 0x6cf   : > { %v13835_v29 = vshrl.u32 %v13702_v43, 16 }
 0x6d0   : > { %19948 = vmatmul.mubr.msk.bf16.vlgmr.msra.gmra.mrb[32].mxu0 %vm1254_vm10, %v21137_v30  ;;  %v13754_v30 = vrot.slane %v13752_v38, 4  ;;  %v13770_v21 = vrot.slane %v13769_v10, 4 }
 0x6d1   : > { %19980 = vmatpush3.bf16.msra.mxu0 %v25702_v20  ;;  %19951 = vmatprep.mubr.msk.bf16.mxu0 %vm1254_vm10, %v21138_v1  ;;  %v21151_v20 = vld [vmem:[%s26996_s1 + $0x98] sm:$0xff]   ;;  %v13741_v1 = vrot.slane %v13739_v14, 4  ;;  %v21142_v14 = vld [vmem:[#allocation2 + $0x48] sm:$0xff]  }
 0x6d2   : > { %19981 = vmatprep.subr.bf16.mxu0 %v21141_v36 }
 0x6d5   : > { %19982 = vmatpush3.bf16.msra.mxu0 %v21141_v36  ;;  %v25981_v36 = vld [vmem:[#allocation2 + $0x1c] sm:$0xf] }
 0x6d6   : > { %19983 = vmatprep.subr.bf16.mxu0 %v21146_v24  ;;  %27232 = vst [vmem:[#allocation31_spill] sm:$0xff] %v25981_v36  ;;  %v13772_v34 = vshll.u32 %v25981_v36, 16  ;;  %v13776_v38 = vshrl.u32 %v25981_v36, 16  ;;  %v15368_v36 = vld [vmem:[#allocation2 + $0xc4] sm:$0xf] }
 0x6d8   : > { %19952 = vmatmul.mubr.msk.bf16.gmra.mrb[36].mxu0 %vm1254_vm10, %v21139_v39  ;;  %v13755_v39 = vor.u32 %v13754_v30, %v13750_v57  ;;  %v25997_v46 = vrot.slane %v13772_v34, 5  ;;  %v13778_v45 = vrot.slane %v13776_v38, 4  ;;  %v13699_v34 = vld [vmem:[#allocation2 + $0x30] sm:$0xf] }
 0x6d9   : > { %19955 = vmatprep.mubr.msk.bf16.mxu0 %vm1254_vm10, %v21140_v44  ;;  %19984 = vmatpush3.bf16.msra.mxu0 %v21146_v24  ;;  %v13745_v24 = vor.u32 %v13744_v50, %v13741_v1  ;;  %v25994_v44 = vld [vmem:[#allocation2 + $0x20] sm:$0x1]  ;;  %v13760_v1 = vrot.slane %v13758_v58, 5  ;;  %v13814_v10 = vshll.u32 %v13699_v34, 16 }
 0x6da   : > { %19985 = vmatprep.subr.bf16.mxu0 %v21151_v20  ;;  %27233 = vst [vmem:[#allocation32_spill] sm:$0xff] %v25994_v44  ;;  %v13756_v30 = vrot.slane %v13755_v39, 4  ;;  %v13779_v32 = vor.u32 %v13778_v45, %v25997_v46  ;;  %v13800_v39 = vshrl.u32 %v25714_v60, 16  ;;  %v21144_v58 = vld [vmem:[#allocation2 + $0x60] sm:$0xff]   ;;  %v13848_v45 = vshrl.u32 %v25731_v6, 16 }
 0x6db   : > { %v13746_v50 = vrot.slane %v13745_v24, 4  ;;  %v13820_v24 = vshll.u32 %v25722_v11, 16 }
 0x6dc   : > { %v13761_v19 = vsel %vm21459_vm7, %v13756_v30, %v13760_v1  ;;  %v13844_v30 = vshll.u32 %v25731_v6, 16  ;;  %v21145_v1 = vld [vmem:[#allocation2 + $0x6c] sm:$0xff]   ;;  %v13802_v56 = vrot.slane %v13800_v39, 4  ;;  %v13826_v6 = vrot.slane %v13824_v62, 4 }
 0x6dd   : > { %19986 = vmatpush3.bf16.msra.mxu0 %v21151_v20  ;;  %v13782_v20 = vshll.u32 %v25994_v44, 16  ;;  %v26019_v26 = vrot.slane %v13820_v24, 5  ;;  %v13868_v39 = vshll.u32 %v25733_v7, 16  ;;  %v16086_v44 = vld [vmem:[#allocation2 + $0x78] sm:$0xe] }
 0x6de   : > { %20019 = vmatprep.subr.bf16.mxu0 %v25986_v47 }
 0x6df   : > { %v13784_v38 = vrot.slane %v13782_v20, 5  ;;  %v13780_v20 = vrot.slane %v13779_v32, 4  ;;  %v13775_v32 = vsel %vm21459_vm7, %v13770_v21, %v25997_v46  ;;  %v13837_v46 = vrot.slane %v13835_v29, 4 }
 0x6e0   : > { %19956 = vmatmul.mubr.msk.bf16.gmra.mrb[40].mxu0 %vm1254_vm10, %v21142_v14  ;;  %v13796_v14 = vshll.u32 %v25714_v60, 16  ;;  %v13792_v60 = vrot.slane %v13790_v13, 5  ;;  %v13850_v13 = vrot.slane %v13848_v45, 4  ;;  %v13816_v45 = vrot.slane %v13814_v10, 5 }
 0x6e1   : > { %19959 = vmatprep.mubr.msk.bf16.mxu0 %vm1254_vm10, %v21143_v2  ;;  %v13751_v2 = vsel %vm21459_vm7, %v13746_v50, %v13750_v57  ;;  %v13811_v57 = vshrl.u32 %v13699_v34, 16  ;;  %v13705_v50 = vld [vmem:[#allocation2 + $0x48] sm:$0xf]  ;;  %v13872_v34 = vshrl.u32 %v25733_v7, 16  ;;  %v13785_v24 = vsel %vm21459_vm7, %v13780_v20, %v13784_v38 }
 0x6e2   : > { %v26012_v9 = vcombine.low %v13751_v2, %v13761_v19  ;;  %v26016_v11 = vrot.slane %v13796_v14, 5  ;;  %v13838_v19 = vshll.u32 %v13702_v43, 16  ;;  %v26021_v2 = vrot.slane %v13844_v30, 5  ;;  %v13708_v30 = vld [vmem:[#allocation2 + $0x54] sm:$0xf] }
 0x6e3   : > { %v13859_v15 = vshrl.u32 %v13705_v50, 16  ;;  %v13862_v51 = vshll.u32 %v13705_v50, 16  ;;  %v13793_v14 = vor.u32 %v13792_v60, %v13789_v49  ;;  %v26031_v43 = vrot.slane %v13806_v17, 5  ;;  %v21147_v49 = vld [vmem:[#allocation2 + $0x78] sm:$0xff]  }
 0x6e4   : > { %v13803_v62 = vor.u32 %v13802_v56, %v26016_v11  ;;  %v13830_v50 = vshll.u32 %v25729_v52, 16  ;;  %v13840_v21 = vrot.slane %v13838_v19, 5  ;;  %v13851_v60 = vor.u32 %v13850_v13, %v26021_v2 }
 0x6e5   : > { %v13861_v7 = vrot.slane %v13859_v15, 4  ;;  %v13864_v40 = vrot.slane %v13862_v51, 5  ;;  %v26036_v38 = vrot.slane %v13868_v39, 5  ;;  %v13874_v56 = vrot.slane %v13872_v34, 4  ;;  %v13711_v15 = vld [vmem:[#allocation2 + $0x60] sm:$0xf] }
 0x6e6   : > { %v13883_v17 = vshrl.u32 %v13708_v30, 16  ;;  %v13886_v20 = vshll.u32 %v13708_v30, 16  ;;  %v13794_v10 = vrot.slane %v13793_v14, 4  ;;  %v13892_v52 = vshll.u32 %v25741_v28, 16 }
 0x6e7   : > { %v13896_v29 = vshrl.u32 %v25741_v28, 16  ;;  %v13832_v51 = vrot.slane %v13830_v50, 5  ;;  %v13854_v13 = vshll.u32 %v25736_v31, 16  ;;  %v13841_v34 = vor.u32 %v13840_v21, %v13837_v46 }
 0x6e8   : > { %19960 = vmatmul.mubr.msk.bf16.gmra.mrb[44].mxu0 %vm1254_vm10, %v21144_v58  ;;  %v13813_v58 = vrot.slane %v13811_v57, 4  ;;  %v26039_v57 = vcombine.low %v13775_v32, %v13785_v24  ;;  %v13852_v30 = vrot.slane %v13851_v60, 4  ;;  %v13865_v32 = vor.u32 %v13864_v40, %v13861_v7  ;;  %v13714_v60 = vld [vmem:[#allocation2 + $0x6c] sm:$0xf]  ;;  %v21150_v7 = vld [vmem:[#allocation2 + $0x9c] sm:$0xff]  }
 0x6e9   : > { %19963 = vmatprep.mubr.msk.bf16.mxu0 %vm1254_vm10, %v21145_v1  ;;  %v13827_v1 = vor.u32 %v13826_v6, %v26019_v26  ;;  %v13804_v6 = vrot.slane %v13803_v62, 4  ;;  %v13875_v14 = vor.u32 %v13874_v56, %v26036_v38  ;;  %v13885_v24 = vrot.slane %v13883_v17, 4 }
 0x6ea   : > { %v13817_v19 = vor.u32 %v13816_v45, %v13813_v58  ;;  %v13888_v22 = vrot.slane %v13886_v20, 5  ;;  %v26047_v41 = vrot.slane %v13892_v52, 5  ;;  %v13898_v28 = vrot.slane %v13896_v29, 4 }
 0x6eb   : > { %v13828_v39 = vrot.slane %v13827_v1, 4  ;;  %v13910_v62 = vshll.u32 %v13711_v15, 16  ;;  %v13799_v31 = vsel %vm21459_vm7, %v13794_v10, %v26016_v11  ;;  %v13856_v58 = vrot.slane %v13854_v13, 5 }
 0x6ec   : > { %v13916_v45 = vshll.u32 %v25767_v27, 16  ;;  %v13920_v1 = vshrl.u32 %v25767_v27, 16  ;;  %v13809_v40 = vsel %vm21459_vm7, %v13804_v6, %v26031_v43  ;;  %v13818_v50 = vrot.slane %v13817_v19, 4 }
 0x6ed   : > { %v13833_v46 = vsel %vm21459_vm7, %v13828_v39, %v13832_v51  ;;  %v13842_v21 = vrot.slane %v13841_v34, 4  ;;  %v13857_v11 = vsel %vm21459_vm7, %v13852_v30, %v13856_v58  ;;  %v13866_v56 = vrot.slane %v13865_v32, 4  ;;  %v26097_v58 = vld [vmem:[#allocation2 + $0x20] sm:$0x1] }
 0x6ee   : > { %v13876_v17 = vrot.slane %v13875_v14, 4  ;;  %v13889_v27 = vor.u32 %v13888_v22, %v13885_v24  ;;  %v13899_v10 = vor.u32 %v13898_v28, %v26047_v41  ;;  %v13912_v43 = vrot.slane %v13910_v62, 5  ;;  %v13717_v28 = vld [vmem:[#allocation2 + $0x78] sm:$0xf]  ;;  %27235 = vst [vmem:[#allocation34_spill] sm:$0xff] %v26097_v58 }
 0x6ef   : > { %v26064_v29 = vrot.slane %v13916_v45, 5  ;;  %v13922_v6 = vrot.slane %v13920_v1, 4  ;;  %v13931_v19 = vshrl.u32 %v13714_v60, 16  ;;  %v13934_v51 = vshll.u32 %v13714_v60, 16  ;;  %v16078_v45 = vld [vmem:[#allocation2 + $0x18] sm:$0xe] }
 0x6f0   : > { %19964 = vmatmul.mubr.msk.bf16.gmra.mrb[48].mxu0 %vm1254_vm10, %v21147_v49  ;;  %v13878_v49 = vshll.u32 %v25738_v12, 16  ;;  %v21149_v12 = vld [vmem:[#allocation2 + $0x90] sm:$0xff]   ;;  %v13823_v13 = vsel %vm21459_vm7, %v13818_v50, %v26019_v26  ;;  %v13940_v39 = vshll.u32 %v25779_v4, 16  ;;  %v13944_v22 = vshrl.u32 %v25779_v4, 16  ;;  %v26087_v4 = vld [vmem:[#allocation2 + $0x1c] sm:$0xf] }
 0x6f1   : > { %19967 = vmatprep.mubr.msk.bf16.mxu0 %vm1254_vm10, %v21148_v8  ;;  %v13907_v8 = vshrl.u32 %v13711_v15, 16  ;;  %v13902_v15 = vshll.u32 %v25759_v61, 16  ;;  %v26072_v34 = vcombine.low %v13799_v31, %v13809_v40  ;;  %v26074_v30 = vcombine.low %v13823_v13, %v13833_v46  ;;  %27234 = vst [vmem:[#allocation33_spill] sm:$0xff] %v26087_v4  ;;  %v21152_v1 = vld [vmem:[#allocation2 + $0xa8] sm:$0xff]  }
 0x6f2   : > { %v13880_v20 = vrot.slane %v13878_v49, 5  ;;  %v13847_v49 = vsel %vm21459_vm7, %v13842_v21, %v26021_v2  ;;  %v26083_v26 = vrot.slane %v13889_v27, 4  ;;  %v26085_v61 = vrot.slane %v13899_v10, 4  ;;  %v26107_v21 = vld [vmem:[#allocation2 + $0x28] sm:$0xf] }
 0x6f3   : > { %v13909_v52 = vrot.slane %v13907_v8, 4  ;;  %v26081_v14 = vcombine.low %v13847_v49, %v13857_v11  ;;  %v13871_v8 = vsel %vm21459_vm7, %v13866_v56, %v26036_v38  ;;  %v13923_v62 = vor.u32 %v13922_v6, %v26064_v29  ;;  %27236 = vst [vmem:[#allocation35_spill] sm:$0xff] %v26107_v21  ;;  %v21153_v38 = vld [vmem:[#allocation2 + $0xb4] sm:$0xff]   ;;  %v26122_v10 = vld [vmem:[#allocation2 + $0x2c] sm:$0x1] }
 0x6f4   : > { %v13881_v32 = vsel %vm21459_vm7, %v13876_v17, %v13880_v20  ;;  %v26093_v2 = vrot.slane %v13931_v19, 4  ;;  %v26095_v31 = vrot.slane %v13934_v51, 5  ;;  %v26101_v40 = vrot.slane %v13902_v15, 5  ;;  %27237 = vst [vmem:[#allocation36_spill] sm:$0xff] %v26122_v10  ;;  %v26134_v15 = vld [vmem:[#allocation2 + $0x38] sm:$0x1] }
 0x6f5   : > { %v13913_v24 = vor.u32 %v13912_v43, %v13909_v52  ;;  %v26103_v50 = vrot.slane %v13940_v39, 5  ;;  %v26105_v46 = vrot.slane %v13944_v22, 4  ;;  %v13958_v11 = vshll.u32 %v13717_v28, 16  ;;  %v26124_v52 = vld [vmem:[#allocation2 + $0x34] sm:$0xf]  ;;  %27239 = vst [vmem:[#allocation38_spill] sm:$0xff] %v26134_v15 }
 0x6f6   : > { %v13964_v56 = vshll.u32 %v25802_v53, 16  ;;  %27238 = vst [vmem:[#allocation37_spill] sm:$0xff] %v26124_v52  ;;  %v16144_v43 = vrot.slane %v26087_v4, 5  ;;  %v26128_v6 = vrot.slane %v13923_v62, 4  ;;  %v13968_v13 = vshrl.u32 %v25802_v53, 16 }
 0x6f7   : > { %v26120_v27 = vrot.slane %v13913_v24, 4  ;;  %v16079_v39 = vld [vmem:[#allocation2 + $0x24] sm:$0xe]  ;;  %v26138_v49 = vld [vmem:[#allocation2 + $0x40] sm:$0xf]  ;;  %v16151_v60 = vrot.slane %v26107_v21, 5 }
 0x6f8   : > { %19968 = vmatmul.mubr.msk.bf16.gmra.mrb[52].mxu0 %vm1254_vm10, %v21149_v12  ;;  %v26099_v12 = vcombine.low %v13871_v8, %v13881_v32  ;;  %27240 = vst [vmem:[#allocation39_spill] sm:$0xff] %v26138_v49  ;;  %v18209_v32 = vrot.slane %v16078_v45, 9  ;;  %v16146_v24 = vrot.slane %v16144_v43, 4  ;;  %v16080_v8 = vld [vmem:[#allocation2 + $0x30] sm:$0xe]  ;;  %v16154_v21 = vrot.slane %v26122_v10, 5 }
 0x6f9   : > { %19971 = vmatprep.mubr.msk.bf16.mxu0 %vm1254_vm10, %v21150_v7  ;;  %v13955_v7 = vshrl.u32 %v13717_v28, 16  ;;  %v16147_v28 = vrot.slane %v26097_v58, 5  ;;  %v26147_v53 = vld [vmem:[#allocation2 + $0x44] sm:$0x1]  ;;  %v26149_v51 = vld [vmem:[#allocation2 + $0x4c] sm:$0xf] }
 0x6fa   : > { %27241 = vst [vmem:[#allocation40_spill] sm:$0xff] %v26147_v53  ;;  %27242 = vst [vmem:[#allocation41_spill] sm:$0xff] %v26149_v51  ;;  %v26152_v17 = vld [vmem:[#allocation2 + $0x50] sm:$0x1]  ;;  %v26156_v45 = vsel %vm21739_vm14, %v18209_v32, %v16144_v43  ;;  %v16081_v20 = vld [vmem:[#allocation2 + $0x3c] sm:$0xe] }
 0x6fb   : > { %v26141_v62 = vrot.slane %v13955_v7, 4  ;;  %27243 = vst [vmem:[#allocation42_spill] sm:$0xff] %v26152_v17  ;;  %27244 = vst [vmem:[#allocation43_spill] sm:$0xff] %v26156_v45  ;;  %v26160_v7 = vsel %vm21739_vm14, %v16146_v24, %v16147_v28  ;;  %v26163_v22 = vld [vmem:[#allocation2 + $0x58] sm:$0xf]  ;;  %v16153_v58 = vrot.slane %v16151_v60, 4 }
 0x6fc   : > { %27245 = vst [vmem:[#allocation44_spill] sm:$0xff] %v26160_v7  ;;  %27246 = vst [vmem:[#allocation45_spill] sm:$0xff] %v26163_v22  ;;  %v18211_v4 = vrot.slane %v16080_v8, 9  ;;  %v26168_v43 = vrot.slane %v13968_v13, 4  ;;  %v16161_v24 = vrot.slane %v26134_v15, 5  ;;  %v18212_v13 = vrot.slane %v16081_v20, 9 }
 0x6fd   : > { %v16082_v28 = vld [vmem:[#allocation2 + $0x48] sm:$0xe]  ;;  %v26179_v19 = vsel %vm21739_vm14, %v16153_v58, %v16154_v21  ;;  %v16165_v7 = vrot.slane %v26138_v49, 5  ;;  %v16083_v45 = vld [vmem:[#allocation2 + $0x54] sm:$0xe]  ;;  %v16172_v21 = vrot.slane %v26149_v51, 5 }
 0x6fe   : > { %27249 = vst [vmem:[#allocation48_spill] sm:$0xff] %v26179_v19  ;;  %v26201_v20 = vld [vmem:[#allocation2 + $0x70] sm:$0xf]  ;;  %v18213_v49 = vrot.slane %v16082_v28, 9  ;;  %v16175_v15 = vrot.slane %v26152_v17, 5 }
 0x6ff   : > { %27254 = vst [vmem:[#allocation53_spill] sm:$0xff] %v26201_v20  ;;  %v16084_v19 = vld [vmem:[#allocation2 + $0x60] sm:$0xe]  ;;  %v26213_v51 = vld [vmem:[#allocation2 + $0x7c] sm:$0xf] }
 0x700   : > { %19972 = vmatmul.mubr.msk.bf16.gmra.mrb[56].mxu0 %vm1254_vm10, %v21152_v1  ;;  %v26143_v1 = vrot.slane %v13958_v11, 5  ;;  %v18210_v11 = vrot.slane %v16079_v39, 9  ;;  %27257 = vst [vmem:[#allocation56_spill] sm:$0xff] %v26213_v51  ;;  %v26221_v28 = vsel %vm21739_vm14, %v18213_v49, %v16172_v21  ;;  %v26225_v17 = vld [vmem:[#allocation2 + $0x88] sm:$0xf] }
 0x701   : > { %19975 = vmatprep.mubr.msk.bf16.mxu0 %vm1254_vm10, %v21153_v38  ;;  %v26145_v38 = vrot.slane %v13964_v56, 5  ;;  %v16158_v56 = vrot.slane %v26124_v52, 5  ;;  %v26175_v52 = vld [vmem:[#allocation2 + $0x5c] sm:$0x1]  ;;  %27259 = vst [vmem:[#allocation58_spill] sm:$0xff] %v26221_v28  ;;  %27260 = vst [vmem:[#allocation59_spill] sm:$0xff] %v26225_v17 }
 0x702   : > { %v26172_v32 = vsel %vm21739_vm14, %v18210_v11, %v16151_v60  ;;  %27248 = vst [vmem:[#allocation47_spill] sm:$0xff] %v26175_v52  ;;  %v26187_v60 = vld [vmem:[#allocation2 + $0x64] sm:$0xf]  ;;  %v26189_v11 = vld [vmem:[#allocation2 + $0x68] sm:$0x1] }
 0x703   : > { %27247 = vst [vmem:[#allocation46_spill] sm:$0xff] %v26172_v32  ;;  %v16160_v39 = vrot.slane %v16158_v56, 4  ;;  %v26183_v8 = vsel %vm21739_vm14, %v18211_v4, %v16158_v56  ;;  %27251 = vst [vmem:[#allocation50_spill] sm:$0xff] %v26187_v60  ;;  %v16168_v4 = vrot.slane %v26147_v53, 5  ;;  %v16167_v56 = vrot.slane %v16165_v7, 4 }
 0x704   : > { %27250 = vst [vmem:[#allocation49_spill] sm:$0xff] %v26183_v8  ;;  %27252 = vst [vmem:[#allocation51_spill] sm:$0xff] %v26189_v11  ;;  %v26206_v32 = vld [vmem:[#allocation2 + $0x74] sm:$0x1]  ;;  %v18214_v53 = vrot.slane %v16083_v45, 9  ;;  %v16186_v8 = vrot.slane %v26187_v60, 5 }
 0x705   : > { %v26195_v58 = vsel %vm21739_vm14, %v16160_v39, %v16161_v24  ;;  %27255 = vst [vmem:[#allocation54_spill] sm:$0xff] %v26206_v32  ;;  %v26210_v39 = vsel %vm21739_vm14, %v18212_v13, %v16165_v7  ;;  %v16174_v24 = vrot.slane %v16172_v21, 4  ;;  %v16085_v7 = vld [vmem:[#allocation2 + $0x6c] sm:$0xe]  ;;  %v15351_v13 = vld [vmem:[#allocation2 + $0x80] sm:$0x1] }
 0x706   : > { %27253 = vst [vmem:[#allocation52_spill] sm:$0xff] %v26195_v58  ;;  %27256 = vst [vmem:[#allocation55_spill] sm:$0xff] %v26210_v39  ;;  %v16182_v58 = vrot.slane %v26175_v52, 5  ;;  %v15354_v10 = vld [vmem:[#allocation2 + $0x8c] sm:$0x1]  ;;  %v16188_v52 = vrot.slane %v16186_v8, 4 }
 0x707   : > { %v16189_v60 = vrot.slane %v26189_v11, 5  ;;  %v21156_v45 = vld [vmem:[%s26996_s1 + $0xa8] sm:$0xff]   ;;  %v26252_v49 = vld [vmem:[#allocation2 + $0x84] sm:$0xf]  ;;  %v15357_v28 = vld [vmem:[#allocation2 + $0x98] sm:$0x1] }
 0x708   : > { %19976 = vmatmul.mubr.msk.bf16.gmra.mrb[60].mxu0 %vm1254_vm10, %v21154_v48  ;;  %v26217_v48 = vsel %vm21739_vm14, %v16167_v56, %v16168_v4  ;;  %v18215_v56 = vrot.slane %v16084_v19, 9  ;;  %v18217_v39 = vrot.slane %v16086_v44, 9  ;;  %v16203_v11 = vrot.slane %v15351_v13, 5  ;;  %v21157_v44 = vld [vmem:[%s26996_s1 + $0xb0] sm:$0xff]   ;;  %v15360_v13 = vld [vmem:[#allocation2 + $0xa4] sm:$0x1] }
 0x709   : > { %19987 = vmatprep.mubr.msk.bf16.mxu0 %vm1254_vm10, %v26012_v9  ;;  %v16179_v9 = vrot.slane %v26163_v22, 5  ;;  %27258 = vst [vmem:[#allocation57_spill] sm:$0xff] %v26217_v48  ;;  %v26231_v22 = vsel %vm21739_vm14, %v16174_v24, %v16175_v15  ;;  %v18216_v24 = vrot.slane %v16085_v7, 9  ;;  %v26279_v7 = vld [vmem:[#allocation2 + $0xac] sm:$0xf] }
 0x70a   : > { %27261 = vst [vmem:[#allocation60_spill] sm:$0xff] %v26231_v22  ;;  %v26249_v19 = vsel %vm21739_vm14, %v18215_v56, %v16186_v8  ;;  %v26254_v22 = vld [vmem:[#allocation2 + $0x94] sm:$0xf]  ;;  %v16200_v8 = vrot.slane %v26213_v51, 5  ;;  %v15366_v51 = vld [vmem:[#allocation2 + $0xbc] sm:$0x1] }
 0x70b   : > { %v16181_v4 = vrot.slane %v16179_v9, 4  ;;  %v26237_v21 = vsel %vm21739_vm14, %v18214_v53, %v16179_v9  ;;  %27264 = vst [vmem:[#allocation63_spill] sm:$0xff] %v26249_v19  ;;  %v16193_v53 = vrot.slane %v26201_v20, 5  ;;  %v16087_v9 = vld [vmem:[#allocation2 + $0x84] sm:$0xe]  ;;  %27265 = vst [vmem:[#allocation64_spill] sm:$0xff] %v26254_v22 }
 0x70c   : > { %27262 = vst [vmem:[#allocation61_spill] sm:$0xff] %v26237_v21  ;;  %v16088_v20 = vld [vmem:[#allocation2 + $0x90] sm:$0xe]  ;;  %v16202_v48 = vrot.slane %v16200_v8, 4 }
 0x70d   : > { %v26245_v15 = vsel %vm21739_vm14, %v16181_v4, %v16182_v58  ;;  %v26260_v58 = vsel %vm21739_vm14, %v16188_v52, %v16189_v60  ;;  %v16196_v4 = vrot.slane %v26206_v32, 5  ;;  %v16195_v56 = vrot.slane %v16193_v53, 4  ;;  %v15359_v52 = vld [vmem:[#allocation2 + $0xa0] sm:$0xf]  ;;  %v27347_v33 = vld [vmem:[#allocation55_spill] sm:$0xff] }
 0x70e   : > { %27263 = vst [vmem:[#allocation62_spill] sm:$0xff] %v26245_v15  ;;  %27266 = vst [vmem:[#allocation65_spill] sm:$0xff] %v26260_v58  ;;  %v26273_v60 = vsel %vm21739_vm14, %v18216_v24, %v16193_v53  ;;  %v18218_v15 = vrot.slane %v16087_v9, 9  ;;  %v16210_v24 = vrot.slane %v15354_v10, 5  ;;  %v16214_v53 = vrot.slane %v26254_v22, 5 }
 0x70f   : > { %v15363_v9 = vld [vmem:[#allocation2 + $0xb0] sm:$0x1]  ;;  %v15365_v58 = vld [vmem:[#allocation2 + $0xb8] sm:$0xf]  ;;  %v26294_v21 = vsel %vm21739_vm14, %v16202_v48, %v16203_v11  ;;  %v18219_v32 = vrot.slane %v16088_v20, 9  ;;  %v16221_v48 = vrot.slane %v15359_v52, 5 }
 0x710   : > { %19988 = vmatmul.mubr.msk.bf16.vlgmr.msra.gmra.mrb[32].mxu0 %vm1254_vm10, %v26039_v57  ;;  %v16207_v57 = vrot.slane %v26225_v17, 5  ;;  %v16216_v10 = vrot.slane %v16214_v53, 4  ;;  %v16090_v22 = vld [vmem:[#allocation2 + $0xa8] sm:$0xe] }
 0x711   : > { %20020 = vmatpush3.bf16.msra.mxu0 %v25986_v47  ;;  %19991 = vmatprep.mubr.msk.bf16.mxu0 %vm1254_vm10, %v26072_v34  ;;  %v26283_v47 = vsel %vm21739_vm14, %v16195_v56, %v16196_v4  ;;  %v26287_v34 = vsel %vm21739_vm14, %v18217_v39, %v16200_v8  ;;  %v16089_v4 = vld [vmem:[#allocation2 + $0x9c] sm:$0xe]  ;;  %v16217_v8 = vrot.slane %v15357_v28, 5  ;;  %v26309_v20 = vsel %vm21739_vm14, %v18219_v32, %v16214_v53  ;;  %v15369_v39 = vld [vmem:[#allocation2 + $0xc8] sm:$0x1] }
 0x712   : > { %20021 = vmatprep.subr.bf16.mxu0 %v21156_v45  ;;  %v16209_v17 = vrot.slane %v16207_v57, 4  ;;  %v26301_v19 = vsel %vm21739_vm14, %v18218_v15, %v16207_v57  ;;  %v21158_v28 = vld [vmem:[%s26996_s1 + $0xb8] sm:$0xff]   ;;  %v18220_v57 = vrot.slane %v16089_v4, 9  ;;  %v16223_v52 = vrot.slane %v16221_v48, 4 }
 0x713   : > { %v26318_v15 = vsel %vm21739_vm14, %v16216_v10, %v16217_v8  ;;  %v16224_v53 = vrot.slane %v15360_v13, 5  ;;  %v18221_v56 = vrot.slane %v16090_v22, 9  ;;  %v16231_v8 = vrot.slane %v15363_v9, 5 }
 0x714   : > { %v26305_v11 = vsel %vm21739_vm14, %v16209_v17, %v16210_v24  ;;  %v16228_v17 = vrot.slane %v26279_v7, 5  ;;  %v16091_v24 = vld [vmem:[#allocation2 + $0xb4] sm:$0xe]  ;;  %v16235_v4 = vrot.slane %v15365_v58, 5  ;;  %v16242_v13 = vrot.slane %v15368_v36, 5  ;;  %v26342_v58 = vld [vmem:[%s26996_s1 + $0xc0] sm:$0xff]  }
 0x715   : > { %20022 = vmatpush3.bf16.msra.mxu0 %v21156_v45  ;;  %27267 = vst [vmem:[#allocation66_spill] sm:$0xff] %v26305_v11  ;;  %v26327_v45 = vsel %vm21739_vm14, %v18220_v57, %v16221_v48  ;;  %v16092_v11 = vld [vmem:[#allocation2 + $0xc0] sm:$0xe]  ;;  %v26333_v32 = vsel %vm21739_vm14, %v16223_v52, %v16224_v53  ;;  %v16238_v48 = vrot.slane %v15366_v51, 5  ;;  %v13992_v52 = vshrl.u32 %v25815_v23, 16 }
 0x716   : > { %20023 = vmatprep.subr.bf16.mxu0 %v21157_v44  ;;  %v16230_v10 = vrot.slane %v16228_v17, 4  ;;  %v26337_v22 = vsel %vm21739_vm14, %v18221_v56, %v16228_v17  ;;  %v16237_v9 = vrot.slane %v16235_v4, 4  ;;  %v18223_v57 = vrot.slane %v16092_v11, 9 }
 0x717   : > { %v16244_v36 = vrot.slane %v16242_v13, 4  ;;  %v16245_v17 = vrot.slane %v15369_v39, 5  ;;  %v13982_v51 = vshll.u32 %v26252_v49, 16 }
 0x718   : > { %19992 = vmatmul.mubr.msk.bf16.gmra.mrb[36].mxu0 %vm1254_vm10, %v26074_v30  ;;  %v18222_v30 = vrot.slane %v16091_v24, 9  ;;  %v13988_v24 = vshll.u32 %v25815_v23, 16  ;;  %v26367_v39 = vsel %vm21739_vm14, %v18223_v57, %v16242_v13 }
 0x719   : > { %19995 = vmatprep.mubr.msk.bf16.mxu0 %vm1254_vm10, %v26081_v14  ;;  %20024 = vmatpush3.bf16.msra.mxu0 %v21157_v44  ;;  %v18244_v14 = vcombine.low %v26327_v45, %v26333_v32  ;;  %v26348_v44 = vsel %vm21739_vm14, %v16230_v10, %v16231_v8  ;;  %v26360_v10 = vsel %vm21739_vm14, %v16237_v9, %v16238_v48  ;;  %v26857_v45 = vld [vmem:[%s26998_s3] ss:$0 sm:$0xff] }
 0x71a   : > { %20025 = vmatprep.subr.bf16.mxu0 %v21158_v28  ;;  %v18245_v56 = vcombine.low %v26337_v22, %v26348_v44  ;;  %v26356_v53 = vsel %vm21739_vm14, %v18222_v30, %v16235_v4  ;;  %v26371_v23 = vsel %vm21739_vm14, %v16244_v36, %v16245_v17  ;;  %v27268_v8 = vor.u32 %v26095_v31, %v26093_v2 }
 0x71b   : > { %v18246_v11 = vcombine.low %v26356_v53, %v26360_v10  ;;  %v27269_v30 = vor.u32 %v26105_v46, %v26103_v50  ;;  %v18247_v13 = vcombine.low %v26367_v39, %v26371_v23  ;;  %v27270_v48 = vsel %vm21459_vm7, %v26085_v61, %v26101_v40  ;;  %v13723_v40 = vld [vmem:[#allocation2 + $0x90] sm:$0xf] }
 0x71c   : > { %v13938_v4 = vrot.slane %v27268_v8, 4  ;;  %v27271_v2 = vsel %vm21459_vm7, %v26083_v26, %v26047_v41  ;;  %v27272_v46 = vshll.u32 %v25791_v54, 16  ;;  %v13974_v17 = vshll.u32 %v25813_v25, 16 }
 0x71d   : > { %20026 = vmatpush3.bf16.msra.mxu0 %v21158_v28  ;;  %v13948_v9 = vrot.slane %v27269_v30, 4  ;;  %v13971_v28 = vor.u32 %v26168_v43, %v26145_v38  ;;  %v18031_v31 = vcombine.low %v27271_v2, %v27270_v48  ;;  %v27273_v43 = vshll.u32 %v25800_v18, 16 }
 0x71e   : > { %20059 = vmatprep.subr.bf16.mxu0 %v26342_v58  ;;  %v13928_v57 = vrot.slane %v27272_v46, 5  ;;  %v26401_v8 = vrot.slane %v13988_v24, 5  ;;  %v13994_v61 = vrot.slane %v13992_v52, 4  ;;  %v13919_v41 = vsel %vm21459_vm7, %v26120_v27, %v26064_v29 }
 0x71f   : > { %v13952_v36 = vrot.slane %v27273_v43, 5  ;;  %v13961_v54 = vor.u32 %v26143_v1, %v26141_v62  ;;  %v27274_v26 = vshrl.u32 %v26252_v49, 16  ;;  %v13943_v24 = vsel %vm21459_vm7, %v13938_v4, %v26103_v50  ;;  %v13726_v49 = vld [vmem:[#allocation2 + $0x9c] sm:$0xf] }
 0x720   : > { %19996 = vmatmul.mubr.msk.bf16.gmra.mrb[40].mxu0 %vm1254_vm10, %v26099_v12  ;;  %v13984_v12 = vrot.slane %v13982_v51, 5  ;;  %v13929_v25 = vsel %vm21459_vm7, %v26128_v6, %v13928_v57  ;;  %v13972_v30 = vrot.slane %v13971_v28, 4  ;;  %v14003_v29 = vshrl.u32 %v13723_v40, 16 }
 0x721   : > { %19999 = vmatprep.mubr.msk.bf16.mxu0 %vm1254_vm10, %v18031_v31  ;;  %v13981_v18 = vrot.slane %v27274_v26, 4  ;;  %v13953_v52 = vsel %vm21459_vm7, %v13948_v9, %v13952_v36  ;;  %v14006_v27 = vshll.u32 %v13723_v40, 16  ;;  %v14012_v62 = vshll.u32 %v25824_v37, 16 }
 0x722   : > { %v14016_v1 = vshrl.u32 %v25824_v37, 16  ;;  %v13976_v51 = vrot.slane %v13974_v17, 5  ;;  %v13995_v48 = vor.u32 %v13994_v61, %v26401_v8  ;;  %v14036_v6 = vshll.u32 %v25847_v42, 16 }
 0x723   : > { %v14040_v2 = vshrl.u32 %v25847_v42, 16  ;;  %v18032_v31 = vcombine.low %v13919_v41, %v13929_v25  ;;  %v18033_v50 = vcombine.low %v13943_v24, %v13953_v52  ;;  %v13962_v4 = vrot.slane %v13961_v54, 4  ;;  %v13729_v24 = vld [vmem:[#allocation2 + $0xa8] sm:$0xf] }
 0x724   : > { %v13985_v46 = vor.u32 %v13984_v12, %v13981_v18  ;;  %v13977_v9 = vsel %vm21459_vm7, %v13972_v30, %v13976_v51  ;;  %v13998_v28 = vshll.u32 %v25833_v63, 16  ;;  %v14027_v57 = vshrl.u32 %v13726_v49, 16 }
 0x725   : > { %v14030_v43 = vshll.u32 %v13726_v49, 16  ;;  %v14005_v37 = vrot.slane %v14003_v29, 4  ;;  %v14008_v36 = vrot.slane %v14006_v27, 5  ;;  %v26428_v17 = vrot.slane %v14012_v62, 5  ;;  %v13732_v62 = vld [vmem:[#allocation2 + $0xb4] sm:$0xf] }
 0x726   : > { %v14018_v61 = vrot.slane %v14016_v1, 4  ;;  %v13996_v40 = vrot.slane %v13995_v48, 4  ;;  %v26431_v42 = vrot.slane %v14036_v6, 5  ;;  %v14042_v41 = vrot.slane %v14040_v2, 4  ;;  %v21290_v6 = vld [vmem:[#allocation2 + $0x98] sm:$0x1] }
 0x727   : > { %v13967_v54 = vsel %vm21459_vm7, %v13962_v4, %v26145_v38  ;;  %v13986_v63 = vrot.slane %v13985_v46, 4  ;;  %v14000_v18 = vrot.slane %v13998_v28, 5  ;;  %v14029_v12 = vrot.slane %v14027_v57, 4 }
 0x728   : > { %20000 = vmatmul.mubr.msk.bf16.gmra.mrb[44].mxu0 %vm1254_vm10, %v18032_v31  ;;  %v18034_v26 = vcombine.low %v13967_v54, %v13977_v9  ;;  %v14032_v25 = vrot.slane %v14030_v43, 5  ;;  %v14009_v52 = vor.u32 %v14008_v36, %v14005_v37  ;;  %v14019_v30 = vor.u32 %v14018_v61, %v26428_v17 }
 0x729   : > { %20003 = vmatprep.mubr.msk.bf16.mxu0 %vm1254_vm10, %v18033_v50  ;;  %v14060_v29 = vshll.u32 %v25859_v59, 16  ;;  %v14064_v27 = vshrl.u32 %v25859_v59, 16  ;;  %v14001_v1 = vsel %vm21459_vm7, %v13996_v40, %v14000_v18  ;;  %v14043_v49 = vor.u32 %v14042_v41, %v26431_v42 }
 0x72a   : > { %v14084_v38 = vshll.u32 %v25883_v0, 16  ;;  %v14088_v51 = vshrl.u32 %v25883_v0, 16  ;;  %v13991_v48 = vsel %vm21459_vm7, %v13986_v63, %v26401_v8  ;;  %v14022_v2 = vshll.u32 %v21290_v6, 16 }
 0x72b   : > { %v14051_v31 = vshrl.u32 %v13729_v24, 16  ;;  %v14054_v50 = vshll.u32 %v13729_v24, 16  ;;  %v14033_v4 = vor.u32 %v14032_v25, %v14029_v12  ;;  %v14046_v59 = vshll.u32 %v25868_v16, 16  ;;  %v13735_v25 = vld [vmem:[#allocation2 + $0xc0] sm:$0xf] }
 0x72c   : > { %v14075_v46 = vshrl.u32 %v13732_v62, 16  ;;  %v14078_v9 = vshll.u32 %v13732_v62, 16  ;;  %v18035_v28 = vcombine.low %v13991_v48, %v14001_v1  ;;  %v14020_v57 = vrot.slane %v14019_v30, 4 }
 0x72d   : > { %v14062_v43 = vrot.slane %v14060_v29, 5  ;;  %v14066_v37 = vrot.slane %v14064_v27, 4  ;;  %v14010_v0 = vrot.slane %v14009_v52, 4  ;;  %v14044_v36 = vrot.slane %v14043_v49, 4  ;;  %v21291_v49 = vld [vmem:[#allocation2 + $0xb0] sm:$0x1] }
 0x72e   : > { %v14086_v61 = vrot.slane %v14084_v38, 5  ;;  %v14090_v40 = vrot.slane %v14088_v51, 4  ;;  %v14024_v8 = vrot.slane %v14022_v2, 5  ;;  %v14053_v41 = vrot.slane %v14051_v31, 4 }
 0x72f   : > { %v14056_v54 = vrot.slane %v14054_v50, 5  ;;  %v14034_v63 = vrot.slane %v14033_v4, 4  ;;  %v14048_v18 = vrot.slane %v14046_v59, 5  ;;  %v14077_v16 = vrot.slane %v14075_v46, 4 }
 0x730   : > { %20004 = vmatmul.mubr.msk.bf16.gmra.mrb[48].mxu0 %vm1254_vm10, %v18034_v26  ;;  %v14080_v12 = vrot.slane %v14078_v9, 5  ;;  %v14025_v24 = vsel %vm21459_vm7, %v14020_v57, %v14024_v8  ;;  %v14067_v30 = vor.u32 %v14066_v37, %v14062_v43  ;;  %v14108_v26 = vshll.u32 %v25900_v35, 16 }
 0x731   : > { %20007 = vmatprep.mubr.msk.bf16.mxu0 %vm1254_vm10, %v18035_v28  ;;  %v14112_v52 = vshrl.u32 %v25900_v35, 16  ;;  %v14015_v29 = vsel %vm21459_vm7, %v14010_v0, %v26428_v17  ;;  %v14049_v27 = vsel %vm21459_vm7, %v14044_v36, %v14048_v18  ;;  %v14091_v62 = vor.u32 %v14090_v40, %v14086_v61  ;;  %v21292_v35 = vld [vmem:[#allocation2 + $0xbc] sm:$0x1] }
 0x732   : > { %v14057_v1 = vor.u32 %v14056_v54, %v14053_v41  ;;  %v14070_v38 = vshll.u32 %v21291_v49, 16  ;;  %v14099_v51 = vshrl.u32 %v13735_v25, 16  ;;  %v14102_v48 = vshll.u32 %v13735_v25, 16 }
 0x733   : > { %v18036_v6 = vcombine.low %v14015_v29, %v14025_v24  ;;  %v14039_v2 = vsel %vm21459_vm7, %v14034_v63, %v26431_v42  ;;  %v14081_v31 = vor.u32 %v14080_v12, %v14077_v16  ;;  %v14094_v50 = vshll.u32 %v21292_v35, 16  ;;  %v21293_v16 = vld [vmem:[#allocation2 + $0xc8] sm:$0x1]  ;;  %v27276_v35 = vld [vmem:[#allocation32_spill] sm:$0xff] }
 0x734   : > { %v18037_v4 = vcombine.low %v14039_v2, %v14049_v27  ;;  %v14068_v59 = vrot.slane %v14067_v30, 4  ;;  %v14110_v17 = vrot.slane %v14108_v26, 5  ;;  %v14114_v46 = vrot.slane %v14112_v52, 4 }
 0x735   : > { %v14092_v9 = vrot.slane %v14091_v62, 4  ;;  %v14058_v28 = vrot.slane %v14057_v1, 4  ;;  %v14072_v57 = vrot.slane %v14070_v38, 5  ;;  %v14101_v37 = vrot.slane %v14099_v51, 4  ;;  %v27275_v1 = vld [vmem:[#allocation31_spill] sm:$0xff] }
 0x736   : > { %v14104_v0 = vrot.slane %v14102_v48, 5  ;;  %v14082_v36 = vrot.slane %v14081_v31, 4  ;;  %v14096_v40 = vrot.slane %v14094_v50, 5  ;;  %v14115_v8 = vor.u32 %v14114_v46, %v14110_v17 }
 0x737   : > { %v14073_v42 = vsel %vm21459_vm7, %v14068_v59, %v14072_v57  ;;  %v14509_v54 = vrot.slane %v25969_v55, 5  ;;  %v14063_v63 = vsel %vm21459_vm7, %v14058_v28, %v14062_v43  ;;  %v14118_v12 = vshll.u32 %v21293_v16, 16  ;;  %v14443_v55 = vld [vmem:[#allocation2 + $0xc] sm:$0xe]  ;;  %v27277_v28 = vld [vmem:[#allocation6_spill] sm:$0xff] }
 0x738   : > { %20008 = vmatmul.mubr.msk.bf16.gmra.mrb[52].mxu0 %vm1254_vm10, %v18036_v6  ;;  %v14097_v41 = vsel %vm21459_vm7, %v14092_v9, %v14096_v40  ;;  %v14105_v18 = vor.u32 %v14104_v0, %v14101_v37  ;;  %v18038_v25 = vcombine.low %v14063_v63, %v14073_v42  ;;  %v14087_v24 = vsel %vm21459_vm7, %v14082_v36, %v14086_v61  ;;  %v21160_v9 = vld [vmem:[%s26996_s1 + $0xc8] sm:$0xff]   ;;  %v21161_v0 = vld [vmem:[%s26996_s1 + $0xd0] sm:$0xff]   ;;  %v21162_v36 = vld [vmem:[%s26996_s1 + $0xd8] sm:$0xff]  }
 0x739   : > { %20011 = vmatprep.mubr.msk.bf16.mxu0 %vm1254_vm10, %v18037_v4  ;;  %v18039_v30 = vcombine.low %v14087_v24, %v14097_v41  ;;  %v14116_v26 = vrot.slane %v14115_v8, 4  ;;  %v14511_v52 = vrot.slane %v14509_v54, 4  ;;  %v14120_v27 = vrot.slane %v14118_v12, 5  ;;  %v27278_v57 = vld [vmem:[#allocation9_spill] sm:$0xff]  ;;  %v27280_v40 = vld [vmem:[#allocation10_spill] sm:$0xff]  ;;  %v27281_v42 = vld [vmem:[#allocation7_spill] sm:$0xff] }
 0x73a   : > { %v14106_v29 = vrot.slane %v14105_v18, 4  ;;  %v14512_v62 = vrot.slane %v25988_v5, 5  ;;  %v14516_v49 = vrot.slane %v27275_v1, 5  ;;  %v18061_v38 = vrot.slane %v14443_v55, 9  ;;  %v14444_v5 = vld [vmem:[#allocation2 + $0x18] sm:$0xe] }
 0x73b   : > { %v14121_v43 = vsel %vm21459_vm7, %v14116_v26, %v14120_v27  ;;  %v14519_v50 = vrot.slane %v27276_v35, 5  ;;  %v18062_v4 = vrot.slane %v14444_v5, 9  ;;  %v27279_v37 = vcombine.low %v27277_v28, %v27278_v57  ;;  %v27284_v41 = vld [vmem:[#allocation8_spill] sm:$0xff]  ;;  %v27287_v16 = vld [vmem:[#allocation5_spill] sm:$0xff]  ;;  %v27295_v27 = vld [vmem:[#allocation14_spill] sm:$0xff] }
 0x73c   : > { %v14513_v61 = vsel %vm21739_vm14, %v14511_v52, %v14512_v62  ;;  %v14111_v51 = vsel %vm21459_vm7, %v14106_v29, %v14110_v17  ;;  %v14510_v6 = vsel %vm21739_vm14, %v18061_v38, %v14509_v54  ;;  %v14518_v31 = vrot.slane %v14516_v49, 4  ;;  %v21164_v63 = vld [vmem:[%s26996_s1 + $0xe0] sm:$0xff]   ;;  %v27292_v26 = vld [vmem:[#allocation13_spill] sm:$0xff]  ;;  %v27293_v52 = vld [vmem:[#allocation15_spill] sm:$0xff] }
 0x73d   : > { %v18040_v48 = vcombine.low %v14111_v51, %v14121_v43  ;;  %v18085_v2 = vcombine.low %v14510_v6, %v14513_v61  ;;  %v14517_v17 = vsel %vm21739_vm14, %v18062_v4, %v14516_v49  ;;  %v27282_v8 = vcombine.low %v27280_v40, %v27281_v42  ;;  %v27286_v18 = vld [vmem:[#allocation4_spill] sm:$0xff]  ;;  %v27298_v43 = vld [vmem:[#allocation17_spill] sm:$0xff]  ;;  %v27299_v1 = vld [vmem:[#allocation18_spill] sm:$0xff] }
 0x73e   : > { %v14520_v59 = vsel %vm21739_vm14, %v14518_v31, %v14519_v50  ;;  %v27288_v12 = vcombine.low %v27286_v18, %v27287_v16  ;;  %v27290_v24 = vld [vmem:[#allocation12_spill] sm:$0xff]  ;;  %v27294_v29 = vcombine.low %v27292_v26, %v27293_v52  ;;  %v27300_v49 = vcombine.low %v27298_v43, %v27299_v1  ;;  %v27301_v38 = vld [vmem:[#allocation19_spill] sm:$0xff]  ;;  %v27305_v6 = vld [vmem:[#allocation22_spill] sm:$0xff] }
 0x73f   : > { %v18086_v46 = vcombine.low %v14517_v17, %v14520_v59  ;;  %v27296_v55 = vld [vmem:[#allocation16_spill] sm:$0xff]  ;;  %v27307_v31 = vld [vmem:[#allocation23_spill] sm:$0xff]  ;;  %v27310_v50 = vld [vmem:[#allocation25_spill] sm:$0xff] }
 0x740   : > { %20012 = vmatmul.mubr.msk.bf16.gmra.mrb[56].mxu0 %vm1254_vm10, %v18038_v25  ;;  %v27289_v25 = vld [vmem:[#allocation3_spill] sm:$0xff]  ;;  %v27297_v62 = vcombine.low %v27295_v27, %v27296_v55  ;;  %v27302_v61 = vld [vmem:[#allocation20_spill] sm:$0xff]  ;;  %v27311_v4 = vld [vmem:[#allocation26_spill] sm:$0xff] }
 0x741   : > { %20015 = vmatprep.mubr.msk.bf16.mxu0 %vm1254_vm10, %v18039_v30  ;;  %v27291_v30 = vcombine.low %v27289_v25, %v27290_v24  ;;  %v27303_v51 = vcombine.low %v27301_v38, %v27302_v61  ;;  %v27308_v5 = vld [vmem:[#allocation24_spill] sm:$0xff]  ;;  %v27312_v59 = vcombine.low %v27310_v50, %v27311_v4  ;;  %v27313_v17 = vld [vmem:[#allocation27_spill] sm:$0xff]  ;;  %v27316_v57 = vld [vmem:[#allocation29_spill] sm:$0xff] }
 0x742   : > { %v27309_v35 = vcombine.low %v27307_v31, %v27308_v5  ;;  %v21163_v28 = vld [vmem:[#allocation2 + $0x18] sm:$0xff]   ;;  %v21169_v40 = vld [vmem:[%s26996_s1 + $0xe8] sm:$0xff]   ;;  %v21166_v42 = vld [vmem:[#allocation2 + $0x30] sm:$0xff]  }
 0x743   : > { %v21170_v18 = vld [vmem:[#allocation2 + $0x54] sm:$0xff]   ;;  %v21171_v16 = vld [vmem:[#allocation2 + $0x60] sm:$0xff]  }
 0x744   : > { %v21173_v25 = vld [vmem:[#allocation2 + $0x78] sm:$0xff]   ;;  %v15328_v43 = vld [vmem:[#allocation2 + $0x24] sm:$0xf] }
 0x745   : > { %v15325_v24 = vld [vmem:[#allocation2 + $0x18] sm:$0xf]  ;;  %v21177_v50 = vld [vmem:[#allocation2 + $0x9c] sm:$0xff]  }
 0x746   : > { %v15374_v27 = vshrl.u32 %v15325_v24, 16  ;;  %v15377_v55 = vshll.u32 %v15325_v24, 16 }
 0x748   : > { %20016 = vmatmul.mubr.msk.bf16.gmra.mrb[60].mxu0 %vm1254_vm10, %v18040_v48  ;;  %v27304_v48 = vld [vmem:[#allocation21_spill] sm:$0xff]  ;;  %v15376_v38 = vrot.slane %v15374_v27, 4  ;;  %v15379_v61 = vrot.slane %v15377_v55, 5 }
 0x749   : > { %20027 = vmatprep.mubr.msk.bf16.mxu0 %vm1254_vm10, %v18085_v2  ;;  %v27306_v2 = vcombine.low %v27304_v48, %v27305_v6  ;;  %v15401_v48 = vshll.u32 %v15328_v43, 16  ;;  %v27320_v6 = vld [vmem:[#allocation35_spill] sm:$0xff] }
 0x74a   : > { %v15411_v31 = vshrl.u32 %v27320_v6, 16  ;;  %v15380_v4 = vor.u32 %v15379_v61, %v15376_v38 }
 0x750   : > { %20028 = vmatmul.mubr.msk.bf16.vlgmr.msra.gmra.mrb[32].mxu0 %vm1254_vm10, %v18086_v46  ;;  %v27314_v46 = vld [vmem:[#allocation28_spill] sm:$0xff] }
 0x751   : > { %20060 = vmatpush3.bf16.msra.mxu0 %v26342_v58  ;;  %20031 = vmatprep.mubr.msk.bf16.mxu0 %vm1254_vm10, %v27279_v37  ;;  %v27283_v58 = vld [vmem:[#allocation11_spill] sm:$0xff]  ;;  %v27317_v37 = vld [vmem:[#allocation30_spill] sm:$0xff] }
 0x752   : > { %20061 = vmatprep.subr.bf16.mxu0 %v21160_v9  ;;  %v27285_v54 = vcombine.low %v27283_v58, %v27284_v41  ;;  %v21167_v58 = vld [vmem:[#allocation2 + $0x3c] sm:$0xff]  }
 0x753   : > { %v21179_v41 = vld [vmem:[%s26996_s1 + $0xf8] sm:$0xff]  }
 0x755   : > { %20062 = vmatpush3.bf16.msra.mxu0 %v21160_v9  ;;  %v27315_v9 = vcombine.low %v27313_v17, %v27314_v46 }
 0x756   : > { %20063 = vmatprep.subr.bf16.mxu0 %v21161_v0 }
 0x758   : > { %20032 = vmatmul.mubr.msk.bf16.gmra.mrb[36].mxu0 %vm1254_vm10, %v27282_v8  ;;  %v21174_v8 = vld [vmem:[%s26996_s1 + $0xf0] sm:$0xff]  }
 0x759   : > { %20035 = vmatprep.mubr.msk.bf16.mxu0 %vm1254_vm10, %v27285_v54  ;;  %20064 = vmatpush3.bf16.msra.mxu0 %v21161_v0  ;;  %v27318_v0 = vcombine.low %v27316_v57, %v27317_v37  ;;  %v21168_v54 = vld [vmem:[#allocation2 + $0x48] sm:$0xff]   ;;  %v15413_v37 = vrot.slane %v15411_v31, 4 }
 0x75a   : > { %20065 = vmatprep.subr.bf16.mxu0 %v21162_v36 }
 0x75d   : > { %20066 = vmatpush3.bf16.msra.mxu0 %v21162_v36  ;;  %v21165_v36 = vld [vmem:[#allocation2 + $0x24] sm:$0xff]  }
 0x75e   : > { %20099 = vmatprep.subr.bf16.mxu0 %v21164_v63 }
 0x760   : > { %20036 = vmatmul.mubr.msk.bf16.gmra.mrb[40].mxu0 %vm1254_vm10, %v27288_v12  ;;  %v21172_v12 = vld [vmem:[#allocation2 + $0x6c] sm:$0xff]  }
 0x761   : > { %20039 = vmatprep.mubr.msk.bf16.mxu0 %vm1254_vm10, %v27291_v30  ;;  %v27319_v30 = vld [vmem:[#allocation33_spill] sm:$0xff] }
 0x762   : > { %v15383_v26 = vshll.u32 %v27319_v30, 16  ;;  %v15387_v52 = vshrl.u32 %v27319_v30, 16 }
 0x764   : > { %v15385_v1 = vrot.slane %v15383_v26, 5 }
 0x768   : > { %20040 = vmatmul.mubr.msk.bf16.gmra.mrb[44].mxu0 %vm1254_vm10, %v27294_v29  ;;  %v21175_v29 = vld [vmem:[#allocation2 + $0x84] sm:$0xff]  }
 0x769   : > { %20043 = vmatprep.mubr.msk.bf16.mxu0 %vm1254_vm10, %v27297_v62  ;;  %v21176_v62 = vld [vmem:[#allocation2 + $0x90] sm:$0xff]  }
 0x770   : > { %20044 = vmatmul.mubr.msk.bf16.gmra.mrb[48].mxu0 %vm1254_vm10, %v27300_v49  ;;  %v15389_v49 = vrot.slane %v15387_v52, 4 }
 0x771   : > { %20047 = vmatprep.mubr.msk.bf16.mxu0 %vm1254_vm10, %v27303_v51  ;;  %v15398_v51 = vshrl.u32 %v15328_v43, 16 }
 0x772   : > { %v15390_v5 = vor.u32 %v15389_v49, %v15385_v1 }
 0x773   : > { %v15400_v46 = vrot.slane %v15398_v51, 4  ;;  %v21181_v51 = vld [vmem:[#allocation2 + $0xc0] sm:$0xff]  }
 0x778   : > { %20048 = vmatmul.mubr.msk.bf16.gmra.mrb[52].mxu0 %vm1254_vm10, %v27306_v2  ;;  %v15407_v2 = vshll.u32 %v27320_v6, 16 }
 0x779   : > { %20051 = vmatprep.mubr.msk.bf16.mxu0 %vm1254_vm10, %v27309_v35  ;;  %v15331_v35 = vld [vmem:[#allocation2 + $0x30] sm:$0xf] }
 0x77a   : > { %v26594_v57 = vrot.slane %v15407_v2, 5  ;;  %v27324_v2 = vld [vmem:[#allocation38_spill] sm:$0xff] }
 0x77b   : > { %v15441_v31 = vshll.u32 %v27324_v2, 16 }
 0x77c   : > { %v15414_v24 = vor.u32 %v15413_v37, %v26594_v57 }
 0x780   : > { %20052 = vmatmul.mubr.msk.bf16.gmra.mrb[56].mxu0 %vm1254_vm10, %v27312_v59  ;;  %v27321_v59 = vld [vmem:[#allocation34_spill] sm:$0xff] }
 0x781   : > { %20055 = vmatprep.mubr.msk.bf16.mxu0 %vm1254_vm10, %v27315_v9  ;;  %v15393_v17 = vshll.u32 %v27321_v59, 16  ;;  %v15403_v9 = vrot.slane %v15401_v48, 5  ;;  %v15415_v48 = vrot.slane %v15414_v24, 4 }
 0x788   : > { %20056 = vmatmul.mubr.msk.bf16.gmra.mrb[60].mxu0 %vm1254_vm10, %v27318_v0  ;;  %v27322_v0 = vld [vmem:[#allocation37_spill] sm:$0xff] }
 0x789   : > { %20067 = vmatprep.mubr.msk.bf16.mxu0 %vm1254_vm10, %v21163_v28  ;;  %v21178_v28 = vld [vmem:[#allocation2 + $0xa8] sm:$0xff]  }
 0x790   : > { %20068 = vmatmul.mubr.msk.bf16.vlgmr.msra.gmra.mrb[32].mxu0 %vm1254_vm10, %v21165_v36  ;;  %v15431_v36 = vshll.u32 %v27322_v0, 16 }
 0x791   : > { %20100 = vmatpush3.bf16.msra.mxu0 %v21164_v63  ;;  %20071 = vmatprep.mubr.msk.bf16.mxu0 %vm1254_vm10, %v21166_v42  ;;  %v26580_v63 = vld [vmem:[%s26996_s1 + $0x100] sm:$0xff]   ;;  %v15422_v42 = vshrl.u32 %v15331_v35, 16 }
 0x792   : > { %20101 = vmatprep.subr.bf16.mxu0 %v21169_v40  ;;  %v26602_v30 = vrot.slane %v15431_v36, 5  ;;  %v16093_v36 = vld [vmem:[#allocation2 + $0xcc] sm:$0xe] }
 0x793   : > { %v15424_v52 = vrot.slane %v15422_v42, 4 }
 0x795   : > { %20102 = vmatpush3.bf16.msra.mxu0 %v21169_v40  ;;  %v15435_v40 = vshrl.u32 %v27322_v0, 16 }
 0x796   : > { %20103 = vmatprep.subr.bf16.mxu0 %v21174_v8 }
 0x797   : > { %v15437_v26 = vrot.slane %v15435_v40, 4 }
 0x798   : > { %20072 = vmatmul.mubr.msk.bf16.gmra.mrb[36].mxu0 %vm1254_vm10, %v21167_v58  ;;  %v15391_v58 = vrot.slane %v15390_v5, 4  ;;  %v27325_v5 = vld [vmem:[#allocation39_spill] sm:$0xff] }
 0x799   : > { %20075 = vmatprep.mubr.msk.bf16.mxu0 %vm1254_vm10, %v21168_v54  ;;  %20104 = vmatpush3.bf16.msra.mxu0 %v21174_v8  ;;  %v15425_v8 = vshll.u32 %v15331_v35, 16  ;;  %v15404_v54 = vor.u32 %v15403_v9, %v15400_v46  ;;  %v15438_v6 = vor.u32 %v15437_v26, %v26602_v30  ;;  %v15455_v35 = vshll.u32 %v27325_v5, 16  ;;  %v27326_v46 = vld [vmem:[#allocation41_spill] sm:$0xff]  ;;  %v26614_v9 = vld [vmem:[#allocation2 + $0xd0] sm:$0xf] }
 0x79a   : > { %20105 = vmatprep.subr.bf16.mxu0 %v21179_v41  ;;  %v15483_v0 = vshrl.u32 %v27326_v46, 16  ;;  %v16249_v40 = vrot.slane %v26614_v9, 5 }
 0x79b   : > { %v15405_v49 = vrot.slane %v15404_v54, 4 }
 0x79c   : > { %v16251_v26 = vrot.slane %v16249_v40, 4 }
 0x79d   : > { %20106 = vmatpush3.bf16.msra.mxu0 %v21179_v41  ;;  %v15381_v41 = vrot.slane %v15380_v4, 4 }
 0x79e   : > { %20139 = vmatprep.subr.bf16.mxu0 %v26580_v63 }
 0x79f   : > { %v15386_v43 = vsel %vm21459_vm7, %v15381_v41, %v15385_v1  ;;  %v15479_v1 = vshll.u32 %v27326_v46, 16  ;;  %v27327_v41 = vld [vmem:[#allocation45_spill] sm:$0xff] }
 0x7a0   : > { %20076 = vmatmul.mubr.msk.bf16.gmra.mrb[40].mxu0 %vm1254_vm10, %v21170_v18  ;;  %v27323_v18 = vld [vmem:[#allocation36_spill] sm:$0xff]  ;;  %v15503_v54 = vshll.u32 %v27327_v41, 16 }
 0x7a1   : > { %20079 = vmatprep.mubr.msk.bf16.mxu0 %vm1254_vm10, %v21171_v16  ;;  %v15417_v16 = vshll.u32 %v27323_v18, 16  ;;  %v15507_v18 = vshrl.u32 %v27327_v41, 16 }
 0x7a3   : > { %v15419_v38 = vrot.slane %v15417_v16, 5  ;;  %v18224_v16 = vrot.slane %v16093_v36, 9 }
 0x7a5   : > { %v15420_v46 = vsel %vm21459_vm7, %v15415_v48, %v15419_v38 }
 0x7a8   : > { %20080 = vmatmul.mubr.msk.bf16.gmra.mrb[44].mxu0 %vm1254_vm10, %v21172_v12  ;;  %v15334_v12 = vld [vmem:[#allocation2 + $0x3c] sm:$0xf] }
 0x7a9   : > { %20083 = vmatprep.mubr.msk.bf16.mxu0 %vm1254_vm10, %v21173_v25  ;;  %v15395_v25 = vrot.slane %v15393_v17, 5  ;;  %v15446_v55 = vshrl.u32 %v15334_v12, 16  ;;  %v15449_v61 = vshll.u32 %v15334_v12, 16  ;;  %v15459_v17 = vshrl.u32 %v27325_v5, 16 }
 0x7aa   : > { %v15439_v12 = vrot.slane %v15438_v6, 4  ;;  %v15443_v6 = vrot.slane %v15441_v31, 5  ;;  %v26636_v5 = vrot.slane %v15503_v54, 5  ;;  %v15518_v54 = vshrl.u32 %v15343_v3, 16 }
 0x7ab   : > { %v15396_v27 = vsel %vm21459_vm7, %v15391_v58, %v15395_v25  ;;  %v15448_v37 = vrot.slane %v15446_v55, 4  ;;  %v15340_v58 = vld [vmem:[#allocation2 + $0x54] sm:$0xf]  ;;  %v26624_v25 = vrot.slane %v15455_v35, 5  ;;  %v26626_v55 = vrot.slane %v15479_v1, 5 }
 0x7ac   : > { %v18173_v4 = vcombine.low %v15386_v43, %v15396_v27  ;;  %v15485_v43 = vrot.slane %v15483_v0, 4  ;;  %v15509_v35 = vrot.slane %v15507_v18, 4  ;;  %v27328_v0 = vld [vmem:[#allocation40_spill] sm:$0xff]  ;;  %v15444_v31 = vsel %vm21459_vm7, %v15439_v12, %v15443_v6  ;;  %v27330_v12 = vld [vmem:[#allocation50_spill] sm:$0xff] }
 0x7ad   : > { %v15465_v36 = vshll.u32 %v27328_v0, 16  ;;  %v15521_v18 = vshll.u32 %v15343_v3, 16 }
 0x7af   : > { %v15523_v0 = vrot.slane %v15521_v18, 5 }
 0x7b0   : > { %20084 = vmatmul.mubr.msk.bf16.gmra.mrb[48].mxu0 %vm1254_vm10, %v21175_v29  ;;  %v15427_v29 = vrot.slane %v15425_v8, 5  ;;  %v15451_v8 = vrot.slane %v15449_v61, 5  ;;  %v15494_v61 = vshrl.u32 %v15340_v58, 16 }
 0x7b1   : > { %20087 = vmatprep.mubr.msk.bf16.mxu0 %vm1254_vm10, %v21176_v62  ;;  %v21180_v62 = vld [vmem:[#allocation2 + $0xb4] sm:$0xff]  }
 0x7b2   : > { %v15428_v59 = vor.u32 %v15427_v29, %v15424_v52  ;;  %v21182_v52 = vld [vmem:[#allocation2 + $0xcc] sm:$0xff]   ;;  %v15461_v29 = vrot.slane %v15459_v17, 4  ;;  %v15410_v17 = vsel %vm21459_vm7, %v15405_v49, %v26594_v57  ;;  %v15486_v57 = vor.u32 %v15485_v43, %v26626_v55  ;;  %v27331_v43 = vld [vmem:[#allocation47_spill] sm:$0xff] }
 0x7b3   : > { %v15496_v49 = vrot.slane %v15494_v61, 4  ;;  %v18174_v48 = vcombine.low %v15410_v17, %v15420_v46  ;;  %v15513_v61 = vshll.u32 %v27331_v43, 16 }
 0x7b4   : > { %v15429_v1 = vrot.slane %v15428_v59, 4  ;;  %v15510_v59 = vor.u32 %v15509_v35, %v26636_v5  ;;  %v15487_v35 = vrot.slane %v15486_v57, 4 }
 0x7b6   : > { %v15511_v46 = vrot.slane %v15510_v59, 4 }
 0x7b8   : > { %20088 = vmatmul.mubr.msk.bf16.gmra.mrb[52].mxu0 %vm1254_vm10, %v21177_v50  ;;  %v15337_v50 = vld [vmem:[#allocation2 + $0x48] sm:$0xf] }
 0x7b9   : > { %20091 = vmatprep.mubr.msk.bf16.mxu0 %vm1254_vm10, %v21178_v28  ;;  %v26616_v28 = vld [vmem:[#allocation2 + $0xd4] sm:$0x1]  ;;  %v15470_v24 = vshrl.u32 %v15337_v50, 16  ;;  %v15473_v27 = vshll.u32 %v15337_v50, 16 }
 0x7ba   : > { %v16252_v42 = vrot.slane %v26616_v28, 5 }
 0x7bb   : > { %v15475_v41 = vrot.slane %v15473_v27, 5  ;;  %v15467_v27 = vrot.slane %v15465_v36, 5 }
 0x7bc   : > { %v26634_v2 = vsel %vm21739_vm14, %v16251_v26, %v16252_v42  ;;  %v15462_v42 = vor.u32 %v15461_v29, %v26624_v25  ;;  %v15346_v26 = vld [vmem:[#allocation2 + $0x6c] sm:$0xf] }
 0x7bd   : > { %v15542_v3 = vshrl.u32 %v15346_v26, 16 }
 0x7c0   : > { %20092 = vmatmul.mubr.msk.bf16.gmra.mrb[56].mxu0 %vm1254_vm10, %v21180_v62  ;;  %v26630_v62 = vsel %vm21739_vm14, %v18224_v16, %v16249_v40  ;;  %v15452_v40 = vor.u32 %v15451_v8, %v15448_v37  ;;  %v15434_v16 = vsel %vm21459_vm7, %v15429_v1, %v26602_v30  ;;  %v27329_v37 = vld [vmem:[#allocation42_spill] sm:$0xff]  ;;  %v21184_v30 = vld [vmem:[%s26996_s1 + $0x108] sm:$0xff]   ;;  %v15520_v1 = vrot.slane %v15518_v54, 4 }
 0x7c1   : > { %20095 = vmatprep.mubr.msk.bf16.mxu0 %vm1254_vm10, %v21181_v51  ;;  %v15497_v51 = vshll.u32 %v15340_v58, 16  ;;  %v18248_v50 = vcombine.low %v26630_v62, %v26634_v2  ;;  %v15472_v58 = vrot.slane %v15470_v24, 4  ;;  %v15489_v8 = vshll.u32 %v27329_v37, 16 }
 0x7c2   : > { %v15527_v24 = vshll.u32 %v27330_v12, 16  ;;  %v15453_v29 = vrot.slane %v15452_v40, 4  ;;  %v15545_v40 = vshll.u32 %v15346_v26, 16  ;;  %v15524_v18 = vor.u32 %v15523_v0, %v15520_v1 }
 0x7c3   : > { %v15499_v38 = vrot.slane %v15497_v51, 5  ;;  %v15463_v51 = vrot.slane %v15462_v42, 4  ;;  %v15476_v6 = vor.u32 %v15475_v41, %v15472_v58  ;;  %v15491_v37 = vrot.slane %v15489_v8, 5  ;;  %v27332_v58 = vld [vmem:[#allocation53_spill] sm:$0xff] }
 0x7c4   : > { %v15458_v36 = vsel %vm21459_vm7, %v15453_v29, %v26624_v25  ;;  %v15515_v42 = vrot.slane %v15513_v61, 5  ;;  %v15551_v41 = vshll.u32 %v27332_v58, 16  ;;  %v15555_v57 = vshrl.u32 %v27332_v58, 16  ;;  %v27334_v61 = vld [vmem:[#allocation56_spill] sm:$0xff] }
 0x7c5   : > { %v15500_v17 = vor.u32 %v15499_v38, %v15496_v49  ;;  %v15349_v49 = vld [vmem:[#allocation2 + $0x78] sm:$0xf]  ;;  %v15468_v38 = vsel %vm21459_vm7, %v15463_v51, %v15467_v27  ;;  %v15477_v59 = vrot.slane %v15476_v6, 4  ;;  %v15547_v26 = vrot.slane %v15545_v40, 5 }
 0x7c6   : > { %v15516_v25 = vsel %vm21459_vm7, %v15511_v46, %v15515_v42  ;;  %v15569_v29 = vshll.u32 %v15349_v49, 16  ;;  %v26684_v27 = vrot.slane %v15551_v41, 5  ;;  %v15557_v43 = vrot.slane %v15555_v57, 4  ;;  %v21186_v40 = vld [vmem:[%s26996_s1 + $0x118] sm:$0xff]   ;;  %v27335_v42 = vld [vmem:[#allocation54_spill] sm:$0xff] }
 0x7c7   : > { %v15501_v54 = vrot.slane %v15500_v17, 4  ;;  %v15575_v51 = vshll.u32 %v27334_v61, 16  ;;  %v15579_v6 = vshrl.u32 %v27334_v61, 16  ;;  %v15482_v17 = vsel %vm21459_vm7, %v15477_v59, %v26626_v55  ;;  %v15355_v57 = vld [vmem:[#allocation2 + $0x90] sm:$0xf] }
 0x7c8   : > { %20096 = vmatmul.mubr.msk.bf16.gmra.mrb[60].mxu0 %vm1254_vm10, %v21182_v52  ;;  %v18175_v52 = vcombine.low %v15434_v16, %v15444_v31  ;;  %v27333_v16 = vld [vmem:[#allocation51_spill] sm:$0xff]  ;;  %v15561_v58 = vshll.u32 %v27335_v42, 16  ;;  %v15571_v55 = vrot.slane %v15569_v29, 5 }
 0x7c9   : > { %20107 = vmatprep.mubr.msk.bf16.mxu0 %vm1254_vm10, %v18173_v4  ;;  %v15531_v4 = vshrl.u32 %v27330_v12, 16  ;;  %v26663_v12 = vrot.slane %v15527_v24, 5  ;;  %v15537_v8 = vshll.u32 %v27333_v16, 16  ;;  %v15544_v24 = vrot.slane %v15542_v3, 4 }
 0x7ca   : > { %v15506_v46 = vsel %vm21459_vm7, %v15501_v54, %v26636_v5  ;;  %v15525_v3 = vrot.slane %v15524_v18, 4  ;;  %v27336_v54 = vld [vmem:[#allocation59_spill] sm:$0xff]  ;;  %v15614_v16 = vshrl.u32 %v15355_v57, 16 }
 0x7cb   : > { %v15533_v31 = vrot.slane %v15531_v4, 4  ;;  %v18178_v0 = vcombine.low %v15506_v46, %v15516_v25  ;;  %v15599_v25 = vshll.u32 %v27336_v54, 16  ;;  %v15603_v18 = vshrl.u32 %v27336_v54, 16 }
 0x7cd   : > { %v15534_v4 = vor.u32 %v15533_v31, %v26663_v12  ;;  %v15352_v31 = vld [vmem:[#allocation2 + $0x84] sm:$0xf]  ;;  %v15605_v42 = vrot.slane %v15603_v18, 4 }
 0x7ce   : > { %v15590_v59 = vshrl.u32 %v15352_v31, 16 }
 0x7cf   : > { %v15535_v5 = vrot.slane %v15534_v4, 4 }
 0x7d0   : > { %20108 = vmatmul.mubr.msk.bf16.vlgmr.msra.gmra.mrb[32].mxu0 %vm1254_vm10, %v18174_v48  ;;  %v15492_v48 = vsel %vm21459_vm7, %v15487_v35, %v15491_v37  ;;  %v18176_v35 = vcombine.low %v15458_v36, %v15468_v38  ;;  %v15539_v37 = vrot.slane %v15537_v8, 5  ;;  %v15548_v36 = vor.u32 %v15547_v26, %v15544_v24  ;;  %v27337_v24 = vld [vmem:[#allocation64_spill] sm:$0xff] }
 0x7d1   : > { %20140 = vmatpush3.bf16.msra.mxu0 %v26580_v63  ;;  %20111 = vmatprep.mubr.msk.bf16.mxu0 %vm1254_vm10, %v18175_v52  ;;  %v21185_v63 = vld [vmem:[%s26996_s1 + $0x110] sm:$0xff]   ;;  %v15566_v52 = vshrl.u32 %v15349_v49, 16  ;;  %v18177_v1 = vcombine.low %v15482_v17, %v15492_v48  ;;  %v26700_v49 = vrot.slane %v15575_v51, 5  ;;  %v15581_v38 = vrot.slane %v15579_v6, 4 }
 0x7d2   : > { %20141 = vmatprep.subr.bf16.mxu0 %v21184_v30  ;;  %v15593_v48 = vshll.u32 %v15352_v31, 16  ;;  %v15617_v8 = vshll.u32 %v15355_v57, 16  ;;  %v15623_v26 = vshll.u32 %v27337_v24, 16  ;;  %v15627_v4 = vshrl.u32 %v27337_v24, 16  ;;  %v21296_v24 = vld [vmem:[#allocation2 + $0xa0] sm:$0xf] }
 0x7d3   : > { %v15568_v41 = vrot.slane %v15566_v52, 4  ;;  %v15530_v52 = vsel %vm21459_vm7, %v15525_v3, %v26663_v12  ;;  %v15549_v29 = vrot.slane %v15548_v36, 4  ;;  %v15540_v51 = vsel %vm21459_vm7, %v15535_v5, %v15539_v37  ;;  %v15358_v36 = vld [vmem:[#allocation2 + $0x9c] sm:$0xf] }
 0x7d4   : > { %v15592_v46 = vrot.slane %v15590_v59, 4  ;;  %v26713_v31 = vrot.slane %v15599_v25, 5  ;;  %v15616_v57 = vrot.slane %v15614_v16, 4  ;;  %v15619_v54 = vrot.slane %v15617_v8, 5  ;;  %v21295_v25 = vld [vmem:[#allocation2 + $0x8c] sm:$0x1] }
 0x7d5   : > { %20142 = vmatpush3.bf16.msra.mxu0 %v21184_v30  ;;  %v15558_v30 = vor.u32 %v15557_v43, %v26684_v27  ;;  %v15563_v43 = vrot.slane %v15561_v58, 5  ;;  %v15572_v61 = vor.u32 %v15571_v55, %v15568_v41  ;;  %v26715_v12 = vrot.slane %v15623_v26, 5 }
 0x7d6   : > { %20143 = vmatprep.subr.bf16.mxu0 %v21185_v63  ;;  %v15629_v3 = vrot.slane %v15627_v4, 4  ;;  %v18179_v58 = vcombine.low %v15530_v52, %v15540_v51  ;;  %v15554_v37 = vsel %vm21459_vm7, %v15549_v29, %v26684_v27  ;;  %v15641_v59 = vshll.u32 %v15358_v36, 16  ;;  %v15361_v52 = vld [vmem:[#allocation2 + $0xa8] sm:$0xf] }
 0x7d7   : > { %v15559_v6 = vrot.slane %v15558_v30, 4  ;;  %v15573_v41 = vrot.slane %v15572_v61, 4  ;;  %v15606_v30 = vor.u32 %v15605_v42, %v26713_v31  ;;  %v15609_v18 = vshll.u32 %v21295_v25, 16 }
 0x7d8   : > { %20112 = vmatmul.mubr.msk.bf16.gmra.mrb[36].mxu0 %vm1254_vm10, %v18176_v35  ;;  %v21294_v35 = vld [vmem:[#allocation2 + $0x80] sm:$0x1]  ;;  %v15620_v16 = vor.u32 %v15619_v54, %v15616_v57  ;;  %v15647_v26 = vshll.u32 %v21296_v24, 16  ;;  %v15651_v4 = vshrl.u32 %v21296_v24, 16  ;;  %v15671_v51 = vshll.u32 %v26279_v7, 16 }
 0x7d9   : > { %20115 = vmatprep.mubr.msk.bf16.mxu0 %vm1254_vm10, %v18177_v1  ;;  %20144 = vmatpush3.bf16.msra.mxu0 %v21185_v63  ;;  %v15582_v63 = vor.u32 %v15581_v38, %v26700_v49  ;;  %v15585_v17 = vshll.u32 %v21294_v35, 16  ;;  %v15595_v1 = vrot.slane %v15593_v48, 5  ;;  %v15564_v55 = vsel %vm21459_vm7, %v15559_v6, %v15563_v43  ;;  %v21297_v43 = vld [vmem:[#allocation2 + $0x98] sm:$0x1] }
 0x7da   : > { %20145 = vmatprep.subr.bf16.mxu0 %v21186_v40  ;;  %v15638_v38 = vshrl.u32 %v15358_v36, 16  ;;  %v18180_v8 = vcombine.low %v15554_v37, %v15564_v55  ;;  %v15578_v27 = vsel %vm21459_vm7, %v15573_v41, %v26700_v49  ;;  %v15633_v61 = vshll.u32 %v21297_v43, 16 }
 0x7db   : > { %v15583_v5 = vrot.slane %v15582_v63, 4  ;;  %v15587_v48 = vrot.slane %v15585_v17, 5  ;;  %v15675_v6 = vshrl.u32 %v26279_v7, 16  ;;  %v15607_v35 = vrot.slane %v15606_v30, 4  ;;  %v15364_v7 = vld [vmem:[#allocation2 + $0xb4] sm:$0xf] }
 0x7dc   : > { %v15640_v17 = vrot.slane %v15638_v38, 4  ;;  %v15662_v49 = vshrl.u32 %v15361_v52, 16  ;;  %v15665_v57 = vshll.u32 %v15361_v52, 16  ;;  %v26733_v36 = vrot.slane %v15647_v26, 5  ;;  %v21298_v38 = vld [vmem:[#allocation2 + $0xa4] sm:$0x1] }
 0x7dd   : > { %20146 = vmatpush3.bf16.msra.mxu0 %v21186_v40  ;;  %v15596_v40 = vor.u32 %v15595_v1, %v15592_v46  ;;  %v15588_v29 = vsel %vm21459_vm7, %v15583_v5, %v15587_v48  ;;  %v15643_v46 = vrot.slane %v15641_v59, 5  ;;  %v15621_v1 = vrot.slane %v15620_v16, 4  ;;  %v15367_v26 = vld [vmem:[#allocation2 + $0xc0] sm:$0xf] }
 0x7de   : > { %v18181_v54 = vcombine.low %v15578_v27, %v15588_v29  ;;  %v15635_v41 = vrot.slane %v15633_v61, 5  ;;  %v26736_v37 = vrot.slane %v15671_v51, 5  ;;  %v15677_v55 = vrot.slane %v15675_v6, 4  ;;  %v21299_v27 = vld [vmem:[#allocation2 + $0xb8] sm:$0xf] }
 0x7df   : > { %v15597_v63 = vrot.slane %v15596_v40, 4  ;;  %v15644_v30 = vor.u32 %v15643_v46, %v15640_v17  ;;  %v15657_v59 = vshll.u32 %v21298_v38, 16  ;;  %v15626_v48 = vsel %vm21459_vm7, %v15621_v1, %v26715_v12  ;;  %v21300_v29 = vld [vmem:[#allocation2 + $0xc4] sm:$0xf]  ;;  %v21301_v17 = vld [vmem:[#allocation2 + $0xb0] sm:$0x1] }
 0x7e0   : > { %20116 = vmatmul.mubr.msk.bf16.gmra.mrb[40].mxu0 %vm1254_vm10, %v18178_v0  ;;  %v15630_v0 = vor.u32 %v15629_v3, %v26715_v12  ;;  %v15611_v3 = vrot.slane %v15609_v18, 5  ;;  %v15664_v18 = vrot.slane %v15662_v49, 4  ;;  %v15667_v16 = vrot.slane %v15665_v57, 5  ;;  %v15370_v49 = vld [vmem:[#allocation2 + $0xcc] sm:$0xf] }
 0x7e1   : > { %20119 = vmatprep.mubr.msk.bf16.mxu0 %vm1254_vm10, %v18179_v58  ;;  %v15653_v58 = vrot.slane %v15651_v4, 4  ;;  %v15602_v5 = vsel %vm21459_vm7, %v15597_v63, %v26713_v31  ;;  %v15695_v31 = vshll.u32 %v21299_v27, 16  ;;  %v15699_v24 = vshrl.u32 %v21299_v27, 16 }
 0x7e2   : > { %v15631_v42 = vrot.slane %v15630_v0, 4  ;;  %v15612_v40 = vsel %vm21459_vm7, %v15607_v35, %v15611_v3  ;;  %v15678_v4 = vor.u32 %v15677_v55, %v26736_v37  ;;  %v15689_v52 = vshll.u32 %v15364_v7, 16 }
 0x7e3   : > { %v15654_v0 = vor.u32 %v15653_v58, %v26733_v36  ;;  %v15719_v43 = vshll.u32 %v21300_v29, 16  ;;  %v15723_v61 = vshrl.u32 %v21300_v29, 16  ;;  %v18182_v51 = vcombine.low %v15602_v5, %v15612_v40 }
 0x7e4   : > { %v15636_v25 = vsel %vm21459_vm7, %v15631_v42, %v15635_v41  ;;  %v15645_v6 = vrot.slane %v15644_v30, 4  ;;  %v15659_v63 = vrot.slane %v15657_v59, 5  ;;  %v15668_v35 = vor.u32 %v15667_v16, %v15664_v18 }
 0x7e5   : > { %v18183_v12 = vcombine.low %v15626_v48, %v15636_v25  ;;  %v15681_v46 = vshll.u32 %v21301_v17, 16  ;;  %v15710_v1 = vshrl.u32 %v15367_v26, 16  ;;  %v15713_v42 = vshll.u32 %v15367_v26, 16  ;;  %v21302_v26 = vld [vmem:[#allocation2 + $0xbc] sm:$0x1] }
 0x7e6   : > { %v15655_v57 = vrot.slane %v15654_v0, 4  ;;  %v15697_v3 = vrot.slane %v15695_v31, 5  ;;  %v15701_v58 = vrot.slane %v15699_v24, 4  ;;  %v15679_v41 = vrot.slane %v15678_v4, 4 }
 0x7e7   : > { %v15691_v55 = vrot.slane %v15689_v52, 5  ;;  %v15725_v38 = vrot.slane %v15723_v61, 4  ;;  %v15734_v5 = vshrl.u32 %v15370_v49, 16  ;;  %v15737_v40 = vshll.u32 %v15370_v49, 16 }
 0x7e8   : > { %20120 = vmatmul.mubr.msk.bf16.gmra.mrb[44].mxu0 %vm1254_vm10, %v18180_v8  ;;  %v15686_v8 = vshrl.u32 %v15364_v7, 16  ;;  %v15721_v7 = vrot.slane %v15719_v43, 5  ;;  %v15743_v30 = vshll.u32 %v26614_v9, 16  ;;  %v15747_v59 = vshrl.u32 %v26614_v9, 16 }
 0x7e9   : > { %20123 = vmatprep.mubr.msk.bf16.mxu0 %vm1254_vm10, %v18181_v54  ;;  %v15669_v48 = vrot.slane %v15668_v35, 4  ;;  %v15683_v25 = vrot.slane %v15681_v46, 5  ;;  %v15712_v18 = vrot.slane %v15710_v1, 4  ;;  %v15715_v16 = vrot.slane %v15713_v42, 5 }
 0x7ea   : > { %v15688_v54 = vrot.slane %v15686_v8, 4  ;;  %v15650_v0 = vsel %vm21459_vm7, %v15645_v6, %v26733_v36  ;;  %v15660_v8 = vsel %vm21459_vm7, %v15655_v57, %v15659_v63  ;;  %v15702_v27 = vor.u32 %v15701_v58, %v15697_v3  ;;  %v21303_v6 = vld [vmem:[#allocation2 + $0xc8] sm:$0x1] }
 0x7eb   : > { %v15684_v31 = vsel %vm21459_vm7, %v15679_v41, %v15683_v25  ;;  %v15705_v4 = vshll.u32 %v21302_v26, 16  ;;  %v15726_v52 = vor.u32 %v15725_v38, %v15721_v7  ;;  %v15736_v9 = vrot.slane %v15734_v5, 4  ;;  %v27345_v26 = vld [vmem:[#allocation52_spill] sm:$0xff] }
 0x7ec   : > { %v15692_v24 = vor.u32 %v15691_v55, %v15688_v54  ;;  %v15739_v29 = vrot.slane %v15737_v40, 5  ;;  %v15745_v43 = vrot.slane %v15743_v30, 5  ;;  %v15749_v61 = vrot.slane %v15747_v59, 4 }
 0x7ed   : > { %v15674_v36 = vsel %vm21459_vm7, %v15669_v48, %v26736_v37  ;;  %v15729_v63 = vshll.u32 %v21303_v6, 16  ;;  %v15703_v17 = vrot.slane %v15702_v27, 4  ;;  %v15707_v46 = vrot.slane %v15705_v4, 5  ;;  %v27342_v27 = vld [vmem:[#allocation48_spill] sm:$0xff]  ;;  %v27356_v6 = vld [vmem:[#allocation63_spill] sm:$0xff] }
 0x7ee   : > { %v18185_v35 = vcombine.low %v15674_v36, %v15684_v31  ;;  %v15727_v1 = vrot.slane %v15726_v52, 4  ;;  %v15693_v42 = vrot.slane %v15692_v24, 4  ;;  %v15740_v49 = vor.u32 %v15739_v29, %v15736_v9  ;;  %v27344_v24 = vld [vmem:[#allocation49_spill] sm:$0xff]  ;;  %v27350_v29 = vld [vmem:[#allocation58_spill] sm:$0xff] }
 0x7ef   : > { %v15750_v57 = vor.u32 %v15749_v61, %v15745_v43  ;;  %v15753_v54 = vshll.u32 %v26616_v28, 16  ;;  %v15731_v41 = vrot.slane %v15729_v63, 5  ;;  %v15708_v37 = vsel %vm21459_vm7, %v15703_v17, %v15707_v46  ;;  %v27348_v52 = vld [vmem:[#allocation57_spill] sm:$0xff]  ;;  %v27354_v36 = vld [vmem:[#allocation62_spill] sm:$0xff] }
 0x7f0   : > { %20124 = vmatmul.mubr.msk.bf16.gmra.mrb[48].mxu0 %vm1254_vm10, %v18182_v51  ;;  %v18184_v51 = vcombine.low %v15650_v0, %v15660_v8  ;;  %v15698_v38 = vsel %vm21459_vm7, %v15693_v42, %v15697_v3  ;;  %v15741_v5 = vrot.slane %v15740_v49, 4  ;;  %v27338_v3 = vld [vmem:[#allocation43_spill] sm:$0xff]  ;;  %v27339_v0 = vld [vmem:[#allocation44_spill] sm:$0xff]  ;;  %v27346_v4 = vcombine.low %v27344_v24, %v27345_v26  ;;  %v27357_v63 = vld [vmem:[#allocation65_spill] sm:$0xff] }
 0x7f1   : > { %20127 = vmatprep.mubr.msk.bf16.mxu0 %vm1254_vm10, %v18183_v12  ;;  %v15716_v12 = vor.u32 %v15715_v16, %v15712_v18  ;;  %v15732_v55 = vsel %vm21459_vm7, %v15727_v1, %v15731_v41  ;;  %v15751_v40 = vrot.slane %v15750_v57, 4  ;;  %v15755_v30 = vrot.slane %v15753_v54, 5  ;;  %v27361_v1 = vld [vmem:[#allocation66_spill] sm:$0xff] }
 0x7f2   : > { %v18186_v59 = vcombine.low %v15698_v38, %v15708_v37  ;;  %v15746_v28 = vsel %vm21459_vm7, %v15741_v5, %v15745_v43  ;;  %v27340_v8 = vcombine.low %v27338_v3, %v27339_v0  ;;  %v27349_v9 = vcombine.low %v27347_v33, %v27348_v52  ;;  %v27351_v43 = vld [vmem:[#allocation60_spill] sm:$0xff] }
 0x7f3   : > { %v15717_v58 = vrot.slane %v15716_v12, 4  ;;  %v15756_v18 = vsel %vm21459_vm7, %v15751_v40, %v15755_v30  ;;  %v27352_v61 = vcombine.low %v27350_v29, %v27351_v43  ;;  %v27359_v17 = vcombine.low %v26273_v60, %v26283_v47 }
 0x7f4   : > { %v18188_v16 = vcombine.low %v15746_v28, %v15756_v18  ;;  %v27360_v46 = vcombine.low %v26287_v34, %v26294_v21  ;;  %v27362_v42 = vcombine.low %v26301_v19, %v27361_v1  ;;  %v27363_v49 = vcombine.low %v26309_v20, %v26318_v15  ;;  %v26850_v19 = vld [vmem:[%s26997_s2] ss:$0 sm:$0xff] }
 0x7f5   : > { %v15722_v48 = vsel %vm21459_vm7, %v15717_v58, %v15721_v7  ;;  %v27341_v7 = vld [vmem:[#allocation46_spill] sm:$0xff] }
 0x7f6   : > { %v18187_v25 = vcombine.low %v15722_v48, %v15732_v55  ;;  %v27343_v31 = vcombine.low %v27341_v7, %v27342_v27 }
 0x7f8   : > { %20128 = vmatmul.mubr.msk.bf16.gmra.mrb[52].mxu0 %vm1254_vm10, %v18184_v51  ;;  %v27353_v51 = vld [vmem:[#allocation61_spill] sm:$0xff] }
 0x7f9   : > { %20131 = vmatprep.mubr.msk.bf16.mxu0 %vm1254_vm10, %v18185_v35  ;;  %v27355_v12 = vcombine.low %v27353_v51, %v27354_v36  ;;  %v27358_v35 = vcombine.low %v27356_v6, %v27357_v63 }
 0x800   : > { %20132 = vmatmul.mubr.msk.bf16.gmra.mrb[56].mxu0 %vm1254_vm10, %v18186_v59 }
 0x801   : > { %20135 = vmatprep.mubr.msk.bf16.mxu0 %vm1254_vm10, %v18187_v25 }
 0x808   : > { %20136 = vmatmul.mubr.msk.bf16.gmra.mrb[60].mxu0 %vm1254_vm10, %v18188_v16 }
 0x809   : > { %20147 = vmatprep.mubr.msk.bf16.mxu0 %vm1254_vm10, %v27340_v8 }
 0x810   : > { %20148 = vmatmul.mubr.msk.bf16.vlgmr.msra.gmra.mrb[32].mxu0 %vm1254_vm10, %v27343_v31 }
 0x811   : > { %20151 = vmatprep.mubr.msk.bf16.mxu0 %vm1254_vm10, %v27346_v4 }
 0x818   : > { %20152 = vmatmul.mubr.msk.bf16.gmra.mrb[36].mxu0 %vm1254_vm10, %v27349_v9 }
 0x819   : > { %20155 = vmatprep.mubr.msk.bf16.mxu0 %vm1254_vm10, %v27352_v61 }
 0x820   : > { %20156 = vmatmul.mubr.msk.bf16.gmra.mrb[40].mxu0 %vm1254_vm10, %v27355_v12 }
 0x821   : > { %20159 = vmatprep.mubr.msk.bf16.mxu0 %vm1254_vm10, %v27358_v35 }
 0x828   : > { %20160 = vmatmul.mubr.msk.bf16.gmra.mrb[44].mxu0 %vm1254_vm10, %v27359_v17 }
 0x829   : > { %20163 = vmatprep.mubr.msk.bf16.mxu0 %vm1254_vm10, %v27360_v46 }
 0x830   : > { %20164 = vmatmul.mubr.msk.bf16.gmra.mrb[48].mxu0 %vm1254_vm10, %v27362_v42 }
 0x831   : > { %20167 = vmatprep.mubr.msk.bf16.mxu0 %vm1254_vm10, %v27363_v49 }
 0x838   : > { %20168 = vmatmul.mubr.msk.bf16.gmra.mrb[52].mxu0 %vm1254_vm10, %v18244_v14 }
 0x839   : > { %20171 = vmatprep.mubr.msk.bf16.mxu0 %vm1254_vm10, %v18245_v56 }
 0x840   : > { %20172 = vmatmul.mubr.msk.bf16.gmra.mrb[56].mxu0 %vm1254_vm10, %v18246_v11 }
 0x841   : > { %20175 = vmatprep.mubr.msk.bf16.mxu0 %vm1254_vm10, %v18247_v13 }
 0x848   : > { %20176 = vmatmul.mubr.msk.bf16.gmra.mrb[60].mxu0 %vm1254_vm10, %v18248_v50 }
 0x8e3   : > { %v20149_v21 = vpop.f32.mrb[32].mxu0 }
 0x8e4   : > { %v16577_v60 = vmul.f32 %v26850_v19, %v20149_v21  ;;  %v16416_v47 = vpop.f32.mrb[33].mxu0 }
 0x8e5   : > { %v16575_v34 = vmul.f32 %v26850_v19, %v16416_v47  ;;  %v20150_v20 = vpop.f32.mrb[34].mxu0 }
 0x8e6   : > { %v16609_v15 = vadd.f32 %v26857_v45, %v16577_v60  ;;  %v16578_v32 = vmul.f32 %v26850_v19, %v20150_v20  ;;  %v16419_v22 = vpop.f32.mrb[35].mxu0 }
 0x8e7   : > { %v16607_v14 = vadd.f32 %v26857_v45, %v16575_v34  ;;  %v16576_v44 = vmul.f32 %v26850_v19, %v16419_v22 }
 0x8e8   : > { %v16641_v56 = vmax.f32 %v16609_v15, 0.0  ;;  %v16610_v53 = vadd.f32 %v26857_v45, %v16578_v32 }
 0x8e9   : > { %v16639_v10 = vmax.f32 %v16607_v14, 0.0  ;;  %v16608_v11 = vadd.f32 %v26857_v45, %v16576_v44 }
 0x8ea   : > { %v18371_v39 = vpack.c.bf16 %v16641_v56, %v16641_v56  ;;  %v16642_v23 = vmax.f32 %v16610_v53, 0.0 }
 0x8eb   : > { %v18369_v13 = vpack.c.bf16 %v16639_v10, %v16639_v10  ;;  %v16640_v62 = vmax.f32 %v16608_v11, 0.0  ;;  %v20153_v2 = vpop.f32.mrb[36].mxu0 }
 0x8ec   : > { %16801 = vst.msk [vmem:[%s26869_s23 + $0x8] sm:$0xf] %vm201_vm0, %v18371_v39  ;;  %v18372_v50 = vpack.c.bf16 %v16642_v23, %v16642_v23  ;;  %v16581_v57 = vmul.f32 %v26850_v19, %v20153_v2  ;;  %v16432_v54 = vpop.f32.mrb[37].mxu0 }
 0x8ed   : > { %16799 = vst.msk [vmem:[%s26869_s23] sm:$0xf] %vm201_vm0, %v18369_v13  ;;  %v18370_v58 = vpack.c.bf16 %v16640_v62, %v16640_v62  ;;  %v16579_v41 = vmul.f32 %v26850_v19, %v16432_v54  ;;  %v20154_v37 = vpop.f32.mrb[38].mxu0 }
 0x8ee   : > { %16802 = vst.msk [vmem:[%s26869_s23 + $0xc] sm:$0xf] %vm201_vm0, %v18372_v50  ;;  %v16613_v55 = vadd.f32 %v26857_v45, %v16581_v57  ;;  %v16582_v38 = vmul.f32 %v26850_v19, %v20154_v37  ;;  %v16435_v5 = vpop.f32.mrb[39].mxu0 }
 0x8ef   : > { %16800 = vst.msk [vmem:[%s26869_s23 + $0x4] sm:$0xf] %vm201_vm0, %v18370_v58  ;;  %v16611_v40 = vadd.f32 %v26857_v45, %v16579_v41  ;;  %v16580_v30 = vmul.f32 %v26850_v19, %v16435_v5 }
 0x8f0   : > { %v16645_v59 = vmax.f32 %v16613_v55, 0.0  ;;  %v16614_v48 = vadd.f32 %v26857_v45, %v16582_v38 }
 0x8f1   : > { %v16643_v25 = vmax.f32 %v16611_v40, 0.0  ;;  %v16612_v28 = vadd.f32 %v26857_v45, %v16580_v30 }
 0x8f2   : > { %v18375_v18 = vpack.c.bf16 %v16645_v59, %v16645_v59  ;;  %v16646_v16 = vmax.f32 %v16614_v48, 0.0 }
 0x8f3   : > { %v18373_v3 = vpack.c.bf16 %v16643_v25, %v16643_v25  ;;  %v16644_v0 = vmax.f32 %v16612_v28, 0.0  ;;  %v20157_v8 = vpop.f32.mrb[40].mxu0 }
 0x8f4   : > { %16805 = vst.msk [vmem:[%s26869_s23 + $0x18] sm:$0xf] %vm201_vm0, %v18375_v18  ;;  %v18376_v7 = vpack.c.bf16 %v16646_v16, %v16646_v16  ;;  %v16585_v27 = vmul.f32 %v26850_v19, %v20157_v8  ;;  %v16448_v31 = vpop.f32.mrb[41].mxu0 }
 0x8f5   : > { %16803 = vst.msk [vmem:[%s26869_s23 + $0x10] sm:$0xf] %vm201_vm0, %v18373_v3  ;;  %v18374_v24 = vpack.c.bf16 %v16644_v0, %v16644_v0  ;;  %v16583_v26 = vmul.f32 %v26850_v19, %v16448_v31  ;;  %v20158_v4 = vpop.f32.mrb[42].mxu0 }
 0x8f6   : > { %16806 = vst.msk [vmem:[%s26869_s23 + $0x1c] sm:$0xf] %vm201_vm0, %v18376_v7  ;;  %v16617_v33 = vadd.f32 %v26857_v45, %v16585_v27  ;;  %v16586_v52 = vmul.f32 %v26850_v19, %v20158_v4  ;;  %v16451_v9 = vpop.f32.mrb[43].mxu0 }
 0x8f7   : > { %16804 = vst.msk [vmem:[%s26869_s23 + $0x14] sm:$0xf] %vm201_vm0, %v18374_v24  ;;  %v16615_v29 = vadd.f32 %v26857_v45, %v16583_v26  ;;  %v16584_v43 = vmul.f32 %v26850_v19, %v16451_v9 }
 0x8f8   : > { %v16649_v61 = vmax.f32 %v16617_v33, 0.0  ;;  %v16618_v51 = vadd.f32 %v26857_v45, %v16586_v52 }
 0x8f9   : > { %v16647_v36 = vmax.f32 %v16615_v29, 0.0  ;;  %v16616_v12 = vadd.f32 %v26857_v45, %v16584_v43 }
 0x8fa   : > { %v18379_v6 = vpack.c.bf16 %v16649_v61, %v16649_v61  ;;  %v16650_v63 = vmax.f32 %v16618_v51, 0.0 }
 0x8fb   : > { %v18377_v35 = vpack.c.bf16 %v16647_v36, %v16647_v36  ;;  %v16648_v17 = vmax.f32 %v16616_v12, 0.0  ;;  %v20161_v46 = vpop.f32.mrb[44].mxu0 }
 0x8fc   : > { %16809 = vst.msk [vmem:[%s26869_s23 + $0x28] sm:$0xf] %vm201_vm0, %v18379_v6  ;;  %v18380_v1 = vpack.c.bf16 %v16650_v63, %v16650_v63  ;;  %v16589_v42 = vmul.f32 %v26850_v19, %v20161_v46  ;;  %v16464_v49 = vpop.f32.mrb[45].mxu0 }
 0x8fd   : > { %16807 = vst.msk [vmem:[%s26869_s23 + $0x20] sm:$0xf] %vm201_vm0, %v18377_v35  ;;  %v18378_v21 = vpack.c.bf16 %v16648_v17, %v16648_v17  ;;  %v16587_v60 = vmul.f32 %v26850_v19, %v16464_v49  ;;  %v20162_v47 = vpop.f32.mrb[46].mxu0 }
 0x8fe   : > { %16810 = vst.msk [vmem:[%s26869_s23 + $0x2c] sm:$0xf] %vm201_vm0, %v18380_v1  ;;  %v16621_v34 = vadd.f32 %v26857_v45, %v16589_v42  ;;  %v16590_v20 = vmul.f32 %v26850_v19, %v20162_v47  ;;  %v16467_v15 = vpop.f32.mrb[47].mxu0 }
 0x8ff   : > { %16808 = vst.msk [vmem:[%s26869_s23 + $0x24] sm:$0xf] %vm201_vm0, %v18378_v21  ;;  %v16619_v32 = vadd.f32 %v26857_v45, %v16587_v60  ;;  %v16588_v22 = vmul.f32 %v26850_v19, %v16467_v15 }
 0x900   : > { %v16653_v14 = vmax.f32 %v16621_v34, 0.0  ;;  %v16622_v44 = vadd.f32 %v26857_v45, %v16590_v20 }
 0x901   : > { %v16651_v56 = vmax.f32 %v16619_v32, 0.0  ;;  %v16620_v53 = vadd.f32 %v26857_v45, %v16588_v22 }
 0x902   : > { %v18383_v10 = vpack.c.bf16 %v16653_v14, %v16653_v14  ;;  %v16654_v11 = vmax.f32 %v16622_v44, 0.0 }
 0x903   : > { %v18381_v39 = vpack.c.bf16 %v16651_v56, %v16651_v56  ;;  %v16652_v23 = vmax.f32 %v16620_v53, 0.0  ;;  %v20165_v13 = vpop.f32.mrb[48].mxu0 }
 0x904   : > { %16813 = vst.msk [vmem:[%s26869_s23 + $0x38] sm:$0xf] %vm201_vm0, %v18383_v10  ;;  %v18384_v62 = vpack.c.bf16 %v16654_v11, %v16654_v11  ;;  %v16593_v2 = vmul.f32 %v26850_v19, %v20165_v13  ;;  %v16480_v50 = vpop.f32.mrb[49].mxu0 }
 0x905   : > { %16811 = vst.msk [vmem:[%s26869_s23 + $0x30] sm:$0xf] %vm201_vm0, %v18381_v39  ;;  %v18382_v57 = vpack.c.bf16 %v16652_v23, %v16652_v23  ;;  %v16591_v54 = vmul.f32 %v26850_v19, %v16480_v50  ;;  %v20166_v58 = vpop.f32.mrb[50].mxu0 }
 0x906   : > { %16814 = vst.msk [vmem:[%s26869_s23 + $0x3c] sm:$0xf] %vm201_vm0, %v18384_v62  ;;  %v16625_v41 = vadd.f32 %v26857_v45, %v16593_v2  ;;  %v16594_v37 = vmul.f32 %v26850_v19, %v20166_v58  ;;  %v16483_v55 = vpop.f32.mrb[51].mxu0 }
 0x907   : > { %16812 = vst.msk [vmem:[%s26869_s23 + $0x34] sm:$0xf] %vm201_vm0, %v18382_v57  ;;  %v16623_v38 = vadd.f32 %v26857_v45, %v16591_v54  ;;  %v16592_v5 = vmul.f32 %v26850_v19, %v16483_v55 }
 0x908   : > { %v16657_v40 = vmax.f32 %v16625_v41, 0.0  ;;  %v16626_v30 = vadd.f32 %v26857_v45, %v16594_v37 }
 0x909   : > { %v16655_v59 = vmax.f32 %v16623_v38, 0.0  ;;  %v16624_v48 = vadd.f32 %v26857_v45, %v16592_v5 }
 0x90a   : > { %v18387_v25 = vpack.c.bf16 %v16657_v40, %v16657_v40  ;;  %v16658_v28 = vmax.f32 %v16626_v30, 0.0 }
 0x90b   : > { %v18385_v18 = vpack.c.bf16 %v16655_v59, %v16655_v59  ;;  %v16656_v16 = vmax.f32 %v16624_v48, 0.0  ;;  %v20169_v3 = vpop.f32.mrb[52].mxu0 }
 0x90c   : > { %16817 = vst.msk [vmem:[%s26869_s23 + $0x48] sm:$0xf] %vm201_vm0, %v18387_v25  ;;  %v18388_v0 = vpack.c.bf16 %v16658_v28, %v16658_v28  ;;  %v16597_v8 = vmul.f32 %v26850_v19, %v20169_v3  ;;  %v16496_v7 = vpop.f32.mrb[53].mxu0 }
 0x90d   : > { %16815 = vst.msk [vmem:[%s26869_s23 + $0x40] sm:$0xf] %vm201_vm0, %v18385_v18  ;;  %v18386_v27 = vpack.c.bf16 %v16656_v16, %v16656_v16  ;;  %v16595_v31 = vmul.f32 %v26850_v19, %v16496_v7  ;;  %v20170_v24 = vpop.f32.mrb[54].mxu0 }
 0x90e   : > { %16818 = vst.msk [vmem:[%s26869_s23 + $0x4c] sm:$0xf] %vm201_vm0, %v18388_v0  ;;  %v16629_v26 = vadd.f32 %v26857_v45, %v16597_v8  ;;  %v16598_v4 = vmul.f32 %v26850_v19, %v20170_v24  ;;  %v16499_v33 = vpop.f32.mrb[55].mxu0 }
 0x90f   : > { %16816 = vst.msk [vmem:[%s26869_s23 + $0x44] sm:$0xf] %vm201_vm0, %v18386_v27  ;;  %v16627_v52 = vadd.f32 %v26857_v45, %v16595_v31  ;;  %v16596_v9 = vmul.f32 %v26850_v19, %v16499_v33 }
 0x910   : > { %v16661_v29 = vmax.f32 %v16629_v26, 0.0  ;;  %v16630_v43 = vadd.f32 %v26857_v45, %v16598_v4 }
 0x911   : > { %v16659_v61 = vmax.f32 %v16627_v52, 0.0  ;;  %v16628_v51 = vadd.f32 %v26857_v45, %v16596_v9 }
 0x912   : > { %v18391_v36 = vpack.c.bf16 %v16661_v29, %v16661_v29  ;;  %v16662_v12 = vmax.f32 %v16630_v43, 0.0 }
 0x913   : > { %v18389_v6 = vpack.c.bf16 %v16659_v61, %v16659_v61  ;;  %v16660_v63 = vmax.f32 %v16628_v51, 0.0  ;;  %v20173_v35 = vpop.f32.mrb[56].mxu0 }
 0x914   : > { %16821 = vst.msk [vmem:[%s26869_s23 + $0x58] sm:$0xf] %vm201_vm0, %v18391_v36  ;;  %v18392_v17 = vpack.c.bf16 %v16662_v12, %v16662_v12  ;;  %v16601_v46 = vmul.f32 %v26850_v19, %v20173_v35  ;;  %v16512_v1 = vpop.f32.mrb[57].mxu0 }
 0x915   : > { %16819 = vst.msk [vmem:[%s26869_s23 + $0x50] sm:$0xf] %vm201_vm0, %v18389_v6  ;;  %v18390_v42 = vpack.c.bf16 %v16660_v63, %v16660_v63  ;;  %v16599_v49 = vmul.f32 %v26850_v19, %v16512_v1  ;;  %v20174_v21 = vpop.f32.mrb[58].mxu0 }
 0x916   : > { %16822 = vst.msk [vmem:[%s26869_s23 + $0x5c] sm:$0xf] %vm201_vm0, %v18392_v17  ;;  %v16633_v60 = vadd.f32 %v26857_v45, %v16601_v46  ;;  %v16602_v47 = vmul.f32 %v26850_v19, %v20174_v21  ;;  %v16515_v34 = vpop.f32.mrb[59].mxu0 }
 0x917   : > { %16820 = vst.msk [vmem:[%s26869_s23 + $0x54] sm:$0xf] %vm201_vm0, %v18390_v42  ;;  %v16631_v20 = vadd.f32 %v26857_v45, %v16599_v49  ;;  %v16600_v15 = vmul.f32 %v26850_v19, %v16515_v34 }
 0x918   : > { %v16665_v32 = vmax.f32 %v16633_v60, 0.0  ;;  %v16634_v22 = vadd.f32 %v26857_v45, %v16602_v47 }
 0x919   : > { %v16663_v14 = vmax.f32 %v16631_v20, 0.0  ;;  %v16632_v44 = vadd.f32 %v26857_v45, %v16600_v15 }
 0x91a   : > { %v18395_v56 = vpack.c.bf16 %v16665_v32, %v16665_v32  ;;  %v16666_v53 = vmax.f32 %v16634_v22, 0.0 }
 0x91b   : > { %v18393_v10 = vpack.c.bf16 %v16663_v14, %v16663_v14  ;;  %v16664_v11 = vmax.f32 %v16632_v44, 0.0  ;;  %v20177_v39 = vpop.f32.mrb[60].mxu0 }
 0x91c   : > { %16825 = vst.msk [vmem:[%s26869_s23 + $0x68] sm:$0xf] %vm201_vm0, %v18395_v56  ;;  %v18396_v23 = vpack.c.bf16 %v16666_v53, %v16666_v53  ;;  %v16605_v13 = vmul.f32 %v26850_v19, %v20177_v39  ;;  %v16528_v62 = vpop.f32.mrb[61].mxu0 }
 0x91d   : > { %16823 = vst.msk [vmem:[%s26869_s23 + $0x60] sm:$0xf] %vm201_vm0, %v18393_v10  ;;  %v18394_v2 = vpack.c.bf16 %v16664_v11, %v16664_v11  ;;  %v16603_v50 = vmul.f32 %v26850_v19, %v16528_v62  ;;  %v20178_v57 = vpop.f32.mrb[62].mxu0 }
 0x91e   : > { %16826 = vst.msk [vmem:[%s26869_s23 + $0x6c] sm:$0xf] %vm201_vm0, %v18396_v23  ;;  %v16637_v54 = vadd.f32 %v26857_v45, %v16605_v13  ;;  %v16606_v58 = vmul.f32 %v26850_v19, %v20178_v57  ;;  %v16531_v41 = vpop.f32.mrb[63].mxu0 }
 0x91f   : > { %16824 = vst.msk [vmem:[%s26869_s23 + $0x64] sm:$0xf] %vm201_vm0, %v18394_v2  ;;  %v16635_v37 = vadd.f32 %v26857_v45, %v16603_v50  ;;  %v16604_v55 = vmul.f32 %v26850_v19, %v16531_v41 }
 0x920   : > { %v16669_v38 = vmax.f32 %v16637_v54, 0.0  ;;  %v16638_v5 = vadd.f32 %v26857_v45, %v16606_v58 }
 0x921   : > { %v16667_v40 = vmax.f32 %v16635_v37, 0.0  ;;  %v16636_v30 = vadd.f32 %v26857_v45, %v16604_v55 }
 0x922   : > { %v18399_v59 = vpack.c.bf16 %v16669_v38, %v16669_v38  ;;  %v16670_v48 = vmax.f32 %v16638_v5, 0.0 }
 0x923   : > { %v18397_v25 = vpack.c.bf16 %v16667_v40, %v16667_v40  ;;  %v16668_v28 = vmax.f32 %v16636_v30, 0.0 }
 0x924   : > { %16829 = vst.msk [vmem:[%s26869_s23 + $0x78] sm:$0xf] %vm201_vm0, %v18399_v59  ;;  %v18400_v18 = vpack.c.bf16 %v16670_v48, %v16670_v48 }
 0x925   : > { %16827 = vst.msk [vmem:[%s26869_s23 + $0x70] sm:$0xf] %vm201_vm0, %v18397_v25  ;;  %v18398_v16 = vpack.c.bf16 %v16668_v28, %v16668_v28 }
 0x926   : > { %16830 = vst.msk [vmem:[%s26869_s23 + $0x7c] sm:$0xf] %vm201_vm0, %v18400_v18 }
 0x927   : > { %16828 = vst.msk [vmem:[%s26869_s23 + $0x74] sm:$0xf] %vm201_vm0, %v18398_v16 }
 0x928 PF: > { %s14_s15 = sadd.s32 1, %s21312_s15  }
 0x929   : > { %p11_p4 = scmp.ge.s32.totalorder %s14_s15, 4  }
 0x92b   :  { %13 = sbr.rel (!%p11_p4) target bundleno = 1 (0x1), region = 76 }

</bundles_post_ra>
